<compile_context>
chip_gen: v7x
topology: tpu7x:2x2x1
jax: 0.10.0
libtpu: 0.0.40
codegen_flags: <defaults>
</compile_context>

<pallas_src>
import math

import jax
import jax.numpy as jnp
from jax.experimental import pallas as pl
from jax.experimental.pallas import tpu as pltpu

_BN_EPS = 1e-5
_VMEM_LIMIT = 32 * 1024 * 1024


def _rup(x, m):
    return ((x + m - 1) // m) * m


# ----------------------------------------------------------------------------
# Kernel 1: ConvTranspose2d(k=2, s=2), emitting the interleaved layout directly
# ----------------------------------------------------------------------------
def _deconv_tap_kernel(x_ref, w_ref, b_ref, o_ref):
    """One image, one output-row parity of the 2x2/stride-2 transposed conv.

    x_ref: (1, H, W, Cin)        bf16
    w_ref: (1, Cin, 2*Cmid)      bf16   columns ordered (col-parity, out-channel)
    b_ref: (1, 2*Cmid)           f32
    o_ref: (1, H, 1, W, 2*Cmid)  bf16   -> free host reshape to interleaved NHWC
    """
    _, H, W, cin = x_ref.shape
    xf = x_ref[...].reshape(H * W, cin)
    d = jnp.dot(xf, w_ref[0], preferred_element_type=jnp.float32) + b_ref[...]
    o_ref[...] = d.reshape(o_ref.shape).astype(o_ref.dtype)


def deconv2x2(x, wu, bu):
    """ConvTranspose2d(Cin, Cmid, 2, stride=2) on NHWC -> (N, 2H, 2W, Cmid) bf16."""
    N, H, W, cin = x.shape
    cmid = wu.shape[-1]
    # wu stored (Cin, kH, kW, Cmid) -> (row-parity, Cin, col-parity*Cmid)
    wu_r = jnp.transpose(wu.astype(jnp.bfloat16), (1, 0, 2, 3)).reshape(2, cin, 2 * cmid)
    bu2 = jnp.tile(bu.astype(jnp.float32), 2).reshape(1, 2 * cmid)

    out = pl.pallas_call(
        _deconv_tap_kernel,
        out_shape=jax.ShapeDtypeStruct((N, H, 2, W, 2 * cmid), jnp.bfloat16),
        grid=(N, 2),
        in_specs=[
            pl.BlockSpec((1, H, W, cin), lambda n, a: (n, 0, 0, 0)),
            pl.BlockSpec((1, cin, 2 * cmid), lambda n, a: (a, 0, 0)),
            pl.BlockSpec((1, 2 * cmid), lambda n, a: (0, 0)),
        ],
        out_specs=pl.BlockSpec((1, H, 1, W, 2 * cmid), lambda n, a: (n, 0, a, 0, 0)),
        compiler_params=pltpu.CompilerParams(
            dimension_semantics=("parallel", "parallel"),
            vmem_limit_bytes=_VMEM_LIMIT),
    )(x.astype(jnp.bfloat16), wu_r, bu2)
    # (N, H, 2, W, 2*Cmid) -> (N, 2H, 2W, Cmid): contiguous => pure metadata reshape.
    return out.reshape(N, 2 * H, 2 * W, cmid)


# ----------------------------------------------------------------------------
# Kernel 2: fused [conv3x3 -> ReLU -> BN(eval)] x 2 over cat([up, bridge], ch)
# ----------------------------------------------------------------------------
def _fused_block_kernel(up_ref, br_ref, w1_ref, e1_ref, w2_ref, e2_ref, o_ref,
                        pad1_ref, patch1_ref, pad2_ref, patch2_ref):
    """One image of block1 + block2.

    up_ref : (1, OH, OW, Cmid)       bf16
    br_ref : (1, OH, OW, Cb)         bf16
    w1_ref : (9*(Cmid+Cb), Cp)       bf16   im2col weight (tap-major, channel-minor)
    e1_ref : (3, Cp)                 f32    rows = (conv bias, bn scale a, bn shift c)
    w2_ref : (9*Cp, Cp)              bf16
    e2_ref : (3, Cp)                 f32
    o_ref  : (1, OH, OW, Cp)         f32    Cp = cout rounded up to 128 (lane dense)
    """
    _, OH, OW, cmid = up_ref.shape
    cb = br_ref.shape[3]
    cin1 = cmid + cb
    cp = o_ref.shape[3]

    # ---- stage inputs into a zero-halo VMEM buffer (implicit channel concat) ----
    pad1_ref[...] = jnp.zeros_like(pad1_ref)
    pad1_ref[1:OH + 1, 1:OW + 1, 0:cmid] = up_ref[0]
    pad1_ref[1:OH + 1, 1:OW + 1, cmid:cin1] = br_ref[0]

    # ---- block1: in-VMEM im2col + single MXU matmul (K = 9*cin1) ----
    for k in range(9):
        kh, kw = divmod(k, 3)
        patch1_ref[:, k * cin1:(k + 1) * cin1] = (
            pad1_ref[kh:kh + OH, kw:kw + OW, :].reshape(OH * OW, cin1))
    e1 = e1_ref[...]
    z1 = jnp.dot(patch1_ref[...], w1_ref[...], preferred_element_type=jnp.float32)
    # BatchNorm(eval) is applied AFTER ReLU: y = a * relu(z + b) + c
    y1 = jnp.maximum(z1 + e1[0:1, :], 0.0) * e1[1:2, :] + e1[2:3, :]

    # ---- block1 result stays in VMEM (zero-halo buffer feeding block2) ----
    pad2_ref[...] = jnp.zeros_like(pad2_ref)
    pad2_ref[1:OH + 1, 1:OW + 1, :] = y1.astype(pad2_ref.dtype).reshape(OH, OW, cp)

    # ---- block2: in-VMEM im2col + single MXU matmul (K = 9*Cp) ----
    for k in range(9):
        kh, kw = divmod(k, 3)
        patch2_ref[:, k * cp:(k + 1) * cp] = (
            pad2_ref[kh:kh + OH, kw:kw + OW, :].reshape(OH * OW, cp))
    e2 = e2_ref[...]
    z2 = jnp.dot(patch2_ref[...], w2_ref[...], preferred_element_type=jnp.float32)
    y2 = jnp.maximum(z2 + e2[0:1, :], 0.0) * e2[1:2, :] + e2[2:3, :]
    o_ref[...] = y2.reshape(1, OH, OW, cp).astype(o_ref.dtype)


def fused_double_conv(up, bridge, w1m, e1, w2m, e2):
    N, OH, OW, cmid = up.shape
    cb = bridge.shape[3]
    cin1 = cmid + cb
    cp = w1m.shape[-1]
    return pl.pallas_call(
        _fused_block_kernel,
        out_shape=jax.ShapeDtypeStruct((N, OH, OW, cp), jnp.float32),
        grid=(N,),
        in_specs=[
            pl.BlockSpec((1, OH, OW, cmid), lambda n: (n, 0, 0, 0)),
            pl.BlockSpec((1, OH, OW, cb), lambda n: (n, 0, 0, 0)),
            pl.BlockSpec((9 * cin1, cp), lambda n: (0, 0)),
            pl.BlockSpec((3, cp), lambda n: (0, 0)),
            pl.BlockSpec((9 * cp, cp), lambda n: (0, 0)),
            pl.BlockSpec((3, cp), lambda n: (0, 0)),
        ],
        out_specs=pl.BlockSpec((1, OH, OW, cp), lambda n: (n, 0, 0, 0)),
        scratch_shapes=[
            pltpu.VMEM((OH + 2, OW + 2, cin1), jnp.bfloat16),   # padded cat(up, bridge)
            pltpu.VMEM((OH * OW, 9 * cin1), jnp.bfloat16),      # block1 im2col patches
            pltpu.VMEM((OH + 2, OW + 2, cp), jnp.bfloat16),     # padded block1 output
            pltpu.VMEM((OH * OW, 9 * cp), jnp.bfloat16),        # block2 im2col patches
        ],
        compiler_params=pltpu.CompilerParams(
            dimension_semantics=("parallel",),
            vmem_limit_bytes=_VMEM_LIMIT),
    )(up, bridge, w1m, e1, w2m, e2)


# ----------------------------------------------------------------------------
# ConvUpBlock forward (host-facing tensors are NCHW, like PyTorch; eval mode)
# ----------------------------------------------------------------------------
def conv_up_block_forward(params, x_nchw, bridge_nchw):
    x = jnp.transpose(x_nchw, (0, 2, 3, 1))                         # NHWC
    br = jnp.transpose(bridge_nchw, (0, 2, 3, 1)).astype(jnp.bfloat16)

    # --- ConvTranspose2d(in, in//2, 2, stride=2) -----------------------------
    up = deconv2x2(x, params["wu"], params["bu"])                   # (N, 2H, 2W, Cmid)

    # --- match bridge to `up` spatially (torch F.pad(..., mode='reflect')) ---
    dy = up.shape[1] - br.shape[1]
    dx = up.shape[2] - br.shape[2]
    if dy < 0 or dx < 0:
        # TODO(synk): torch F.pad with negative reflect padding; verify crop semantics.
        br = br[:, :up.shape[1], :up.shape[2], :]
        dy, dx = max(dy, 0), max(dx, 0)
    if dy > 0 or dx > 0:
        br = jnp.pad(br, ((0, 0), (0, dy), (0, dx), (0, 0)), mode="reflect")

    cout = params["w2"].shape[-1]
    cp = _rup(cout, 128)                       # lane-dense padded channel count
    cmid = up.shape[-1]
    cin1 = cmid + br.shape[-1]

    # --- eval BatchNorm (applied AFTER ReLU): y = a*relu(conv + b) + c -------
    a1 = params["g1"] / jnp.sqrt(params["v1"] + _BN_EPS)
    c1 = params["beta1"] - a1 * params["m1"]
    a2 = params["g2"] / jnp.sqrt(params["v2"] + _BN_EPS)
    c2 = params["beta2"] - a2 * params["m2"]

    def padc(v):
        return jnp.pad(v.astype(jnp.float32), (0, cp - cout))

    e1 = jnp.stack([padc(params["b1"]), padc(a1), padc(c1)])        # (3, cp)
    e2 = jnp.stack([padc(params["b2"]), padc(a2), padc(c2)])        # (3, cp)
    w1m = jnp.pad(params["w1"].astype(jnp.bfloat16),
                  ((0, 0), (0, 0), (0, 0), (0, cp - cout))).reshape(9 * cin1, cp)
    w2m = jnp.pad(params["w2"].astype(jnp.bfloat16),
                  ((0, 0), (0, 0), (0, cp - cout), (0, cp - cout))).reshape(9 * cp, cp)

    y = fused_double_conv(up, br, w1m, e1, w2m, e2)                 # (N, 2H, 2W, cp) f32
    y = y[..., :cout]                                               # drop lane padding
    return jnp.transpose(y, (0, 3, 1, 2))                           # NHWC -> NCHW


# ----------------------------------------------------------------------------
# Parameter init (deterministic, PyTorch-default-style uniform bounds)
# ----------------------------------------------------------------------------
def init_params(key, in_size, out_size):
    cmid = in_size // 2
    cin1 = cmid + out_size
    ks = jax.random.split(key, 6)

    def uinit(k, shape, fan_in):
        bound = 1.0 / math.sqrt(fan_in)
        return jax.random.uniform(k, shape, jnp.float32, -bound, bound)

    ones = jnp.ones((out_size,), jnp.float32)
    zeros = jnp.zeros((out_size,), jnp.float32)
    return {
        # ConvTranspose2d weight stored (Cin, kH, kW, Cmid); PyTorch stores
        # (Cin, Cout, kH, kW) -> permute (0, 2, 3, 1) when porting real weights.
        "wu": uinit(ks[0], (in_size, 2, 2, cmid), in_size * 4),
        "bu": uinit(ks[1], (cmid,), in_size * 4),
        # Conv2d weights stored (kH, kW, Cin, Cout); PyTorch stores
        # (Cout, Cin, kH, kW) -> permute (2, 3, 1, 0) when porting real weights.
        "w1": uinit(ks[2], (3, 3, cin1, out_size), cin1 * 9),
        "b1": uinit(ks[3], (out_size,), cin1 * 9),
        "w2": uinit(ks[4], (3, 3, out_size, out_size), out_size * 9),
        "b2": uinit(ks[5], (out_size,), out_size * 9),
        # BatchNorm2d eval-mode parameters (PyTorch defaults: identity).
        "g1": ones, "beta1": zeros, "m1": zeros, "v1": ones,
        "g2": ones, "beta2": zeros, "m2": zeros, "v2": ones,
    }


if __name__ == "__main__":
    key = jax.random.PRNGKey(0)
    kp, kx, kb = jax.random.split(key, 3)

    in_size, out_size = 64, 32
    N, H, W = 2, 8, 8                      # x: (2, 64, 8, 8), bridge: (2, 32, 16, 16)

    params = init_params(kp, in_size, out_size)
    x = jax.random.normal(kx, (N, in_size, H, W), jnp.float32)
    bridge = jax.random.normal(kb, (N, out_size, 2 * H, 2 * W), jnp.float32)

    fwd = jax.jit(conv_up_block_forward)
    y = fwd(params, x, bridge)
    jax.block_until_ready(y)

    assert y.shape == (N, out_size, 2 * H, 2 * W), y.shape
    assert bool(jnp.all(jnp.isfinite(y)))
    print("KERNEL_OK")
</pallas_src>

<mosaic_0001>
module attributes {stable_mosaic.version = 11 : i64} {
  func.func @_deconv_tap_kernel(%arg0: i32, %arg1: i32, %arg2: memref<1x8x8x64xbf16, #tpu.memory_space<vmem>>, %arg3: memref<1x64x64xbf16, #tpu.memory_space<vmem>>, %arg4: memref<1x64xf32, #tpu.memory_space<vmem>>, %arg5: memref<1x8x1x8x64xbf16, #tpu.memory_space<vmem>>) attributes {dimension_semantics = [#tpu.dimension_semantics<parallel>, #tpu.dimension_semantics<parallel>], iteration_bounds = array<i64: 2, 2>, scalar_prefetch = 0 : i64, scratch_operands = 0 : i64, tpu.core_type = #tpu.core_type<tc>, window_params = [{transform_indices = @transform_0, window_bounds = array<i64: 1, 8, 8, 64>}, {transform_indices = @transform_1, window_bounds = array<i64: 1, 64, 64>}, {pipeline_mode = #tpu.pipeline_mode<synchronous>, transform_indices = @transform_2, window_bounds = array<i64: 1, 64>}, {transform_indices = @transform_3, window_bounds = array<i64: 1, 8, 1, 8, 64>}]} {
    %c0 = arith.constant 0 : index
    %c0_0 = arith.constant 0 : index
    %c0_1 = arith.constant 0 : index
    %c0_2 = arith.constant 0 : index
    %0 = vector.load %arg2[%c0, %c0_0, %c0_1, %c0_2] : memref<1x8x8x64xbf16, #tpu.memory_space<vmem>>, vector<1x8x8x64xbf16>
    %1 = vector.shape_cast %0 : vector<1x8x8x64xbf16> to vector<64x64xbf16>
    %c0_3 = arith.constant 0 : index
    %c0_4 = arith.constant 0 : index
    %c0_5 = arith.constant 0 : index
    %2 = vector.load %arg3[%c0_3, %c0_4, %c0_5] : memref<1x64x64xbf16, #tpu.memory_space<vmem>>, vector<1x64x64xbf16>
    %3 = vector.shape_cast %2 : vector<1x64x64xbf16> to vector<64x64xbf16>
    %cst = arith.constant dense<0.000000e+00> : vector<64x64xf32>
    %4 = tpu.matmul %1, %3, %cst {dimension_numbers = #tpu.dot_dimension_numbers<[1], [0], [0], [1], [0, 0, 1, 1], [], []>} : vector<64x64xbf16>, vector<64x64xbf16>, vector<64x64xf32> -> vector<64x64xf32>
    %c0_6 = arith.constant 0 : index
    %c0_7 = arith.constant 0 : index
    %5 = vector.load %arg4[%c0_6, %c0_7] : memref<1x64xf32, #tpu.memory_space<vmem>>, vector<1x64xf32>
    %6 = vector.broadcast %5 : vector<1x64xf32> to vector<64x64xf32>
    %7 = arith.addf %4, %6 : vector<64x64xf32>
    %8 = vector.shape_cast %7 : vector<64x64xf32> to vector<1x8x1x8x64xf32>
    %9 = arith.truncf %8 : vector<1x8x1x8x64xf32> to vector<1x8x1x8x64xbf16>
    %c0_8 = arith.constant 0 : index
    %c0_9 = arith.constant 0 : index
    %c0_10 = arith.constant 0 : index
    %c0_11 = arith.constant 0 : index
    %c0_12 = arith.constant 0 : index
    %10 = vector.load %arg5[%c0_8, %c0_9, %c0_10, %c0_11, %c0_12] : memref<1x8x1x8x64xbf16, #tpu.memory_space<vmem>>, vector<1x8x1x8x64xbf16>
    tpu.vector_store %arg5[%c0_8, %c0_9, %c0_10, %c0_11, %c0_12], %9 {strides = array<i32>} : memref<1x8x1x8x64xbf16, #tpu.memory_space<vmem>>, vector<1x8x1x8x64xbf16>,
    return
  }
  func.func @transform_0(%arg0: i32, %arg1: i32) -> (i32, i32, i32, i32) {
    %c0_i32 = arith.constant 0 : i32
    %c0_i32_0 = arith.constant 0 : i32
    %c0_i32_1 = arith.constant 0 : i32
    %c0_i32_2 = arith.constant 0 : i32
    return %arg0, %c0_i32, %c0_i32_0, %c0_i32_1 : i32, i32, i32, i32
  }
  func.func @transform_1(%arg0: i32, %arg1: i32) -> (i32, i32, i32) {
    %c0_i32 = arith.constant 0 : i32
    %c0_i32_0 = arith.constant 0 : i32
    %c0_i32_1 = arith.constant 0 : i32
    return %arg1, %c0_i32, %c0_i32_0 : i32, i32, i32
  }
  func.func @transform_2(%arg0: i32, %arg1: i32) -> (i32, i32) {
    %c0_i32 = arith.constant 0 : i32
    %c0_i32_0 = arith.constant 0 : i32
    %c0_i32_1 = arith.constant 0 : i32
    return %c0_i32, %c0_i32_0 : i32, i32
  }
  func.func @transform_3(%arg0: i32, %arg1: i32) -> (i32, i32, i32, i32, i32) {
    %c0_i32 = arith.constant 0 : i32
    %c0_i32_0 = arith.constant 0 : i32
    %c0_i32_1 = arith.constant 0 : i32
    %c0_i32_2 = arith.constant 0 : i32
    return %arg0, %c0_i32, %arg1, %c0_i32_0, %c0_i32_1 : i32, i32, i32, i32, i32
  }
}

module attributes {stable_mosaic.version = 11 : i64} {
  func.func @_fused_block_kernel(%arg0: i32, %arg1: memref<1x16x16x32xbf16, #tpu.memory_space<vmem>>, %arg2: memref<1x16x16x32xbf16, #tpu.memory_space<vmem>>, %arg3: memref<576x128xbf16, #tpu.memory_space<vmem>>, %arg4: memref<3x128xf32, #tpu.memory_space<vmem>>, %arg5: memref<1152x128xbf16, #tpu.memory_space<vmem>>, %arg6: memref<3x128xf32, #tpu.memory_space<vmem>>, %arg7: memref<1x16x16x128xf32, #tpu.memory_space<vmem>>, %arg8: memref<18x18x64xbf16, #tpu.memory_space<vmem>>, %arg9: memref<256x576xbf16, #tpu.memory_space<vmem>>, %arg10: memref<18x18x128xbf16, #tpu.memory_space<vmem>>, %arg11: memref<256x1152xbf16, #tpu.memory_space<vmem>>) attributes {dimension_semantics = [#tpu.dimension_semantics<parallel>], iteration_bounds = array<i64: 2>, scalar_prefetch = 0 : i64, scratch_operands = 4 : i64, tpu.core_type = #tpu.core_type<tc>, window_params = [{transform_indices = @transform_0, window_bounds = array<i64: 1, 16, 16, 32>}, {transform_indices = @transform_1, window_bounds = array<i64: 1, 16, 16, 32>}, {pipeline_mode = #tpu.pipeline_mode<synchronous>, transform_indices = @transform_2, window_bounds = array<i64: 576, 128>}, {pipeline_mode = #tpu.pipeline_mode<synchronous>, transform_indices = @transform_3, window_bounds = array<i64: 3, 128>}, {pipeline_mode = #tpu.pipeline_mode<synchronous>, transform_indices = @transform_4, window_bounds = array<i64: 1152, 128>}, {pipeline_mode = #tpu.pipeline_mode<synchronous>, transform_indices = @transform_5, window_bounds = array<i64: 3, 128>}, {transform_indices = @transform_6, window_bounds = array<i64: 1, 16, 16, 128>}]} {
    %cst = arith.constant 0.000000e+00 : bf16
    %0 = vector.broadcast %cst : bf16 to vector<18x18x64xbf16>
    %c0 = arith.constant 0 : index
    %c0_0 = arith.constant 0 : index
    %c0_1 = arith.constant 0 : index
    %1 = vector.load %arg8[%c0, %c0_0, %c0_1] : memref<18x18x64xbf16, #tpu.memory_space<vmem>>, vector<18x18x64xbf16>
    tpu.vector_store %arg8[%c0, %c0_0, %c0_1], %0 {strides = array<i32>} : memref<18x18x64xbf16, #tpu.memory_space<vmem>>, vector<18x18x64xbf16>,
    %c0_2 = arith.constant 0 : index
    %c0_3 = arith.constant 0 : index
    %c0_4 = arith.constant 0 : index
    %c0_5 = arith.constant 0 : index
    %2 = vector.load %arg1[%c0_2, %c0_3, %c0_4, %c0_5] : memref<1x16x16x32xbf16, #tpu.memory_space<vmem>>, vector<1x16x16x32xbf16>
    %3 = vector.shape_cast %2 : vector<1x16x16x32xbf16> to vector<16x16x32xbf16>
    %c1 = arith.constant 1 : index
    %c1_6 = arith.constant 1 : index
    %c0_7 = arith.constant 0 : index
    %4 = vector.load %arg8[%c1, %c1_6, %c0_7] : memref<18x18x64xbf16, #tpu.memory_space<vmem>>, vector<16x16x32xbf16>
    tpu.vector_store %arg8[%c1, %c1_6, %c0_7], %3 {strides = array<i32>} : memref<18x18x64xbf16, #tpu.memory_space<vmem>>, vector<16x16x32xbf16>,
    %c0_8 = arith.constant 0 : index
    %c0_9 = arith.constant 0 : index
    %c0_10 = arith.constant 0 : index
    %c0_11 = arith.constant 0 : index
    %5 = vector.load %arg2[%c0_8, %c0_9, %c0_10, %c0_11] : memref<1x16x16x32xbf16, #tpu.memory_space<vmem>>, vector<1x16x16x32xbf16>
    %6 = vector.shape_cast %5 : vector<1x16x16x32xbf16> to vector<16x16x32xbf16>
    %c1_12 = arith.constant 1 : index
    %c1_13 = arith.constant 1 : index
    %c32 = arith.constant 32 : index
    %7 = vector.load %arg8[%c1_12, %c1_13, %c32] : memref<18x18x64xbf16, #tpu.memory_space<vmem>>, vector<16x16x32xbf16>
    tpu.vector_store %arg8[%c1_12, %c1_13, %c32], %6 {strides = array<i32>} : memref<18x18x64xbf16, #tpu.memory_space<vmem>>, vector<16x16x32xbf16>,
    %c0_14 = arith.constant 0 : index
    %c0_15 = arith.constant 0 : index
    %c0_16 = arith.constant 0 : index
    %8 = vector.load %arg8[%c0_14, %c0_15, %c0_16] : memref<18x18x64xbf16, #tpu.memory_space<vmem>>, vector<16x16x64xbf16>
    %9 = vector.shape_cast %8 : vector<16x16x64xbf16> to vector<256x64xbf16>
    %c0_17 = arith.constant 0 : index
    %c0_18 = arith.constant 0 : index
    %10 = vector.load %arg9[%c0_17, %c0_18] : memref<256x576xbf16, #tpu.memory_space<vmem>>, vector<256x64xbf16>
    tpu.vector_store %arg9[%c0_17, %c0_18], %9 {strides = array<i32>} : memref<256x576xbf16, #tpu.memory_space<vmem>>, vector<256x64xbf16>,
    %c0_19 = arith.constant 0 : index
    %c1_20 = arith.constant 1 : index
    %c0_21 = arith.constant 0 : index
    %11 = vector.load %arg8[%c0_19, %c1_20, %c0_21] : memref<18x18x64xbf16, #tpu.memory_space<vmem>>, vector<16x16x64xbf16>
    %12 = vector.shape_cast %11 : vector<16x16x64xbf16> to vector<256x64xbf16>
    %c0_22 = arith.constant 0 : index
    %c64 = arith.constant 64 : index
    %13 = vector.load %arg9[%c0_22, %c64] : memref<256x576xbf16, #tpu.memory_space<vmem>>, vector<256x64xbf16>
    tpu.vector_store %arg9[%c0_22, %c64], %12 {strides = array<i32>} : memref<256x576xbf16, #tpu.memory_space<vmem>>, vector<256x64xbf16>,
    %c0_23 = arith.constant 0 : index
    %c2 = arith.constant 2 : index
    %c0_24 = arith.constant 0 : index
    %14 = vector.load %arg8[%c0_23, %c2, %c0_24] : memref<18x18x64xbf16, #tpu.memory_space<vmem>>, vector<16x16x64xbf16>
    %15 = vector.shape_cast %14 : vector<16x16x64xbf16> to vector<256x64xbf16>
    %c0_25 = arith.constant 0 : index
    %c128 = arith.constant 128 : index
    %16 = vector.load %arg9[%c0_25, %c128] : memref<256x576xbf16, #tpu.memory_space<vmem>>, vector<256x64xbf16>
    tpu.vector_store %arg9[%c0_25, %c128], %15 {strides = array<i32>} : memref<256x576xbf16, #tpu.memory_space<vmem>>, vector<256x64xbf16>,
    %c1_26 = arith.constant 1 : index
    %c0_27 = arith.constant 0 : index
    %c0_28 = arith.constant 0 : index
    %17 = vector.load %arg8[%c1_26, %c0_27, %c0_28] : memref<18x18x64xbf16, #tpu.memory_space<vmem>>, vector<16x16x64xbf16>
    %18 = vector.shape_cast %17 : vector<16x16x64xbf16> to vector<256x64xbf16>
    %c0_29 = arith.constant 0 : index
    %c192 = arith.constant 192 : index
    %19 = vector.load %arg9[%c0_29, %c192] : memref<256x576xbf16, #tpu.memory_space<vmem>>, vector<256x64xbf16>
    tpu.vector_store %arg9[%c0_29, %c192], %18 {strides = array<i32>} : memref<256x576xbf16, #tpu.memory_space<vmem>>, vector<256x64xbf16>,
    %c1_30 = arith.constant 1 : index
    %c1_31 = arith.constant 1 : index
    %c0_32 = arith.constant 0 : index
    %20 = vector.load %arg8[%c1_30, %c1_31, %c0_32] : memref<18x18x64xbf16, #tpu.memory_space<vmem>>, vector<16x16x64xbf16>
    %21 = vector.shape_cast %20 : vector<16x16x64xbf16> to vector<256x64xbf16>
    %c0_33 = arith.constant 0 : index
    %c256 = arith.constant 256 : index
    %22 = vector.load %arg9[%c0_33, %c256] : memref<256x576xbf16, #tpu.memory_space<vmem>>, vector<256x64xbf16>
    tpu.vector_store %arg9[%c0_33, %c256], %21 {strides = array<i32>} : memref<256x576xbf16, #tpu.memory_space<vmem>>, vector<256x64xbf16>,
    %c1_34 = arith.constant 1 : index
    %c2_35 = arith.constant 2 : index
    %c0_36 = arith.constant 0 : index
    %23 = vector.load %arg8[%c1_34, %c2_35, %c0_36] : memref<18x18x64xbf16, #tpu.memory_space<vmem>>, vector<16x16x64xbf16>
    %24 = vector.shape_cast %23 : vector<16x16x64xbf16> to vector<256x64xbf16>
    %c0_37 = arith.constant 0 : index
    %c320 = arith.constant 320 : index
    %25 = vector.load %arg9[%c0_37, %c320] : memref<256x576xbf16, #tpu.memory_space<vmem>>, vector<256x64xbf16>
    tpu.vector_store %arg9[%c0_37, %c320], %24 {strides = array<i32>} : memref<256x576xbf16, #tpu.memory_space<vmem>>, vector<256x64xbf16>,
    %c2_38 = arith.constant 2 : index
    %c0_39 = arith.constant 0 : index
    %c0_40 = arith.constant 0 : index
    %26 = vector.load %arg8[%c2_38, %c0_39, %c0_40] : memref<18x18x64xbf16, #tpu.memory_space<vmem>>, vector<16x16x64xbf16>
    %27 = vector.shape_cast %26 : vector<16x16x64xbf16> to vector<256x64xbf16>
    %c0_41 = arith.constant 0 : index
    %c384 = arith.constant 384 : index
    %28 = vector.load %arg9[%c0_41, %c384] : memref<256x576xbf16, #tpu.memory_space<vmem>>, vector<256x64xbf16>
    tpu.vector_store %arg9[%c0_41, %c384], %27 {strides = array<i32>} : memref<256x576xbf16, #tpu.memory_space<vmem>>, vector<256x64xbf16>,
    %c2_42 = arith.constant 2 : index
    %c1_43 = arith.constant 1 : index
    %c0_44 = arith.constant 0 : index
    %29 = vector.load %arg8[%c2_42, %c1_43, %c0_44] : memref<18x18x64xbf16, #tpu.memory_space<vmem>>, vector<16x16x64xbf16>
    %30 = vector.shape_cast %29 : vector<16x16x64xbf16> to vector<256x64xbf16>
    %c0_45 = arith.constant 0 : index
    %c448 = arith.constant 448 : index
    %31 = vector.load %arg9[%c0_45, %c448] : memref<256x576xbf16, #tpu.memory_space<vmem>>, vector<256x64xbf16>
    tpu.vector_store %arg9[%c0_45, %c448], %30 {strides = array<i32>} : memref<256x576xbf16, #tpu.memory_space<vmem>>, vector<256x64xbf16>,
    %c2_46 = arith.constant 2 : index
    %c2_47 = arith.constant 2 : index
    %c0_48 = arith.constant 0 : index
    %32 = vector.load %arg8[%c2_46, %c2_47, %c0_48] : memref<18x18x64xbf16, #tpu.memory_space<vmem>>, vector<16x16x64xbf16>
    %33 = vector.shape_cast %32 : vector<16x16x64xbf16> to vector<256x64xbf16>
    %c0_49 = arith.constant 0 : index
    %c512 = arith.constant 512 : index
    %34 = vector.load %arg9[%c0_49, %c512] : memref<256x576xbf16, #tpu.memory_space<vmem>>, vector<256x64xbf16>
    tpu.vector_store %arg9[%c0_49, %c512], %33 {strides = array<i32>} : memref<256x576xbf16, #tpu.memory_space<vmem>>, vector<256x64xbf16>,
    %c0_50 = arith.constant 0 : index
    %c0_51 = arith.constant 0 : index
    %35 = vector.load %arg4[%c0_50, %c0_51] : memref<3x128xf32, #tpu.memory_space<vmem>>, vector<3x128xf32>
    %c0_52 = arith.constant 0 : index
    %c0_53 = arith.constant 0 : index
    %36 = vector.load %arg9[%c0_52, %c0_53] : memref<256x576xbf16, #tpu.memory_space<vmem>>, vector<256x576xbf16>
    %c0_54 = arith.constant 0 : index
    %c0_55 = arith.constant 0 : index
    %37 = vector.load %arg3[%c0_54, %c0_55] : memref<576x128xbf16, #tpu.memory_space<vmem>>, vector<576x128xbf16>
    %cst_56 = arith.constant dense<0.000000e+00> : vector<256x128xf32>
    %38 = tpu.matmul %36, %37, %cst_56 {dimension_numbers = #tpu.dot_dimension_numbers<[1], [0], [0], [1], [0, 0, 1, 1], [], []>} : vector<256x576xbf16>, vector<576x128xbf16>, vector<256x128xf32> -> vector<256x128xf32>
    %39 = vector.extract_strided_slice %35 {offsets = [0, 0], sizes = [1, 128], strides = [1, 1]} : vector<3x128xf32> to vector<1x128xf32>
    %40 = vector.broadcast %39 : vector<1x128xf32> to vector<256x128xf32>
    %41 = arith.addf %38, %40 : vector<256x128xf32>
    %cst_57 = arith.constant 0.000000e+00 : f32
    %42 = vector.broadcast %cst_57 : f32 to vector<256x128xf32>
    %43 = arith.maximumf %41, %42 : vector<256x128xf32>
    %44 = vector.extract_strided_slice %35 {offsets = [1, 0], sizes = [1, 128], strides = [1, 1]} : vector<3x128xf32> to vector<1x128xf32>
    %45 = vector.broadcast %44 : vector<1x128xf32> to vector<256x128xf32>
    %46 = arith.mulf %43, %45 : vector<256x128xf32>
    %47 = vector.extract_strided_slice %35 {offsets = [2, 0], sizes = [1, 128], strides = [1, 1]} : vector<3x128xf32> to vector<1x128xf32>
    %48 = vector.broadcast %47 : vector<1x128xf32> to vector<256x128xf32>
    %49 = arith.addf %46, %48 : vector<256x128xf32>
    %cst_58 = arith.constant 0.000000e+00 : bf16
    %50 = vector.broadcast %cst_58 : bf16 to vector<18x18x128xbf16>
    %c0_59 = arith.constant 0 : index
    %c0_60 = arith.constant 0 : index
    %c0_61 = arith.constant 0 : index
    %51 = vector.load %arg10[%c0_59, %c0_60, %c0_61] : memref<18x18x128xbf16, #tpu.memory_space<vmem>>, vector<18x18x128xbf16>
    tpu.vector_store %arg10[%c0_59, %c0_60, %c0_61], %50 {strides = array<i32>} : memref<18x18x128xbf16, #tpu.memory_space<vmem>>, vector<18x18x128xbf16>,
    %52 = arith.truncf %49 : vector<256x128xf32> to vector<256x128xbf16>
    %53 = vector.shape_cast %52 : vector<256x128xbf16> to vector<16x16x128xbf16>
    %c1_62 = arith.constant 1 : index
    %c1_63 = arith.constant 1 : index
    %c0_64 = arith.constant 0 : index
    %54 = vector.load %arg10[%c1_62, %c1_63, %c0_64] : memref<18x18x128xbf16, #tpu.memory_space<vmem>>, vector<16x16x128xbf16>
    tpu.vector_store %arg10[%c1_62, %c1_63, %c0_64], %53 {strides = array<i32>} : memref<18x18x128xbf16, #tpu.memory_space<vmem>>, vector<16x16x128xbf16>,
    %c0_65 = arith.constant 0 : index
    %c0_66 = arith.constant 0 : index
    %c0_67 = arith.constant 0 : index
    %55 = vector.load %arg10[%c0_65, %c0_66, %c0_67] : memref<18x18x128xbf16, #tpu.memory_space<vmem>>, vector<16x16x128xbf16>
    %56 = vector.shape_cast %55 : vector<16x16x128xbf16> to vector<256x128xbf16>
    %c0_68 = arith.constant 0 : index
    %c0_69 = arith.constant 0 : index
    %57 = vector.load %arg11[%c0_68, %c0_69] : memref<256x1152xbf16, #tpu.memory_space<vmem>>, vector<256x128xbf16>
    tpu.vector_store %arg11[%c0_68, %c0_69], %56 {strides = array<i32>} : memref<256x1152xbf16, #tpu.memory_space<vmem>>, vector<256x128xbf16>,
    %c0_70 = arith.constant 0 : index
    %c1_71 = arith.constant 1 : index
    %c0_72 = arith.constant 0 : index
    %58 = vector.load %arg10[%c0_70, %c1_71, %c0_72] : memref<18x18x128xbf16, #tpu.memory_space<vmem>>, vector<16x16x128xbf16>
    %59 = vector.shape_cast %58 : vector<16x16x128xbf16> to vector<256x128xbf16>
    %c0_73 = arith.constant 0 : index
    %c128_74 = arith.constant 128 : index
    %60 = vector.load %arg11[%c0_73, %c128_74] : memref<256x1152xbf16, #tpu.memory_space<vmem>>, vector<256x128xbf16>
    tpu.vector_store %arg11[%c0_73, %c128_74], %59 {strides = array<i32>} : memref<256x1152xbf16, #tpu.memory_space<vmem>>, vector<256x128xbf16>,
    %c0_75 = arith.constant 0 : index
    %c2_76 = arith.constant 2 : index
    %c0_77 = arith.constant 0 : index
    %61 = vector.load %arg10[%c0_75, %c2_76, %c0_77] : memref<18x18x128xbf16, #tpu.memory_space<vmem>>, vector<16x16x128xbf16>
    %62 = vector.shape_cast %61 : vector<16x16x128xbf16> to vector<256x128xbf16>
    %c0_78 = arith.constant 0 : index
    %c256_79 = arith.constant 256 : index
    %63 = vector.load %arg11[%c0_78, %c256_79] : memref<256x1152xbf16, #tpu.memory_space<vmem>>, vector<256x128xbf16>
    tpu.vector_store %arg11[%c0_78, %c256_79], %62 {strides = array<i32>} : memref<256x1152xbf16, #tpu.memory_space<vmem>>, vector<256x128xbf16>,
    %c1_80 = arith.constant 1 : index
    %c0_81 = arith.constant 0 : index
    %c0_82 = arith.constant 0 : index
    %64 = vector.load %arg10[%c1_80, %c0_81, %c0_82] : memref<18x18x128xbf16, #tpu.memory_space<vmem>>, vector<16x16x128xbf16>
    %65 = vector.shape_cast %64 : vector<16x16x128xbf16> to vector<256x128xbf16>
    %c0_83 = arith.constant 0 : index
    %c384_84 = arith.constant 384 : index
    %66 = vector.load %arg11[%c0_83, %c384_84] : memref<256x1152xbf16, #tpu.memory_space<vmem>>, vector<256x128xbf16>
    tpu.vector_store %arg11[%c0_83, %c384_84], %65 {strides = array<i32>} : memref<256x1152xbf16, #tpu.memory_space<vmem>>, vector<256x128xbf16>,
    %c1_85 = arith.constant 1 : index
    %c1_86 = arith.constant 1 : index
    %c0_87 = arith.constant 0 : index
    %67 = vector.load %arg10[%c1_85, %c1_86, %c0_87] : memref<18x18x128xbf16, #tpu.memory_space<vmem>>, vector<16x16x128xbf16>
    %68 = vector.shape_cast %67 : vector<16x16x128xbf16> to vector<256x128xbf16>
    %c0_88 = arith.constant 0 : index
    %c512_89 = arith.constant 512 : index
    %69 = vector.load %arg11[%c0_88, %c512_89] : memref<256x1152xbf16, #tpu.memory_space<vmem>>, vector<256x128xbf16>
    tpu.vector_store %arg11[%c0_88, %c512_89], %68 {strides = array<i32>} : memref<256x1152xbf16, #tpu.memory_space<vmem>>, vector<256x128xbf16>,
    %c1_90 = arith.constant 1 : index
    %c2_91 = arith.constant 2 : index
    %c0_92 = arith.constant 0 : index
    %70 = vector.load %arg10[%c1_90, %c2_91, %c0_92] : memref<18x18x128xbf16, #tpu.memory_space<vmem>>, vector<16x16x128xbf16>
    %71 = vector.shape_cast %70 : vector<16x16x128xbf16> to vector<256x128xbf16>
    %c0_93 = arith.constant 0 : index
    %c640 = arith.constant 640 : index
    %72 = vector.load %arg11[%c0_93, %c640] : memref<256x1152xbf16, #tpu.memory_space<vmem>>, vector<256x128xbf16>
    tpu.vector_store %arg11[%c0_93, %c640], %71 {strides = array<i32>} : memref<256x1152xbf16, #tpu.memory_space<vmem>>, vector<256x128xbf16>,
    %c2_94 = arith.constant 2 : index
    %c0_95 = arith.constant 0 : index
    %c0_96 = arith.constant 0 : index
    %73 = vector.load %arg10[%c2_94, %c0_95, %c0_96] : memref<18x18x128xbf16, #tpu.memory_space<vmem>>, vector<16x16x128xbf16>
    %74 = vector.shape_cast %73 : vector<16x16x128xbf16> to vector<256x128xbf16>
    %c0_97 = arith.constant 0 : index
    %c768 = arith.constant 768 : index
    %75 = vector.load %arg11[%c0_97, %c768] : memref<256x1152xbf16, #tpu.memory_space<vmem>>, vector<256x128xbf16>
    tpu.vector_store %arg11[%c0_97, %c768], %74 {strides = array<i32>} : memref<256x1152xbf16, #tpu.memory_space<vmem>>, vector<256x128xbf16>,
    %c2_98 = arith.constant 2 : index
    %c1_99 = arith.constant 1 : index
    %c0_100 = arith.constant 0 : index
    %76 = vector.load %arg10[%c2_98, %c1_99, %c0_100] : memref<18x18x128xbf16, #tpu.memory_space<vmem>>, vector<16x16x128xbf16>
    %77 = vector.shape_cast %76 : vector<16x16x128xbf16> to vector<256x128xbf16>
    %c0_101 = arith.constant 0 : index
    %c896 = arith.constant 896 : index
    %78 = vector.load %arg11[%c0_101, %c896] : memref<256x1152xbf16, #tpu.memory_space<vmem>>, vector<256x128xbf16>
    tpu.vector_store %arg11[%c0_101, %c896], %77 {strides = array<i32>} : memref<256x1152xbf16, #tpu.memory_space<vmem>>, vector<256x128xbf16>,
    %c2_102 = arith.constant 2 : index
    %c2_103 = arith.constant 2 : index
    %c0_104 = arith.constant 0 : index
    %79 = vector.load %arg10[%c2_102, %c2_103, %c0_104] : memref<18x18x128xbf16, #tpu.memory_space<vmem>>, vector<16x16x128xbf16>
    %80 = vector.shape_cast %79 : vector<16x16x128xbf16> to vector<256x128xbf16>
    %c0_105 = arith.constant 0 : index
    %c1024 = arith.constant 1024 : index
    %81 = vector.load %arg11[%c0_105, %c1024] : memref<256x1152xbf16, #tpu.memory_space<vmem>>, vector<256x128xbf16>
    tpu.vector_store %arg11[%c0_105, %c1024], %80 {strides = array<i32>} : memref<256x1152xbf16, #tpu.memory_space<vmem>>, vector<256x128xbf16>,
    %c0_106 = arith.constant 0 : index
    %c0_107 = arith.constant 0 : index
    %82 = vector.load %arg6[%c0_106, %c0_107] : memref<3x128xf32, #tpu.memory_space<vmem>>, vector<3x128xf32>
    %c0_108 = arith.constant 0 : index
    %c0_109 = arith.constant 0 : index
    %83 = vector.load %arg11[%c0_108, %c0_109] : memref<256x1152xbf16, #tpu.memory_space<vmem>>, vector<256x1152xbf16>
    %c0_110 = arith.constant 0 : index
    %c0_111 = arith.constant 0 : index
    %84 = vector.load %arg5[%c0_110, %c0_111] : memref<1152x128xbf16, #tpu.memory_space<vmem>>, vector<1152x128xbf16>
    %cst_112 = arith.constant dense<0.000000e+00> : vector<256x128xf32>
    %85 = tpu.matmul %83, %84, %cst_112 {dimension_numbers = #tpu.dot_dimension_numbers<[1], [0], [0], [1], [0, 0, 1, 1], [], []>} : vector<256x1152xbf16>, vector<1152x128xbf16>, vector<256x128xf32> -> vector<256x128xf32>
    %86 = vector.extract_strided_slice %82 {offsets = [0, 0], sizes = [1, 128], strides = [1, 1]} : vector<3x128xf32> to vector<1x128xf32>
    %87 = vector.broadcast %86 : vector<1x128xf32> to vector<256x128xf32>
    %88 = arith.addf %85, %87 : vector<256x128xf32>
    %cst_113 = arith.constant 0.000000e+00 : f32
    %89 = vector.broadcast %cst_113 : f32 to vector<256x128xf32>
    %90 = arith.maximumf %88, %89 : vector<256x128xf32>
    %91 = vector.extract_strided_slice %82 {offsets = [1, 0], sizes = [1, 128], strides = [1, 1]} : vector<3x128xf32> to vector<1x128xf32>
    %92 = vector.broadcast %91 : vector<1x128xf32> to vector<256x128xf32>
    %93 = arith.mulf %90, %92 : vector<256x128xf32>
    %94 = vector.extract_strided_slice %82 {offsets = [2, 0], sizes = [1, 128], strides = [1, 1]} : vector<3x128xf32> to vector<1x128xf32>
    %95 = vector.broadcast %94 : vector<1x128xf32> to vector<256x128xf32>
    %96 = arith.addf %93, %95 : vector<256x128xf32>
    %97 = vector.shape_cast %96 : vector<256x128xf32> to vector<1x16x16x128xf32>
    %c0_114 = arith.constant 0 : index
    %c0_115 = arith.constant 0 : index
    %c0_116 = arith.constant 0 : index
    %c0_117 = arith.constant 0 : index
    %98 = vector.load %arg7[%c0_114, %c0_115, %c0_116, %c0_117] : memref<1x16x16x128xf32, #tpu.memory_space<vmem>>, vector<1x16x16x128xf32>
    tpu.vector_store %arg7[%c0_114, %c0_115, %c0_116, %c0_117], %97 {strides = array<i32>} : memref<1x16x16x128xf32, #tpu.memory_space<vmem>>, vector<1x16x16x128xf32>,
    return
  }
  func.func @transform_0(%arg0: i32) -> (i32, i32, i32, i32) {
    %c0_i32 = arith.constant 0 : i32
    %c0_i32_0 = arith.constant 0 : i32
    %c0_i32_1 = arith.constant 0 : i32
    %c0_i32_2 = arith.constant 0 : i32
    return %arg0, %c0_i32, %c0_i32_0, %c0_i32_1 : i32, i32, i32, i32
  }
  func.func @transform_1(%arg0: i32) -> (i32, i32, i32, i32) {
    %c0_i32 = arith.constant 0 : i32
    %c0_i32_0 = arith.constant 0 : i32
    %c0_i32_1 = arith.constant 0 : i32
    %c0_i32_2 = arith.constant 0 : i32
    return %arg0, %c0_i32, %c0_i32_0, %c0_i32_1 : i32, i32, i32, i32
  }
  func.func @transform_2(%arg0: i32) -> (i32, i32) {
    %c0_i32 = arith.constant 0 : i32
    %c0_i32_0 = arith.constant 0 : i32
    %c0_i32_1 = arith.constant 0 : i32
    return %c0_i32, %c0_i32_0 : i32, i32
  }
  func.func @transform_3(%arg0: i32) -> (i32, i32) {
    %c0_i32 = arith.constant 0 : i32
    %c0_i32_0 = arith.constant 0 : i32
    %c0_i32_1 = arith.constant 0 : i32
    return %c0_i32, %c0_i32_0 : i32, i32
  }
  func.func @transform_4(%arg0: i32) -> (i32, i32) {
    %c0_i32 = arith.constant 0 : i32
    %c0_i32_0 = arith.constant 0 : i32
    %c0_i32_1 = arith.constant 0 : i32
    return %c0_i32, %c0_i32_0 : i32, i32
  }
  func.func @transform_5(%arg0: i32) -> (i32, i32) {
    %c0_i32 = arith.constant 0 : i32
    %c0_i32_0 = arith.constant 0 : i32
    %c0_i32_1 = arith.constant 0 : i32
    return %c0_i32, %c0_i32_0 : i32, i32
  }
  func.func @transform_6(%arg0: i32) -> (i32, i32, i32, i32) {
    %c0_i32 = arith.constant 0 : i32
    %c0_i32_0 = arith.constant 0 : i32
    %c0_i32_1 = arith.constant 0 : i32
    %c0_i32_2 = arith.constant 0 : i32
    return %arg0, %c0_i32, %c0_i32_0, %c0_i32_1 : i32, i32, i32, i32
  }
}

</mosaic_0001>

<bundles_post_ra>
// kernel: tile.9
= control target key start
LH: loop header
LB: loop body
LE: loop exit
PB: predicated region body
PF: predicated region fallthrough
CT: control target
= control target key end

     0   :  { %vm7_vm0 = vcmask 261120   ;;  %vm13_vm1 = vcmask 523520   ;;  %s39_s0 = inlined_call_operand.vmem [shape: f32[2,32], index: 0, kind: input, shape index: {}]   ;;  %s40_s1 = inlined_call_operand.vmem [shape: f32[1,64], index: 1, kind: output, shape index: {}]  }
   0x1   :  { %v4_v0 = vld [vmem:[%s39_s0] sm:$0x3]  ;;  %s22_s0 = smov 32  }
   0x2   :  { %5 = vst [vmem:[#allocation1] sm:$0x3] %v4_v0 }
   0x9   :  { %v10_v1 = vld [vmem:[#allocation1 + $0x1] sm:$0x1]   ;;  %v6_v2 = vld [vmem:[#allocation1] sm:$0x1]  }
   0xa   :  { %11 = vrot.lane.b32.xlu0 %v10_v1, %s22_s0  ;;  %8 = vst.msk [vmem:[#allocation0] sm:$0x1] %vm7_vm0, %v6_v2  }
  0x7c   :  { %v12_v3 = vpop.permute.xlu0 %11  }
  0x7d   :  { %14 = vst.msk [vmem:[#allocation0] sm:$0x1] %vm13_vm1, %v12_v3  }
  0x84   :  { %v18_v4 = vld [vmem:[#allocation0] sm:$0x1] }
  0x85   :  { %20 = vst [vmem:[%s40_s1] sm:$0x1] %v18_v4 }

// kernel: tile.8
= control target key start
LH: loop header
LB: loop body
LE: loop exit
PB: predicated region body
PF: predicated region fallthrough
CT: control target
= control target key end

     0   :  { %2 = vsyncpa [#allocation1], 0  ;;  %s44_s6 = smov [#allocation0]   ;;  %s70_s0 = inlined_call_operand.hbm [shape: f32[32], index: 0, kind: input, shape index: {}]   ;;  %s71_s1 = inlined_call_operand.vmem [shape: f32[2,32], index: 1, kind: output, shape index: {}]  }
   0x1   :  { %s9_s7 = sshll.u32 %s44_s6, 4  ;;  %s20_s10 = scalar_lea.hbm %s70_s0, 16  ;;  %s10_s7 = int_to_ptr.vmem [resolvable:$true] %s9_s7 }
   0x2   :  { %p21_p0 = scmp.ne.s32.totalorder %s70_s0, %s20_s10  ;;  %p24_p1 = scmp.lt.u32.totalorder %s20_s10, %s70_s0 }
   0x4   :  { %p26_p2 = pnand %p24_p1, %p21_p0 }
   0x6   :  { %29 = shalt.err (!%p26_p2)
}
   0x7   :  { %s30_s15 = scalar_lea.vmem %s10_s7, 16  ;;  %s34_s16 = scalar_lea.vmem %s10_s7, 32 }
   0x8   :  { %p31_p3 = scmp.ne.s32.totalorder %s10_s7, %s30_s15  ;;  %p35_p4 = scmp.lt.s32.totalorder %s10_s7, %s10_s7 }
   0x9   :  { %p36_p5 = scmp.lt.s32.totalorder %s34_s16, %s30_s15 }
   0xb   :  { %p37_p6 = por %p36_p5, %p35_p4 }
   0xd   :  { %p38_p7 = pnand %p37_p6, %p31_p3 }
   0xf   :  { %41 = shalt.err (!%p38_p7)
}
  0x10   :  { %12 = dma.hbm_to_vmem [thread:$0]  %s70_s0, 16, %s10_s7, [#allocation1]  }
  0x11   :  { %42 = dma.done.wait [#allocation1], 16  }
  0x12   :  { %43 = vsyncadd [#allocation1], 4294967280  ;;  %v16_v0 = vld [vmem:[#allocation0] ss:$0 sm:$0xff] }
  0x13   :  { %17 = vst [vmem:[%s71_s1] sm:$0x3] %v16_v0 }
  0x14   :  { %18 = vsyncpa [#allocation1], 1 }

// kernel: conv_up_block_forward.2
= control target key start
LH: loop header
LB: loop body
LE: loop exit
PB: predicated region body
PF: predicated region fallthrough
CT: control target
= control target key end

     0   :  { %s718_s12 = smov 0   ;;  %s720_s13 = smov 0   ;;  %s831_s0 = inlined_call_operand.vmem [shape: bf16[2,8,8,64], index: 0, kind: input, shape index: {}]   ;;  %s832_s1 = inlined_call_operand.vmem [shape: bf16[2,64,64], index: 1, kind: input, shape index: {}]   ;;  %s833_s2 = inlined_call_operand.vmem [shape: f32[1,64], index: 2, kind: input, shape index: {}]   ;;  %s834_s3 = inlined_call_operand.vmem [shape: bf16[2,8,2,8,64], index: 3, kind: output, shape index: {}]  }
   0x1   :  { %s722_s14 = smov 0   ;;  %s724_s15 = smov 0  }
   0x2   :  { %s726_s16 = smov 0   ;;  %s728_s17 = smov 0  }
   0x3   :  { %s730_s18 = smov 0  }
   0x4 LB: > { %s22_s19 = sadd.s32 1, %s688_s16  ;;  %s25_s20 = sadd.s32 1, %s692_s17  ;;  %s696_s18 = sphi %s730_s18, %s13_s18   ;;  %s692_s17 = sphi %s728_s17, %s841_s17   ;;  %s688_s16 = sphi %s726_s16, %s840_s16   ;;  %s684_s15 = sphi %s724_s15, %s839_s15   ;;  %s680_s14 = sphi %s722_s14, %s838_s14   ;;  %s676_s13 = sphi %s720_s13, %s837_s13   ;;  %s672_s12 = sphi %s718_s12, %s836_s12  }
   0x5   : > { %p23_p0 = scmp.ge.s32.totalorder %s22_s19, 2  ;;  %s516_s21 = sadd.s32 4294967295, %s696_s18  }
   0x6   : > { %p117_p1 = scmp.ne.s32.totalorder %s676_s13, %s672_s12  ;;  %p118_p2 = scmp.eq.s32.totalorder %s516_s21, 3 }
   0x7   : > { %s843_s19 = smov (%p23_p0, %s22_s19), 0  ;;  %s845_s20 = smov (!%p23_p0, %s25_s20), %s692_s17 }
   0x8   : > { %s103_s22 = ssub.s32 %s688_s16, %s843_s19  ;;  %p27_p3 = scmp.ge.s32.totalorder %s845_s20, 2 }
   0x9   : > { %p520_p4 = scmp.ge.s32.totalorder %s696_s18, 1  ;;  %p764_p5 = por %p118_p2, %p117_p1 }
   0xa   : > { %p161_p6 = scmp.lt.s32.totalorder %s696_s18, 5  ;;  %s847_s20 = smov (%p27_p3, %s845_s20), 0 }
   0xb   : > { %s102_s24 = ssub.s32 %s692_s17, %s847_s20  ;;  %s107_s26 = sadd.s32 1, %s676_s13 }
   0xc   : > { %p162_p7 = pnand %p520_p4, %p161_p6  ;;  %s104_s25 = sor.u32 %s103_s22, %s102_s24 }
   0xd   : > { %p105_p8 = scmp.eq.s32.totalorder %s104_s25, 0  ;;  %p194_p9 = scmp.lt.s32.totalorder (!%p162_p7), %s680_s14, 1  ;;  %vm267_vm0 = vcmask (!%p162_p7), 523264   ;;  %v526_v8 = vld [vmem:[%s833_s2] ss:$0 sm:$0xff] (!%p162_p7)  ;;  %vm353_vm1 = vcmask (!%p162_p7), 519168  }
   0xe   : > { %165 = sbr.rel (%p162_p7) target bundleno = 272 (0x110), region = 32  ;;  %p189_p10 = scmp.lt.s32.totalorder (!%p162_p7), %s684_s15, 1 }
   0xf   : > { %s775_s27 = scalar_select %p105_p8, %s676_s13, %s107_s26  }
  0x10   : > { %s186_s11 = sand.u32 (!%p162_p7), 1, %s672_s12  }
  0x11   : > { %s521_s24 = sshll.u32 (!%p162_p7), %s186_s11, 5 }
  0x12   : > { %s188_s12 = scalar_lea.vmem (!%p162_p7), [#allocation2], %s521_s24 }
  0x15   : > { %s195_s28 = scalar_select %p194_p9, %s680_s14, 1 }
  0x16   : > { %s190_s29 = scalar_select %p189_p10, %s684_s15, 1 }
  0x17   : > { %s545_s30 = sshll.u32 %s195_s28, 5  ;;  %s540_s25 = sshll.u32 (%p764_p5), %s684_s15, 4 }
  0x18   : > { %s198_s6 = scalar_lea.vmem %s832_s1, %s545_s30  ;;  %s544_s7 = sshll.u32 %s190_s29, 5 }
  0x19   : > { %v634_v0 = vld [vmem:[%s198_s6] sm:$0xff]   ;;  %v635_v1 = vld [vmem:[%s198_s6 + $0x8] sm:$0xff]   ;;  %s193_s10 = scalar_lea.vmem %s831_s0, %s544_s7  ;;  %v636_v2 = vld [vmem:[%s198_s6 + $0x10] sm:$0xff]   ;;  %s370_s26 = sadd.s32 (%p764_p5), %s680_s14, %s540_s25 }
  0x1a   : > { %554 = vmatprep.subr.bf16.mxu0 %v634_v0  ;;  %570 = vmatprep.subr.bf16.mxu1 %v634_v0  ;;  %v638_v3 = vld [vmem:[%s193_s10] sm:$0xff]   ;;  %v639_v4 = vld [vmem:[%s193_s10 + $0x10] sm:$0xff]   ;;  %v637_v5 = vld [vmem:[%s198_s6 + $0x18] sm:$0xff]   ;;  %s541_s28 = sshll.u32 (%p764_p5), %s370_s26, 2 }
  0x1b   : > { %555 = vmatpush3.bf16.msra.mxu0 %v634_v0  ;;  %574 = vmatpush3.bf16.msra.mxu1 %v634_v0  ;;  %v640_v6 = vld [vmem:[%s193_s10 + $0x8] sm:$0xff]   ;;  %v641_v7 = vld [vmem:[%s193_s10 + $0x18] sm:$0xff]   ;;  %s372_s4 = scalar_lea.vmem (%p764_p5), %s834_s3, %s541_s28 }
  0x1c   : > { %556 = vmatprep.subr.bf16.mxu0 %v635_v1  ;;  %571 = vmatprep.subr.bf16.mxu1 %v635_v1 }
  0x1d   : > { %562 = vmatprep.mubr.msk.bf16.mxu0 %vm267_vm0, %v638_v3  ;;  %566 = vmatprep.mubr.msk.bf16.mxu1 %vm267_vm0, %v639_v4 }
  0x1f   : > { %557 = vmatpush3.bf16.msra.mxu0 %v635_v1  ;;  %575 = vmatpush3.bf16.msra.mxu1 %v635_v1 }
  0x20   : > { %558 = vmatprep.subr.bf16.mxu0 %v636_v2  ;;  %572 = vmatprep.subr.bf16.mxu1 %v636_v2 }
  0x23   : > { %559 = vmatpush3.bf16.msra.mxu0 %v636_v2  ;;  %576 = vmatpush3.bf16.msra.mxu1 %v636_v2 }
  0x24   : > { %560 = vmatprep.subr.bf16.mxu0 %v637_v5  ;;  %573 = vmatprep.subr.bf16.mxu1 %v637_v5 }
  0x27   : > { %561 = vmatpush3.bf16.msra.mxu0 %v637_v5  ;;  %577 = vmatpush3.bf16.msra.mxu1 %v637_v5 }
  0x2a   : > { %563 = vmatmul.mubr.msk.bf16.vlgmr.msra.gmra.mrb[0].mxu0 %vm267_vm0, %v640_v6  ;;  %567 = vmatmul.mubr.msk.bf16.vlgmr.msra.gmra.mrb[0].mxu1 %vm267_vm0, %v641_v7 }
  0xfd   : > { %v564_v9 = vpop.f32.mrb[0].mxu0  ;;  %v568_v10 = vpop.f32.mrb[0].mxu1 }
  0xfe   : > { %v323_v11 = vadd.f32 %v564_v9, %v526_v8  ;;  %v339_v12 = vadd.f32 %v568_v10, %v526_v8  ;;  %v314_v13 = vpop.f32.mrb[1].mxu0  ;;  %v330_v14 = vpop.f32.mrb[1].mxu1 }
  0xff   : > { %v315_v15 = vadd.f32 %v526_v8, %v314_v13  ;;  %v331_v16 = vadd.f32 %v526_v8, %v330_v14  ;;  %v565_v17 = vpop.f32.mrb[2].mxu0  ;;  %v569_v18 = vpop.f32.mrb[2].mxu1  ;;  %368 = sbr.rel (!%p764_p5) target bundleno = 272 (0x110), region = 36 }
 0x100   : > { %v347_v19 = vpack.c.bf16 %v323_v11, %v323_v11  ;;  %v351_v20 = vpack.c.bf16 %v339_v12, %v339_v12  ;;  %v326_v21 = vadd.f32 %v565_v17, %v526_v8  ;;  %v342_v22 = vadd.f32 %v569_v18, %v526_v8  ;;  %v317_v23 = vpop.f32.mrb[3].mxu0  ;;  %v333_v24 = vpop.f32.mrb[3].mxu1 }
 0x101   : > { %v345_v25 = vpack.c.bf16 %v315_v15, %v315_v15  ;;  %v349_v26 = vpack.c.bf16 %v331_v16, %v331_v16  ;;  %v318_v27 = vadd.f32 %v526_v8, %v317_v23  ;;  %v334_v28 = vadd.f32 %v526_v8, %v333_v24 }
 0x102   : > { %356 = vst.msk [vmem:[%s188_s12 + $0x8] sm:$0xf] %vm353_vm1, %v347_v19  ;;  %360 = vst.msk [vmem:[%s188_s12 + $0x18] sm:$0xf] %vm353_vm1, %v351_v20  ;;  %v348_v29 = vpack.c.bf16 %v326_v21, %v326_v21  ;;  %v352_v30 = vpack.c.bf16 %v342_v22, %v342_v22 }
 0x103   : > { %354 = vst.msk [vmem:[%s188_s12] sm:$0xf] %vm353_vm1, %v345_v25  ;;  %358 = vst.msk [vmem:[%s188_s12 + $0x10] sm:$0xf] %vm353_vm1, %v349_v26  ;;  %v346_v31 = vpack.c.bf16 %v318_v27, %v318_v27  ;;  %v350_v32 = vpack.c.bf16 %v334_v28, %v334_v28 }
 0x104   : > { %357 = vst.msk [vmem:[%s188_s12 + $0xc] sm:$0xf] %vm353_vm1, %v348_v29  ;;  %361 = vst.msk [vmem:[%s188_s12 + $0x1c] sm:$0xf] %vm353_vm1, %v352_v30 }
 0x105   : > { %355 = vst.msk [vmem:[%s188_s12 + $0x4] sm:$0xf] %vm353_vm1, %v346_v31  ;;  %359 = vst.msk [vmem:[%s188_s12 + $0x14] sm:$0xf] %vm353_vm1, %v350_v32 }
 0x109   : > { %v392_v35 = vld [vmem:[%s188_s12 + $0x8] sm:$0xf]  ;;  %v400_v39 = vld [vmem:[%s188_s12 + $0x18] sm:$0xf] }
 0x10a   : > { %v388_v33 = vld [vmem:[%s188_s12] sm:$0xf]  ;;  %v396_v37 = vld [vmem:[%s188_s12 + $0x10] sm:$0xf]  ;;  %393 = vst [vmem:[%s372_s4 + $0x10] sm:$0xf] %v392_v35 }
 0x10b   : > { %v394_v36 = vld [vmem:[%s188_s12 + $0xc] sm:$0xf]  ;;  %v402_v40 = vld [vmem:[%s188_s12 + $0x1c] sm:$0xf]  ;;  %389 = vst [vmem:[%s372_s4] sm:$0xf] %v388_v33 }
 0x10c   : > { %v390_v34 = vld [vmem:[%s188_s12 + $0x4] sm:$0xf]  ;;  %v398_v38 = vld [vmem:[%s188_s12 + $0x14] sm:$0xf]  ;;  %395 = vst [vmem:[%s372_s4 + $0x18] sm:$0xf] %v394_v36 }
 0x10d   : > { %391 = vst [vmem:[%s372_s4 + $0x8] sm:$0xf] %v390_v34  ;;  %397 = vst [vmem:[%s372_s4 + $0x20] sm:$0xf] %v396_v37 }
 0x10e   : > { %399 = vst [vmem:[%s372_s4 + $0x28] sm:$0xf] %v398_v38  ;;  %401 = vst [vmem:[%s372_s4 + $0x30] sm:$0xf] %v400_v39 }
 0x10f   : > { %403 = vst [vmem:[%s372_s4 + $0x38] sm:$0xf] %v402_v40 }
 0x110 PF: > { %s13_s18 = sadd.s32 1, %s696_s18   ;;  %s836_s12 = smov %s676_s13 }
 0x111   : > { %p10_p11 = scmp.ge.s32.totalorder %s13_s18, 6   ;;  %s837_s13 = smov %s775_s27 }
 0x112   : > { %s838_s14 = smov %s688_s16  ;;  %s839_s15 = smov %s692_s17 }
 0x113   : > { %s840_s16 = smov %s843_s19  ;;  %s841_s17 = smov %s847_s20 }
 0x114   :  { %12 = sbr.rel (!%p10_p11) target bundleno = 4 (0x4), region = 106 }

// kernel: conv_up_block_forward.3
= control target key start
LH: loop header
LB: loop body
LE: loop exit
PB: predicated region body
PF: predicated region fallthrough
CT: control target
= control target key end

     0   :  { %s12153_s21 = smov 0   ;;  %s16475_s0 = inlined_call_operand.vmem [shape: bf16[2,16,16,32], index: 0, kind: input, shape index: {}]   ;;  %s16476_s1 = inlined_call_operand.vmem [shape: bf16[2,16,16,32], index: 1, kind: input, shape index: {}]   ;;  %s16477_s2 = inlined_call_operand.vmem [shape: bf16[576,128], index: 2, kind: input, shape index: {}]   ;;  %s16478_s3 = inlined_call_operand.vmem [shape: f32[3,128], index: 3, kind: input, shape index: {}]   ;;  %s16479_s4 = inlined_call_operand.vmem [shape: bf16[1152,128], index: 4, kind: input, shape index: {}]   ;;  %s16480_s5 = inlined_call_operand.vmem [shape: f32[3,128], index: 5, kind: input, shape index: {}]   ;;  %s16481_s6 = inlined_call_operand.vmem [shape: f32[2,16,16,128], index: 6, kind: output, shape index: {}]  }
   0x1 LB: > { %s10498_s22 = sadd.s32 4294967295, %s12113_s21   ;;  %p10502_p0 = scmp.ge.s32.totalorder %s12113_s21, 1  ;;  %s12113_s21 = sphi %s12153_s21, %s16_s21  }
   0x2   : > { %p222_p1 = scmp.lt.s32.totalorder %s12113_s21, 3 }
   0x4   : > { %p223_p2 = pnand %p10502_p0, %p222_p1 }
   0x6   : > { %226 = sbr.rel (%p223_p2) target bundleno = 1409 (0x581), region = 44 }
   0xd   : > { %p257_p3 = scmp.lt.s32.totalorder %s10498_s22, 1  ;;  %vm276_vm0 = vcmask 516096   ;;  %v12115_v0 = vmov 0   ;;  %vm273_vm1 = vcmask 519168   ;;  %vm361_vm2 = vsmask.f32 256 }
   0xe   : > { %280 = vst.msk [vmem:[#allocation2 + $0x14] sm:$0x1] %vm276_vm0, %v12115_v0  ;;  %277 = vst.msk [vmem:[#allocation2 + $0x8] sm:$0x1] %vm276_vm0, %v12115_v0  ;;  %vm362_vm3 = vsmask.f32 4368 }
   0xf   : > { %s16722_s22 = smov (!%p257_p3, %s10498_s22), 1  ;;  %283 = vst.msk [vmem:[#allocation2 + $0x20] sm:$0x1] %vm276_vm0, %v12115_v0  ;;  %286 = vst.msk [vmem:[#allocation2 + $0x2c] sm:$0x1] %vm276_vm0, %v12115_v0  ;;  %v16523_v25 = vmov 0 }
  0x10   : > { %289 = vst.msk [vmem:[#allocation2 + $0x38] sm:$0x1] %vm276_vm0, %v12115_v0  ;;  %292 = vst.msk [vmem:[#allocation2 + $0x44] sm:$0x1] %vm276_vm0, %v12115_v0  ;;  %s11051_s23 = sshll.u32 %s16722_s22, 7  ;;  %s12116_s27 = smov 32  }
  0x11   : > { %295 = vst.msk [vmem:[#allocation2 + $0x50] sm:$0x1] %vm276_vm0, %v12115_v0  ;;  %298 = vst.msk [vmem:[#allocation2 + $0x5c] sm:$0x1] %vm276_vm0, %v12115_v0  ;;  %s12331_s26 = scalar_lea.vmem %s16476_s1, %s11051_s23  ;;  %s12369_s30 = scalar_lea.vmem %s16475_s0, %s11051_s23  ;;  %vm693_vm5 = vcmask 253952   ;;  %vm685_vm7 = vcmask 257024  }
  0x12   : > { %301 = vst.msk [vmem:[#allocation2 + $0x68] sm:$0x1] %vm276_vm0, %v12115_v0  ;;  %304 = vst.msk [vmem:[#allocation2 + $0x74] sm:$0x1] %vm276_vm0, %v12115_v0  ;;  %v804_v1 = vld [vmem:[%s12331_s26 + $0x4] sm:$0xf] }
  0x13   : > { %307 = vst.msk [vmem:[#allocation2 + $0x80] sm:$0x1] %vm276_vm0, %v12115_v0  ;;  %310 = vst.msk [vmem:[#allocation2 + $0x8c] sm:$0x1] %vm276_vm0, %v12115_v0  ;;  %v803_v2 = vld [vmem:[%s12331_s26] sm:$0xf] }
  0x14   : > { %313 = vst.msk [vmem:[#allocation2 + $0x98] sm:$0x1] %vm276_vm0, %v12115_v0  ;;  %316 = vst.msk [vmem:[#allocation2 + $0xa4] sm:$0x1] %vm276_vm0, %v12115_v0  ;;  %v805_v3 = vld [vmem:[%s12331_s26 + $0x8] sm:$0xf] }
  0x15   : > { %319 = vst.msk [vmem:[#allocation2 + $0xb0] sm:$0x1] %vm276_vm0, %v12115_v0  ;;  %322 = vst.msk [vmem:[#allocation2 + $0xbc] sm:$0x1] %vm276_vm0, %v12115_v0  ;;  %v844_v4 = vshrl.u32 %v804_v1, 16  ;;  %v847_v5 = vshll.u32 %v804_v1, 16 }
  0x16   : > { %325 = vst.msk [vmem:[#allocation2 + $0xc8] sm:$0x1] %vm276_vm0, %v12115_v0  ;;  %328 = vst.msk [vmem:[#allocation2 + $0xd4] sm:$0x1] %vm276_vm0, %v12115_v0  ;;  %v836_v6 = vshrl.u32 %v803_v2, 16  ;;  %v839_v7 = vshll.u32 %v803_v2, 16 }
  0x17   : > { %5345 = vst [vmem:[#allocation4] sm:$0xf] %v12115_v0  ;;  %5346 = vst [vmem:[#allocation4 + $0x4] sm:$0xf] %v12115_v0  ;;  %v806_v8 = vld [vmem:[%s12331_s26 + $0xc] sm:$0xf] }
  0x18   : > { %5347 = vst [vmem:[#allocation4 + $0x8] sm:$0x1] %v12115_v0  ;;  %5348 = vst [vmem:[#allocation4 + $0xc] sm:$0xf] %v12115_v0  ;;  %v853_v9 = vshrl.u32 %v805_v3, 16  ;;  %v861_v10 = vshrl.u32 %v806_v8, 16 }
  0x19   : > { %5349 = vst [vmem:[#allocation4 + $0x10] sm:$0xf] %v12115_v0  ;;  %5350 = vst [vmem:[#allocation4 + $0x14] sm:$0x1] %v12115_v0  ;;  %v807_v11 = vld [vmem:[%s12331_s26 + $0x10] sm:$0xf] }
  0x1a   : > { %5351 = vst [vmem:[#allocation4 + $0x18] sm:$0xf] %v12115_v0  ;;  %5352 = vst [vmem:[#allocation4 + $0x1c] sm:$0xf] %v12115_v0  ;;  %v846_v12 = vrot.slane %v844_v4, 7  ;;  %v838_v13 = vrot.slane %v836_v6, 7 }
  0x1b   : > { %5353 = vst [vmem:[#allocation4 + $0x20] sm:$0x1] %v12115_v0  ;;  %5354 = vst [vmem:[#allocation4 + $0x24] sm:$0xf] %v12115_v0  ;;  %v856_v14 = vshll.u32 %v805_v3, 16  ;;  %v864_v15 = vshll.u32 %v806_v8, 16 }
  0x1c   : > { %5355 = vst [vmem:[#allocation4 + $0x28] sm:$0xf] %v12115_v0  ;;  %5356 = vst [vmem:[#allocation4 + $0x2c] sm:$0x1] %v12115_v0  ;;  %v808_v16 = vld [vmem:[%s12331_s26 + $0x14] sm:$0xf]  ;;  %v849_v22 = vor.u32 %v847_v5, %v846_v12  ;;  %v841_v23 = vor.u32 %v839_v7, %v838_v13 }
  0x1d   : > { %5357 = vst [vmem:[#allocation4 + $0x30] sm:$0xf] %v12115_v0  ;;  %5358 = vst [vmem:[#allocation4 + $0x34] sm:$0xf] %v12115_v0  ;;  %v855_v17 = vrot.slane %v853_v9, 7  ;;  %v863_v18 = vrot.slane %v861_v10, 7 }
  0x1e   : > { %5359 = vst [vmem:[#allocation4 + $0x38] sm:$0x1] %v12115_v0  ;;  %5360 = vst [vmem:[#allocation4 + $0x3c] sm:$0xf] %v12115_v0  ;;  %v870_v19 = vshrl.u32 %v807_v11, 16  ;;  %v878_v20 = vshrl.u32 %v808_v16, 16  ;;  %1107 = vrot.lane.b32.xlu0 %v841_v23, %s12116_s27 }
  0x1f   : > { %5361 = vst [vmem:[#allocation4 + $0x40] sm:$0xf] %v12115_v0  ;;  %5362 = vst [vmem:[#allocation4 + $0x44] sm:$0x1] %v12115_v0  ;;  %v851_v21 = vrot.slane %v846_v12, 4  ;;  %v842_v24 = vrot.slane %v838_v13, 4  ;;  %v858_v26 = vor.u32 %v856_v14, %v855_v17  ;;  %v866_v31 = vor.u32 %v864_v15, %v863_v18 }
  0x20   : > { %5363 = vst [vmem:[#allocation4 + $0x48] sm:$0xf] %v12115_v0  ;;  %5364 = vst [vmem:[#allocation4 + $0x4c] sm:$0xf] %v12115_v0  ;;  %v859_v27 = vrot.slane %v855_v17, 4  ;;  %v881_v28 = vshll.u32 %v808_v16, 16 }
  0x21   : > { %5365 = vst [vmem:[#allocation4 + $0x50] sm:$0x1] %v12115_v0  ;;  %5366 = vst [vmem:[#allocation4 + $0x54] sm:$0xf] %v12115_v0  ;;  %1111 = vrot.lane.b32.xlu1 %v851_v21, %s12116_s27  ;;  %v810_v29 = vld [vmem:[%s12331_s26 + $0x1c] sm:$0xf] }
  0x22   : > { %5367 = vst [vmem:[#allocation4 + $0x58] sm:$0xf] %v12115_v0  ;;  %5368 = vst [vmem:[#allocation4 + $0x5c] sm:$0x1] %v12115_v0  ;;  %v872_v32 = vrot.slane %v870_v19, 7  ;;  %v880_v33 = vrot.slane %v878_v20, 7 }
  0x23   : > { %5369 = vst [vmem:[#allocation4 + $0x60] sm:$0xf] %v12115_v0  ;;  %5370 = vst [vmem:[#allocation4 + $0x64] sm:$0xf] %v12115_v0  ;;  %v809_v34 = vld [vmem:[%s12331_s26 + $0x18] sm:$0xf] }
  0x24   : > { %5371 = vst [vmem:[#allocation4 + $0x68] sm:$0x1] %v12115_v0  ;;  %5372 = vst [vmem:[#allocation4 + $0x6c] sm:$0xf] %v12115_v0  ;;  %v895_v35 = vshrl.u32 %v810_v29, 16  ;;  %v868_v36 = vrot.slane %v863_v18, 4  ;;  %v883_v42 = vor.u32 %v881_v28, %v880_v33 }
  0x25   : > { %5373 = vst [vmem:[#allocation4 + $0x70] sm:$0xf] %v12115_v0  ;;  %5374 = vst [vmem:[#allocation4 + $0x74] sm:$0x1] %v12115_v0  ;;  %1113 = vrot.lane.b32.xlu1 %v858_v26, %s12116_s27  ;;  %v873_v37 = vshll.u32 %v807_v11, 16  ;;  %v887_v38 = vshrl.u32 %v809_v34, 16 }
  0x26   : > { %5375 = vst [vmem:[#allocation4 + $0x78] sm:$0xf] %v12115_v0  ;;  %5376 = vst [vmem:[#allocation4 + $0x7c] sm:$0xf] %v12115_v0  ;;  %v811_v39 = vld [vmem:[%s12331_s26 + $0x20] sm:$0xf] }
  0x27   : > { %5377 = vst [vmem:[#allocation4 + $0x80] sm:$0x1] %v12115_v0  ;;  %5378 = vst [vmem:[#allocation4 + $0x84] sm:$0xf] %v12115_v0  ;;  %v876_v41 = vrot.slane %v872_v32, 4  ;;  %v890_v45 = vshll.u32 %v809_v34, 16  ;;  %v875_v50 = vor.u32 %v873_v37, %v872_v32 }
  0x28   : > { %5379 = vst [vmem:[#allocation4 + $0x88] sm:$0xf] %v12115_v0  ;;  %5380 = vst [vmem:[#allocation4 + $0x8c] sm:$0x1] %v12115_v0  ;;  %v812_v43 = vld [vmem:[%s12331_s26 + $0x24] sm:$0xf] }
  0x29   : > { %5381 = vst [vmem:[#allocation4 + $0x90] sm:$0xf] %v12115_v0  ;;  %5382 = vst [vmem:[#allocation4 + $0x94] sm:$0xf] %v12115_v0  ;;  %v813_v44 = vld [vmem:[%s12331_s26 + $0x28] sm:$0xf]  ;;  %1117 = vrot.lane.b32.xlu1 %v868_v36, %s12116_s27 }
  0x2a   : > { %5383 = vst [vmem:[#allocation4 + $0x98] sm:$0x1] %v12115_v0  ;;  %5384 = vst [vmem:[#allocation4 + $0x9c] sm:$0xf] %v12115_v0  ;;  %v897_v46 = vrot.slane %v895_v35, 7  ;;  %v898_v47 = vshll.u32 %v810_v29, 16 }
  0x2b   : > { %5385 = vst [vmem:[#allocation4 + $0xa0] sm:$0xf] %v12115_v0  ;;  %5386 = vst [vmem:[#allocation4 + $0xa4] sm:$0x1] %v12115_v0  ;;  %v904_v48 = vshrl.u32 %v811_v39, 16  ;;  %v889_v51 = vrot.slane %v887_v38, 7 }
  0x2c   : > { %5387 = vst [vmem:[#allocation4 + $0xa8] sm:$0xf] %v12115_v0  ;;  %5388 = vst [vmem:[#allocation4 + $0xac] sm:$0xf] %v12115_v0  ;;  %v814_v49 = vld [vmem:[%s12331_s26 + $0x2c] sm:$0xf]  ;;  %v900_v59 = vor.u32 %v898_v47, %v897_v46 }
  0x2d   : > { %5389 = vst [vmem:[#allocation4 + $0xb0] sm:$0x1] %v12115_v0  ;;  %5390 = vst [vmem:[#allocation4 + $0xb4] sm:$0xf] %v12115_v0  ;;  %v912_v52 = vshrl.u32 %v812_v43, 16  ;;  %v921_v53 = vshrl.u32 %v813_v44, 16  ;;  %v892_v63 = vor.u32 %v890_v45, %v889_v51 }
  0x2e   : > { %5391 = vst [vmem:[#allocation4 + $0xb8] sm:$0xf] %v12115_v0  ;;  %5392 = vst [vmem:[#allocation4 + $0xbc] sm:$0x1] %v12115_v0  ;;  %v885_v55 = vrot.slane %v880_v33, 4  ;;  %v929_v56 = vshrl.u32 %v814_v49, 16 }
  0x2f   : > { %5393 = vst [vmem:[#allocation4 + $0xc0] sm:$0xf] %v12115_v0  ;;  %5394 = vst [vmem:[#allocation4 + $0xc4] sm:$0xf] %v12115_v0  ;;  %v815_v57 = vld [vmem:[%s12331_s26 + $0x30] sm:$0xf] }
  0x30   : > { %5395 = vst [vmem:[#allocation4 + $0xc8] sm:$0x1] %v12115_v0  ;;  %5396 = vst [vmem:[#allocation4 + $0xcc] sm:$0xf] %v12115_v0  ;;  %v893_v58 = vrot.slane %v889_v51, 4  ;;  %v906_v60 = vrot.slane %v904_v48, 7 }
  0x31   : > { %5397 = vst [vmem:[#allocation4 + $0xd0] sm:$0xf] %v12115_v0  ;;  %5398 = vst [vmem:[#allocation4 + $0xd4] sm:$0x1] %v12115_v0  ;;  %v907_v61 = vshll.u32 %v811_v39, 16  ;;  %v915_v1 = vshll.u32 %v812_v43, 16 }
  0x32   : > { %278 = vst.msk [vmem:[#allocation2 + $0xc] sm:$0xf] %vm273_vm1, %v12115_v0  ;;  %274 = vst.msk [vmem:[#allocation2] sm:$0xf] %vm273_vm1, %v12115_v0  ;;  %v816_v62 = vld [vmem:[%s12331_s26 + $0x34] sm:$0xf] }
  0x33   : > { %275 = vst.msk [vmem:[#allocation2 + $0x4] sm:$0xf] %vm273_vm1, %v12115_v0  ;;  %279 = vst.msk [vmem:[#allocation2 + $0x10] sm:$0xf] %vm273_vm1, %v12115_v0  ;;  %v923_v2 = vrot.slane %v921_v53, 7  ;;  %v938_v3 = vshrl.u32 %v815_v57, 16  ;;  %v909_v11 = vor.u32 %v907_v61, %v906_v60 }
  0x34   : > { %281 = vst.msk [vmem:[#allocation2 + $0x18] sm:$0xf] %vm273_vm1, %v12115_v0  ;;  %282 = vst.msk [vmem:[#allocation2 + $0x1c] sm:$0xf] %vm273_vm1, %v12115_v0  ;;  %v817_v4 = vld [vmem:[%s12331_s26 + $0x38] sm:$0xf] }
  0x35   : > { %284 = vst.msk [vmem:[#allocation2 + $0x24] sm:$0xf] %vm273_vm1, %v12115_v0  ;;  %285 = vst.msk [vmem:[#allocation2 + $0x28] sm:$0xf] %vm273_vm1, %v12115_v0  ;;  %vm686_vm6 = vsmask.f32 7938 }
  0x36   : > { %287 = vst.msk [vmem:[#allocation2 + $0x30] sm:$0xf] %vm273_vm1, %v12115_v0  ;;  %288 = vst.msk [vmem:[#allocation2 + $0x34] sm:$0xf] %vm273_vm1, %v12115_v0  ;;  %v12377_v5 = vrot.slane %v929_v56, 7  ;;  %v932_v6 = vshll.u32 %v814_v49, 16 }
  0x37   : > { %290 = vst.msk [vmem:[#allocation2 + $0x3c] sm:$0xf] %vm273_vm1, %v12115_v0  ;;  %291 = vst.msk [vmem:[#allocation2 + $0x40] sm:$0xf] %vm273_vm1, %v12115_v0  ;;  %v946_v7 = vshrl.u32 %v816_v62, 16  ;;  %v902_v10 = vrot.slane %v897_v46, 4 }
  0x38   : > { %293 = vst.msk [vmem:[#allocation2 + $0x48] sm:$0xf] %vm273_vm1, %v12115_v0  ;;  %294 = vst.msk [vmem:[#allocation2 + $0x4c] sm:$0xf] %vm273_vm1, %v12115_v0  ;;  %v12380_v8 = vld [vmem:[%s12369_s30 + $0x4] sm:$0xf]  ;;  %v934_v23 = vor.u32 %v932_v6, %v12377_v5 }
  0x39   : > { %296 = vst.msk [vmem:[#allocation2 + $0x54] sm:$0xf] %vm273_vm1, %v12115_v0  ;;  %297 = vst.msk [vmem:[#allocation2 + $0x58] sm:$0xf] %vm273_vm1, %v12115_v0  ;;  %v924_v12 = vshll.u32 %v813_v44, 16  ;;  %v910_v14 = vrot.slane %v906_v60, 4 }
  0x3a   : > { %299 = vst.msk [vmem:[#allocation2 + $0x60] sm:$0xf] %vm273_vm1, %v12115_v0  ;;  %300 = vst.msk [vmem:[#allocation2 + $0x64] sm:$0xf] %vm273_vm1, %v12115_v0  ;;  %v329_v13 = vld [vmem:[%s12369_s30] sm:$0xf] }
  0x3b   : > { %302 = vst.msk [vmem:[#allocation2 + $0x6c] sm:$0xf] %vm273_vm1, %v12115_v0  ;;  %303 = vst.msk [vmem:[#allocation2 + $0x70] sm:$0xf] %vm273_vm1, %v12115_v0  ;;  %v927_v16 = vrot.slane %v923_v2, 4  ;;  %v955_v17 = vshrl.u32 %v817_v4, 16 }
  0x3c   : > { %305 = vst.msk [vmem:[#allocation2 + $0x78] sm:$0xf] %vm273_vm1, %v12115_v0  ;;  %306 = vst.msk [vmem:[#allocation2 + $0x7c] sm:$0xf] %vm273_vm1, %v12115_v0  ;;  %v818_v18 = vld [vmem:[%s12331_s26 + $0x3c] sm:$0xf] }
  0x3d   : > { %308 = vst.msk [vmem:[#allocation2 + $0x84] sm:$0xf] %vm273_vm1, %v12115_v0  ;;  %309 = vst.msk [vmem:[#allocation2 + $0x88] sm:$0xf] %vm273_vm1, %v12115_v0  ;;  %v940_v19 = vrot.slane %v938_v3, 7  ;;  %v941_v20 = vshll.u32 %v815_v57, 16 }
  0x3e   : > { %311 = vst.msk [vmem:[#allocation2 + $0x90] sm:$0xf] %vm273_vm1, %v12115_v0  ;;  %312 = vst.msk [vmem:[#allocation2 + $0x94] sm:$0xf] %vm273_vm1, %v12115_v0  ;;  %v949_v21 = vshll.u32 %v816_v62, 16  ;;  %v368_v28 = vshll.u32 %v329_v13, 16 }
  0x3f   : > { %314 = vst.msk [vmem:[#allocation2 + $0x9c] sm:$0xf] %vm273_vm1, %v12115_v0  ;;  %315 = vst.msk [vmem:[#allocation2 + $0xa0] sm:$0xf] %vm273_vm1, %v12115_v0  ;;  %v12394_v26 = vld [vmem:[%s12331_s26 + $0x40] sm:$0xf] }
  0x40   : > { %317 = vst.msk [vmem:[#allocation2 + $0xa8] sm:$0xf] %vm273_vm1, %v12115_v0  ;;  %318 = vst.msk [vmem:[#allocation2 + $0xac] sm:$0xf] %vm273_vm1, %v12115_v0  ;;  %v695_v32 = vld [vmem:[#allocation2 + $0x14] sm:$0x1] }
  0x41   : > { %320 = vst.msk [vmem:[#allocation2 + $0xb4] sm:$0xf] %vm273_vm1, %v12115_v0  ;;  %321 = vst.msk [vmem:[#allocation2 + $0xb8] sm:$0xf] %vm273_vm1, %v12115_v0  ;;  %v12401_v35 = vrot.slane %v955_v17, 7  ;;  %v958_v36 = vshll.u32 %v817_v4, 16 }
  0x42   : > { %323 = vst.msk [vmem:[#allocation2 + $0xc0] sm:$0xf] %vm273_vm1, %v12115_v0  ;;  %324 = vst.msk [vmem:[#allocation2 + $0xc4] sm:$0xf] %vm273_vm1, %v12115_v0  ;;  %v16526_v37 = vmov 0  ;;  %v972_v48 = vshrl.u32 %v12394_v26, 16 }
  0x43   : > { %326 = vst.msk [vmem:[#allocation2 + $0xcc] sm:$0xf] %vm273_vm1, %v12115_v0  ;;  %327 = vst.msk [vmem:[#allocation2 + $0xd0] sm:$0xf] %vm273_vm1, %v12115_v0  ;;  %v12374_v0 = vrot.slane %v912_v52, 7  ;;  %v966_v53 = vshll.u32 %v818_v18, 16 }
  0x44   : > { %vm12341_vm4 = vmor %vm361_vm2, %vm362_vm3  ;;  %v688_v38 = vld [vmem:[#allocation2 + $0xc] sm:$0xf]  ;;  %v331_v45 = vld [vmem:[%s12369_s30 + $0x8] sm:$0xf]  ;;  %v975_v56 = vshll.u32 %v12394_v26, 16  ;;  %v961_v3 = vrot.slane %v12401_v35, 4 }
  0x45   : > { %v16524_v25 = vsel %vm12341_vm4, 4294967295, %v16523_v25  ;;  %v850_v30 = vsel %vm12341_vm4, %v842_v24, %v849_v22  ;;  %v867_v40 = vsel %vm12341_vm4, %v859_v27, %v866_v31  ;;  %v884_v54 = vsel %vm12341_vm4, %v876_v41, %v883_v42  ;;  %vm12405_vm8 = vmand %vm693_vm5, %vm361_vm2  ;;  %v12424_v49 = vld [vmem:[%s12331_s26 + $0x44] sm:$0xf]  ;;  %s12117_s7 = smov 64   ;;  %s11053_s17 = sshll.u32 %s16722_s22, 8 }
  0x46   : > { %16525 = vst [vmem:[#allocation6_spill] sm:$0xff] %v16524_v25  ;;  %1109 = vrot.lane.b32.xlu0 %v850_v30, %s12116_s27  ;;  %1121 = vrot.lane.b32.xlu1 %v884_v54, %s12116_s27  ;;  %v901_v9 = vsel %vm12341_vm4, %v893_v58, %v900_v59  ;;  %v917_v15 = vor.u32 %v915_v1, %v12374_v0  ;;  %v373_v22 = vshrl.u32 %v12380_v8, 16  ;;  %v12391_v24 = vrot.slane %v946_v7, 7  ;;  %vm12414_vm9 = vmand %vm685_vm7, %vm686_vm6  ;;  %v1513_v58 = vld [vmem:[#allocation2] sm:$0xf]  ;;  %s16347_s23 = scalar_lea.vmem %s16481_s6, %s11053_s17 }
  0x47   : > { %v365_v27 = vshrl.u32 %v329_v13, 16  ;;  %v919_v29 = vrot.slane %v12374_v0, 4  ;;  %v926_v30 = vor.u32 %v924_v12, %v923_v2  ;;  %v963_v31 = vshrl.u32 %v818_v18, 16  ;;  %v1514_v59 = vld [vmem:[#allocation2 + $0x4] sm:$0xf] }
  0x48   : > { %v375_v33 = vrot.slane %v373_v22, 7  ;;  %v918_v34 = vsel %vm12341_vm4, %v910_v14, %v917_v15  ;;  %v16527_v37 = vsel %vm12405_vm8, 4294967295, %v16526_v37  ;;  %v12410_v41 = vor.u32 %v941_v20, %v940_v19  ;;  %v332_v1 = vld [vmem:[%s12369_s30 + $0xc] sm:$0xf] }
  0x49   : > { %16528 = vst [vmem:[#allocation7_spill] sm:$0xff] %v16527_v37  ;;  %v367_v39 = vrot.slane %v365_v27, 7  ;;  %v944_v42 = vrot.slane %v940_v19, 4  ;;  %v935_v46 = vsel %vm12341_vm4, %v927_v16, %v934_v23  ;;  %v951_v47 = vor.u32 %v949_v21, %v12391_v24  ;;  %v12454_v19 = vld [vmem:[%s12331_s26 + $0x48] sm:$0xf] }
  0x4a   : > { %1115 = vrot.lane.b32.xlu0 %v867_v40, %s12116_s27  ;;  %1125 = vrot.lane.b32.xlu1 %v892_v63, %s12116_s27  ;;  %v936_v40 = vrot.slane %v12377_v5, 4  ;;  %v380_v43 = vrot.slane %v375_v33, 4  ;;  %v953_v51 = vrot.slane %v12391_v24, 4  ;;  %v12427_v52 = vrot.slane %v963_v31, 7  ;;  %v335_v5 = vld [vmem:[%s12369_s30 + $0x18] sm:$0xf] }
  0x4b   : > { %v382_v60 = vshrl.u32 %v331_v45, 16  ;;  %v980_v61 = vshrl.u32 %v12424_v49, 16  ;;  %v385_v62 = vshll.u32 %v331_v45, 16  ;;  %v371_v63 = vrot.slane %v367_v39, 4 }
  0x4c   : > { %v696_v54 = vsel %vm12405_vm8, %v380_v43, %v695_v32  ;;  %v376_v0 = vshll.u32 %v12380_v8, 16  ;;  %v952_v2 = vsel %vm12341_vm4, %v944_v42, %v951_v47  ;;  %v12445_v4 = vrot.slane %v972_v48, 7  ;;  %v1515_v8 = vld [vmem:[#allocation2 + $0x8] sm:$0x1]  ;;  %v334_v42 = vld [vmem:[%s12369_s30 + $0x14] sm:$0xf] }
  0x4d   : > { %697 = vst [vmem:[#allocation2 + $0x14] sm:$0x1] %v696_v54  ;;  %v384_v6 = vrot.slane %v382_v60, 7  ;;  %v968_v7 = vor.u32 %v966_v53, %v12427_v52  ;;  %v1574_v13 = vshll.u32 %v1514_v59, 16  ;;  %v1578_v14 = vshrl.u32 %v1514_v59, 16 }
  0x4e   : > { %1119 = vrot.lane.b32.xlu0 %v875_v50, %s12116_s27  ;;  %1129 = vrot.lane.b32.xlu1 %v902_v10, %s12116_s27  ;;  %v370_v50 = vor.u32 %v368_v28, %v367_v39  ;;  %v1568_v10 = vshll.u32 %v1513_v58, 16  ;;  %v378_v12 = vor.u32 %v376_v0, %v375_v33  ;;  %v390_v16 = vshrl.u32 %v332_v1, 16  ;;  %v336_v59 = vld [vmem:[%s12369_s30 + $0x1c] sm:$0xf]  ;;  %v705_v0 = vld [vmem:[#allocation2 + $0x24] sm:$0xf] }
  0x4f   : > { %v387_v15 = vor.u32 %v385_v62, %v384_v6  ;;  %v12450_v17 = vrot.slane %v980_v61, 7  ;;  %v983_v18 = vshll.u32 %v12424_v49, 16  ;;  %v393_v21 = vshll.u32 %v332_v1, 16  ;;  %v12495_v62 = vld [vmem:[%s12331_s26 + $0x4c] sm:$0xf] }
  0x50   : > { %v689_v57 = vsel %vm12414_vm9, %v370_v50, %v688_v38  ;;  %v379_v20 = vsel %vm12341_vm4, %v371_v63, %v378_v12  ;;  %v970_v22 = vrot.slane %v12427_v52, 4  ;;  %v388_v27 = vrot.slane %v384_v6, 4  ;;  %v12498_v63 = vld [vmem:[%s12331_s26 + $0x50] sm:$0xf]  ;;  %v12501_v6 = vld [vmem:[%s12331_s26 + $0x54] sm:$0xf] }
  0x51   : > { %690 = vst [vmem:[#allocation2 + $0xc] sm:$0xf] %v689_v57  ;;  %692 = vst.msk [vmem:[#allocation2 + $0x10] sm:$0xf] %vm685_vm7, %v379_v20  ;;  %v392_v28 = vrot.slane %v390_v16, 7  ;;  %v1570_v32 = vrot.slane %v1568_v10, 5  ;;  %v12473_v43 = vsel %vm12341_vm4, %v961_v3, %v968_v7  ;;  %v12476_v45 = vor.u32 %v983_v18, %v12450_v17 }
  0x52   : > { %1123 = vrot.lane.b32.xlu0 %v885_v55, %s12116_s27  ;;  %1133 = vrot.lane.b32.xlu1 %v918_v34, %s12116_s27  ;;  %v12434_v55 = vor.u32 %v958_v36, %v12401_v35  ;;  %v1584_v33 = vshll.u32 %v1515_v8, 16  ;;  %v702_v34 = vld [vmem:[#allocation2 + $0x20] sm:$0x1]  ;;  %vm1561_vm10 = vsmask.f32 3328  ;;  %v12468_v35 = vrot.slane %v1574_v13, 5 }
  0x53   : > { %vm1562_vm11 = vsmask.f32 7440  ;;  %v1580_v36 = vrot.slane %v1578_v14, 4  ;;  %v395_v38 = vor.u32 %v393_v21, %v392_v28  ;;  %v397_v39 = vrot.slane %v392_v28, 4  ;;  %v716_v20 = vld [vmem:[#allocation2 + $0x38] sm:$0x1] }
  0x54   : > { %v989_v48 = vshrl.u32 %v12454_v19, 16  ;;  %v12485_v54 = vrot.slane %v1584_v33, 5  ;;  %v992_v61 = vshll.u32 %v12454_v19, 16  ;;  %v410_v1 = vshll.u32 %v334_v42, 16  ;;  %vm12533_vm12 = vmor %vm1561_vm10, %vm1562_vm11 }
  0x55   : > { %v396_v49 = vsel %vm12341_vm4, %v388_v27, %v395_v38  ;;  %v703_v50 = vsel %vm12405_vm8, %v397_v39, %v702_v34  ;;  %v1581_v60 = vor.u32 %v1580_v36, %v12468_v35  ;;  %v416_v3 = vshrl.u32 %v335_v5, 16 }
  0x56   : > { %1127 = vrot.lane.b32.xlu0 %v901_v9, %s12116_s27  ;;  %v1565_v9 = vshrl.u32 %v1513_v58, 16  ;;  %1137 = vrot.lane.b32.xlu1 %v926_v30, %s12116_s27  ;;  %v978_v30 = vrot.slane %v12445_v4, 4  ;;  %701 = vst.msk [vmem:[#allocation2 + $0x1c] sm:$0xf] %vm685_vm7, %v396_v49  ;;  %704 = vst [vmem:[#allocation2 + $0x20] sm:$0x1] %v703_v50  ;;  %v977_v39 = vor.u32 %v975_v56, %v12445_v4 }
  0x57   : > { %v407_v58 = vshrl.u32 %v334_v42, 16  ;;  %v12503_v12 = vrot.slane %v989_v48, 7  ;;  %v418_v8 = vrot.slane %v416_v3, 7  ;;  %v424_v13 = vshrl.u32 %v336_v59, 16 }
  0x58   : > { %v1567_v31 = vrot.slane %v1565_v9, 4  ;;  %v427_v14 = vshll.u32 %v336_v59, 16  ;;  %v12514_v21 = vrot.slane %v1581_v60, 4  ;;  %v986_v50 = vsel %vm12341_vm4, %v978_v30, %v12476_v45 }
  0x59   : > { %v409_v10 = vrot.slane %v407_v58, 7  ;;  %v422_v27 = vrot.slane %v418_v8, 4  ;;  %v426_v28 = vrot.slane %v424_v13, 7  ;;  %v1000_v52 = vshll.u32 %v12495_v62, 16  ;;  %v340_v58 = vld [vmem:[%s12369_s30 + $0x2c] sm:$0xf] }
  0x5a   : > { %1131 = vrot.lane.b32.xlu0 %v909_v11, %s12116_s27  ;;  %v698_v11 = vld [vmem:[#allocation2 + $0x18] sm:$0xf]  ;;  %1141 = vrot.lane.b32.xlu1 %v936_v40, %s12116_s27  ;;  %v987_v40 = vrot.slane %v12450_v17, 4  ;;  %v1571_v53 = vor.u32 %v1570_v32, %v1567_v31  ;;  %v997_v31 = vshrl.u32 %v12495_v62, 16  ;;  %v1006_v32 = vshrl.u32 %v12498_v63, 16 }
  0x5b   : > { %v699_v23 = vsel %vm12414_vm9, %v387_v15, %v698_v11  ;;  %v709_v11 = vld [vmem:[#allocation2 + $0x2c] sm:$0x1]  ;;  %v412_v18 = vor.u32 %v410_v1, %v409_v10  ;;  %v414_v19 = vrot.slane %v409_v10, 4  ;;  %v429_v36 = vor.u32 %v427_v14, %v426_v28  ;;  %v723_v62 = vld [vmem:[#allocation2 + $0x44] sm:$0x1] }
  0x5c   : > { %700 = vst [vmem:[#allocation2 + $0x18] sm:$0xf] %v699_v23  ;;  %v12505_v15 = vrot.slane %v1571_v53, 4  ;;  %v431_v38 = vrot.slane %v426_v28, 4  ;;  %v1587_v4 = vsel %vm12533_vm12, %v12514_v21, %v12485_v54  ;;  %v999_v30 = vrot.slane %v997_v31, 7 }
  0x5d   : > { %v710_v24 = vsel %vm12405_vm8, %v414_v19, %v709_v11  ;;  %v430_v26 = vsel %vm12341_vm4, %v422_v27, %v429_v36  ;;  %v1017_v59 = vshll.u32 %v12501_v6, 16  ;;  %v995_v11 = vrot.slane %v12503_v12, 4  ;;  %v341_v13 = vld [vmem:[%s12369_s30 + $0x30] sm:$0xf] }
  0x5e   : > { %1135 = vrot.lane.b32.xlu0 %v919_v29, %s12116_s27  ;;  %v333_v29 = vld [vmem:[%s12369_s30 + $0x10] sm:$0xf]  ;;  %1145 = vrot.lane.b32.xlu1 %v952_v2, %s12116_s27  ;;  %711 = vst [vmem:[#allocation2 + $0x2c] sm:$0x1] %v710_v24  ;;  %v717_v56 = vsel %vm12405_vm8, %v431_v38, %v716_v20  ;;  %715 = vst.msk [vmem:[#allocation2 + $0x34] sm:$0xf] %vm685_vm7, %v430_v26 }
  0x5f   : > { %v402_v47 = vshll.u32 %v333_v29, 16  ;;  %v712_v2 = vld [vmem:[#allocation2 + $0x30] sm:$0xf]  ;;  %718 = vst [vmem:[#allocation2 + $0x38] sm:$0x1] %v717_v56  ;;  %v1004_v14 = vrot.slane %v999_v30, 4 }
  0x60   : > { %v461_v20 = vshll.u32 %v340_v58, 16  ;;  %v730_v21 = vld [vmem:[#allocation2 + $0x50] sm:$0x1]  ;;  %v737_v56 = vld [vmem:[#allocation2 + $0x5c] sm:$0x1]  ;;  %vm2157_vm13 = vcmask 1042432  }
  0x61   : > { %vm2158_vm14 = vcmask 1046532   ;;  %vm1496_vm15 = vcmask 523264   ;;  %vm1258_vm1 = vcmask 516352   ;;  %vm1251_vm3 = vcmask 519424  }
  0x62   : > { %1139 = vrot.lane.b32.xlu0 %v935_v46, %s12116_s27  ;;  %v399_v46 = vshrl.u32 %v333_v29, 16  ;;  %1149 = vrot.lane.b32.xlu1 %v12434_v55, %s12116_s27  ;;  %v337_v29 = vld [vmem:[%s12369_s30 + $0x20] sm:$0xf]  ;;  %v1014_v55 = vshrl.u32 %v12501_v6, 16  ;;  %v458_v6 = vshrl.u32 %v340_v58, 16  ;;  %vm12675_vm0 = vmor %vm2157_vm13, %vm2158_vm14  ;;  %vm2044_vm11 = vcmask 1048064  }
  0x63   : > { %v11909_v58 = vld [vmem:[%s16477_s2 + $0x40] sm:$0xff]   ;;  %vm12702_vm5 = vmand %vm1258_vm1, %vm361_vm2 }
  0x64   : > { %v401_v57 = vrot.slane %v399_v46, 7  ;;  %v433_v46 = vshrl.u32 %v337_v29, 16  ;;  %v12567_v1 = vrot.slane %v1014_v55, 7  ;;  %11086 = vmatprep.subr.bf16.mxu0 %v11909_v58  ;;  %v761_v58 = vld [vmem:[#allocation2 + $0x84] sm:$0xf]  ;;  %vm12708_vm10 = vmand %vm1251_vm3, %vm686_vm6 }
  0x66   : > { %1143 = vrot.lane.b32.xlu0 %v12410_v41, %s12116_s27  ;;  %v404_v7 = vor.u32 %v402_v47, %v401_v57  ;;  %v405_v9 = vrot.slane %v401_v57, 4  ;;  %v419_v41 = vshll.u32 %v335_v5, 16  ;;  %v436_v47 = vshll.u32 %v337_v29, 16  ;;  %v339_v5 = vld [vmem:[%s12369_s30 + $0x28] sm:$0xf]  ;;  %1153 = vrot.lane.b32.xlu1 %v970_v22, %s12116_s27 }
  0x67   : > { %v719_v22 = vld [vmem:[#allocation2 + $0x3c] sm:$0xf]  ;;  %v435_v53 = vrot.slane %v433_v46, 7  ;;  %v1577_v57 = vsel %vm12533_vm12, %v12505_v15, %v12468_v35  ;;  %v1008_v35 = vrot.slane %v1006_v32, 7  ;;  %v453_v10 = vshll.u32 %v339_v5, 16 }
  0x68   : > { %v706_v16 = vsel %vm12414_vm9, %v404_v7, %v705_v0  ;;  %v421_v23 = vor.u32 %v419_v41, %v418_v8  ;;  %v413_v33 = vsel %vm12341_vm4, %v405_v9, %v412_v18  ;;  %v450_v0 = vshrl.u32 %v339_v5, 16  ;;  %v726_v8 = vld [vmem:[#allocation2 + $0x48] sm:$0xf]  ;;  %v343_v5 = vld [vmem:[%s12369_s30 + $0x38] sm:$0xf] }
  0x69   : > { %707 = vst [vmem:[#allocation2 + $0x24] sm:$0xf] %v706_v16  ;;  %708 = vst.msk [vmem:[#allocation2 + $0x28] sm:$0xf] %vm685_vm7, %v413_v33  ;;  %v438_v60 = vor.u32 %v436_v47, %v435_v53  ;;  %v460_v16 = vrot.slane %v458_v6, 7  ;;  %v1002_v18 = vor.u32 %v1000_v52, %v999_v30  ;;  %v1012_v27 = vrot.slane %v1008_v35, 4 }
  0x6a   : > { %1147 = vrot.lane.b32.xlu0 %v953_v51, %s12116_s27  ;;  %v338_v51 = vld [vmem:[%s12369_s30 + $0x24] sm:$0xf]  ;;  %v713_v34 = vsel %vm12414_vm9, %v421_v23, %v712_v2  ;;  %1157 = vrot.lane.b32.xlu1 %v986_v50, %s12116_s27  ;;  %v452_v9 = vrot.slane %v450_v0, 7  ;;  %v342_v23 = vld [vmem:[%s12369_s30 + $0x34] sm:$0xf]  ;;  %v1019_v28 = vor.u32 %v1017_v59, %v12567_v1  ;;  %v467_v33 = vshrl.u32 %v341_v13, 16 }
  0x6b   : > { %714 = vst [vmem:[#allocation2 + $0x30] sm:$0xf] %v713_v34  ;;  %v441_v48 = vshrl.u32 %v338_v51, 16  ;;  %v444_v49 = vshll.u32 %v338_v51, 16  ;;  %v720_v54 = vsel %vm12414_vm9, %v438_v60, %v719_v22  ;;  %v465_v31 = vrot.slane %v460_v16, 4  ;;  %v11912_v6 = vld [vmem:[%s16477_s2 + $0x8] sm:$0xff]  }
  0x6c   : > { %721 = vst [vmem:[#allocation2 + $0x3c] sm:$0xf] %v720_v54  ;;  %v455_v15 = vor.u32 %v453_v10, %v452_v9  ;;  %v456_v19 = vrot.slane %v452_v9, 4  ;;  %v463_v32 = vor.u32 %v461_v20, %v460_v16  ;;  %v475_v24 = vshrl.u32 %v342_v23, 16  ;;  %v344_v50 = vld [vmem:[%s12369_s30 + $0x3c] sm:$0xf] }
  0x6d   : > { %v443_v45 = vrot.slane %v441_v48, 7  ;;  %v731_v17 = vsel %vm12405_vm8, %v465_v31, %v730_v21  ;;  %v1009_v51 = vshll.u32 %v12498_v63, 16  ;;  %v469_v34 = vrot.slane %v467_v33, 7  ;;  %v740_v59 = vld [vmem:[#allocation2 + $0x60] sm:$0xf]  ;;  %v11911_v54 = vld [vmem:[%s16477_s2 + $0x48] sm:$0xff]  }
  0x6e   : > { %1151 = vrot.lane.b32.xlu0 %v12473_v43, %s12116_s27  ;;  %v994_v43 = vor.u32 %v992_v61, %v12503_v12  ;;  %v439_v61 = vrot.slane %v435_v53, 4  ;;  %v10525_v12 = vcombine.low %v1577_v57, %v1587_v4  ;;  %v727_v29 = vsel %vm12414_vm9, %v455_v15, %v726_v8  ;;  %732 = vst [vmem:[#allocation2 + $0x50] sm:$0x1] %v731_v17  ;;  %v744_v9 = vld [vmem:[#allocation2 + $0x68] sm:$0x1]  ;;  %v11914_v8 = vld [vmem:[#allocation2] sm:$0xff]  }
  0x6f   : > { %v446_v3 = vor.u32 %v444_v49, %v443_v45  ;;  %v448_v7 = vrot.slane %v443_v45, 4  ;;  %728 = vst [vmem:[#allocation2 + $0x48] sm:$0xf] %v727_v29  ;;  %v464_v55 = vsel %vm12341_vm4, %v456_v19, %v463_v32  ;;  %v1003_v36 = vsel %vm12341_vm4, %v995_v11, %v1002_v18  ;;  %v346_v10 = vld [vmem:[%s12369_s30 + $0x44] sm:$0xf]  ;;  %1497 = vst.msk [vmem:[#allocation3] sm:$0xff] %vm1496_vm15, %v11914_v8 }
  0x70   : > { %1161 = vrot.lane.b32.xlu1 %v994_v43, %s12116_s27  ;;  %v1020_v38 = vsel %vm12341_vm4, %v1012_v27, %v1019_v28  ;;  %729 = vst.msk [vmem:[#allocation2 + $0x4c] sm:$0xf] %vm685_vm7, %v464_v55  ;;  %v477_v46 = vrot.slane %v475_v24, 7  ;;  %v478_v47 = vshll.u32 %v342_v23, 16  ;;  %v473_v63 = vrot.slane %v469_v34, 4  ;;  %v11915_v27 = vld [vmem:[%s16477_s2 + $0x10] sm:$0xff]  }
  0x71   : > { %v447_v41 = vsel %vm12341_vm4, %v439_v61, %v446_v3  ;;  %v724_v2 = vsel %vm12405_vm8, %v448_v7, %v723_v62  ;;  %v1011_v43 = vor.u32 %v1009_v51, %v1008_v35  ;;  %v484_v22 = vshrl.u32 %v343_v5, 16  ;;  %v11910_v61 = vld [vmem:[%s16477_s2] sm:$0xff]   ;;  %v347_v19 = vld [vmem:[%s12369_s30 + $0x48] sm:$0xf]  ;;  %v751_v23 = vld [vmem:[#allocation2 + $0x74] sm:$0x1] }
  0x72   : > { %1155 = vrot.lane.b32.xlu0 %v977_v39, %s12116_s27  ;;  %722 = vst.msk [vmem:[#allocation2 + $0x40] sm:$0xf] %vm685_vm7, %v447_v41  ;;  %725 = vst [vmem:[#allocation2 + $0x44] sm:$0x1] %v724_v2  ;;  %v733_v39 = vld [vmem:[#allocation2 + $0x54] sm:$0xf]  ;;  %v480_v48 = vor.u32 %v478_v47, %v477_v46  ;;  %11087 = vmatpush3.bf16.msra.mxu0 %v11910_v61 }
  0x73   : > { %v482_v49 = vrot.slane %v477_v46, 4  ;;  %v487_v53 = vshll.u32 %v343_v5, 16  ;;  %v486_v30 = vrot.slane %v484_v22, 7  ;;  %v492_v45 = vshrl.u32 %v344_v50, 16  ;;  %v345_v7 = vld [vmem:[%s12369_s30 + $0x40] sm:$0xf]  ;;  %11088 = vmatprep.subr.bf16.mxu0 %v11911_v54 }
  0x74   : > { %1165 = vrot.lane.b32.xlu1 %v1004_v14, %s12116_s27  ;;  %v481_v57 = vsel %vm12341_vm4, %v473_v63, %v480_v48  ;;  %v495_v60 = vshll.u32 %v344_v50, 16  ;;  %v1021_v62 = vrot.slane %v12567_v1, 4  ;;  %v11913_v2 = vld [vmem:[%s16477_s2 + $0x50] sm:$0xff]   ;;  %v504_v14 = vshll.u32 %v345_v7, 16  ;;  %v11916_v32 = vld [vmem:[%s16477_s2 + $0x58] sm:$0xff]   ;;  %v11920_v61 = vld [vmem:[%s16477_s2 + $0x20] sm:$0xff]  }
  0x75   : > { %v738_v4 = vsel %vm12405_vm8, %v482_v49, %v737_v56  ;;  %736 = vst.msk [vmem:[#allocation2 + $0x58] sm:$0xf] %vm685_vm7, %v481_v57  ;;  %v489_v0 = vor.u32 %v487_v53, %v486_v30  ;;  %v490_v35 = vrot.slane %v486_v30, 4  ;;  %v494_v3 = vrot.slane %v492_v45, 7  ;;  %v348_v33 = vld [vmem:[%s12369_s30 + $0x4c] sm:$0xf] }
  0x76   : > { %1159 = vrot.lane.b32.xlu0 %v987_v40, %s12116_s27  ;;  %v470_v40 = vshll.u32 %v341_v13, 16  ;;  %739 = vst [vmem:[#allocation2 + $0x5c] sm:$0x1] %v738_v4  ;;  %v501_v13 = vshrl.u32 %v345_v7, 16  ;;  %v509_v18 = vshrl.u32 %v346_v10, 16  ;;  %v512_v21 = vshll.u32 %v346_v10, 16  ;;  %11089 = vmatpush3.bf16.msra.mxu0 %v11912_v6 }
  0x77   : > { %v741_v1 = vsel %vm12414_vm9, %v489_v0, %v740_v59  ;;  %v497_v11 = vor.u32 %v495_v60, %v494_v3  ;;  %v499_v41 = vrot.slane %v494_v3, 4  ;;  %11090 = vmatprep.subr.bf16.mxu0 %v11913_v2  ;;  %v518_v29 = vshrl.u32 %v347_v19, 16  ;;  %v754_v24 = vld [vmem:[#allocation2 + $0x78] sm:$0xf]  ;;  %v349_v5 = vld [vmem:[%s12369_s30 + $0x50] sm:$0xf] }
  0x78   : > { %v472_v26 = vor.u32 %v470_v40, %v469_v34  ;;  %1169 = vrot.lane.b32.xlu1 %v1020_v38, %s12116_s27  ;;  %742 = vst [vmem:[#allocation2 + $0x60] sm:$0xf] %v741_v1  ;;  %v503_v20 = vrot.slane %v501_v13, 7  ;;  %v511_v28 = vrot.slane %v509_v18, 7  ;;  %v521_v31 = vshll.u32 %v347_v19, 16  ;;  %v11917_v47 = vld [vmem:[%s16477_s2 + $0x18] sm:$0xff]  }
  0x79   : > { %v498_v15 = vsel %vm12341_vm4, %v490_v35, %v497_v11  ;;  %v745_v16 = vsel %vm12405_vm8, %v499_v41, %v744_v9  ;;  %v526_v51 = vshrl.u32 %v348_v33, 16  ;;  %v529_v55 = vshll.u32 %v348_v33, 16  ;;  %v758_v50 = vld [vmem:[#allocation2 + $0x80] sm:$0x1]  ;;  %v11921_v35 = vld [vmem:[%s16477_s2 + $0x68] sm:$0xff]   ;;  %v11956_v33 = vld [vmem:[%s16477_s2 + $0x110] sm:$0xff]  }
  0x7a   : > { %1996 = vrot.lane.b32.xlu0 %v10525_v12, %s12117_s7  ;;  %v734_v52 = vsel %vm12414_vm9, %v472_v26, %v733_v39  ;;  %v747_v12 = vld [vmem:[#allocation2 + $0x6c] sm:$0xf]  ;;  %743 = vst.msk [vmem:[#allocation2 + $0x64] sm:$0xf] %vm685_vm7, %v498_v15  ;;  %746 = vst [vmem:[#allocation2 + $0x68] sm:$0x1] %v745_v16  ;;  %v506_v17 = vor.u32 %v504_v14, %v503_v20  ;;  %v514_v34 = vor.u32 %v512_v21, %v511_v28 }
  0x7b   : > { %735 = vst [vmem:[#allocation2 + $0x54] sm:$0xf] %v734_v52  ;;  %v507_v40 = vrot.slane %v503_v20, 4  ;;  %v520_v38 = vrot.slane %v518_v29, 7  ;;  %11091 = vmatpush3.bf16.msra.mxu0 %v11915_v27  ;;  %v528_v46 = vrot.slane %v526_v51, 7  ;;  %v535_v53 = vshrl.u32 %v349_v5, 16 }
  0x7c   : > { %v748_v39 = vsel %vm12414_vm9, %v506_v17, %v747_v12  ;;  %v350_v26 = vld [vmem:[%s12369_s30 + $0x54] sm:$0xf]  ;;  %11092 = vmatprep.subr.bf16.mxu0 %v11916_v32  ;;  %v538_v57 = vshll.u32 %v349_v5, 16  ;;  %v765_v3 = vld [vmem:[#allocation2 + $0x8c] sm:$0x1] }
  0x7d   : > { %749 = vst [vmem:[#allocation2 + $0x6c] sm:$0xf] %v748_v39  ;;  %v515_v63 = vsel %vm12341_vm4, %v507_v40, %v514_v34  ;;  %v523_v48 = vor.u32 %v521_v31, %v520_v38  ;;  %v524_v49 = vrot.slane %v520_v38, 4  ;;  %v531_v52 = vor.u32 %v529_v55, %v528_v46  ;;  %v2061_v7 = vld [vmem:[#allocation2] sm:$0xe]  ;;  %v11922_v15 = vld [vmem:[%s16477_s2 + $0x28] sm:$0xff]  }
  0x7e   : > { %1163 = vrot.lane.b32.xlu0 %v1003_v36, %s12116_s27  ;;  %v516_v36 = vrot.slane %v511_v28, 4  ;;  %750 = vst.msk [vmem:[#allocation2 + $0x70] sm:$0xf] %vm685_vm7, %v515_v63  ;;  %v533_v22 = vrot.slane %v528_v46, 4  ;;  %v543_v30 = vshrl.u32 %v350_v26, 16  ;;  %v546_v45 = vshll.u32 %v350_v26, 16 }
  0x7f   : > { %v755_v4 = vsel %vm12414_vm9, %v523_v48, %v754_v24  ;;  %v532_v59 = vsel %vm12341_vm4, %v524_v49, %v531_v52  ;;  %11093 = vmatpush3.bf16.msra.mxu0 %v11917_v47  ;;  %v2062_v10 = vld [vmem:[#allocation2 + $0x4] sm:$0xf]  ;;  %v2063_v6 = vld [vmem:[#allocation2 + $0x8] sm:$0x1]  ;;  %v10541_v1 = vrot.slane %v2061_v7, 9  ;;  %v11924_v5 = vld [vmem:[%s16477_s2 + $0x70] sm:$0xff]  }
  0x80   : > { %v752_v56 = vsel %vm12405_vm8, %v516_v36, %v751_v23  ;;  %756 = vst [vmem:[#allocation2 + $0x78] sm:$0xf] %v755_v4  ;;  %v759_v60 = vsel %vm12405_vm8, %v533_v22, %v758_v50  ;;  %757 = vst.msk [vmem:[#allocation2 + $0x7c] sm:$0xf] %vm685_vm7, %v532_v59  ;;  %v545_v0 = vrot.slane %v543_v30, 7  ;;  %v2162_v8 = vrot.slane %v2062_v10, 5 }
  0x81   : > { %753 = vst [vmem:[#allocation2 + $0x74] sm:$0x1] %v752_v56  ;;  %760 = vst [vmem:[#allocation2 + $0x80] sm:$0x1] %v759_v60  ;;  %v2165_v13 = vrot.slane %v2063_v6, 5  ;;  %v11925_v26 = vld [vmem:[%s16477_s2 + $0x30] sm:$0xff]  }
  0x82   : > { %1167 = vrot.lane.b32.xlu0 %v1011_v43, %s12116_s27  ;;  %v11919_v43 = vld [vmem:[%s16477_s2 + $0x60] sm:$0xff]   ;;  %v548_v41 = vor.u32 %v546_v45, %v545_v0  ;;  %v550_v2 = vrot.slane %v545_v0, 4  ;;  %v12685_v16 = vld [vmem:[%s12331_s26 + $0x58] sm:$0xf]  ;;  %v2163_v19 = vsel %vm12675_vm0, %v10541_v1, %v2162_v8  ;;  %v2164_v20 = vrot.slane %v2162_v8, 4 }
  0x83   : > { %11094 = vmatprep.subr.bf16.mxu0 %v11919_v43  ;;  %v826_v23 = vld [vmem:[%s12331_s26 + $0x5c] sm:$0xf]  ;;  %v1023_v27 = vshrl.u32 %v12685_v16, 16  ;;  %v1260_v17 = vld [vmem:[#allocation2 + $0x14] sm:$0x1] }
  0x84   : > { %11095 = vmatpush3.bf16.msra.mxu0 %v11920_v61  ;;  %v766_v18 = vsel %vm12405_vm8, %v550_v2, %v765_v3  ;;  %v2166_v21 = vsel %vm12675_vm0, %v2164_v20, %v2165_v13  ;;  %v1031_v31 = vshrl.u32 %v826_v23, 16  ;;  %v1253_v40 = vld [vmem:[#allocation2 + $0xc] sm:$0xf]  ;;  %v1263_v55 = vld [vmem:[#allocation2 + $0x18] sm:$0xf]  ;;  %v1034_v47 = vshll.u32 %v826_v23, 16 }
  0x85   : > { %11096 = vmatprep.subr.bf16.mxu0 %v11921_v35  ;;  %767 = vst [vmem:[#allocation2 + $0x8c] sm:$0x1] %v766_v18  ;;  %v10557_v28 = vcombine.low %v2163_v19, %v2166_v21  ;;  %v12699_v29 = vrot.slane %v1023_v27, 7  ;;  %v12713_v34 = vld [vmem:[%s12331_s26 + $0x60] sm:$0xf]  ;;  %v11926_v52 = vld [vmem:[%s16477_s2 + $0x78] sm:$0xff]  }
  0x86   : > { %1171 = vrot.lane.b32.xlu0 %v1021_v62, %s12116_s27  ;;  %v537_v62 = vrot.slane %v535_v53, 7  ;;  %v12716_v36 = vld [vmem:[%s12331_s26 + $0x64] sm:$0xf]  ;;  %v12722_v46 = vrot.slane %v1031_v31, 7  ;;  %v1267_v48 = vld [vmem:[#allocation2 + $0x20] sm:$0x1] }
  0x87   : > { %2336 = vst.msk [vmem:[#allocation3 + $0x8] sm:$0xff] %vm1496_vm15, %v10557_v28  ;;  %v1040_v50 = vshrl.u32 %v12713_v34, 16  ;;  %v1048_v43 = vshrl.u32 %v12716_v36, 16  ;;  %v11927_v22 = vld [vmem:[%s16477_s2 + $0x38] sm:$0xff]   ;;  %v12742_v4 = vld [vmem:[%s12331_s26 + $0x68] sm:$0xf] }
  0x88   : > { %v540_v54 = vor.u32 %v538_v57, %v537_v62  ;;  %v541_v9 = vrot.slane %v537_v62, 4  ;;  %11097 = vmatpush3.bf16.msra.mxu0 %v11922_v15  ;;  %v1029_v45 = vrot.slane %v12699_v29, 4  ;;  %v12750_v60 = vld [vmem:[%s12331_s26 + $0x6c] sm:$0xf]  ;;  %v1270_v61 = vld [vmem:[#allocation2 + $0x24] sm:$0xf] }
  0x89   : > { %11098 = vmatprep.subr.bf16.mxu0 %v11924_v5  ;;  %v1026_v35 = vshll.u32 %v12685_v16, 16  ;;  %v1038_v3 = vrot.slane %v12722_v46, 4  ;;  %v12757_v10 = vrot.slane %v1048_v43, 7  ;;  %v1051_v6 = vshll.u32 %v12716_v36, 16  ;;  %v1274_v8 = vld [vmem:[#allocation2 + $0x2c] sm:$0x1] }
  0x8a   : > { %v762_v14 = vsel %vm12414_vm9, %v540_v54, %v761_v58  ;;  %v549_v12 = vsel %vm12341_vm4, %v541_v9, %v548_v41  ;;  %v1036_v58 = vor.u32 %v1034_v47, %v12722_v46  ;;  %v12754_v54 = vrot.slane %v1040_v50, 7  ;;  %v1277_v19 = vld [vmem:[#allocation2 + $0x30] sm:$0xf]  ;;  %v12769_v28 = vld [vmem:[%s12331_s26 + $0x74] sm:$0xf] }
  0x8b   : > { %763 = vst [vmem:[#allocation2 + $0x84] sm:$0xf] %v762_v14  ;;  %764 = vst.msk [vmem:[#allocation2 + $0x88] sm:$0xf] %vm685_vm7, %v549_v12  ;;  %v1043_v9 = vshll.u32 %v12713_v34, 16  ;;  %v1057_v18 = vshrl.u32 %v12742_v4, 16 }
  0x8c   : > { %11099 = vmatpush3.bf16.msra.mxu0 %v11925_v26  ;;  %v1037_v20 = vsel %vm12341_vm4, %v1029_v45, %v1036_v58  ;;  %v1065_v27 = vshrl.u32 %v12750_v60, 16  ;;  %v1046_v26 = vrot.slane %v12754_v54, 4  ;;  %v1068_v43 = vshll.u32 %v12750_v60, 16 }
  0x8d   : > { %11100 = vmatprep.subr.bf16.mxu0 %v11926_v52  ;;  %v12779_v50 = vrot.slane %v1057_v18, 7  ;;  %v12783_v52 = vld [vmem:[%s12331_s26 + $0x70] sm:$0xf] }
  0x8e   : > { %v12788_v45 = vrot.slane %v1065_v27, 7  ;;  %v1074_v18 = vshrl.u32 %v12783_v52, 16 }
  0x90   : > { %v1108_v51 = vpop.permute.xlu0 %1107  ;;  %11101 = vmatpush3.bf16.msra.mxu0 %v11927_v22  ;;  %v1281_v22 = vld [vmem:[#allocation2 + $0x38] sm:$0x1] }
  0x91   : > { %v1254_v39 = vsel %vm12708_vm10, %v1108_v51, %v1253_v40 }
  0x92   : > { %1255 = vst [vmem:[#allocation2 + $0xc] sm:$0xf] %v1254_v39 }
  0x93   : > { %v1112_v24 = vpop.permute.xlu1 %1111 }
  0x94   : > { %v1261_v38 = vsel %vm12702_vm5, %v1112_v24, %v1260_v17 }
  0x95   : > { %1262 = vst [vmem:[#allocation2 + $0x14] sm:$0x1] %v1261_v38 }
  0x97   : > { %v1114_v63 = vpop.permute.xlu1 %1113 }
  0x98   : > { %v1264_v49 = vsel %vm12708_vm10, %v1114_v63, %v1263_v55  ;;  %v1055_v63 = vrot.slane %v12757_v10, 4 }
  0x99   : > { %1265 = vst [vmem:[#allocation2 + $0x18] sm:$0xf] %v1264_v49  ;;  %v1516_v59 = vld [vmem:[#allocation2 + $0xc] sm:$0xf] }
  0x9a   : > { %v1589_v62 = vshrl.u32 %v1516_v59, 16  ;;  %v1592_v0 = vshll.u32 %v1516_v59, 16 }
  0x9b   : > { %v1118_v57 = vpop.permute.xlu1 %1117 }
  0x9c   : > { %v1268_v30 = vsel %vm12702_vm5, %v1118_v57, %v1267_v48  ;;  %v1518_v7 = vld [vmem:[#allocation2 + $0x14] sm:$0x1]  ;;  %v1591_v14 = vrot.slane %v1589_v62, 4  ;;  %v1594_v16 = vrot.slane %v1592_v0, 5  ;;  %v1082_v0 = vshrl.u32 %v12769_v28, 16 }
  0x9d   : > { %1269 = vst [vmem:[#allocation2 + $0x20] sm:$0x1] %v1268_v30  ;;  %v1608_v17 = vshll.u32 %v1518_v7, 16 }
  0x9e   : > { %v1595_v47 = vor.u32 %v1594_v16, %v1591_v14  ;;  %v1063_v16 = vrot.slane %v12779_v50, 4 }
  0x9f   : > { %v1610_v59 = vrot.slane %v1608_v17, 5 }
  0xa0   : > { %v1519_v23 = vld [vmem:[#allocation2 + $0x18] sm:$0xf] }
  0xa1   : > { %v1613_v40 = vshrl.u32 %v1519_v23, 16  ;;  %v1616_v24 = vshll.u32 %v1519_v23, 16  ;;  %v12809_v23 = vor.u32 %v1043_v9, %v12754_v54  ;;  %v12868_v54 = vld [vmem:[#allocation2 + $0xc] sm:$0xe] }
  0xa3   : > { %v1615_v57 = vrot.slane %v1613_v40, 4  ;;  %v1618_v30 = vrot.slane %v1616_v24, 5 }
  0xb8   : > { %v1110_v56 = vpop.permute.xlu0 %1109  ;;  %v1122_v41 = vpop.permute.xlu1 %1121 }
  0xb9   : > { %1257 = vst.msk [vmem:[#allocation2 + $0x10] sm:$0xf] %vm1251_vm3, %v1110_v56  ;;  %1273 = vst.msk [vmem:[#allocation2 + $0x28] sm:$0xf] %vm1251_vm3, %v1122_v41  ;;  %v1596_v41 = vrot.slane %v1595_v47, 4 }
  0xbc   : > { %v1116_v53 = vpop.permute.xlu0 %1115  ;;  %v1126_v38 = vpop.permute.xlu1 %1125 }
  0xbd   : > { %1266 = vst.msk [vmem:[#allocation2 + $0x1c] sm:$0xf] %vm1251_vm3, %v1116_v53  ;;  %v1278_v48 = vsel %vm12708_vm10, %v1126_v38, %v1277_v19  ;;  %v1619_v19 = vor.u32 %v1618_v30, %v1615_v57  ;;  %v1291_v57 = vld [vmem:[#allocation2 + $0x48] sm:$0xf]  ;;  %v12830_v30 = vld [vmem:[%s12331_s26 + $0x7c] sm:$0xf] }
  0xbe   : > { %1279 = vst [vmem:[#allocation2 + $0x30] sm:$0xf] %v1278_v48  ;;  %v12820_v48 = vrot.slane %v1082_v0, 7 }
  0xc0   : > { %v1120_v1 = vpop.permute.xlu0 %1119  ;;  %v11901_v2 = vld [vmem:[#allocation2 + $0xc] sm:$0xff]   ;;  %v1523_v47 = vld [vmem:[#allocation2 + $0x28] sm:$0xf] }
  0xc1   : > { %v1517_v13 = vld [vmem:[#allocation2 + $0x10] sm:$0xf]  ;;  %v1271_v15 = vsel %vm12708_vm10, %v1120_v1, %v1270_v61  ;;  %2464 = vrot.lane.b32.xlu1 %v11901_v2, %s12117_s7  ;;  %v1130_v1 = vpop.permute.xlu1 %1129 }
  0xc2   : > { %v1598_v12 = vshll.u32 %v1517_v13, 16  ;;  %1272 = vst [vmem:[#allocation2 + $0x24] sm:$0xf] %v1271_v15  ;;  %v1602_v21 = vshrl.u32 %v1517_v13, 16  ;;  %v11929_v51 = vld [vmem:[#allocation2 + $0xc] sm:$0xff]   ;;  %v1282_v14 = vsel %vm12702_vm5, %v1130_v1, %v1281_v22 }
  0xc3   : > { %1498 = vst.msk [vmem:[#allocation3 + $0x28] sm:$0xff] %vm1496_vm15, %v11929_v51  ;;  %v1521_v13 = vld [vmem:[#allocation2 + $0x20] sm:$0x1]  ;;  %1283 = vst [vmem:[#allocation2 + $0x38] sm:$0x1] %v1282_v14  ;;  %v1077_v51 = vshll.u32 %v12783_v52, 16 }
  0xc4   : > { %v12771_v31 = vrot.slane %v1598_v12, 5  ;;  %v1124_v55 = vpop.permute.xlu0 %1123  ;;  %v11902_v39 = vld [vmem:[#allocation2 + $0x18] sm:$0xff]   ;;  %v1604_v5 = vrot.slane %v1602_v21, 4  ;;  %v1060_v12 = vshll.u32 %v12742_v4, 16  ;;  %v1632_v24 = vshll.u32 %v1521_v13, 16 }
  0xc5   : > { %v1275_v56 = vsel %vm12702_vm5, %v1124_v55, %v1274_v8  ;;  %v1520_v49 = vld [vmem:[#allocation2 + $0x1c] sm:$0xf]  ;;  %2466 = vrot.lane.b32.xlu0 %v11902_v39, %s12117_s7  ;;  %v12792_v8 = vor.u32 %v1026_v35, %v12699_v29  ;;  %v12815_v55 = vld [vmem:[%s12331_s26 + $0x78] sm:$0xf]  ;;  %v1134_v9 = vpop.permute.xlu1 %1133  ;;  %v1288_v39 = vld [vmem:[#allocation2 + $0x44] sm:$0x1] }
  0xc6   : > { %1276 = vst [vmem:[#allocation2 + $0x2c] sm:$0x1] %v1275_v56  ;;  %v1605_v53 = vor.u32 %v1604_v5, %v12771_v31  ;;  %v11930_v58 = vld [vmem:[#allocation2 + $0x18] sm:$0xff]   ;;  %v1622_v61 = vshll.u32 %v1520_v49, 16  ;;  %v1626_v62 = vshrl.u32 %v1520_v49, 16  ;;  %v1601_v38 = vsel %vm12533_vm12, %v1596_v41, %v12771_v31 }
  0xc7   : > { %1499 = vst.msk [vmem:[#allocation3 + $0x50] sm:$0xff] %vm1496_vm15, %v11930_v58  ;;  %v1284_v35 = vld [vmem:[#allocation2 + $0x3c] sm:$0xf]  ;;  %v12827_v31 = vrot.slane %v1074_v18, 7  ;;  %v1620_v58 = vrot.slane %v1619_v19, 4  ;;  %v1091_v0 = vshrl.u32 %v12815_v55, 16  ;;  %v1053_v18 = vor.u32 %v1051_v6, %v12757_v10 }
  0xc8   : > { %v1128_v7 = vpop.permute.xlu0 %1127  ;;  %v1606_v2 = vrot.slane %v1605_v53, 4  ;;  %v12804_v21 = vrot.slane %v1622_v61, 5  ;;  %v1628_v40 = vrot.slane %v1626_v62, 4  ;;  %1287 = vst.msk [vmem:[#allocation2 + $0x40] sm:$0xf] %vm1251_vm3, %v1134_v9  ;;  %v1634_v1 = vrot.slane %v1632_v24, 5 }
  0xc9   : > { %1280 = vst.msk [vmem:[#allocation2 + $0x34] sm:$0xf] %vm1251_vm3, %v1128_v7  ;;  %v11903_v15 = vld [vmem:[#allocation2 + $0x24] sm:$0xff]   ;;  %1175 = vrot.lane.b32.xlu0 %v1037_v20, %s12116_s27  ;;  %v1072_v20 = vrot.slane %v12788_v45, 4  ;;  %v1646_v41 = vshll.u32 %v1523_v47, 16  ;;  %v1080_v19 = vrot.slane %v12827_v31, 4 }
  0xca   : > { %v1611_v29 = vsel %vm12533_vm12, %v1606_v2, %v1610_v59  ;;  %v1522_v27 = vld [vmem:[#allocation2 + $0x24] sm:$0xf]  ;;  %2468 = vrot.lane.b32.xlu1 %v11903_v15, %s12117_s7  ;;  %v1629_v53 = vor.u32 %v1628_v40, %v12804_v21  ;;  %v1650_v2 = vshrl.u32 %v1523_v47, 16  ;;  %v1525_v13 = vld [vmem:[#allocation2 + $0x30] sm:$0xf] }
  0xcb   : > { %v11932_v17 = vld [vmem:[#allocation2 + $0x24] sm:$0xff]   ;;  %v1637_v5 = vshrl.u32 %v1522_v27, 16  ;;  %v1640_v56 = vshll.u32 %v1522_v27, 16  ;;  %v10526_v49 = vcombine.low %v1601_v38, %v1611_v29  ;;  %v1138_v29 = vpop.permute.xlu1 %1137  ;;  %v1085_v27 = vshll.u32 %v12769_v28, 16 }
  0xcc   : > { %v1132_v34 = vpop.permute.xlu0 %1131  ;;  %1500 = vst.msk [vmem:[#allocation3 + $0x78] sm:$0xff] %vm1496_vm15, %v11932_v17  ;;  %v1630_v7 = vrot.slane %v1629_v53, 4  ;;  %v1292_v24 = vsel %vm12708_vm10, %v1138_v29, %v1291_v57  ;;  %v12847_v9 = vrot.slane %v1646_v41, 5  ;;  %v1102_v53 = vshll.u32 %v12830_v30, 16  ;;  %v1298_v41 = vld [vmem:[#allocation2 + $0x54] sm:$0xf] }
  0xcd   : > { %v1285_v22 = vsel %vm12708_vm10, %v1132_v34, %v1284_v35  ;;  %v1524_v59 = vld [vmem:[#allocation2 + $0x2c] sm:$0x1]  ;;  %v1639_v61 = vrot.slane %v1637_v5, 4  ;;  %v1642_v62 = vrot.slane %v1640_v56, 5  ;;  %v1089_v35 = vrot.slane %v12820_v48, 4 }
  0xce   : > { %1286 = vst [vmem:[#allocation2 + $0x3c] sm:$0xf] %v1285_v22  ;;  %1998 = vrot.lane.b32.xlu1 %v10526_v49, %s12117_s7  ;;  %v1635_v17 = vsel %vm12533_vm12, %v1630_v7, %v1634_v1  ;;  %v1661_v34 = vshrl.u32 %v1525_v13, 16  ;;  %1293 = vst [vmem:[#allocation2 + $0x48] sm:$0xf] %v1292_v24  ;;  %v1656_v47 = vshll.u32 %v1524_v59, 16  ;;  %v1054_v59 = vsel %vm12341_vm4, %v1046_v26, %v1053_v18 }
  0xcf   : > { %v1643_v6 = vor.u32 %v1642_v62, %v1639_v61  ;;  %v1295_v5 = vld [vmem:[#allocation2 + $0x50] sm:$0x1]  ;;  %v1099_v56 = vshrl.u32 %v12830_v30, 16  ;;  %v1652_v49 = vrot.slane %v1650_v2, 4  ;;  %v12855_v22 = vrot.slane %v1091_v0, 7  ;;  %v1142_v62 = vpop.permute.xlu1 %1141 }
  0xd0   : > { %v11904_v14 = vld [vmem:[#allocation2 + $0x30] sm:$0xff]   ;;  %v1136_v15 = vpop.permute.xlu0 %1135  ;;  %v1664_v7 = vshll.u32 %v1525_v13, 16  ;;  %v1663_v0 = vrot.slane %v1661_v34, 4  ;;  %v1094_v2 = vshll.u32 %v12815_v55, 16  ;;  %v1529_v24 = vld [vmem:[#allocation2 + $0x40] sm:$0xf] }
  0xd1   : > { %v1289_v40 = vsel %vm12702_vm5, %v1136_v15, %v1288_v39  ;;  %v1526_v38 = vld [vmem:[#allocation2 + $0x34] sm:$0xf]  ;;  %2470 = vrot.lane.b32.xlu0 %v11904_v14, %s12117_s7  ;;  %v1625_v39 = vsel %vm12533_vm12, %v1620_v58, %v12804_v21  ;;  %v1653_v21 = vor.u32 %v1652_v49, %v12847_v9  ;;  %v1296_v58 = vsel %vm12702_vm5, %v1142_v62, %v1295_v5 }
  0xd2   : > { %v11933_v36 = vld [vmem:[#allocation2 + $0x30] sm:$0xff]   ;;  %1290 = vst [vmem:[#allocation2 + $0x44] sm:$0x1] %v1289_v40  ;;  %1173 = vrot.lane.b32.xlu1 %v12792_v8, %s12116_s27  ;;  %v10527_v57 = vcombine.low %v1625_v39, %v1635_v17  ;;  %v1527_v8 = vld [vmem:[#allocation2 + $0x38] sm:$0x1]  ;;  %v1670_v1 = vshll.u32 %v1526_v38, 16 }
  0xd3   : > { %1501 = vst.msk [vmem:[#allocation3 + $0xa0] sm:$0xff] %vm1496_vm15, %v11933_v36  ;;  %v1644_v26 = vrot.slane %v1643_v6, 4  ;;  %v1658_v14 = vrot.slane %v1656_v47, 5  ;;  %1297 = vst [vmem:[#allocation2 + $0x50] sm:$0x1] %v1296_v58  ;;  %v1666_v13 = vrot.slane %v1664_v7, 5  ;;  %v1070_v36 = vor.u32 %v1068_v43, %v12788_v45  ;;  %v1146_v5 = vpop.permute.xlu1 %1145 }
  0xd4   : > { %v1140_v61 = vpop.permute.xlu0 %1139  ;;  %v1674_v15 = vshrl.u32 %v1526_v38, 16  ;;  %v1654_v29 = vrot.slane %v1653_v21, 4  ;;  %v12874_v17 = vrot.slane %v1670_v1, 5  ;;  %v1680_v40 = vshll.u32 %v1527_v8, 16  ;;  %1301 = vst.msk [vmem:[#allocation2 + $0x58] sm:$0xf] %vm1251_vm3, %v1146_v5 }
  0xd5   : > { %1294 = vst.msk [vmem:[#allocation2 + $0x4c] sm:$0xf] %vm1251_vm3, %v1140_v61  ;;  %2000 = vrot.lane.b32.xlu0 %v10527_v57, %s12117_s7  ;;  %v1528_v18 = vld [vmem:[#allocation2 + $0x3c] sm:$0xf]  ;;  %v1694_v38 = vshll.u32 %v1529_v24, 16  ;;  %v1667_v57 = vor.u32 %v1666_v13, %v1663_v0  ;;  %v1097_v62 = vrot.slane %v12855_v22, 4  ;;  %v1649_v60 = vsel %vm12533_vm12, %v1644_v26, %v12847_v9 }
  0xd6   : > { %1177 = vrot.lane.b32.xlu1 %v1038_v3, %s12116_s27  ;;  %v1685_v34 = vshrl.u32 %v1528_v18, 16  ;;  %v1676_v6 = vrot.slane %v1674_v15, 4  ;;  %v1688_v39 = vshll.u32 %v1528_v18, 16  ;;  %v11935_v49 = vld [vmem:[#allocation2 + $0x3c] sm:$0xff]   ;;  %v12883_v8 = vrot.slane %v1099_v56, 7 }
  0xd7   : > { %v1302_v3 = vld [vmem:[#allocation2 + $0x5c] sm:$0x1]  ;;  %v1305_v61 = vld [vmem:[#allocation2 + $0x60] sm:$0xf]  ;;  %v1659_v43 = vsel %vm12533_vm12, %v1654_v29, %v1658_v14  ;;  %v12892_v1 = vld [vmem:[#allocation2 + $0x14] sm:$0x1]  ;;  %v1071_v26 = vsel %vm12341_vm4, %v1063_v16, %v1070_v36  ;;  %v12909_v13 = vor.u32 %v1060_v12, %v12779_v50  ;;  %v1150_v18 = vpop.permute.xlu1 %1149 }
  0xd8   : > { %v1144_v47 = vpop.permute.xlu0 %1143  ;;  %v1687_v7 = vrot.slane %v1685_v34, 4  ;;  %1502 = vst.msk [vmem:[#allocation3 + $0xc8] sm:$0xff] %vm1496_vm15, %v11935_v49  ;;  %v12896_v56 = vld [vmem:[#allocation2 + $0x18] sm:$0xe]  ;;  %v1690_v58 = vrot.slane %v1688_v39, 5  ;;  %v1698_v9 = vshrl.u32 %v1529_v24, 16  ;;  %v10528_v29 = vcombine.low %v1649_v60, %v1659_v43 }
  0xd9   : > { %v1299_v46 = vsel %vm12708_vm10, %v1144_v47, %v1298_v41  ;;  %1179 = vrot.lane.b32.xlu0 %v12809_v23, %s12116_s27  ;;  %v10542_v41 = vrot.slane %v12868_v54, 9  ;;  %v1677_v23 = vor.u32 %v1676_v6, %v12874_v17  ;;  %v1530_v21 = vld [vmem:[#allocation2 + $0x44] sm:$0x1]  ;;  %v12900_v0 = vld [vmem:[#allocation2 + $0x1c] sm:$0xf]  ;;  %v1682_v14 = vrot.slane %v1680_v40, 5 }
  0xda   : > { %1300 = vst [vmem:[#allocation2 + $0x54] sm:$0xf] %v1299_v46  ;;  %1181 = vrot.lane.b32.xlu1 %v1054_v59, %s12116_s27  ;;  %v12911_v59 = vrot.slane %v1694_v38, 5  ;;  %v1668_v34 = vrot.slane %v1667_v57, 4  ;;  %v1531_v47 = vld [vmem:[#allocation2 + $0x48] sm:$0xf]  ;;  %v1691_v16 = vor.u32 %v1690_v58, %v1687_v7  ;;  %v1306_v12 = vsel %vm12708_vm10, %v1150_v18, %v1305_v61 }
  0xdb   : > { %v1678_v24 = vrot.slane %v1677_v23, 4  ;;  %v1700_v4 = vrot.slane %v1698_v9, 4  ;;  %v1704_v50 = vshll.u32 %v1530_v21, 16  ;;  %v1309_v36 = vld [vmem:[#allocation2 + $0x68] sm:$0x1]  ;;  %v16482_v38 = vrot.slane %v12900_v0, 5  ;;  %v1154_v7 = vpop.permute.xlu1 %1153 }
  0xdc   : > { %v1148_v15 = vpop.permute.xlu0 %1147  ;;  %v1532_v40 = vld [vmem:[#allocation2 + $0x4c] sm:$0xf]  ;;  %v11905_v49 = vld [vmem:[#allocation2 + $0x3c] sm:$0xff]   ;;  %1307 = vst [vmem:[#allocation2 + $0x60] sm:$0xf] %v1306_v12  ;;  %v1709_v10 = vshrl.u32 %v1531_v47, 16  ;;  %v1087_v46 = vor.u32 %v1085_v27, %v12820_v48  ;;  %v1673_v58 = vsel %vm12533_vm12, %v1668_v34, %v12874_v17 }
  0xdd   : > { %v1303_v6 = vsel %vm12702_vm5, %v1148_v15, %v1302_v3  ;;  %1183 = vrot.lane.b32.xlu0 %v1055_v63, %s12116_s27  ;;  %v11937_v5 = vld [vmem:[#allocation2 + $0x48] sm:$0xff]   ;;  %v2172_v63 = vrot.slane %v12892_v1, 5  ;;  %v1701_v57 = vor.u32 %v1700_v4, %v12911_v59  ;;  %v1533_v61 = vld [vmem:[#allocation2 + $0x50] sm:$0x1]  ;;  %v1712_v60 = vshll.u32 %v1531_v47, 16 }
  0xde   : > { %1304 = vst [vmem:[#allocation2 + $0x5c] sm:$0x1] %v1303_v6  ;;  %2002 = vrot.lane.b32.xlu1 %v10528_v29, %s12117_s7  ;;  %v1718_v43 = vshll.u32 %v1532_v40, 16  ;;  %1503 = vst.msk [vmem:[#allocation3 + $0xf0] sm:$0xff] %vm1496_vm15, %v11937_v5  ;;  %v12929_v23 = vld [vmem:[#allocation2 + $0x20] sm:$0x1]  ;;  %v1683_v9 = vsel %vm12533_vm12, %v1678_v24, %v1682_v14  ;;  %v1310_v47 = vsel %vm12702_vm5, %v1154_v7, %v1309_v36 }
  0xdf   : > { %v12931_v21 = vld [vmem:[#allocation2 + $0x28] sm:$0xf]  ;;  %v1711_v28 = vrot.slane %v1709_v10, 4  ;;  %v1722_v27 = vshrl.u32 %v1532_v40, 16  ;;  %v12940_v15 = vrot.slane %v1691_v16, 4  ;;  %v12942_v18 = vrot.slane %v1704_v50, 5 }
  0xe0   : > { %v1152_v3 = vpop.permute.xlu0 %1151  ;;  %v1714_v29 = vrot.slane %v1712_v60, 5  ;;  %v12944_v6 = vrot.slane %v1718_v43, 5  ;;  %v12947_v17 = vrot.slane %v1701_v57, 4  ;;  %v1728_v14 = vshll.u32 %v1533_v61, 16  ;;  %v1312_v4 = vld [vmem:[#allocation2 + $0x6c] sm:$0xf] }
  0xe1   : > { %1308 = vst.msk [vmem:[#allocation2 + $0x64] sm:$0xf] %vm1251_vm3, %v1152_v3  ;;  %1187 = vrot.lane.b32.xlu0 %v1071_v26, %s12116_s27  ;;  %v1724_v34 = vrot.slane %v1722_v27, 4  ;;  %v1534_v24 = vld [vmem:[#allocation2 + $0x54] sm:$0xf]  ;;  %v10529_v16 = vcombine.low %v1673_v58, %v1683_v9  ;;  %v1158_v3 = vpop.permute.xlu1 %1157  ;;  %v16485_v58 = vrot.slane %v12931_v21, 5  ;;  %v1079_v27 = vor.u32 %v1077_v51, %v12827_v31 }
  0xe2   : > { %2472 = vrot.lane.b32.xlu1 %v11905_v49, %s12117_s7  ;;  %v11938_v26 = vld [vmem:[#allocation2 + $0x54] sm:$0xff]   ;;  %v1715_v12 = vor.u32 %v1714_v29, %v1711_v28  ;;  %v1733_v40 = vshrl.u32 %v1534_v24, 16  ;;  %v1736_v5 = vshll.u32 %v1534_v24, 16  ;;  %1311 = vst [vmem:[#allocation2 + $0x68] sm:$0x1] %v1310_v47  ;;  %v12953_v49 = vrot.slane %v16482_v38, 4 }
  0xe3   : > { %v1535_v50 = vld [vmem:[#allocation2 + $0x58] sm:$0xf]  ;;  %v1316_v60 = vld [vmem:[#allocation2 + $0x74] sm:$0x1]  ;;  %v12956_v61 = vld [vmem:[#allocation2 + $0x24] sm:$0xe]  ;;  %v1725_v36 = vor.u32 %v1724_v34, %v12944_v6  ;;  %v1697_v34 = vsel %vm12533_vm12, %v12940_v15, %v12911_v59  ;;  %v12978_v47 = vsel %vm12341_vm4, %v1080_v19, %v1087_v46 }
  0xe4   : > { %v1156_v10 = vpop.permute.xlu0 %1155  ;;  %v1742_v43 = vshll.u32 %v1535_v50, 16  ;;  %1315 = vst.msk [vmem:[#allocation2 + $0x70] sm:$0xf] %vm1251_vm3, %v1158_v3  ;;  %v1319_v7 = vld [vmem:[#allocation2 + $0x78] sm:$0xf]  ;;  %v11906_v28 = vld [vmem:[#allocation2 + $0x48] sm:$0xff]  }
  0xe5   : > { %1504 = vst.msk [vmem:[#allocation3 + $0x118] sm:$0xff] %vm1496_vm15, %v11938_v26  ;;  %v12962_v9 = vld [vmem:[#allocation2 + $0x2c] sm:$0x1]  ;;  %2004 = vrot.lane.b32.xlu0 %v10529_v16, %s12117_s7  ;;  %v1735_v29 = vrot.slane %v1733_v40, 4  ;;  %v1738_v24 = vrot.slane %v1736_v5, 5  ;;  %v1746_v52 = vshrl.u32 %v1535_v50, 16  ;;  %v1313_v31 = vsel %vm12708_vm10, %v1156_v10, %v1312_v4  ;;  %v1162_v46 = vpop.permute.xlu1 %1161 }
  0xe6   : > { %1185 = vrot.lane.b32.xlu1 %v12909_v13, %s12116_s27  ;;  %v1536_v26 = vld [vmem:[#allocation2 + $0x5c] sm:$0x1]  ;;  %v12980_v16 = vrot.slane %v1742_v43, 5  ;;  %v12982_v51 = vld [vmem:[#allocation2 + $0x34] sm:$0xf]  ;;  %v1707_v13 = vsel %vm12533_vm12, %v12947_v17, %v12942_v18  ;;  %v12988_v40 = vrot.slane %v1715_v12, 4  ;;  %v1320_v12 = vsel %vm12708_vm10, %v1162_v46, %v1319_v7 }
  0xe7   : > { %v12990_v59 = vrot.slane %v1728_v14, 5  ;;  %v12994_v15 = vld [vmem:[#allocation2 + $0x40] sm:$0xf]  ;;  %v12996_v5 = vrot.slane %v1725_v36, 4  ;;  %v1739_v50 = vor.u32 %v1738_v24, %v1735_v29  ;;  %v1748_v3 = vrot.slane %v1746_v52, 4 }
  0xe8   : > { %v1160_v19 = vpop.permute.xlu0 %1159  ;;  %1314 = vst [vmem:[#allocation2 + $0x6c] sm:$0xf] %v1313_v31  ;;  %v1537_v18 = vld [vmem:[#allocation2 + $0x60] sm:$0xf]  ;;  %v13003_v14 = vrot.slane %v16485_v58, 4  ;;  %v1752_v4 = vshll.u32 %v1536_v26, 16  ;;  %v10530_v31 = vcombine.low %v1697_v34, %v1707_v13  ;;  %v1721_v7 = vsel %vm12533_vm12, %v12988_v40, %v12944_v6 }
  0xe9   : > { %v1317_v43 = vsel %vm12702_vm5, %v1160_v19, %v1316_v60  ;;  %2474 = vrot.lane.b32.xlu0 %v11906_v28, %s12117_s7  ;;  %v1323_v10 = vld [vmem:[#allocation2 + $0x80] sm:$0x1]  ;;  %v13009_v29 = vld [vmem:[#allocation2 + $0x30] sm:$0xe]  ;;  %v16484_v60 = vrot.slane %v12982_v51, 5  ;;  %v1749_v24 = vor.u32 %v1748_v3, %v12980_v16  ;;  %v1757_v26 = vshrl.u32 %v1537_v18, 16  ;;  %v1166_v46 = vpop.permute.xlu1 %1165 }
  0xea   : > { %1318 = vst [vmem:[#allocation2 + $0x74] sm:$0x1] %v1317_v43  ;;  %1189 = vrot.lane.b32.xlu1 %v1072_v20, %s12116_s27  ;;  %1321 = vst [vmem:[#allocation2 + $0x78] sm:$0xf] %v1320_v12  ;;  %v1538_v28 = vld [vmem:[#allocation2 + $0x64] sm:$0xf]  ;;  %v1731_v45 = vsel %vm12533_vm12, %v12996_v5, %v12990_v59  ;;  %v1324_v34 = vsel %vm12702_vm5, %v1166_v46, %v1323_v10 }
  0xeb   : > { %v16483_v52 = vrot.slane %v12994_v15, 5  ;;  %v1539_v43 = vld [vmem:[#allocation2 + $0x68] sm:$0x1]  ;;  %v1760_v39 = vshll.u32 %v1537_v18, 16  ;;  %v13021_v38 = vld [vmem:[#allocation2 + $0x38] sm:$0x1] }
  0xec   : > { %v1997_v19 = vpop.permute.xlu0 %1996  ;;  %v13027_v20 = vrot.slane %v1739_v50, 4  ;;  %v1759_v13 = vrot.slane %v1757_v26, 4  ;;  %v1541_v6 = vld [vmem:[#allocation2 + $0x70] sm:$0xf]  ;;  %v13032_v40 = vld [vmem:[#allocation2 + $0x3c] sm:$0xe] }
  0xed   : > { %2045 = vst.msk [vmem:[#allocation3] sm:$0xff] %vm2044_vm11, %v1997_v19  ;;  %1191 = vrot.lane.b32.xlu0 %v1079_v27, %s12116_s27  ;;  %v13035_v3 = vrot.slane %v1752_v4, 5  ;;  %1325 = vst [vmem:[#allocation2 + $0x80] sm:$0x1] %v1324_v34  ;;  %v1762_v18 = vrot.slane %v1760_v39, 5  ;;  %v1766_v12 = vshll.u32 %v1538_v28, 16  ;;  %v1170_v27 = vpop.permute.xlu1 %1169 }
  0xee   : > { %v1770_v57 = vshrl.u32 %v1538_v28, 16  ;;  %2006 = vrot.lane.b32.xlu1 %v10530_v31, %s12117_s7  ;;  %v1750_v59 = vrot.slane %v1749_v24, 4  ;;  %v1776_v5 = vshll.u32 %v1539_v43, 16  ;;  %v1790_v50 = vshll.u32 %v1541_v6, 16  ;;  %v1326_v4 = vld [vmem:[#allocation2 + $0x84] sm:$0xf] }
  0xef   : > { %v1794_v19 = vshrl.u32 %v1541_v6, 16  ;;  %v1763_v36 = vor.u32 %v1762_v18, %v1759_v13  ;;  %v13040_v17 = vrot.slane %v1766_v12, 5  ;;  %v13042_v34 = vld [vmem:[#allocation2 + $0x10] sm:$0xf]  ;;  %v13046_v39 = vrot.slane %v16484_v60, 4  ;;  %v11907_v12 = vld [vmem:[#allocation2 + $0x54] sm:$0xff]  }
  0xf0   : > { %v1164_v46 = vpop.permute.xlu0 %1163  ;;  %v13049_v28 = vld [vmem:[#allocation2 + $0x44] sm:$0x1]  ;;  %v1772_v31 = vrot.slane %v1770_v57, 4  ;;  %1329 = vst.msk [vmem:[#allocation2 + $0x88] sm:$0xf] %vm1251_vm3, %v1170_v27  ;;  %v13053_v43 = vrot.slane %v1790_v50, 5  ;;  %v10531_v18 = vcombine.low %v1721_v7, %v1731_v45  ;;  %v1104_v57 = vor.u32 %v1102_v53, %v12883_v8 }
  0xf1   : > { %1322 = vst.msk [vmem:[#allocation2 + $0x7c] sm:$0xf] %vm1251_vm3, %v1164_v46  ;;  %v13057_v13 = vrot.slane %v16483_v52, 4  ;;  %v13059_v6 = vld [vmem:[#allocation2 + $0x48] sm:$0xe]  ;;  %1195 = vrot.lane.b32.xlu0 %v1089_v35, %s12116_s27  ;;  %v1745_v50 = vsel %vm12533_vm12, %v13027_v20, %v12980_v16  ;;  %v1755_v46 = vsel %vm12533_vm12, %v1750_v59, %v13035_v3  ;;  %v1778_v35 = vrot.slane %v1776_v5, 5 }
  0xf2   : > { %1193 = vrot.lane.b32.xlu1 %v12978_v47, %s12116_s27  ;;  %v1773_v48 = vor.u32 %v1772_v31, %v13040_v17  ;;  %v1540_v7 = vld [vmem:[#allocation2 + $0x6c] sm:$0xf]  ;;  %v1542_v45 = vld [vmem:[#allocation2 + $0x74] sm:$0x1]  ;;  %v1796_v27 = vrot.slane %v1794_v19, 4  ;;  %v1764_v53 = vrot.slane %v1763_v36, 4 }
  0xf3   : > { %v13077_v30 = vld [vmem:[#allocation2 + $0x4c] sm:$0xf]  ;;  %v1781_v52 = vshrl.u32 %v1540_v7, 16  ;;  %v1784_v26 = vshll.u32 %v1540_v7, 16  ;;  %v1800_v16 = vshll.u32 %v1542_v45, 16  ;;  %v2169_v59 = vrot.slane %v13042_v34, 5 }
  0xf4   : > { %v1168_v24 = vpop.permute.xlu0 %1167  ;;  %v1774_v20 = vrot.slane %v1773_v48, 4  ;;  %v1330_v10 = vld [vmem:[#allocation2 + $0x8c] sm:$0x1]  ;;  %v1797_v3 = vor.u32 %v1796_v27, %v13053_v43  ;;  %v2068_v5 = vld [vmem:[#allocation2 + $0x1c] sm:$0xf]  ;;  %v16488_v48 = vrot.slane %v13077_v30, 5  ;;  %v1096_v34 = vor.u32 %v1094_v2, %v12855_v22 }
  0xf5   : > { %v1327_v47 = vsel %vm12708_vm10, %v1168_v24, %v1326_v4  ;;  %2008 = vrot.lane.b32.xlu0 %v10531_v18, %s12117_s7  ;;  %v1783_v36 = vrot.slane %v1781_v52, 4  ;;  %v1786_v7 = vrot.slane %v1784_v26, 5  ;;  %v2069_v45 = vld [vmem:[#allocation2 + $0x20] sm:$0x1]  ;;  %v13087_v60 = vld [vmem:[#allocation2 + $0x50] sm:$0x1]  ;;  %v1105_v4 = vsel %vm12341_vm4, %v1097_v62, %v1104_v57 }
  0xf6   : > { %1328 = vst [vmem:[#allocation2 + $0x84] sm:$0xf] %v1327_v47  ;;  %2476 = vrot.lane.b32.xlu1 %v11907_v12, %s12117_s7  ;;  %v2171_v24 = vrot.slane %v2169_v59, 4  ;;  %v2067_v18 = vld [vmem:[#allocation2 + $0x18] sm:$0xe]  ;;  %v10532_v27 = vcombine.low %v1745_v50, %v1755_v46  ;;  %v1769_v12 = vsel %vm12533_vm12, %v1764_v53, %v13040_v17  ;;  %v1779_v62 = vsel %vm12533_vm12, %v1774_v20, %v1778_v35 }
  0xf7   : > { %v13097_v52 = vld [vmem:[#allocation2 + $0x58] sm:$0xf]  ;;  %v13099_v26 = vld [vmem:[#allocation2 + $0x64] sm:$0xf]  ;;  %v1787_v19 = vor.u32 %v1786_v7, %v1783_v36  ;;  %v1798_v22 = vrot.slane %v1797_v3, 4  ;;  %v1802_v2 = vrot.slane %v1800_v16, 5  ;;  %v2170_v17 = vsel %vm12675_vm0, %v10542_v41, %v2169_v59 }
  0xf8   : > { %16539 = vst [vmem:[#allocation8_spill] sm:$0xff] %v13099_v26  ;;  %v1172_v47 = vpop.permute.xlu0 %1171  ;;  %v1543_v57 = vld [vmem:[#allocation2 + $0x78] sm:$0xf]  ;;  %v2173_v46 = vsel %vm12675_vm0, %v2171_v24, %v2172_v63  ;;  %v2176_v35 = vrot.slane %v2068_v5, 5  ;;  %v16487_v53 = vrot.slane %v13097_v52, 5  ;;  %v11908_v16 = vld [vmem:[#allocation2 + $0x60] sm:$0xff]   ;;  %v10533_v63 = vcombine.low %v1769_v12, %v1779_v62 }
  0xf9   : > { %v1331_v55 = vsel %vm12702_vm5, %v1172_v47, %v1330_v10  ;;  %1199 = vrot.lane.b32.xlu0 %v1105_v4, %s12116_s27  ;;  %v1788_v50 = vrot.slane %v1787_v19, 4  ;;  %v10558_v20 = vcombine.low %v2170_v17, %v2173_v46  ;;  %v2179_v3 = vrot.slane %v2069_v45, 5  ;;  %v1544_v54 = vld [vmem:[#allocation2 + $0x7c] sm:$0xf]  ;;  %v351_v19 = vld [vmem:[%s12369_s30 + $0x58] sm:$0xf] }
  0xfa   : > { %1332 = vst [vmem:[#allocation2 + $0x8c] sm:$0x1] %v1331_v55  ;;  %1197 = vrot.lane.b32.xlu1 %v1096_v34, %s12116_s27  ;;  %v10543_v59 = vrot.slane %v2067_v18, 9  ;;  %v2178_v1 = vrot.slane %v2176_v35, 4  ;;  %v1545_v36 = vld [vmem:[#allocation2 + $0x80] sm:$0x1]  ;;  %v1803_v4 = vsel %vm12533_vm12, %v1798_v22, %v1802_v2 }
  0xfb   : > { %v1805_v7 = vshrl.u32 %v1543_v57, 16  ;;  %v1793_v5 = vsel %vm12533_vm12, %v1788_v50, %v13053_v43  ;;  %2337 = vst.msk [vmem:[#allocation3 + $0x30] sm:$0xff] %vm1496_vm15, %v10558_v20  ;;  %v1808_v34 = vshll.u32 %v1543_v57, 16  ;;  %v352_v45 = vld [vmem:[%s12369_s30 + $0x5c] sm:$0xf]  ;;  %v1814_v47 = vshll.u32 %v1544_v54, 16 }
  0xfc   : > { %v2177_v24 = vsel %vm12675_vm0, %v10543_v59, %v2176_v35  ;;  %v2180_v18 = vsel %vm12675_vm0, %v2178_v1, %v2179_v3  ;;  %v2070_v62 = vld [vmem:[#allocation2 + $0x24] sm:$0xe]  ;;  %v11918_v43 = vld [vmem:[#allocation2 + $0x6c] sm:$0xff]   ;;  %v1818_v2 = vshrl.u32 %v1544_v54, 16  ;;  %v1824_v50 = vshll.u32 %v1545_v36, 16 }
  0xfd   : > { %2010 = vrot.lane.b32.xlu0 %v10532_v27, %s12117_s7  ;;  %v1807_v12 = vrot.slane %v1805_v7, 4  ;;  %v10559_v55 = vcombine.low %v2177_v24, %v2180_v18  ;;  %v1810_v22 = vrot.slane %v1808_v34, 5  ;;  %v2071_v57 = vld [vmem:[#allocation2 + $0x28] sm:$0xf]  ;;  %v1816_v17 = vrot.slane %v1814_v47, 5  ;;  %v11923_v18 = vld [vmem:[#allocation2 + $0x78] sm:$0xff]  }
  0xfe   : > { %2478 = vrot.lane.b32.xlu1 %v11908_v16, %s12117_s7  ;;  %v552_v46 = vshrl.u32 %v351_v19, 16  ;;  %v555_v27 = vshll.u32 %v351_v19, 16  ;;  %v560_v20 = vshrl.u32 %v352_v45, 16  ;;  %v2072_v10 = vld [vmem:[#allocation2 + $0x2c] sm:$0x1]  ;;  %v10534_v35 = vcombine.low %v1793_v5, %v1803_v4 }
  0xff   : > { %2338 = vst.msk [vmem:[#allocation3 + $0x58] sm:$0xff] %vm1496_vm15, %v10559_v55  ;;  %v1811_v3 = vor.u32 %v1810_v22, %v1807_v12  ;;  %v1820_v59 = vrot.slane %v1818_v2, 4  ;;  %v563_v1 = vshll.u32 %v352_v45, 16  ;;  %v1547_v7 = vld [vmem:[#allocation2 + $0x88] sm:$0xf]  ;;  %v1826_v16 = vrot.slane %v1824_v50, 5 }
 0x100   : > { %v554_v24 = vrot.slane %v552_v46, 7  ;;  %v562_v34 = vrot.slane %v560_v20, 7  ;;  %v10544_v54 = vrot.slane %v2070_v62, 9  ;;  %v1546_v36 = vld [vmem:[#allocation2 + $0x84] sm:$0xf]  ;;  %v2183_v31 = vrot.slane %v2071_v57, 5 }
 0x101   : > { %2012 = vrot.lane.b32.xlu0 %v10533_v63, %s12117_s7  ;;  %v1812_v19 = vrot.slane %v1811_v3, 4  ;;  %v1821_v47 = vor.u32 %v1820_v59, %v1816_v17  ;;  %v2186_v5 = vrot.slane %v2072_v10, 5  ;;  %v1548_v22 = vld [vmem:[#allocation2 + $0x8c] sm:$0x1]  ;;  %v772_v46 = vld [vmem:[#allocation2 + $0x98] sm:$0x1] }
 0x102   : > { %2480 = vrot.lane.b32.xlu1 %v11918_v43, %s12117_s7  ;;  %v557_v4 = vor.u32 %v555_v27, %v554_v24  ;;  %v558_v55 = vrot.slane %v554_v24, 4  ;;  %v565_v12 = vor.u32 %v563_v1, %v562_v34  ;;  %v567_v45 = vrot.slane %v562_v34, 4  ;;  %v768_v43 = vld [vmem:[#allocation2 + $0x90] sm:$0xf]  ;;  %v11928_v10 = vld [vmem:[#allocation2 + $0x84] sm:$0xff]  }
 0x103   : > { %v1817_v63 = vsel %vm12533_vm12, %v1812_v19, %v1816_v17  ;;  %v1822_v2 = vrot.slane %v1821_v47, 4  ;;  %v2184_v62 = vsel %vm12675_vm0, %v10544_v54, %v2183_v31  ;;  %v2185_v50 = vrot.slane %v2183_v31, 4  ;;  %v353_v59 = vld [vmem:[%s12369_s30 + $0x60] sm:$0xf]  ;;  %v354_v24 = vld [vmem:[%s12369_s30 + $0x64] sm:$0xf] }
 0x104   : > { %v566_v57 = vsel %vm12341_vm4, %v558_v55, %v565_v12  ;;  %v1829_v27 = vshrl.u32 %v1546_v36, 16  ;;  %v1832_v20 = vshll.u32 %v1546_v36, 16  ;;  %v1838_v3 = vshll.u32 %v1547_v7, 16  ;;  %v355_v47 = vld [vmem:[%s12369_s30 + $0x68] sm:$0xf] }
 0x105   : > { %2014 = vrot.lane.b32.xlu0 %v10534_v35, %s12117_s7  ;;  %v1827_v31 = vsel %vm12533_vm12, %v1822_v2, %v1826_v16  ;;  %771 = vst.msk [vmem:[#allocation2 + $0x94] sm:$0xf] %vm685_vm7, %v566_v57  ;;  %v2187_v17 = vsel %vm12675_vm0, %v2185_v50, %v2186_v5  ;;  %v1842_v35 = vshrl.u32 %v1547_v7, 16  ;;  %v1848_v1 = vshll.u32 %v1548_v22, 16  ;;  %v356_v16 = vld [vmem:[%s12369_s30 + $0x6c] sm:$0xf] }
 0x106   : > { %2482 = vrot.lane.b32.xlu1 %v11923_v18, %s12117_s7  ;;  %v10535_v34 = vcombine.low %v1817_v63, %v1827_v31  ;;  %v10560_v54 = vcombine.low %v2184_v62, %v2187_v17  ;;  %v1831_v19 = vrot.slane %v1829_v27, 4  ;;  %v1834_v36 = vrot.slane %v1832_v20, 5  ;;  %v775_v62 = vld [vmem:[#allocation2 + $0x9c] sm:$0xf] }
 0x107   : > { %v1840_v55 = vrot.slane %v1838_v3, 5  ;;  %v1844_v12 = vrot.slane %v1842_v35, 4  ;;  %v1850_v18 = vrot.slane %v1848_v1, 5  ;;  %v769_v58 = vsel %vm12414_vm9, %v557_v4, %v768_v43  ;;  %v11941_v43 = vld [vmem:[#allocation2 + $0x60] sm:$0xff]  }
 0x108   : > { %2339 = vst.msk [vmem:[#allocation3 + $0x80] sm:$0xff] %vm1496_vm15, %v10560_v54  ;;  %v1835_v5 = vor.u32 %v1834_v36, %v1831_v19  ;;  %770 = vst [vmem:[#allocation2 + $0x90] sm:$0xf] %v769_v58  ;;  %v773_v7 = vsel %vm12405_vm8, %v567_v45, %v772_v46  ;;  %v569_v22 = vshrl.u32 %v353_v59, 16  ;;  %v572_v63 = vshll.u32 %v353_v59, 16 }
 0x109   : > { %2016 = vrot.lane.b32.xlu0 %v10535_v34, %s12117_s7  ;;  %v1845_v2 = vor.u32 %v1844_v12, %v1840_v55  ;;  %774 = vst [vmem:[#allocation2 + $0x98] sm:$0x1] %v773_v7  ;;  %v577_v50 = vshrl.u32 %v354_v24, 16  ;;  %v580_v57 = vshll.u32 %v354_v24, 16  ;;  %v586_v4 = vshrl.u32 %v355_v47, 16  ;;  %1505 = vst.msk [vmem:[#allocation3 + $0x140] sm:$0xff] %vm1496_vm15, %v11941_v43 }
 0x10a   : > { %2484 = vrot.lane.b32.xlu1 %v11928_v10, %s12117_s7  ;;  %v1836_v27 = vrot.slane %v1835_v5, 4  ;;  %v571_v20 = vrot.slane %v569_v22, 7  ;;  %v779_v3 = vld [vmem:[#allocation2 + $0xa4] sm:$0x1]  ;;  %v589_v31 = vshll.u32 %v355_v47, 16  ;;  %v594_v17 = vshrl.u32 %v356_v16, 16 }
 0x10b   : > { %v2073_v58 = vld [vmem:[#allocation2 + $0x30] sm:$0xe]  ;;  %v1846_v35 = vrot.slane %v1845_v2, 4  ;;  %v579_v1 = vrot.slane %v577_v50, 7  ;;  %v588_v45 = vrot.slane %v586_v4, 7  ;;  %v597_v46 = vshll.u32 %v356_v16, 16 }
 0x10c   : > { %v2074_v59 = vld [vmem:[#allocation2 + $0x34] sm:$0xf]  ;;  %v2075_v34 = vld [vmem:[#allocation2 + $0x38] sm:$0x1]  ;;  %v782_v10 = vld [vmem:[#allocation2 + $0xa8] sm:$0xf]  ;;  %v1841_v24 = vsel %vm12533_vm12, %v1836_v27, %v1840_v55  ;;  %v574_v54 = vor.u32 %v572_v63, %v571_v20 }
 0x10d   : > { %v575_v19 = vrot.slane %v571_v20, 4  ;;  %v596_v36 = vrot.slane %v594_v17, 7  ;;  %v2076_v12 = vld [vmem:[#allocation2 + $0x3c] sm:$0xe]  ;;  %v2077_v5 = vld [vmem:[#allocation2 + $0x40] sm:$0xf]  ;;  %v1851_v47 = vsel %vm12533_vm12, %v1846_v35, %v1850_v18  ;;  %v582_v7 = vor.u32 %v580_v57, %v579_v1 }
 0x10e   : > { %v584_v22 = vrot.slane %v579_v1, 4  ;;  %v591_v16 = vor.u32 %v589_v31, %v588_v45  ;;  %v2078_v2 = vld [vmem:[#allocation2 + $0x44] sm:$0x1]  ;;  %v786_v50 = vld [vmem:[#allocation2 + $0xb0] sm:$0x1]  ;;  %v10536_v4 = vcombine.low %v1841_v24, %v1851_v47  ;;  %v776_v43 = vsel %vm12414_vm9, %v574_v54, %v775_v62 }
 0x10f   : > { %v592_v41 = vrot.slane %v588_v45, 4  ;;  %v599_v55 = vor.u32 %v597_v46, %v596_v36  ;;  %v11943_v63 = vld [vmem:[#allocation2 + $0x6c] sm:$0xff]   ;;  %777 = vst [vmem:[#allocation2 + $0x9c] sm:$0xf] %v776_v43  ;;  %v583_v27 = vsel %vm12341_vm4, %v575_v19, %v582_v7  ;;  %v601_v57 = vrot.slane %v596_v36, 4 }
 0x110   : > { %v780_v18 = vsel %vm12405_vm8, %v584_v22, %v779_v3  ;;  %v10545_v20 = vrot.slane %v2073_v58, 9  ;;  %v357_v31 = vld [vmem:[%s12369_s30 + $0x70] sm:$0xf]  ;;  %2018 = vrot.lane.b32.xlu0 %v10536_v4, %s12117_s7  ;;  %778 = vst.msk [vmem:[#allocation2 + $0xa0] sm:$0xf] %vm685_vm7, %v583_v27  ;;  %v2190_v17 = vrot.slane %v2074_v59, 5  ;;  %v783_v1 = vsel %vm12414_vm9, %v591_v16, %v782_v10 }
 0x111   : > { %781 = vst [vmem:[#allocation2 + $0xa4] sm:$0x1] %v780_v18  ;;  %v600_v62 = vsel %vm12341_vm4, %v592_v41, %v599_v55  ;;  %v2193_v35 = vrot.slane %v2075_v34, 5  ;;  %v358_v45 = vld [vmem:[%s12369_s30 + $0x74] sm:$0xf]  ;;  %1506 = vst.msk [vmem:[#allocation3 + $0x168] sm:$0xff] %vm1496_vm15, %v11943_v63  ;;  %v787_v54 = vsel %vm12405_vm8, %v601_v57, %v786_v50 }
 0x112   : > { %v2079_v46 = vld [vmem:[#allocation2 + $0x48] sm:$0xe]  ;;  %785 = vst.msk [vmem:[#allocation2 + $0xac] sm:$0xf] %vm685_vm7, %v600_v62  ;;  %784 = vst [vmem:[#allocation2 + $0xa8] sm:$0xf] %v783_v1  ;;  %v2191_v59 = vsel %vm12675_vm0, %v10545_v20, %v2190_v17 }
 0x113   : > { %v10546_v3 = vrot.slane %v2076_v12, 9  ;;  %v2197_v58 = vrot.slane %v2077_v5, 5  ;;  %v2200_v24 = vrot.slane %v2078_v2, 5  ;;  %v2080_v41 = vld [vmem:[#allocation2 + $0x4c] sm:$0xf]  ;;  %v2192_v34 = vrot.slane %v2190_v17, 4 }
 0x114   : > { %788 = vst [vmem:[#allocation2 + $0xb0] sm:$0x1] %v787_v54  ;;  %v603_v10 = vshrl.u32 %v357_v31, 16  ;;  %v606_v19 = vshll.u32 %v357_v31, 16  ;;  %v2081_v36 = vld [vmem:[#allocation2 + $0x50] sm:$0x1] }
 0x115   : > { %v2198_v47 = vsel %vm12675_vm0, %v10546_v3, %v2197_v58  ;;  %v2199_v12 = vrot.slane %v2197_v58, 4  ;;  %v789_v7 = vld [vmem:[#allocation2 + $0xb4] sm:$0xf]  ;;  %v611_v5 = vshrl.u32 %v358_v45, 16  ;;  %v614_v22 = vshll.u32 %v358_v45, 16  ;;  %v11944_v45 = vld [vmem:[#allocation2 + $0x78] sm:$0xff]  }
 0x116   : > { %v359_v16 = vld [vmem:[%s12369_s30 + $0x78] sm:$0xf]  ;;  %v2194_v2 = vsel %vm12675_vm0, %v2192_v34, %v2193_v35  ;;  %v605_v50 = vrot.slane %v603_v10, 7  ;;  %v10547_v4 = vrot.slane %v2079_v46, 9  ;;  %v2204_v43 = vrot.slane %v2080_v41, 5  ;;  %1507 = vst.msk [vmem:[#allocation3 + $0x190] sm:$0xff] %vm1496_vm15, %v11944_v45 }
 0x117   : > { %v360_v55 = vld [vmem:[%s12369_s30 + $0x7c] sm:$0xf]  ;;  %v10561_v63 = vcombine.low %v2191_v59, %v2194_v2  ;;  %v2201_v27 = vsel %vm12675_vm0, %v2199_v12, %v2200_v24  ;;  %v613_v18 = vrot.slane %v611_v5, 7  ;;  %v2207_v57 = vrot.slane %v2081_v36, 5  ;;  %v2082_v54 = vld [vmem:[#allocation2 + $0x54] sm:$0xe] }
 0x118   : > { %v10562_v20 = vcombine.low %v2198_v47, %v2201_v27  ;;  %v608_v31 = vor.u32 %v606_v19, %v605_v50  ;;  %v793_v62 = vld [vmem:[#allocation2 + $0xbc] sm:$0x1]  ;;  %v609_v17 = vrot.slane %v605_v50, 4  ;;  %v2205_v1 = vsel %vm12675_vm0, %v10547_v4, %v2204_v43  ;;  %v13198_v41 = vld [vmem:[#allocation2 + $0x54] sm:$0xe] }
 0x119   : > { %2340 = vst.msk [vmem:[#allocation3 + $0xa8] sm:$0xff] %vm1496_vm15, %v10561_v63  ;;  %v618_v35 = vrot.slane %v613_v18, 4  ;;  %v616_v46 = vor.u32 %v614_v22, %v613_v18  ;;  %v2206_v3 = vrot.slane %v2204_v43, 4  ;;  %v620_v58 = vshrl.u32 %v359_v16, 16  ;;  %v13200_v24 = vld [vmem:[#allocation2 + $0x5c] sm:$0x1] }
 0x11a   : > { %16540 = vst [vmem:[#allocation9_spill] sm:$0xff] %v13200_v24  ;;  %v13202_v59 = vld [vmem:[#allocation2 + $0x70] sm:$0xf]  ;;  %2341 = vst.msk [vmem:[#allocation3 + $0xd0] sm:$0xff] %vm1496_vm15, %v10562_v20  ;;  %v790_v34 = vsel %vm12414_vm9, %v608_v31, %v789_v7  ;;  %v623_v10 = vshll.u32 %v359_v16, 16  ;;  %v628_v19 = vshrl.u32 %v360_v55, 16 }
 0x11b   : > { %16541 = vst [vmem:[#allocation10_spill] sm:$0xff] %v13202_v59  ;;  %v631_v36 = vshll.u32 %v360_v55, 16  ;;  %791 = vst [vmem:[#allocation2 + $0xb4] sm:$0xf] %v790_v34  ;;  %v794_v47 = vsel %vm12405_vm8, %v618_v35, %v793_v62  ;;  %v617_v12 = vsel %vm12341_vm4, %v609_v17, %v616_v46  ;;  %v2208_v5 = vsel %vm12675_vm0, %v2206_v3, %v2207_v57  ;;  %v796_v2 = vld [vmem:[#allocation2 + $0xc0] sm:$0xf] }
 0x11c   : > { %v622_v22 = vrot.slane %v620_v58, 7  ;;  %v2083_v50 = vld [vmem:[#allocation2 + $0x58] sm:$0xf]  ;;  %795 = vst [vmem:[#allocation2 + $0xbc] sm:$0x1] %v794_v47  ;;  %v10563_v7 = vcombine.low %v2205_v1, %v2208_v5  ;;  %v13215_v16 = vrot.slane %v628_v19, 7 }
 0x11d   : > { %792 = vst.msk [vmem:[#allocation2 + $0xb8] sm:$0xf] %vm685_vm7, %v617_v12  ;;  %v2084_v4 = vld [vmem:[#allocation2 + $0x5c] sm:$0x1]  ;;  %v10548_v43 = vrot.slane %v2082_v54, 9  ;;  %v2211_v55 = vrot.slane %v2083_v50, 5 }
 0x11e   : > { %16542 = vst [vmem:[#allocation11_spill] sm:$0xff] %v13215_v16  ;;  %v13219_v63 = vrot.slane %v16488_v48, 4  ;;  %v13221_v27 = vld [vmem:[#allocation2 + $0x60] sm:$0xe]  ;;  %v625_v18 = vor.u32 %v623_v10, %v622_v22  ;;  %v626_v57 = vrot.slane %v622_v22, 4  ;;  %v2214_v20 = vrot.slane %v2084_v4, 5 }
 0x11f   : > { %16543 = vst [vmem:[#allocation12_spill] sm:$0xff] %v13221_v27  ;;  %v13223_v31 = vld [vmem:[#allocation2 + $0x68] sm:$0x1]  ;;  %v16486_v62 = vrot.slane %v13202_v59, 5  ;;  %v13226_v17 = vld [vmem:[#allocation2 + $0x7c] sm:$0xf]  ;;  %v633_v1 = vor.u32 %v631_v36, %v13215_v16  ;;  %v2212_v45 = vsel %vm12675_vm0, %v10548_v43, %v2211_v55 }
 0x120   : > { %16544 = vst [vmem:[#allocation13_spill] sm:$0xff] %v13223_v31  ;;  %16545 = vst [vmem:[#allocation14_spill] sm:$0xff] %v13226_v17  ;;  %v2213_v35 = vrot.slane %v2211_v55, 4  ;;  %v13235_v3 = vrot.slane %v16487_v53, 4  ;;  %v13238_v54 = vld [vmem:[#allocation2 + $0x88] sm:$0xf]  ;;  %v797_v34 = vsel %vm12414_vm9, %v625_v18, %v796_v2 }
 0x121   : > { %2342 = vst.msk [vmem:[#allocation3 + $0xf8] sm:$0xff] %vm1496_vm15, %v10563_v7  ;;  %16547 = vst [vmem:[#allocation16_spill] sm:$0xff] %v13238_v54  ;;  %v11945_v10 = vld [vmem:[#allocation2 + $0x84] sm:$0xff]   ;;  %v16548_v36 = vrot.slane %v13099_v26, 5  ;;  %v13247_v12 = vld [vmem:[#allocation2 + $0x6c] sm:$0xe]  ;;  %v634_v5 = vsel %vm12341_vm4, %v626_v57, %v633_v1 }
 0x122   : > { %16546 = vst [vmem:[#allocation15_spill] sm:$0xff] %v13235_v3  ;;  %16550 = vst [vmem:[#allocation18_spill] sm:$0xff] %v13247_v12  ;;  %v2215_v22 = vsel %vm12675_vm0, %v2213_v35, %v2214_v20  ;;  %v3505_v50 = vld [vmem:[#allocation2 + $0x18] sm:$0xf]  ;;  %v13254_v2 = vld [vmem:[#allocation2 + $0x74] sm:$0x1] }
 0x123   : > { %v13245_v47 = vrot.slane %v16548_v36, 4  ;;  %798 = vst [vmem:[#allocation2 + $0xc0] sm:$0xf] %v797_v34  ;;  %16551 = vst [vmem:[#allocation19_spill] sm:$0xff] %v13254_v2  ;;  %v13256_v7 = vld [vmem:[#allocation2 + $0x78] sm:$0xe]  ;;  %v10564_v43 = vcombine.low %v2212_v45, %v2215_v22 }
 0x124   : > { %16552 = vst [vmem:[#allocation20_spill] sm:$0xff] %v13256_v7  ;;  %v16491_v4 = vrot.slane %v13226_v17, 5  ;;  %799 = vst.msk [vmem:[#allocation2 + $0xc4] sm:$0xf] %vm685_vm7, %v634_v5  ;;  %v13263_v55 = vrot.slane %v16486_v62, 4  ;;  %v16496_v57 = vrot.slane %v13238_v54, 5 }
 0x125   : > { %16549 = vst [vmem:[#allocation17_spill] sm:$0xff] %v13245_v47  ;;  %1508 = vst.msk [vmem:[#allocation3 + $0x1b8] sm:$0xff] %vm1496_vm15, %v11945_v10  ;;  %v13265_v18 = vld [vmem:[#allocation2 + $0x80] sm:$0x1]  ;;  %v3506_v20 = vld [vmem:[#allocation2 + $0x1c] sm:$0xf] }
 0x126   : > { %16553 = vst [vmem:[#allocation21_spill] sm:$0xff] %v13263_v55  ;;  %16554 = vst [vmem:[#allocation22_spill] sm:$0xff] %v13265_v18  ;;  %v3041_v35 = vld [vmem:[#allocation2 + $0x10] sm:$0xf]  ;;  %v3554_v34 = vshrl.u32 %v3505_v50, 16  ;;  %v3557_v36 = vshll.u32 %v3505_v50, 16 }
 0x127   : > { %2343 = vst.msk [vmem:[#allocation3 + $0x120] sm:$0xff] %vm1496_vm15, %v10564_v43  ;;  %v13273_v45 = vld [vmem:[%s16477_s2 + $0x100] sm:$0xff]   ;;  %v13279_v62 = vld [vmem:[#allocation2 + $0x1c] sm:$0xf]  ;;  %v13283_v1 = vrot.slane %v16491_v4, 4  ;;  %v3563_v44 = vshll.u32 %v3506_v20, 16 }
 0x128   : > { %v13277_v22 = vld [vmem:[#allocation2 + $0x84] sm:$0xe]  ;;  %v3040_v50 = vld [vmem:[#allocation2 + $0xc] sm:$0xe]  ;;  %v3567_v19 = vshrl.u32 %v3506_v20, 16  ;;  %11802 = vmatprep.subr.bf16.mxu0 %v13273_v45  ;;  %v13289_v10 = vrot.slane %v16496_v57, 4 }
 0x129   : > { %16555 = vst [vmem:[#allocation23_spill] sm:$0xff] %v13277_v22  ;;  %16556 = vst [vmem:[#allocation24_spill] sm:$0xff] %v13283_v1  ;;  %v3042_v5 = vld [vmem:[#allocation2 + $0x14] sm:$0x1]  ;;  %v3138_v58 = vrot.slane %v3041_v35, 5  ;;  %v3556_v48 = vrot.slane %v3554_v34, 4 }
 0x12a   : > { %16557 = vst [vmem:[#allocation25_spill] sm:$0xff] %v13289_v10  ;;  %v3508_v46 = vld [vmem:[#allocation2 + $0x24] sm:$0xf]  ;;  %v3559_v25 = vrot.slane %v3557_v36, 5  ;;  %v3145_v4 = vrot.slane %v13279_v62, 5  ;;  %v10605_v18 = vrot.slane %v3040_v50, 9 }
 0x12b   : > { %v3509_v1 = vld [vmem:[#allocation2 + $0x28] sm:$0xf]  ;;  %v3507_v20 = vld [vmem:[#allocation2 + $0x20] sm:$0x1]  ;;  %v13294_v17 = vrot.slane %v3563_v44, 5  ;;  %v3569_v54 = vrot.slane %v3567_v19, 4 }
 0x12c   : > { %v3045_v7 = vld [vmem:[#allocation2 + $0x20] sm:$0x1]  ;;  %v3578_v57 = vshrl.u32 %v3508_v46, 16  ;;  %v3581_v10 = vshll.u32 %v3508_v46, 16  ;;  %v3140_v55 = vrot.slane %v3138_v58, 4  ;;  %v3141_v35 = vrot.slane %v3042_v5, 5 }
 0x12d   : > { %v3043_v2 = vld [vmem:[#allocation2 + $0x18] sm:$0xe]  ;;  %v3587_v12 = vshll.u32 %v3509_v1, 16  ;;  %v3591_v53 = vshrl.u32 %v3509_v1, 16  ;;  %v3512_v34 = vld [vmem:[#allocation2 + $0x34] sm:$0xf]  ;;  %v3560_v36 = vor.u32 %v3559_v25, %v3556_v48  ;;  %v13313_v25 = vsel %vm12675_vm0, %v10605_v18, %v3138_v58 }
 0x12e   : > { %v3573_v22 = vshll.u32 %v3507_v20, 16  ;;  %v3147_v62 = vrot.slane %v3145_v4, 4  ;;  %v3148_v59 = vrot.slane %v3045_v7, 5  ;;  %v3511_v47 = vld [vmem:[#allocation2 + $0x30] sm:$0xf]  ;;  %v16558_v50 = vrot.slane %v12931_v21, 5 }
 0x12f   : > { %v16559_v43 = vrot.slane %v12956_v61, 9  ;;  %v16560_v46 = vrot.slane %v12962_v9, 5  ;;  %16561 = vst [vmem:[#allocation26_spill] sm:$0xff] %v13313_v25  ;;  %v3510_v48 = vld [vmem:[#allocation2 + $0x2c] sm:$0x1]  ;;  %v3611_v21 = vshll.u32 %v3512_v34, 16  ;;  %v3570_v61 = vor.u32 %v3569_v54, %v13294_v17 }
 0x130   : > { %v3046_v7 = vld [vmem:[#allocation2 + $0x24] sm:$0xe]  ;;  %v11964_v1 = vld [vmem:[#allocation2 + $0x18] sm:$0xff]   ;;  %v3580_v5 = vrot.slane %v3578_v57, 4  ;;  %v3047_v20 = vld [vmem:[#allocation2 + $0x28] sm:$0xf]  ;;  %v13321_v58 = vsel %vm12675_vm0, %v3140_v55, %v3141_v35  ;;  %v13325_v54 = vsel %vm12675_vm0, %v3147_v62, %v3148_v59 }
 0x131   : > { %v13302_v19 = vsel %vm12675_vm0, %v16559_v43, %v16558_v50  ;;  %v13309_v44 = vsel %vm12675_vm0, %v13003_v14, %v16560_v46  ;;  %v3583_v43 = vrot.slane %v3581_v10, 5  ;;  %v3615_v50 = vshrl.u32 %v3512_v34, 16  ;;  %v3048_v27 = vld [vmem:[#allocation2 + $0x2c] sm:$0x1]  ;;  %3489 = vst.msk [vmem:[#allocation3 + $0x18] sm:$0xff] %vm1496_vm15, %v11964_v1  ;;  %16562 = vst [vmem:[#allocation27_spill] sm:$0xff] %v13321_v58 }
 0x132   : > { %v13316_v9 = vrot.slane %v3587_v12, 5  ;;  %v3593_v31 = vrot.slane %v3591_v53, 4  ;;  %v3602_v14 = vshrl.u32 %v3511_v47, 16  ;;  %v3605_v46 = vshll.u32 %v3511_v47, 16  ;;  %16563 = vst [vmem:[#allocation28_spill] sm:$0xff] %v13325_v54  ;;  %v11967_v10 = vld [vmem:[#allocation2 + $0x24] sm:$0xff]  }
 0x133   : > { %v3561_v18 = vrot.slane %v3560_v36, 4  ;;  %v10606_v26 = vrot.slane %v3043_v2, 9  ;;  %v3513_v57 = vld [vmem:[#allocation2 + $0x38] sm:$0x1]  ;;  %v3597_v12 = vshll.u32 %v3510_v48, 16  ;;  %v3152_v34 = vrot.slane %v3047_v20, 5 }
 0x134   : > { %v13327_v53 = vrot.slane %v3611_v21, 5  ;;  %v3617_v37 = vrot.slane %v3615_v50, 4  ;;  %v3050_v47 = vld [vmem:[#allocation2 + $0x34] sm:$0xf]  ;;  %v3571_v16 = vrot.slane %v3570_v61, 4  ;;  %v3584_v1 = vor.u32 %v3583_v43, %v3580_v5  ;;  %3490 = vst.msk [vmem:[#allocation3 + $0x40] sm:$0xff] %vm1496_vm15, %v11967_v10  ;;  %v2465_v5 = vpop.permute.xlu1 %2464 }
 0x135   : > { %v10607_v3 = vrot.slane %v3046_v7, 9  ;;  %v3155_v24 = vrot.slane %v3048_v27, 5  ;;  %v3594_v2 = vor.u32 %v3593_v31, %v13316_v9  ;;  %v3604_v55 = vrot.slane %v3602_v14, 4  ;;  %v3049_v21 = vld [vmem:[#allocation2 + $0x30] sm:$0xe]  ;;  %2512 = vst.msk [vmem:[#allocation3 + $0x8] sm:$0xff] %vm2044_vm11, %v2465_v5 }
 0x136   : > { %v3607_v35 = vrot.slane %v3605_v46, 5  ;;  %v3621_v59 = vshll.u32 %v3513_v57, 16  ;;  %v3575_v62 = vrot.slane %v3573_v22, 5  ;;  %v13335_v48 = vsel %vm12675_vm0, %v10606_v26, %v3145_v4  ;;  %v3051_v20 = vld [vmem:[#allocation2 + $0x38] sm:$0x1] }
 0x137   : > { %16564 = vst [vmem:[#allocation29_spill] sm:$0xff] %v13335_v48  ;;  %v3159_v61 = vrot.slane %v3050_v47, 5  ;;  %v3566_v27 = vsel %vm12533_vm12, %v3561_v18, %v13294_v17  ;;  %v3154_v7 = vrot.slane %v3152_v34, 4  ;;  %v3618_v43 = vor.u32 %v3617_v37, %v13327_v53  ;;  %v3514_v50 = vld [vmem:[#allocation2 + $0x3c] sm:$0xf] }
 0x138   : > { %v3576_v26 = vsel %vm12533_vm12, %v3571_v16, %v3575_v62  ;;  %v3585_v4 = vrot.slane %v3584_v1, 4  ;;  %v3599_v22 = vrot.slane %v3597_v12, 5  ;;  %v13348_v14 = vsel %vm12675_vm0, %v10607_v3, %v3152_v34  ;;  %v3515_v17 = vld [vmem:[#allocation2 + $0x40] sm:$0xf]  ;;  %v3517_v10 = vld [vmem:[#allocation2 + $0x48] sm:$0xf]  ;;  %v2467_v12 = vpop.permute.xlu0 %2466 }
 0x139   : > { %16565 = vst [vmem:[#allocation30_spill] sm:$0xff] %v13348_v14  ;;  %v3595_v46 = vrot.slane %v3594_v2, 4  ;;  %v13352_v18 = vsel %vm12675_vm0, %v3154_v7, %v3155_v24  ;;  %v3608_v37 = vor.u32 %v3607_v35, %v3604_v55  ;;  %v3623_v57 = vrot.slane %v3621_v59, 5  ;;  %v3518_v47 = vld [vmem:[#allocation2 + $0x4c] sm:$0xf]  ;;  %v11970_v1 = vld [vmem:[#allocation2 + $0x30] sm:$0xff]  }
 0x13a   : > { %16566 = vst [vmem:[#allocation31_spill] sm:$0xff] %v13352_v18  ;;  %v10608_v5 = vrot.slane %v3049_v21, 9  ;;  %v3161_v31 = vrot.slane %v3159_v61, 4  ;;  %v3162_v36 = vrot.slane %v3051_v20, 5  ;;  %v3626_v16 = vshrl.u32 %v3514_v50, 16  ;;  %2513 = vst.msk [vmem:[#allocation3 + $0x30] sm:$0xff] %vm2044_vm11, %v2467_v12 }
 0x13b   : > { %v3619_v62 = vrot.slane %v3618_v43, 4  ;;  %v3629_v54 = vshll.u32 %v3514_v50, 16  ;;  %v3635_v3 = vshll.u32 %v3515_v17, 16  ;;  %v3639_v34 = vshrl.u32 %v3515_v17, 16  ;;  %3491 = vst.msk [vmem:[#allocation3 + $0x68] sm:$0xff] %vm1496_vm15, %v11970_v1 }
 0x13c   : > { %v3650_v2 = vshrl.u32 %v3517_v10, 16  ;;  %v3653_v48 = vshll.u32 %v3517_v10, 16  ;;  %v3659_v24 = vshll.u32 %v3518_v47, 16  ;;  %v3663_v7 = vshrl.u32 %v3518_v47, 16  ;;  %v13365_v43 = vld [vmem:[#allocation2 + $0x44] sm:$0x1]  ;;  %v1176_v10 = vpop.permute.xlu0 %1175 }
 0x13d   : > { %v13356_v55 = vcombine.low %v3566_v27, %v3576_v26  ;;  %v3590_v35 = vsel %vm12533_vm12, %v3585_v4, %v13316_v9  ;;  %v3600_v59 = vsel %vm12533_vm12, %v3595_v46, %v3599_v22  ;;  %v13367_v20 = vld [vmem:[#allocation2 + $0x3c] sm:$0xe]  ;;  %v3609_v50 = vrot.slane %v3608_v37, 4  ;;  %v3520_v26 = vld [vmem:[#allocation2 + $0x54] sm:$0xf]  ;;  %v4339_v22 = vld [vmem:[#allocation3 + $0x8] sm:$0xff] }
 0x13e   : > { %v13371_v17 = vsel %vm12675_vm0, %v10608_v5, %v3159_v61  ;;  %v13375_v27 = vsel %vm12675_vm0, %v3161_v31, %v3162_v36  ;;  %v3628_v9 = vrot.slane %v3626_v16, 4  ;;  %v3521_v4 = vld [vmem:[#allocation2 + $0x58] sm:$0xf]  ;;  %v3624_v47 = vsel %vm12533_vm12, %v3619_v62, %v3623_v57  ;;  %v11946_v61 = vld [vmem:[%s16477_s2 + $0x108] sm:$0xff]   ;;  %4790 = vmatprep.mubr.bf16.mxu0 %v4339_v22  ;;  %v2469_v36 = vpop.permute.xlu1 %2468  ;;  %1336 = vst.msk [vmem:[#allocation2 + $0x94] sm:$0xf] %vm1251_vm3, %v1176_v10 }
 0x13f   : > { %16567 = vst [vmem:[#allocation32_spill] sm:$0xff] %v13356_v55  ;;  %16568 = vst [vmem:[#allocation33_spill] sm:$0xff] %v13371_v17  ;;  %v4338_v46 = vld [vmem:[#allocation3] sm:$0xff]  ;;  %v3631_v1 = vrot.slane %v3629_v54, 5  ;;  %v13379_v12 = vrot.slane %v3635_v3, 5  ;;  %v3641_v37 = vrot.slane %v3639_v34, 4  ;;  %v13390_v14 = vcombine.low %v3590_v35, %v3600_v59 }
 0x140   : > { %16569 = vst [vmem:[#allocation34_spill] sm:$0xff] %v13375_v27  ;;  %v13385_v31 = vld [vmem:[#allocation2 + $0x40] sm:$0xf]  ;;  %v3652_v5 = vrot.slane %v3650_v2, 4  ;;  %v3655_v16 = vrot.slane %v3653_v48, 5  ;;  %v13387_v21 = vrot.slane %v3659_v24, 5  ;;  %4791 = vmatmul.mubr.bf16.vlgmr.msra.gmra.mrb[0].mxu0 %v4338_v46  ;;  %v3614_v22 = vsel %vm12533_vm12, %v3609_v50, %v13327_v53 }
 0x141   : > { %v3665_v18 = vrot.slane %v3663_v7, 4  ;;  %2514 = vst.msk [vmem:[#allocation3 + $0x58] sm:$0xff] %vm2044_vm11, %v2469_v36  ;;  %v3519_v54 = vld [vmem:[#allocation2 + $0x50] sm:$0x1]  ;;  %v3674_v57 = vshrl.u32 %v3520_v26, 16  ;;  %v3677_v62 = vshll.u32 %v3520_v26, 16  ;;  %11803 = vmatpush3.bf16.msra.mxu0 %v13273_v45  ;;  %v13398_v7 = vcombine.low %v3614_v22, %v3624_v47 }
 0x142   : > { %v3683_v3 = vshll.u32 %v3521_v4, 16  ;;  %v3687_v34 = vshrl.u32 %v3521_v4, 16  ;;  %16570 = vst [vmem:[#allocation35_spill] sm:$0xff] %v13390_v14  ;;  %v3645_v2 = vshll.u32 %v13365_v43, 16  ;;  %v10609_v48 = vrot.slane %v13367_v20, 9  ;;  %v4344_v24 = vld [vmem:[#allocation3 + $0x30] sm:$0xff]  ;;  %11804 = vmatprep.subr.bf16.mxu0 %v11946_v61  ;;  %v1999_v53 = vpop.permute.xlu1 %1998 }
 0x143   : > { %16571 = vst [vmem:[#allocation36_spill] sm:$0xff] %v13398_v7  ;;  %v3632_v46 = vor.u32 %v3631_v1, %v3628_v9  ;;  %v3166_v35 = vrot.slane %v13385_v31, 5  ;;  %v3523_v59 = vld [vmem:[#allocation2 + $0x60] sm:$0xf]  ;;  %v3524_v4 = vld [vmem:[#allocation2 + $0x64] sm:$0xf]  ;;  %4798 = vmatprep.mubr.bf16.mxu0 %v4344_v24  ;;  %v3642_v43 = vor.u32 %v3641_v37, %v13379_v12  ;;  %v3656_v20 = vor.u32 %v3655_v16, %v3652_v5  ;;  %v2471_v37 = vpop.permute.xlu0 %2470 }
 0x144   : > { %v3054_v50 = vld [vmem:[#allocation2 + $0x44] sm:$0x1]  ;;  %v3666_v45 = vor.u32 %v3665_v18, %v13387_v21  ;;  %v3669_v10 = vshll.u32 %v3519_v54, 16  ;;  %2046 = vst.msk [vmem:[#allocation3 + $0x28] sm:$0xff] %vm2044_vm11, %v1999_v53  ;;  %v3522_v47 = vld [vmem:[#allocation2 + $0x5c] sm:$0x1] }
 0x145   : > { %v3676_v36 = vrot.slane %v3674_v57, 4  ;;  %v3679_v22 = vrot.slane %v3677_v62, 5  ;;  %v13406_v9 = vrot.slane %v3683_v3, 5  ;;  %v3689_v1 = vrot.slane %v3687_v34, 4  ;;  %v1333_v31 = vld [vmem:[#allocation2 + $0x90] sm:$0xf]  ;;  %11805 = vmatpush3.bf16.msra.mxu0 %v11946_v61 }
 0x146   : > { %v3698_v26 = vshrl.u32 %v3523_v59, 16  ;;  %v3701_v27 = vshll.u32 %v3523_v59, 16  ;;  %v3707_v24 = vshll.u32 %v3524_v4, 16  ;;  %v3711_v17 = vshrl.u32 %v3524_v4, 16  ;;  %2515 = vst.msk [vmem:[#allocation3 + $0x80] sm:$0xff] %vm2044_vm11, %v2471_v37  ;;  %v1174_v54 = vpop.permute.xlu1 %1173  ;;  %11806 = vmatprep.subr.bf16.mxu0 %v11956_v33 }
 0x147   : > { %v3633_v7 = vrot.slane %v3632_v46, 4  ;;  %v3647_v5 = vrot.slane %v3645_v2, 5  ;;  %v3168_v16 = vrot.slane %v3166_v35, 4  ;;  %v3169_v18 = vrot.slane %v3054_v50, 5  ;;  %v1550_v53 = vld [vmem:[#allocation2 + $0x94] sm:$0xf]  ;;  %v2001_v55 = vpop.permute.xlu0 %2000 }
 0x148   : > { %v3643_v57 = vrot.slane %v3642_v43, 4  ;;  %v3657_v62 = vrot.slane %v3656_v20, 4  ;;  %v3671_v3 = vrot.slane %v3669_v10, 5  ;;  %v3693_v14 = vshll.u32 %v3522_v47, 16  ;;  %v1337_v59 = vld [vmem:[#allocation2 + $0x98] sm:$0x1] }
 0x149   : > { %v1334_v34 = vsel %vm12708_vm10, %v1174_v54, %v1333_v31  ;;  %v3667_v58 = vrot.slane %v3666_v45, 4  ;;  %v3680_v4 = vor.u32 %v3679_v22, %v3676_v36  ;;  %v3690_v61 = vor.u32 %v3689_v1, %v13406_v9  ;;  %v11972_v46 = vld [vmem:[#allocation2 + $0x3c] sm:$0xff]   ;;  %v3525_v47 = vld [vmem:[#allocation2 + $0x68] sm:$0x1]  ;;  %2047 = vst.msk [vmem:[#allocation3 + $0x50] sm:$0xff] %vm2044_vm11, %v2001_v55  ;;  %11807 = vmatpush3.bf16.msra.mxu0 %v11956_v33 }
 0x14a   : > { %1335 = vst [vmem:[#allocation2 + $0x90] sm:$0xf] %v1334_v34  ;;  %v3700_v2 = vrot.slane %v3698_v26, 4  ;;  %v3703_v50 = vrot.slane %v3701_v27, 5  ;;  %v13412_v25 = vrot.slane %v3707_v24, 5  ;;  %v3713_v37 = vrot.slane %v3711_v17, 4  ;;  %v1178_v27 = vpop.permute.xlu1 %1177 }
 0x14b   : > { %v1862_v43 = vshll.u32 %v1550_v53, 16  ;;  %v1866_v20 = vshrl.u32 %v1550_v53, 16  ;;  %v3638_v10 = vsel %vm12533_vm12, %v3633_v7, %v13379_v12  ;;  %v13419_v45 = vsel %vm12675_vm0, %v10609_v48, %v3166_v35  ;;  %3492 = vst.msk [vmem:[#allocation3 + $0x90] sm:$0xff] %vm1496_vm15, %v11972_v46  ;;  %v4343_v26 = vld [vmem:[#allocation3 + $0x28] sm:$0xff]  ;;  %v4349_v35 = vld [vmem:[#allocation3 + $0x58] sm:$0xff]  ;;  %v1180_v54 = vpop.permute.xlu0 %1179 }
 0x14c   : > { %v3648_v17 = vsel %vm12533_vm12, %v3643_v57, %v3647_v5  ;;  %v13427_v36 = vsel %vm12675_vm0, %v3168_v16, %v3169_v18  ;;  %v3662_v12 = vsel %vm12533_vm12, %v3657_v62, %v13387_v21  ;;  %v3695_v48 = vrot.slane %v3693_v14, 5  ;;  %4799 = vmatmul.mubr.bf16.gmra.mrb[4].mxu0 %v4343_v26  ;;  %v1340_v55 = vld [vmem:[#allocation2 + $0x9c] sm:$0xf]  ;;  %v13442_v18 = vld [vmem:[#allocation2 + $0x94] sm:$0xf] }
 0x14d   : > { %v1338_v7 = vsel %vm12702_vm5, %v1178_v27, %v1337_v59  ;;  %v3672_v22 = vsel %vm12533_vm12, %v3667_v58, %v3671_v3  ;;  %v3681_v1 = vrot.slane %v3680_v4, 4  ;;  %v3691_v31 = vrot.slane %v3690_v61, 4  ;;  %4806 = vmatprep.mubr.bf16.mxu0 %v4349_v35  ;;  %v13455_v4 = vld [vmem:[#allocation2 + $0x4c] sm:$0xf]  ;;  %v3536_v33 = vld [vmem:[#allocation2 + $0x94] sm:$0xf] }
 0x14e   : > { %1339 = vst [vmem:[#allocation2 + $0x98] sm:$0x1] %v1338_v7  ;;  %v3704_v24 = vor.u32 %v3703_v50, %v3700_v2  ;;  %v3714_v5 = vor.u32 %v3713_v37, %v13412_v25  ;;  %v3717_v16 = vshll.u32 %v3525_v47, 16  ;;  %v16572_v21 = vrot.slane %v12929_v23, 5  ;;  %v1182_v34 = vpop.permute.xlu1 %1181  ;;  %v1344_v23 = vld [vmem:[#allocation2 + $0xa4] sm:$0x1] }
 0x14f   : > { %v13444_v53 = vrot.slane %v1862_v43, 5  ;;  %v1868_v58 = vrot.slane %v1866_v20, 4  ;;  %v13446_v57 = vcombine.low %v3638_v10, %v3648_v17  ;;  %v10625_v62 = vcombine.low %v13419_v45, %v13427_v36  ;;  %1343 = vst.msk [vmem:[#allocation2 + $0xa0] sm:$0xf] %vm1251_vm3, %v1182_v34  ;;  %v13469_v20 = vld [vmem:[#allocation2 + $0x48] sm:$0xe]  ;;  %v1184_v7 = vpop.permute.xlu0 %1183 }
 0x150   : > { %v4151_v14 = vsel %vm12675_vm0, %v12953_v49, %v16572_v21  ;;  %v1341_v3 = vsel %vm12708_vm10, %v1180_v54, %v1340_v55  ;;  %v13452_v59 = vcombine.low %v3662_v12, %v3672_v22  ;;  %v1106_v49 = vrot.slane %v12883_v8, 4  ;;  %v13471_v10 = vld [vmem:[#allocation2 + $0x50] sm:$0x1]  ;;  %v4354_v54 = vld [vmem:[#allocation3 + $0x80] sm:$0xff] }
 0x151   : > { %v16573_v61 = vrot.slane %v12900_v0, 5  ;;  %v16574_v46 = vrot.slane %v12896_v56, 9  ;;  %1342 = vst [vmem:[#allocation2 + $0x9c] sm:$0xf] %v1341_v3  ;;  %v11931_v50 = vld [vmem:[#allocation2 + $0x90] sm:$0xff]   ;;  %v3686_v37 = vsel %vm12533_vm12, %v3681_v1, %v13406_v9  ;;  %v3696_v43 = vsel %vm12533_vm12, %v3691_v31, %v3695_v48  ;;  %v4348_v48 = vld [vmem:[#allocation3 + $0x50] sm:$0xff] }
 0x152   : > { %v3526_v0 = vld [vmem:[#allocation2 + $0x6c] sm:$0xf]  ;;  %v10686_v47 = vcombine.low %v13302_v19, %v13309_v44  ;;  %v4217_v27 = vrot.slane %v13442_v18, 5  ;;  %v1549_v26 = vld [vmem:[#allocation2 + $0x90] sm:$0xf]  ;;  %v13476_v17 = vrot.slane %v3704_v24, 4  ;;  %2486 = vrot.lane.b32.xlu1 %v11931_v50, %s12117_s7  ;;  %v1869_v22 = vor.u32 %v1868_v58, %v13444_v53  ;;  %v2003_v31 = vpop.permute.xlu1 %2002 }
 0x153   : > { %v4148_v2 = vsel %vm12675_vm0, %v16574_v46, %v16573_v61  ;;  %v13478_v12 = vrot.slane %v3714_v5, 4  ;;  %v13480_v9 = vrot.slane %v3717_v16, 5  ;;  %v1853_v35 = vshrl.u32 %v1549_v26, 16  ;;  %v11947_v19 = vld [vmem:[#allocation2 + $0x90] sm:$0xff]   ;;  %2048 = vst.msk [vmem:[#allocation3 + $0x78] sm:$0xff] %vm2044_vm11, %v2003_v31 }
 0x154   : > { %v10685_v56 = vcombine.low %v4148_v2, %v4151_v14  ;;  %v1856_v55 = vshll.u32 %v1549_v26, 16  ;;  %v3173_v1 = vrot.slane %v13455_v4, 5  ;;  %4322 = vst.msk [vmem:[#allocation3 + $0x48] sm:$0xff] %vm1496_vm15, %v10686_v47  ;;  %v1345_v44 = vsel %vm12702_vm5, %v1184_v7, %v1344_v23  ;;  %v13491_v5 = vld [vmem:[#allocation2 + $0x70] sm:$0xf]  ;;  %v11973_v14 = vld [vmem:[#allocation2 + $0x48] sm:$0xff]   ;;  %4807 = vmatmul.mubr.bf16.gmra.mrb[8].mxu0 %v4348_v48 }
 0x155   : > { %v13489_v24 = vcombine.low %v3686_v37, %v3696_v43  ;;  %v3722_v16 = vshrl.u32 %v3526_v0, 16  ;;  %v3725_v21 = vshll.u32 %v3526_v0, 16  ;;  %1346 = vst [vmem:[#allocation2 + $0xa4] sm:$0x1] %v1345_v44  ;;  %v1551_v58 = vld [vmem:[#allocation2 + $0x98] sm:$0x1]  ;;  %4814 = vmatprep.mubr.bf16.mxu0 %v4354_v54  ;;  %v3710_v37 = vsel %vm12533_vm12, %v13476_v17, %v13412_v25 }
 0x156   : > { %4321 = vst.msk [vmem:[#allocation3 + $0x20] sm:$0xff] %vm1496_vm15, %v10685_v56  ;;  %v1855_v3 = vrot.slane %v1853_v35, 4  ;;  %v1858_v34 = vrot.slane %v1856_v55, 5  ;;  %1509 = vst.msk [vmem:[#allocation3 + $0x1e0] sm:$0xff] %vm1496_vm15, %v11947_v19  ;;  %v16575_v23 = vrot.slane %v12982_v51, 5  ;;  %v16576_v4 = vrot.slane %v13009_v29, 9  ;;  %v2473_v7 = vpop.permute.xlu1 %2472 }
 0x157   : > { %v16577_v46 = vrot.slane %v13021_v38, 5  ;;  %v1872_v50 = vshll.u32 %v1551_v58, 16  ;;  %v10610_v51 = vrot.slane %v13469_v20, 9  ;;  %v3176_v29 = vrot.slane %v13471_v10, 5  ;;  %v13512_v43 = vld [vmem:[#allocation2 + $0x74] sm:$0x1]  ;;  %v1188_v38 = vpop.permute.xlu0 %1187 }
 0x158   : > { %v4162_v61 = vsel %vm12675_vm0, %v16576_v4, %v16575_v23  ;;  %3493 = vst.msk [vmem:[#allocation3 + $0xb8] sm:$0xff] %vm1496_vm15, %v11973_v14  ;;  %v1859_v0 = vor.u32 %v1858_v34, %v1855_v3  ;;  %v1870_v56 = vrot.slane %v1869_v22, 4  ;;  %v3175_v47 = vrot.slane %v3173_v1, 4  ;;  %v3529_v26 = vld [vmem:[#allocation2 + $0x78] sm:$0xf]  ;;  %v11934_v22 = vld [vmem:[#allocation2 + $0x9c] sm:$0xff]  }
 0x159   : > { %v4165_v2 = vsel %vm12675_vm0, %v13046_v39, %v16577_v46  ;;  %v3720_v39 = vsel %vm12533_vm12, %v13478_v12, %v13480_v9  ;;  %1350 = vst.msk [vmem:[#allocation2 + $0xac] sm:$0xf] %vm1251_vm3, %v1188_v38  ;;  %v1347_v20 = vld [vmem:[#allocation2 + $0xa8] sm:$0xf]  ;;  %v13520_v48 = vrot.slane %v3722_v16, 4  ;;  %v13522_v35 = vrot.slane %v3725_v21, 5  ;;  %2488 = vrot.lane.b32.xlu1 %v11934_v22, %s12117_s7 }
 0x15a   : > { %v3731_v55 = vshll.u32 %v13491_v5, 16  ;;  %v10687_v19 = vcombine.low %v4162_v61, %v4165_v2  ;;  %2516 = vst.msk [vmem:[#allocation3 + $0xa8] sm:$0xff] %vm2044_vm11, %v2473_v7  ;;  %v1860_v44 = vrot.slane %v1859_v0, 4  ;;  %v3735_v31 = vshrl.u32 %v13491_v5, 16  ;;  %v1552_v3 = vld [vmem:[#allocation2 + $0x9c] sm:$0xf] }
 0x15b   : > { %v3741_v14 = vshll.u32 %v13512_v43, 16  ;;  %v16578_v54 = vrot.slane %v12994_v15, 5  ;;  %v16579_v58 = vrot.slane %v13032_v40, 9  ;;  %v1874_v21 = vrot.slane %v1872_v50, 5  ;;  %v1553_v34 = vld [vmem:[#allocation2 + $0xa0] sm:$0xf]  ;;  %v2005_v40 = vpop.permute.xlu0 %2004 }
 0x15c   : > { %v13536_v23 = vsel %vm12675_vm0, %v10610_v51, %v3173_v1  ;;  %v3746_v4 = vshrl.u32 %v3529_v26, 16  ;;  %4323 = vst.msk [vmem:[#allocation3 + $0x70] sm:$0xff] %vm1496_vm15, %v10687_v19  ;;  %v16580_v5 = vrot.slane %v13049_v28, 5  ;;  %v1865_v61 = vsel %vm12533_vm12, %v1860_v44, %v13444_v53  ;;  %v11948_v50 = vld [vmem:[#allocation2 + $0x9c] sm:$0xff]   ;;  %v1186_v51 = vpop.permute.xlu1 %1185  ;;  %v4353_v38 = vld [vmem:[#allocation3 + $0x78] sm:$0xff] }
 0x15d   : > { %v4169_v16 = vsel %vm12675_vm0, %v16579_v58, %v16578_v54  ;;  %v1877_v46 = vshrl.u32 %v1552_v3, 16  ;;  %v1880_v2 = vshll.u32 %v1552_v3, 16  ;;  %v3749_v1 = vshll.u32 %v3529_v26, 16  ;;  %2049 = vst.msk [vmem:[#allocation3 + $0xa0] sm:$0xff] %vm2044_vm11, %v2005_v40  ;;  %v1554_v0 = vld [vmem:[#allocation2 + $0xa4] sm:$0x1]  ;;  %4815 = vmatmul.mubr.bf16.gmra.mrb[12].mxu0 %v4353_v38 }
 0x15e   : > { %v4172_v15 = vsel %vm12675_vm0, %v13057_v13, %v16580_v5  ;;  %v1875_v28 = vsel %vm12533_vm12, %v1870_v56, %v1874_v21  ;;  %v1886_v13 = vshll.u32 %v1553_v34, 16  ;;  %v13551_v7 = vrot.slane %v3731_v55, 5  ;;  %v1351_v44 = vld [vmem:[#allocation2 + $0xb0] sm:$0x1]  ;;  %1510 = vst.msk [vmem:[#allocation3 + $0x208] sm:$0xff] %vm1496_vm15, %v11948_v50 }
 0x15f   : > { %v10688_v19 = vcombine.low %v4169_v16, %v4172_v15  ;;  %v1348_v22 = vsel %vm12708_vm10, %v1186_v51, %v1347_v20  ;;  %v10537_v53 = vcombine.low %v1865_v61, %v1875_v28  ;;  %v1879_v26 = vrot.slane %v1877_v46, 4  ;;  %v13560_v55 = vld [vmem:[#allocation2 + $0x54] sm:$0xe]  ;;  %v2475_v20 = vpop.permute.xlu0 %2474  ;;  %v13577_v51 = vld [vmem:[#allocation2 + $0x58] sm:$0xf] }
 0x160   : > { %v13555_v54 = vrot.slane %v3735_v31, 4  ;;  %1349 = vst [vmem:[#allocation2 + $0xa8] sm:$0xf] %v1348_v22  ;;  %v1882_v58 = vrot.slane %v1880_v2, 5  ;;  %v13558_v56 = vrot.slane %v1886_v13, 5  ;;  %v1890_v21 = vshrl.u32 %v1553_v34, 16  ;;  %v1190_v61 = vpop.permute.xlu1 %1189 }
 0x161   : > { %v1896_v3 = vshll.u32 %v1554_v0, 16  ;;  %4324 = vst.msk [vmem:[#allocation3 + $0x98] sm:$0xff] %vm1496_vm15, %v10688_v19  ;;  %2020 = vrot.lane.b32.xlu0 %v10537_v53, %s12117_s7  ;;  %v1354_v16 = vld [vmem:[#allocation2 + $0xb4] sm:$0xf]  ;;  %v1556_v5 = vld [vmem:[#allocation2 + $0xac] sm:$0xf]  ;;  %v13568_v31 = vsel %vm12675_vm0, %v3175_v47, %v3176_v29  ;;  %v3728_v15 = vor.u32 %v13522_v35, %v13520_v48 }
 0x162   : > { %v13572_v34 = vrot.slane %v3746_v4, 4  ;;  %v13574_v40 = vrot.slane %v3749_v1, 5  ;;  %2517 = vst.msk [vmem:[#allocation3 + $0xd0] sm:$0xff] %vm2044_vm11, %v2475_v20  ;;  %v4359_v46 = vld [vmem:[#allocation3 + $0xa8] sm:$0xff]  ;;  %v1883_v2 = vor.u32 %v1882_v58, %v1879_v26  ;;  %v1892_v50 = vrot.slane %v1890_v21, 4  ;;  %v16586_v53 = vld [vmem:[#allocation9_spill] sm:$0xff] }
 0x163   : > { %v16581_v10 = vrot.slane %v13077_v30, 5  ;;  %v16582_v29 = vrot.slane %v13059_v6, 9  ;;  %v16583_v48 = vrot.slane %v13087_v60, 5  ;;  %v1352_v4 = vsel %vm12702_vm5, %v1190_v61, %v1351_v44  ;;  %4822 = vmatprep.mubr.bf16.mxu0 %v4359_v46  ;;  %v11949_v30 = vld [vmem:[%s16477_s2 + $0xc0] sm:$0xff]   ;;  %v3530_v19 = vld [vmem:[#allocation2 + $0x7c] sm:$0xf] }
 0x164   : > { %v1910_v1 = vshll.u32 %v1556_v5, 16  ;;  %v1914_v28 = vshrl.u32 %v1556_v5, 16  ;;  %v16584_v6 = vrot.slane %v13097_v52, 5  ;;  %v16585_v38 = vrot.slane %v13198_v41, 9  ;;  %1353 = vst [vmem:[#allocation2 + $0xb0] sm:$0x1] %v1352_v4  ;;  %v1192_v41 = vpop.permute.xlu0 %1191  ;;  %11198 = vmatprep.subr.bf16.mxu1 %v11949_v30 }
 0x165   : > { %v4176_v47 = vsel %vm12675_vm0, %v16582_v29, %v16581_v10  ;;  %v4179_v35 = vsel %vm12675_vm0, %v13219_v63, %v16583_v48  ;;  %v1884_v0 = vrot.slane %v1883_v2, 4  ;;  %v1893_v63 = vor.u32 %v1892_v50, %v13558_v56  ;;  %v11950_v22 = vld [vmem:[%s16477_s2 + $0x80] sm:$0xff]   ;;  %v16588_v26 = vld [vmem:[#allocation15_spill] sm:$0xff]  ;;  %v11951_v46 = vld [vmem:[%s16477_s2 + $0xc8] sm:$0xff]   ;;  %v2007_v29 = vpop.permute.xlu1 %2006 }
 0x166   : > { %v4183_v60 = vsel %vm12675_vm0, %v16585_v38, %v16584_v6  ;;  %v1898_v13 = vrot.slane %v1896_v3, 5  ;;  %v16587_v44 = vrot.slane %v16586_v53, 5  ;;  %v4358_v58 = vld [vmem:[#allocation3 + $0xa0] sm:$0xff]  ;;  %v13610_v20 = vrot.slane %v1910_v1, 5  ;;  %11199 = vmatpush3.bf16.msra.mxu1 %v11950_v22  ;;  %v11952_v4 = vld [vmem:[%s16477_s2 + $0x88] sm:$0xff]   ;;  %2050 = vst.msk [vmem:[#allocation3 + $0xc8] sm:$0xff] %vm2044_vm11, %v2007_v29 }
 0x167   : > { %v1358_v21 = vld [vmem:[#allocation2 + $0xbc] sm:$0x1]  ;;  %v3738_v5 = vor.u32 %v13555_v54, %v13551_v7  ;;  %v10611_v3 = vrot.slane %v13560_v55, 9  ;;  %v3180_v61 = vrot.slane %v13577_v51, 5  ;;  %v1355_v2 = vsel %vm12708_vm10, %v1192_v41, %v1354_v16  ;;  %4823 = vmatmul.mubr.bf16.gmra.mrb[16].mxu0 %v4358_v58  ;;  %v11936_v16 = vld [vmem:[#allocation2 + $0xa8] sm:$0xff]   ;;  %11200 = vmatprep.subr.bf16.mxu1 %v11951_v46 }
 0x168   : > { %v4186_v52 = vsel %vm12675_vm0, %v16588_v26, %v16587_v44  ;;  %v1889_v50 = vsel %vm12533_vm12, %v1884_v0, %v13558_v56  ;;  %v1894_v10 = vrot.slane %v1893_v63, 4  ;;  %v13624_v48 = vrot.slane %v1914_v28, 4  ;;  %v13626_v54 = vld [vmem:[#allocation2 + $0x5c] sm:$0x1]  ;;  %1356 = vst [vmem:[#allocation2 + $0xb4] sm:$0xf] %v1355_v2  ;;  %v1196_v26 = vpop.permute.xlu0 %1195  ;;  %2490 = vrot.lane.b32.xlu1 %v11936_v16, %s12117_s7 }
 0x169   : > { %v3755_v1 = vshll.u32 %v3530_v19, 16  ;;  %v3759_v30 = vshrl.u32 %v3530_v19, 16  ;;  %v10689_v56 = vcombine.low %v4176_v47, %v4179_v35  ;;  %v10690_v6 = vcombine.low %v4183_v60, %v4186_v52  ;;  %v1555_v38 = vld [vmem:[#allocation2 + $0xa8] sm:$0xf]  ;;  %v13644_v19 = vld [vmem:[#allocation2 + $0x80] sm:$0x1] }
 0x16a   : > { %v1899_v28 = vsel %vm12533_vm12, %v1894_v10, %v1898_v13  ;;  %v13634_v0 = vrot.slane %v3728_v15, 4  ;;  %v13638_v63 = vrot.slane %v3741_v14, 5  ;;  %v3752_v22 = vor.u32 %v13574_v40, %v13572_v34  ;;  %v11953_v53 = vld [vmem:[#allocation2 + $0xa8] sm:$0xff]   ;;  %v1194_v14 = vpop.permute.xlu1 %1193  ;;  %v2085_v52 = vld [vmem:[#allocation2 + $0x60] sm:$0xe]  ;;  %11201 = vmatpush3.bf16.msra.mxu1 %v11952_v4  ;;  %v11954_v4 = vld [vmem:[%s16477_s2 + $0xd0] sm:$0xff]  }
 0x16b   : > { %v10538_v44 = vcombine.low %v1889_v50, %v1899_v28  ;;  %v4364_v47 = vld [vmem:[#allocation3 + $0xd0] sm:$0xff]  ;;  %v1901_v35 = vshrl.u32 %v1555_v38, 16  ;;  %v1904_v60 = vshll.u32 %v1555_v38, 16  ;;  %v3183_v13 = vrot.slane %v13626_v54, 5  ;;  %4325 = vst.msk [vmem:[#allocation3 + $0xc0] sm:$0xff] %vm1496_vm15, %v10689_v56  ;;  %4326 = vst.msk [vmem:[#allocation3 + $0xe8] sm:$0xff] %vm1496_vm15, %v10690_v6  ;;  %11202 = vmatprep.subr.bf16.mxu1 %v11954_v4 }
 0x16c   : > { %v1359_v43 = vsel %vm12702_vm5, %v1196_v26, %v1358_v21  ;;  %4830 = vmatprep.mubr.bf16.mxu0 %v4364_v47  ;;  %v1917_v15 = vor.u32 %v13624_v48, %v13610_v20  ;;  %v13652_v34 = vrot.slane %v3738_v5, 4  ;;  %v3182_v40 = vrot.slane %v3180_v61, 4  ;;  %v2086_v41 = vld [vmem:[#allocation2 + $0x64] sm:$0xf]  ;;  %1511 = vst.msk [vmem:[#allocation3 + $0x230] sm:$0xff] %vm1496_vm15, %v11953_v53  ;;  %v2009_v16 = vpop.permute.xlu0 %2008 }
 0x16d   : > { %2022 = vrot.lane.b32.xlu0 %v10538_v44, %s12117_s7  ;;  %1360 = vst [vmem:[#allocation2 + $0xbc] sm:$0x1] %v1359_v43  ;;  %1357 = vst.msk [vmem:[#allocation2 + $0xb8] sm:$0xf] %vm1251_vm3, %v1194_v14  ;;  %v1557_v58 = vld [vmem:[#allocation2 + $0xb0] sm:$0x1]  ;;  %v13671_v10 = vcombine.low %v3710_v37, %v3720_v39  ;;  %v10626_v29 = vcombine.low %v13536_v23, %v13568_v31  ;;  %v3734_v25 = vsel %vm12533_vm12, %v13634_v0, %v13551_v7 }
 0x16e   : > { %v1903_v21 = vrot.slane %v1901_v35, 4  ;;  %v1906_v46 = vrot.slane %v1904_v60, 5  ;;  %v13659_v2 = vrot.slane %v3755_v1, 5  ;;  %v3761_v5 = vrot.slane %v3759_v30, 4  ;;  %v13677_v54 = vld [vmem:[#allocation2 + $0x64] sm:$0xf]  ;;  %v2477_v1 = vpop.permute.xlu1 %2476 }
 0x16f   : > { %v1920_v50 = vshll.u32 %v1557_v58, 16  ;;  %v13675_v48 = vrot.slane %v3752_v22, 4  ;;  %v3765_v17 = vshll.u32 %v13644_v19, 16  ;;  %v2087_v9 = vld [vmem:[#allocation2 + $0x68] sm:$0x1]  ;;  %v2218_v37 = vrot.slane %v2086_v41, 5 }
 0x170   : > { %v1907_v12 = vor.u32 %v1906_v46, %v1903_v21  ;;  %v11955_v39 = vld [vmem:[%s16477_s2 + $0x90] sm:$0xff]   ;;  %2051 = vst.msk [vmem:[#allocation3 + $0xf0] sm:$0xff] %vm2044_vm11, %v2009_v16  ;;  %v4363_v30 = vld [vmem:[#allocation3 + $0xc8] sm:$0xff]  ;;  %v1918_v56 = vrot.slane %v1917_v15, 4  ;;  %v13697_v28 = vsel %vm12675_vm0, %v10611_v3, %v3180_v61  ;;  %v10549_v38 = vrot.slane %v2085_v52, 9  ;;  %2518 = vst.msk [vmem:[#allocation3 + $0xf8] sm:$0xff] %vm2044_vm11, %v2477_v1  ;;  %v1200_v43 = vpop.permute.xlu0 %1199 }
 0x171   : > { %v1922_v6 = vrot.slane %v1920_v50, 5  ;;  %4831 = vmatmul.mubr.bf16.gmra.mrb[20].mxu0 %v4363_v30  ;;  %v1558_v53 = vld [vmem:[#allocation2 + $0xb4] sm:$0xf]  ;;  %v3744_v44 = vsel %vm12533_vm12, %v13652_v34, %v13638_v63  ;;  %v13706_v51 = vsel %vm12675_vm0, %v3182_v40, %v3183_v13  ;;  %v3762_v55 = vor.u32 %v3761_v5, %v13659_v2  ;;  %v13709_v3 = vld [vmem:[#allocation2 + $0x60] sm:$0xe]  ;;  %11203 = vmatpush3.bf16.msra.mxu1 %v11955_v39 }
 0x172   : > { %v1908_v22 = vrot.slane %v1907_v12, 4  ;;  %v1361_v61 = vld [vmem:[#allocation2 + $0xc0] sm:$0xf]  ;;  %v1925_v47 = vshrl.u32 %v1558_v53, 16  ;;  %v1928_v35 = vshll.u32 %v1558_v53, 16  ;;  %v3758_v60 = vsel %vm12533_vm12, %v13675_v48, %v13659_v2  ;;  %v1198_v41 = vpop.permute.xlu1 %1197  ;;  %v11958_v2 = vld [vmem:[%s16477_s2 + $0x98] sm:$0xff]  }
 0x173   : > { %v1923_v26 = vsel %vm12533_vm12, %v1918_v56, %v1922_v6  ;;  %v3063_v19 = vld [vmem:[#allocation2 + $0x68] sm:$0x1]  ;;  %v3187_v14 = vrot.slane %v13677_v54, 5  ;;  %v2220_v15 = vrot.slane %v2218_v37, 4  ;;  %v2221_v40 = vrot.slane %v2087_v9, 5 }
 0x174   : > { %v1913_v13 = vsel %vm12533_vm12, %v1908_v22, %v13610_v20  ;;  %v3532_v52 = vld [vmem:[#allocation2 + $0x84] sm:$0xf]  ;;  %1364 = vst.msk [vmem:[#allocation2 + $0xc4] sm:$0xf] %vm1251_vm3, %v1200_v43  ;;  %v13722_v21 = vrot.slane %v3765_v17, 5  ;;  %v10612_v46 = vrot.slane %v13709_v3, 9  ;;  %v2219_v5 = vsel %vm12675_vm0, %v10549_v38, %v2218_v37  ;;  %v2011_v37 = vpop.permute.xlu0 %2010 }
 0x175   : > { %v10539_v58 = vcombine.low %v1913_v13, %v1923_v26  ;;  %v3533_v50 = vld [vmem:[#allocation2 + $0x88] sm:$0xf]  ;;  %v1362_v20 = vsel %vm12708_vm10, %v1198_v41, %v1361_v61  ;;  %v11939_v4 = vld [vmem:[#allocation2 + $0xb4] sm:$0xff]   ;;  %v1927_v16 = vrot.slane %v1925_v47, 4  ;;  %v3763_v12 = vrot.slane %v3762_v55, 4  ;;  %2052 = vst.msk [vmem:[#allocation3 + $0x118] sm:$0xff] %vm2044_vm11, %v2011_v37 }
 0x176   : > { %v1559_v54 = vld [vmem:[#allocation2 + $0xb8] sm:$0xf]  ;;  %v3190_v9 = vrot.slane %v3063_v19, 5  ;;  %1363 = vst [vmem:[#allocation2 + $0xc0] sm:$0xf] %v1362_v20  ;;  %v1930_v17 = vrot.slane %v1928_v35, 5  ;;  %v2222_v56 = vsel %vm12675_vm0, %v2220_v15, %v2221_v40  ;;  %2492 = vrot.lane.b32.xlu1 %v11939_v4, %s12117_s7  ;;  %v2479_v3 = vpop.permute.xlu1 %2478 }
 0x177   : > { %2024 = vrot.lane.b32.xlu0 %v10539_v58, %s12117_s7  ;;  %v1560_v39 = vld [vmem:[#allocation2 + $0xbc] sm:$0x1]  ;;  %v1934_v1 = vshll.u32 %v1559_v54, 16  ;;  %v1938_v30 = vshrl.u32 %v1559_v54, 16  ;;  %v3189_v38 = vrot.slane %v3187_v14, 4  ;;  %v10565_v22 = vcombine.low %v2219_v5, %v2222_v56  ;;  %v4369_v61 = vld [vmem:[#allocation3 + $0xf8] sm:$0xff] }
 0x178   : > { %v1944_v6 = vshll.u32 %v1560_v39, 16  ;;  %v3534_v53 = vld [vmem:[#allocation2 + $0x8c] sm:$0x1]  ;;  %v3770_v55 = vshrl.u32 %v3532_v52, 16  ;;  %v1931_v26 = vor.u32 %v1930_v17, %v1927_v16  ;;  %v3773_v19 = vshll.u32 %v3532_v52, 16  ;;  %2519 = vst.msk [vmem:[#allocation3 + $0x120] sm:$0xff] %vm2044_vm11, %v2479_v3  ;;  %4838 = vmatprep.mubr.bf16.mxu0 %v4369_v61 }
 0x179   : > { %v1936_v47 = vrot.slane %v1934_v1, 5  ;;  %v1940_v35 = vrot.slane %v1938_v30, 4  ;;  %v4368_v43 = vld [vmem:[#allocation3 + $0xf0] sm:$0xff]  ;;  %v3768_v13 = vsel %vm12533_vm12, %v3763_v12, %v13722_v21  ;;  %2344 = vst.msk [vmem:[#allocation3 + $0x148] sm:$0xff] %vm1496_vm15, %v10565_v22  ;;  %v3779_v40 = vshll.u32 %v3533_v50, 16  ;;  %v11957_v54 = vld [vmem:[%s16477_s2 + $0xd8] sm:$0xff]  }
 0x17a   : > { %v3772_v15 = vrot.slane %v3770_v55, 4  ;;  %v3783_v41 = vshrl.u32 %v3533_v50, 16  ;;  %4839 = vmatmul.mubr.bf16.gmra.mrb[24].mxu0 %v4368_v43  ;;  %v1932_v58 = vrot.slane %v1931_v26, 4  ;;  %v3775_v20 = vrot.slane %v3773_v19, 5  ;;  %v3064_v4 = vld [vmem:[#allocation2 + $0x6c] sm:$0xe]  ;;  %v2013_v50 = vpop.permute.xlu0 %2012  ;;  %11204 = vmatprep.subr.bf16.mxu1 %v11957_v54 }
 0x17b   : > { %v1941_v5 = vor.u32 %v1940_v35, %v1936_v47  ;;  %v3789_v52 = vshll.u32 %v3534_v53, 16  ;;  %v13747_v16 = vsel %vm12675_vm0, %v10612_v46, %v3187_v14  ;;  %v13751_v21 = vsel %vm12675_vm0, %v3189_v38, %v3190_v9  ;;  %v3065_v17 = vld [vmem:[#allocation2 + $0x70] sm:$0xf]  ;;  %v2481_v46 = vpop.permute.xlu1 %2480  ;;  %2053 = vst.msk [vmem:[#allocation3 + $0x140] sm:$0xff] %vm2044_vm11, %v2013_v50  ;;  %v3066_v56 = vld [vmem:[#allocation2 + $0x74] sm:$0x1]  ;;  %11205 = vmatpush3.bf16.msra.mxu1 %v11958_v2 }
 0x17c   : > { %v3781_v12 = vrot.slane %v3779_v40, 5  ;;  %v3785_v39 = vrot.slane %v3783_v41, 4  ;;  %v1946_v30 = vrot.slane %v1944_v6, 5  ;;  %v13763_v14 = vcombine.low %v3734_v25, %v3744_v44  ;;  %2520 = vst.msk [vmem:[#allocation3 + $0x148] sm:$0xff] %vm2044_vm11, %v2481_v46  ;;  %v3535_v34 = vld [vmem:[#allocation2 + $0x90] sm:$0xf] }
 0x17d   : > { %v1942_v1 = vrot.slane %v1941_v5, 4  ;;  %v3776_v9 = vor.u32 %v3775_v20, %v3772_v15  ;;  %v11940_v37 = vld [vmem:[#allocation2 + $0xc0] sm:$0xff]   ;;  %v10627_v6 = vcombine.low %v13697_v28, %v13706_v51  ;;  %v13773_v63 = vcombine.low %v3758_v60, %v3768_v13  ;;  %v3537_v53 = vld [vmem:[#allocation2 + $0x98] sm:$0x1]  ;;  %v3067_v55 = vld [vmem:[#allocation2 + $0x78] sm:$0xe] }
 0x17e   : > { %v3786_v7 = vor.u32 %v3785_v39, %v3781_v12  ;;  %v3791_v0 = vrot.slane %v3789_v52, 5  ;;  %v1937_v25 = vsel %vm12533_vm12, %v1932_v58, %v1936_v47  ;;  %v10628_v38 = vcombine.low %v13747_v16, %v13751_v21  ;;  %2494 = vrot.lane.b32.xlu1 %v11940_v37, %s12117_s7  ;;  %v3068_v26 = vld [vmem:[#allocation2 + $0x7c] sm:$0xf]  ;;  %v2015_v47 = vpop.permute.xlu0 %2014  ;;  %v3069_v40 = vld [vmem:[#allocation2 + $0x80] sm:$0x1]  ;;  %v4373_v58 = vld [vmem:[#allocation3 + $0x118] sm:$0xff] }
 0x17f   : > { %v1947_v44 = vsel %vm12533_vm12, %v1942_v1, %v1946_v30  ;;  %v3777_v22 = vrot.slane %v3776_v9, 4  ;;  %v10613_v3 = vrot.slane %v3064_v4, 9  ;;  %v3194_v61 = vrot.slane %v3065_v17, 5  ;;  %v4374_v35 = vld [vmem:[#allocation3 + $0x120] sm:$0xff]  ;;  %v2088_v41 = vld [vmem:[#allocation2 + $0x6c] sm:$0xe] }
 0x180   : > { %v10540_v48 = vcombine.low %v1937_v25, %v1947_v44  ;;  %v3787_v60 = vrot.slane %v3786_v7, 4  ;;  %v3197_v43 = vrot.slane %v3066_v56, 5  ;;  %v3794_v13 = vshrl.u32 %v3535_v34, 16  ;;  %2054 = vst.msk [vmem:[#allocation3 + $0x168] sm:$0xff] %vm2044_vm11, %v2015_v47  ;;  %4846 = vmatprep.mubr.bf16.mxu0 %v4374_v35  ;;  %v2089_v54 = vld [vmem:[#allocation2 + $0x70] sm:$0xf] }
 0x181   : > { %v3782_v19 = vsel %vm12533_vm12, %v3777_v22, %v3781_v12  ;;  %v3797_v15 = vshll.u32 %v3535_v34, 16  ;;  %v13794_v20 = vsel %vm12675_vm0, %v10613_v3, %v3194_v61  ;;  %v3196_v52 = vrot.slane %v3194_v61, 4  ;;  %v2090_v1 = vld [vmem:[#allocation2 + $0x74] sm:$0x1]  ;;  %v11959_v30 = vld [vmem:[%s16477_s2 + $0xe0] sm:$0xff]  }
 0x182   : > { %2026 = vrot.lane.b32.xlu0 %v10540_v48, %s12117_s7  ;;  %v3792_v5 = vsel %vm12533_vm12, %v3787_v60, %v3791_v0  ;;  %v3803_v4 = vshll.u32 %v3536_v33, 16  ;;  %4847 = vmatmul.mubr.bf16.gmra.mrb[28].mxu0 %v4373_v58  ;;  %v3796_v12 = vrot.slane %v3794_v13, 4  ;;  %v3807_v17 = vshrl.u32 %v3536_v33, 16  ;;  %v16589_v46 = vld [vmem:[#allocation32_spill] sm:$0xff]  ;;  %v3538_v0 = vld [vmem:[#allocation2 + $0x9c] sm:$0xf]  ;;  %v2017_v34 = vpop.permute.xlu0 %2016 }
 0x183   : > { %v13796_v50 = vcombine.low %v3782_v19, %v3792_v5  ;;  %v3799_v39 = vrot.slane %v3797_v15, 5  ;;  %3985 = vrot.lane.b32.xlu1 %v16589_v46, %s12117_s7  ;;  %v13805_v9 = vsel %vm12675_vm0, %v3196_v52, %v3197_v43  ;;  %v3813_v37 = vshll.u32 %v3537_v53, 16  ;;  %v4379_v2 = vld [vmem:[#allocation3 + $0x148] sm:$0xff]  ;;  %2055 = vst.msk [vmem:[#allocation3 + $0x190] sm:$0xff] %vm2044_vm11, %v2017_v34  ;;  %11206 = vmatprep.subr.bf16.mxu1 %v11959_v30  ;;  %v16590_v60 = vld [vmem:[#allocation26_spill] sm:$0xff]  ;;  %v16591_v53 = vld [vmem:[#allocation27_spill] sm:$0xff] }
 0x184   : > { %v3805_v56 = vrot.slane %v3803_v4, 5  ;;  %v10614_v7 = vrot.slane %v3067_v55, 9  ;;  %v10629_v33 = vcombine.low %v13794_v20, %v13805_v9  ;;  %v3809_v44 = vrot.slane %v3807_v17, 4  ;;  %v11960_v48 = vld [vmem:[%s16477_s2 + $0xa0] sm:$0xff]   ;;  %4854 = vmatprep.mubr.bf16.mxu0 %v4379_v2  ;;  %v16593_v58 = vld [vmem:[#allocation35_spill] sm:$0xff] }
 0x185   : > { %v3800_v25 = vor.u32 %v3799_v39, %v3796_v12  ;;  %v3201_v22 = vrot.slane %v3068_v26, 5  ;;  %v16592_v55 = vcombine.low %v16590_v60, %v16591_v53  ;;  %v3815_v3 = vrot.slane %v3813_v37, 5  ;;  %v3539_v15 = vld [vmem:[#allocation2 + $0xa0] sm:$0xf]  ;;  %11207 = vmatpush3.bf16.msra.mxu1 %v11960_v48  ;;  %v4378_v4 = vld [vmem:[#allocation3 + $0x140] sm:$0xff]  ;;  %v16594_v37 = vld [vmem:[#allocation29_spill] sm:$0xff]  ;;  %v2483_v60 = vpop.permute.xlu1 %2482 }
 0x186   : > { %v3204_v61 = vrot.slane %v3069_v40, 5  ;;  %v10550_v47 = vrot.slane %v2088_v41, 9  ;;  %v2225_v35 = vrot.slane %v2089_v54, 5  ;;  %v3810_v26 = vor.u32 %v3809_v44, %v3805_v56  ;;  %v3540_v17 = vld [vmem:[#allocation2 + $0xa4] sm:$0x1] }
 0x187   : > { %3296 = vrot.lane.b32.xlu0 %v16592_v55, %s12117_s7  ;;  %v3801_v19 = vrot.slane %v3800_v25, 4  ;;  %v13819_v43 = vsel %vm12675_vm0, %v10614_v7, %v3201_v22  ;;  %v3203_v13 = vrot.slane %v3201_v22, 4  ;;  %3987 = vrot.lane.b32.xlu1 %v16593_v58, %s12117_s7  ;;  %v2228_v40 = vrot.slane %v2090_v1, 5  ;;  %v3070_v46 = vld [vmem:[#allocation2 + $0x84] sm:$0xe] }
 0x188   : > { %v2226_v5 = vsel %vm12675_vm0, %v10550_v47, %v2225_v35  ;;  %v2227_v52 = vrot.slane %v2225_v35, 4  ;;  %v3818_v41 = vshrl.u32 %v3538_v0, 16  ;;  %v3811_v12 = vrot.slane %v3810_v26, 4  ;;  %v16595_v7 = vld [vmem:[#allocation28_spill] sm:$0xff]  ;;  %v3071_v22 = vld [vmem:[#allocation2 + $0x88] sm:$0xf] }
 0x189   : > { %v3806_v54 = vsel %vm12533_vm12, %v3801_v19, %v3805_v56  ;;  %v13829_v39 = vsel %vm12675_vm0, %v3203_v13, %v3204_v61  ;;  %v3821_v30 = vshll.u32 %v3538_v0, 16  ;;  %v16596_v34 = vcombine.low %v16594_v37, %v16595_v7  ;;  %v3072_v2 = vld [vmem:[#allocation2 + $0x8c] sm:$0x1]  ;;  %v3541_v61 = vld [vmem:[#allocation2 + $0xa8] sm:$0xf]  ;;  %v16597_v35 = vld [vmem:[#allocation36_spill] sm:$0xff] }
 0x18a   : > { %v10630_v1 = vcombine.low %v13819_v43, %v13829_v39  ;;  %v2229_v25 = vsel %vm12675_vm0, %v2227_v52, %v2228_v40  ;;  %v3820_v56 = vrot.slane %v3818_v41, 4  ;;  %v3827_v44 = vshll.u32 %v3539_v15, 16  ;;  %4855 = vmatmul.mubr.bf16.gmra.mrb[32].mxu0 %v4378_v4  ;;  %v3542_v47 = vld [vmem:[#allocation2 + $0xac] sm:$0xf]  ;;  %v3543_v52 = vld [vmem:[#allocation2 + $0xb0] sm:$0x1]  ;;  %v2019_v40 = vpop.permute.xlu0 %2018 }
 0x18b   : > { %3298 = vrot.lane.b32.xlu0 %v16596_v34, %s12117_s7  ;;  %v3816_v48 = vsel %vm12533_vm12, %v3811_v12, %v3815_v3  ;;  %v10566_v0 = vcombine.low %v2226_v5, %v2229_v25  ;;  %v3823_v53 = vrot.slane %v3821_v30, 5  ;;  %v3831_v55 = vshrl.u32 %v3539_v15, 16  ;;  %3989 = vrot.lane.b32.xlu1 %v16597_v35, %s12117_s7  ;;  %v3073_v15 = vld [vmem:[#allocation2 + $0x90] sm:$0xe]  ;;  %2056 = vst.msk [vmem:[#allocation3 + $0x1b8] sm:$0xff] %vm2044_vm11, %v2019_v40  ;;  %v11961_v4 = vld [vmem:[#allocation2 + $0xb4] sm:$0xff]  }
 0x18c   : > { %v13843_v19 = vcombine.low %v3806_v54, %v3816_v48  ;;  %v3829_v26 = vrot.slane %v3827_v44, 5  ;;  %v3837_v13 = vshll.u32 %v3540_v17, 16  ;;  %v10615_v58 = vrot.slane %v3070_v46, 9  ;;  %v16598_v30 = vld [vmem:[#allocation30_spill] sm:$0xff]  ;;  %v16599_v37 = vld [vmem:[#allocation31_spill] sm:$0xff]  ;;  %1512 = vst.msk [vmem:[#allocation3 + $0x258] sm:$0xff] %vm1496_vm15, %v11961_v4 }
 0x18d   : > { %2345 = vst.msk [vmem:[#allocation3 + $0x170] sm:$0xff] %vm1496_vm15, %v10566_v0  ;;  %v3824_v3 = vor.u32 %v3823_v53, %v3820_v56  ;;  %v3833_v5 = vrot.slane %v3831_v55, 4  ;;  %v3208_v41 = vrot.slane %v3071_v22, 5  ;;  %v3211_v12 = vrot.slane %v3072_v2, 5  ;;  %v3074_v25 = vld [vmem:[#allocation2 + $0x94] sm:$0xf] }
 0x18e   : > { %v16600_v54 = vcombine.low %v16598_v30, %v16599_v37  ;;  %2521 = vst.msk [vmem:[#allocation3 + $0x170] sm:$0xff] %vm2044_vm11, %v2483_v60  ;;  %v3839_v17 = vrot.slane %v3837_v13, 5  ;;  %v3842_v46 = vshrl.u32 %v3541_v61, 16  ;;  %v3845_v7 = vshll.u32 %v3541_v61, 16  ;;  %v3075_v48 = vld [vmem:[#allocation2 + $0x98] sm:$0x1] }
 0x18f   : > { %v3851_v34 = vshll.u32 %v3542_v47, 16  ;;  %v3825_v56 = vrot.slane %v3824_v3, 4  ;;  %v3834_v44 = vor.u32 %v3833_v5, %v3829_v26  ;;  %v13854_v22 = vsel %vm12675_vm0, %v10615_v58, %v3208_v41  ;;  %3991 = vrot.lane.b32.xlu1 %v13446_v57, %s12117_s7  ;;  %v2091_v61 = vld [vmem:[#allocation2 + $0x78] sm:$0xe]  ;;  %v2092_v3 = vld [vmem:[#allocation2 + $0x7c] sm:$0xf] }
 0x190   : > { %3300 = vrot.lane.b32.xlu0 %v16600_v54, %s12117_s7  ;;  %v3210_v2 = vrot.slane %v3208_v41, 4  ;;  %v3844_v0 = vrot.slane %v3842_v46, 4  ;;  %v3847_v60 = vrot.slane %v3845_v7, 5  ;;  %v3855_v55 = vshrl.u32 %v3542_v47, 16  ;;  %v16601_v5 = vld [vmem:[#allocation33_spill] sm:$0xff]  ;;  %v16602_v41 = vld [vmem:[#allocation34_spill] sm:$0xff] }
 0x191   : > { %v3853_v53 = vrot.slane %v3851_v34, 5  ;;  %v3830_v35 = vsel %vm12533_vm12, %v3825_v56, %v3829_v26  ;;  %v3835_v13 = vrot.slane %v3834_v44, 4  ;;  %v3861_v40 = vshll.u32 %v3543_v52, 16  ;;  %v2093_v54 = vld [vmem:[#allocation2 + $0x80] sm:$0x1]  ;;  %v11962_v34 = vld [vmem:[%s16477_s2 + $0xe8] sm:$0xff]  }
 0x192   : > { %v13863_v58 = vsel %vm12675_vm0, %v3210_v2, %v3211_v12  ;;  %v16603_v4 = vcombine.low %v16601_v5, %v16602_v41  ;;  %v3848_v47 = vor.u32 %v3847_v60, %v3844_v0  ;;  %v3857_v30 = vrot.slane %v3855_v55, 4  ;;  %v3544_v52 = vld [vmem:[#allocation2 + $0xb4] sm:$0xf]  ;;  %v3545_v0 = vld [vmem:[#allocation2 + $0xb8] sm:$0xf]  ;;  %v4383_v60 = vld [vmem:[#allocation3 + $0x168] sm:$0xff]  ;;  %11208 = vmatprep.subr.bf16.mxu1 %v11962_v34 }
 0x193   : > { %v10631_v57 = vcombine.low %v13854_v22, %v13863_v58  ;;  %v10616_v37 = vrot.slane %v3073_v15, 9  ;;  %v3840_v26 = vsel %vm12533_vm12, %v3835_v13, %v3839_v17  ;;  %v3863_v46 = vrot.slane %v3861_v40, 5  ;;  %3993 = vrot.lane.b32.xlu1 %v13452_v59, %s12117_s7  ;;  %v11963_v17 = vld [vmem:[%s16477_s2 + $0xa8] sm:$0xff]   ;;  %v3546_v59 = vld [vmem:[#allocation2 + $0xbc] sm:$0x1] }
 0x194   : > { %3302 = vrot.lane.b32.xlu0 %v16603_v4, %s12117_s7  ;;  %v3215_v12 = vrot.slane %v3074_v25, 5  ;;  %v3218_v7 = vrot.slane %v3075_v48, 5  ;;  %v13878_v56 = vcombine.low %v3830_v35, %v3840_v26  ;;  %v3849_v44 = vrot.slane %v3848_v47, 4  ;;  %v3076_v35 = vld [vmem:[#allocation2 + $0x9c] sm:$0xe]  ;;  %11209 = vmatpush3.bf16.msra.mxu1 %v11963_v17  ;;  %v2485_v17 = vpop.permute.xlu1 %2484  ;;  %v4388_v51 = vld [vmem:[#allocation3 + $0x190] sm:$0xff] }
 0x195   : > { %v3858_v2 = vor.u32 %v3857_v30, %v3853_v53  ;;  %v10551_v15 = vrot.slane %v2091_v61, 9  ;;  %v2232_v55 = vrot.slane %v2092_v3, 5  ;;  %v2235_v13 = vrot.slane %v2093_v54, 5  ;;  %v4384_v40 = vld [vmem:[#allocation3 + $0x170] sm:$0xff]  ;;  %v3077_v47 = vld [vmem:[#allocation2 + $0xa0] sm:$0xf] }
 0x196   : > { %v13885_v25 = vsel %vm12675_vm0, %v10616_v37, %v3215_v12  ;;  %v3217_v48 = vrot.slane %v3215_v12, 4  ;;  %v3854_v61 = vsel %vm12533_vm12, %v3849_v44, %v3853_v53  ;;  %4862 = vmatprep.mubr.bf16.mxu0 %v4384_v40  ;;  %v3866_v41 = vshrl.u32 %v3544_v52, 16  ;;  %v11965_v3 = vld [vmem:[%s16477_s2 + $0xf0] sm:$0xff]   ;;  %v3078_v37 = vld [vmem:[#allocation2 + $0xa4] sm:$0x1] }
 0x197   : > { %v3859_v5 = vrot.slane %v3858_v2, 4  ;;  %v3869_v4 = vshll.u32 %v3544_v52, 16  ;;  %v2233_v45 = vsel %vm12675_vm0, %v10551_v15, %v2232_v55  ;;  %v2234_v36 = vrot.slane %v2232_v55, 4  ;;  %4863 = vmatmul.mubr.bf16.gmra.mrb[36].mxu0 %v4383_v60  ;;  %v3079_v53 = vld [vmem:[#allocation2 + $0xa8] sm:$0xe]  ;;  %1201 = vrot.lane.b32.xlu1 %v1106_v49, %s12116_s27 }
 0x198   : > { %3304 = vrot.lane.b32.xlu0 %v10625_v62, %s12117_s7  ;;  %v13898_v30 = vsel %vm12675_vm0, %v3217_v48, %v3218_v7  ;;  %v3875_v62 = vshll.u32 %v3545_v0, 16  ;;  %v3868_v12 = vrot.slane %v3866_v41, 4  ;;  %v3080_v52 = vld [vmem:[#allocation2 + $0xac] sm:$0xf]  ;;  %v3081_v34 = vld [vmem:[#allocation2 + $0xb0] sm:$0x1]  ;;  %11210 = vmatprep.subr.bf16.mxu1 %v11965_v3 }
 0x199   : > { %v3864_v54 = vsel %vm12533_vm12, %v3859_v5, %v3863_v46  ;;  %v10632_v26 = vcombine.low %v13885_v25, %v13898_v30  ;;  %v3871_v7 = vrot.slane %v3869_v4, 5  ;;  %v2236_v2 = vsel %vm12675_vm0, %v2234_v36, %v2235_v13  ;;  %v3082_v49 = vld [vmem:[#allocation2 + $0xb4] sm:$0xe]  ;;  %v3083_v60 = vld [vmem:[#allocation2 + $0xb8] sm:$0xf] }
 0x19a   : > { %v13909_v44 = vcombine.low %v3854_v61, %v3864_v54  ;;  %v13913_v15 = vrot.slane %v3875_v62, 5  ;;  %v3879_v8 = vshrl.u32 %v3545_v0, 16  ;;  %v10567_v46 = vcombine.low %v2233_v45, %v2236_v2  ;;  %v3084_v5 = vld [vmem:[#allocation2 + $0xbc] sm:$0x1]  ;;  %v13917_v41 = vld [vmem:[#allocation2 + $0x84] sm:$0xe] }
 0x19b   : > { %v3872_v48 = vor.u32 %v3871_v7, %v3868_v12  ;;  %v3885_v55 = vshll.u32 %v3546_v59, 16  ;;  %v10617_v40 = vrot.slane %v3076_v35, 9  ;;  %v3222_v4 = vrot.slane %v3077_v47, 5  ;;  %v11966_v0 = vld [vmem:[%s16477_s2 + $0xb0] sm:$0xff]   ;;  %3306 = vrot.lane.b32.xlu1 %v10626_v29, %s12117_s7  ;;  %v2095_v36 = vld [vmem:[#allocation2 + $0x88] sm:$0xf] }
 0x19c   : > { %3995 = vrot.lane.b32.xlu0 %v13489_v24, %s12117_s7  ;;  %v3881_v61 = vrot.slane %v3879_v8, 4  ;;  %v3225_v3 = vrot.slane %v3078_v37, 5  ;;  %v10618_v13 = vrot.slane %v3079_v53, 9  ;;  %v11968_v24 = vld [vmem:[%s16477_s2 + $0xf8] sm:$0xff]   ;;  %2346 = vst.msk [vmem:[#allocation3 + $0x198] sm:$0xff] %vm1496_vm15, %v10567_v46  ;;  %v3229_v47 = vrot.slane %v3080_v52, 5  ;;  %11211 = vmatpush3.bf16.msra.mxu1 %v11966_v0 }
 0x19d   : > { %v3873_v59 = vrot.slane %v3872_v48, 4  ;;  %v3887_v35 = vrot.slane %v3885_v55, 5  ;;  %v3232_v45 = vrot.slane %v3081_v34, 5  ;;  %v13930_v62 = vld [vmem:[#allocation2 + $0x8c] sm:$0x1]  ;;  %2522 = vst.msk [vmem:[#allocation3 + $0x198] sm:$0xff] %vm2044_vm11, %v2485_v17  ;;  %v13936_v53 = vsel %vm12675_vm0, %v10617_v40, %v3222_v4  ;;  %11212 = vmatprep.subr.bf16.mxu1 %v11968_v24 }
 0x19e   : > { %v3882_v37 = vor.u32 %v3881_v61, %v13913_v15  ;;  %v3224_v54 = vrot.slane %v3222_v4, 4  ;;  %v10619_v23 = vrot.slane %v3082_v49, 9  ;;  %v2097_v31 = vld [vmem:[#allocation2 + $0x90] sm:$0xe]  ;;  %v2098_v29 = vld [vmem:[#allocation2 + $0x94] sm:$0xf]  ;;  %v13945_v7 = vsel %vm12675_vm0, %v10618_v13, %v3229_v47 }
 0x19f   : > { %v3878_v12 = vsel %vm12533_vm12, %v3873_v59, %v13913_v15  ;;  %v3231_v52 = vrot.slane %v3229_v47, 4  ;;  %v3236_v34 = vrot.slane %v3083_v60, 5  ;;  %v2099_v2 = vld [vmem:[#allocation2 + $0x98] sm:$0x1]  ;;  %v3239_v46 = vrot.slane %v3084_v5, 5  ;;  %3308 = vrot.lane.b32.xlu1 %v10627_v6, %s12117_s7 }
 0x1a0   : > { %3997 = vrot.lane.b32.xlu0 %v13671_v10, %s12117_s7  ;;  %v3883_v8 = vrot.slane %v3882_v37, 4  ;;  %v13949_v49 = vsel %vm12675_vm0, %v3224_v54, %v3225_v3  ;;  %v10552_v10 = vrot.slane %v13917_v41, 9  ;;  %v2100_v17 = vld [vmem:[#allocation2 + $0x9c] sm:$0xe]  ;;  %v2101_v48 = vld [vmem:[#allocation2 + $0xa0] sm:$0xf] }
 0x1a1   : > { %v11969_v15 = vld [vmem:[%s16477_s2 + $0xb8] sm:$0xff]   ;;  %v10633_v55 = vcombine.low %v13936_v53, %v13949_v49  ;;  %v13966_v40 = vsel %vm12675_vm0, %v3231_v52, %v3232_v45  ;;  %v13970_v5 = vsel %vm12675_vm0, %v10619_v23, %v3236_v34  ;;  %v3238_v41 = vrot.slane %v3236_v34, 4  ;;  %v2102_v61 = vld [vmem:[#allocation2 + $0xa4] sm:$0x1]  ;;  %v2103_v4 = vld [vmem:[#allocation2 + $0xa8] sm:$0xe] }
 0x1a2   : > { %v11971_v60 = vld [vmem:[%s16477_s2 + $0x118] sm:$0xff]   ;;  %v3888_v3 = vsel %vm12533_vm12, %v3883_v8, %v3887_v35  ;;  %v10634_v28 = vcombine.low %v13945_v7, %v13966_v40  ;;  %v2239_v6 = vrot.slane %v2095_v36, 5  ;;  %v2242_v13 = vrot.slane %v13930_v62, 5  ;;  %v2104_v0 = vld [vmem:[#allocation2 + $0xac] sm:$0xf]  ;;  %11213 = vmatpush3.bf16.msra.mxu1 %v11969_v15 }
 0x1a3   : > { %11808 = vmatprep.subr.bf16.mxu0 %v11971_v60  ;;  %v13979_v24 = vcombine.low %v3878_v12, %v3888_v3  ;;  %v13983_v59 = vsel %vm12675_vm0, %v3238_v41, %v3239_v46  ;;  %v10553_v35 = vrot.slane %v2097_v31, 9  ;;  %v2246_v47 = vrot.slane %v2098_v29, 5  ;;  %v2105_v45 = vld [vmem:[#allocation2 + $0xb0] sm:$0x1]  ;;  %v2106_v23 = vld [vmem:[#allocation2 + $0xb4] sm:$0xe]  ;;  %3310 = vrot.lane.b32.xlu1 %v10628_v38, %s12117_s7 }
 0x1a4   : > { %3999 = vrot.lane.b32.xlu0 %v13763_v14, %s12117_s7  ;;  %11809 = vmatpush3.bf16.msra.mxu0 %v11971_v60  ;;  %v10635_v36 = vcombine.low %v13970_v5, %v13983_v59  ;;  %v2240_v62 = vsel %vm12675_vm0, %v10552_v10, %v2239_v6  ;;  %v2241_v37 = vrot.slane %v2239_v6, 4  ;;  %v2249_v54 = vrot.slane %v2099_v2, 5  ;;  %v2107_v14 = vld [vmem:[#allocation2 + $0xb8] sm:$0xf]  ;;  %v2108_v12 = vld [vmem:[#allocation2 + $0xbc] sm:$0x1] }
 0x1a5   : > { %v4389_v31 = vld [vmem:[#allocation3 + $0x198] sm:$0xff]  ;;  %v2247_v29 = vsel %vm12675_vm0, %v10553_v35, %v2246_v47  ;;  %v2248_v52 = vrot.slane %v2246_v47, 4  ;;  %v10554_v34 = vrot.slane %v2100_v17, 9  ;;  %v2253_v8 = vrot.slane %v2101_v48, 5  ;;  %v2528_v46 = vld [vmem:[#allocation2 + $0xc] sm:$0xf] }
 0x1a6   : > { %4870 = vmatprep.mubr.bf16.mxu0 %v4389_v31  ;;  %v2243_v2 = vsel %vm12675_vm0, %v2241_v37, %v2242_v13  ;;  %v2256_v10 = vrot.slane %v2102_v61, 5  ;;  %v10555_v15 = vrot.slane %v2103_v4, 9  ;;  %v2260_v60 = vrot.slane %v2104_v0, 5  ;;  %v2529_v48 = vld [vmem:[#allocation2 + $0x10] sm:$0xf]  ;;  %v11974_v3 = vld [vmem:[#allocation2 + $0x54] sm:$0xff]  }
 0x1a7   : > { %4871 = vmatmul.mubr.bf16.gmra.mrb[40].mxu0 %v4388_v51  ;;  %v10568_v16 = vcombine.low %v2240_v62, %v2243_v2  ;;  %v2250_v21 = vsel %vm12675_vm0, %v2248_v52, %v2249_v54  ;;  %v2254_v38 = vsel %vm12675_vm0, %v10554_v34, %v2253_v8  ;;  %v2255_v17 = vrot.slane %v2253_v8, 4  ;;  %v2530_v41 = vld [vmem:[#allocation2 + $0x14] sm:$0x1]  ;;  %v2531_v0 = vld [vmem:[#allocation2 + $0x18] sm:$0xf]  ;;  %3312 = vrot.lane.b32.xlu1 %v10629_v33, %s12117_s7 }
 0x1a8   : > { %4001 = vrot.lane.b32.xlu0 %v13773_v63, %s12117_s7  ;;  %v10569_v6 = vcombine.low %v2247_v29, %v2250_v21  ;;  %v2261_v61 = vsel %vm12675_vm0, %v10555_v15, %v2260_v60  ;;  %v2262_v4 = vrot.slane %v2260_v60, 4  ;;  %v2263_v13 = vrot.slane %v2105_v45, 5  ;;  %3494 = vst.msk [vmem:[#allocation3 + $0xe0] sm:$0xff] %vm1496_vm15, %v11974_v3  ;;  %v2532_v20 = vld [vmem:[#allocation2 + $0x1c] sm:$0xf]  ;;  %v11975_v29 = vld [vmem:[#allocation2 + $0x60] sm:$0xff]  }
 0x1a9   : > { %2347 = vst.msk [vmem:[#allocation3 + $0x1c0] sm:$0xff] %vm1496_vm15, %v10568_v16  ;;  %v2257_v63 = vsel %vm12675_vm0, %v2255_v17, %v2256_v10  ;;  %v10556_v51 = vrot.slane %v2106_v23, 9  ;;  %v2267_v35 = vrot.slane %v2107_v14, 5  ;;  %v2270_v47 = vrot.slane %v2108_v12, 5  ;;  %v2533_v12 = vld [vmem:[#allocation2 + $0x20] sm:$0x1] }
 0x1aa   : > { %2348 = vst.msk [vmem:[#allocation3 + $0x1e8] sm:$0xff] %vm1496_vm15, %v10569_v6  ;;  %v10570_v62 = vcombine.low %v2254_v38, %v2257_v63  ;;  %v2264_v45 = vsel %vm12675_vm0, %v2262_v4, %v2263_v13  ;;  %v2577_v37 = vshrl.u32 %v2528_v46, 16  ;;  %v2580_v54 = vshll.u32 %v2528_v46, 16  ;;  %v2534_v31 = vld [vmem:[#allocation2 + $0x24] sm:$0xf]  ;;  %3495 = vst.msk [vmem:[#allocation3 + $0x108] sm:$0xff] %vm1496_vm15, %v11975_v29 }
 0x1ab   : > { %v10571_v9 = vcombine.low %v2261_v61, %v2264_v45  ;;  %v2268_v33 = vsel %vm12675_vm0, %v10556_v51, %v2267_v35  ;;  %v2269_v23 = vrot.slane %v2267_v35, 4  ;;  %v2586_v14 = vshll.u32 %v2529_v48, 16  ;;  %3314 = vrot.lane.b32.xlu1 %v10630_v1, %s12117_s7  ;;  %v11976_v60 = vld [vmem:[#allocation2 + $0x6c] sm:$0xff]   ;;  %v2538_v58 = vld [vmem:[#allocation2 + $0x34] sm:$0xf] }
 0x1ac   : > { %4003 = vrot.lane.b32.xlu0 %v13796_v50, %s12117_s7  ;;  %2349 = vst.msk [vmem:[#allocation3 + $0x210] sm:$0xff] %vm1496_vm15, %v10570_v62  ;;  %v2579_v52 = vrot.slane %v2577_v37, 4  ;;  %v2582_v34 = vrot.slane %v2580_v54, 5  ;;  %v2590_v8 = vshrl.u32 %v2529_v48, 16  ;;  %v2596_v2 = vshll.u32 %v2530_v41, 16  ;;  %3496 = vst.msk [vmem:[#allocation3 + $0x130] sm:$0xff] %vm1496_vm15, %v11976_v60 }
 0x1ad   : > { %2350 = vst.msk [vmem:[#allocation3 + $0x238] sm:$0xff] %vm1496_vm15, %v10571_v9  ;;  %v2271_v50 = vsel %vm12675_vm0, %v2269_v23, %v2270_v47  ;;  %v2588_v46 = vrot.slane %v2586_v14, 5  ;;  %v2601_v10 = vshrl.u32 %v2531_v0, 16  ;;  %v2604_v15 = vshll.u32 %v2531_v0, 16  ;;  %v2535_v48 = vld [vmem:[#allocation2 + $0x28] sm:$0xf] }
 0x1ae   : > { %v10572_v16 = vcombine.low %v2268_v33, %v2271_v50  ;;  %v2583_v21 = vor.u32 %v2582_v34, %v2579_v52  ;;  %v2592_v38 = vrot.slane %v2590_v8, 4  ;;  %v2598_v17 = vrot.slane %v2596_v2, 5  ;;  %v2536_v3 = vld [vmem:[#allocation2 + $0x2c] sm:$0x1]  ;;  %v2537_v6 = vld [vmem:[#allocation2 + $0x30] sm:$0xf] }
 0x1af   : > { %v2603_v43 = vrot.slane %v2601_v10, 4  ;;  %v2606_v39 = vrot.slane %v2604_v15, 5  ;;  %v2610_v1 = vshll.u32 %v2532_v20, 16  ;;  %v2614_v41 = vshrl.u32 %v2532_v20, 16  ;;  %3316 = vrot.lane.b32.xlu1 %v10631_v57, %s12117_s7  ;;  %v11977_v47 = vld [vmem:[#allocation2 + $0x78] sm:$0xff]   ;;  %v11978_v20 = vld [vmem:[#allocation2 + $0x84] sm:$0xff]  }
 0x1b0   : > { %4005 = vrot.lane.b32.xlu0 %v13843_v19, %s12117_s7  ;;  %2351 = vst.msk [vmem:[#allocation3 + $0x260] sm:$0xff] %vm1496_vm15, %v10572_v16  ;;  %v2584_v61 = vrot.slane %v2583_v21, 4  ;;  %v2593_v4 = vor.u32 %v2592_v38, %v2588_v46  ;;  %v2620_v13 = vshll.u32 %v2533_v12, 16  ;;  %v2625_v0 = vshrl.u32 %v2534_v31, 16  ;;  %3497 = vst.msk [vmem:[#allocation3 + $0x158] sm:$0xff] %vm1496_vm15, %v11977_v47  ;;  %v11979_v57 = vld [vmem:[#allocation2 + $0x90] sm:$0xff]  }
 0x1b1   : > { %v2607_v19 = vor.u32 %v2606_v39, %v2603_v43  ;;  %v2612_v63 = vrot.slane %v2610_v1, 5  ;;  %v2616_v51 = vrot.slane %v2614_v41, 4  ;;  %v2628_v35 = vshll.u32 %v2534_v31, 16  ;;  %v2539_v29 = vld [vmem:[#allocation2 + $0x38] sm:$0x1]  ;;  %3498 = vst.msk [vmem:[#allocation3 + $0x180] sm:$0xff] %vm1496_vm15, %v11978_v20 }
 0x1b2   : > { %v2589_v62 = vsel %vm12533_vm12, %v2584_v61, %v2588_v46  ;;  %v2594_v45 = vrot.slane %v2593_v4, 4  ;;  %v2622_v37 = vrot.slane %v2620_v13, 5  ;;  %v2627_v54 = vrot.slane %v2625_v0, 4  ;;  %v11980_v34 = vld [vmem:[#allocation2 + $0x9c] sm:$0xff]   ;;  %3499 = vst.msk [vmem:[#allocation3 + $0x1a8] sm:$0xff] %vm1496_vm15, %v11979_v57  ;;  %v11981_v46 = vld [vmem:[#allocation2 + $0xa8] sm:$0xff]  }
 0x1b3   : > { %v2608_v9 = vrot.slane %v2607_v19, 4  ;;  %v2617_v33 = vor.u32 %v2616_v51, %v2612_v63  ;;  %v2630_v23 = vrot.slane %v2628_v35, 5  ;;  %v2634_v22 = vshll.u32 %v2535_v48, 16  ;;  %3318 = vrot.lane.b32.xlu1 %v10632_v26, %s12117_s7  ;;  %v2540_v21 = vld [vmem:[#allocation2 + $0x3c] sm:$0xf]  ;;  %3500 = vst.msk [vmem:[#allocation3 + $0x1d0] sm:$0xff] %vm1496_vm15, %v11980_v34 }
 0x1b4   : > { %4007 = vrot.lane.b32.xlu0 %v13878_v56, %s12117_s7  ;;  %v2599_v14 = vsel %vm12533_vm12, %v2594_v45, %v2598_v17  ;;  %v2638_v12 = vshrl.u32 %v2535_v48, 16  ;;  %v2644_v31 = vshll.u32 %v2536_v3, 16  ;;  %v2649_v52 = vshrl.u32 %v2537_v6, 16  ;;  %3501 = vst.msk [vmem:[#allocation3 + $0x1f8] sm:$0xff] %vm1496_vm15, %v11981_v46  ;;  %v11982_v17 = vld [vmem:[#allocation2 + $0xb4] sm:$0xff]  }
 0x1b5   : > { %v10589_v56 = vcombine.low %v2589_v62, %v2599_v14  ;;  %v2613_v8 = vsel %vm12533_vm12, %v2608_v9, %v2612_v63  ;;  %v2618_v2 = vrot.slane %v2617_v33, 4  ;;  %v2631_v50 = vor.u32 %v2630_v23, %v2627_v54  ;;  %v2541_v41 = vld [vmem:[#allocation2 + $0x40] sm:$0xf]  ;;  %3502 = vst.msk [vmem:[#allocation3 + $0x220] sm:$0xff] %vm1496_vm15, %v11982_v17  ;;  %v800_v51 = vld [vmem:[#allocation2 + $0xc8] sm:$0x1] }
 0x1b6   : > { %v2636_v10 = vrot.slane %v2634_v22, 5  ;;  %v2640_v15 = vrot.slane %v2638_v12, 4  ;;  %v2646_v60 = vrot.slane %v2644_v31, 5  ;;  %v2651_v16 = vrot.slane %v2649_v52, 4  ;;  %v2543_v54 = vld [vmem:[#allocation2 + $0x48] sm:$0xf] }
 0x1b7   : > { %3024 = vst.msk [vmem:[#allocation3 + $0x10] sm:$0xff] %vm1496_vm15, %v10589_v56  ;;  %v2623_v25 = vsel %vm12533_vm12, %v2618_v2, %v2622_v37  ;;  %v2632_v30 = vrot.slane %v2631_v50, 4  ;;  %v2652_v26 = vshll.u32 %v2537_v6, 16  ;;  %v2658_v38 = vshll.u32 %v2538_v58, 16  ;;  %3320 = vrot.lane.b32.xlu1 %v10633_v55, %s12117_s7  ;;  %v2542_v6 = vld [vmem:[#allocation2 + $0x44] sm:$0x1] }
 0x1b8   : > { %4009 = vrot.lane.b32.xlu0 %v13909_v44, %s12117_s7  ;;  %v10590_v48 = vcombine.low %v2613_v8, %v2623_v25  ;;  %v2641_v43 = vor.u32 %v2640_v15, %v2636_v10  ;;  %v2662_v39 = vshrl.u32 %v2538_v58, 16  ;;  %v2668_v1 = vshll.u32 %v2539_v29, 16  ;;  %v2544_v23 = vld [vmem:[#allocation2 + $0x4c] sm:$0xf]  ;;  %v16604_v14 = vld [vmem:[#allocation11_spill] sm:$0xff] }
 0x1b9   : > { %v2637_v44 = vsel %vm12533_vm12, %v2632_v30, %v2636_v10  ;;  %v2654_v3 = vrot.slane %v2652_v26, 5  ;;  %v2660_v61 = vrot.slane %v2658_v38, 5  ;;  %v2673_v4 = vshrl.u32 %v2540_v21, 16  ;;  %v2545_v52 = vld [vmem:[#allocation2 + $0x50] sm:$0x1] }
 0x1ba   : > { %3025 = vst.msk [vmem:[#allocation3 + $0x38] sm:$0xff] %vm1496_vm15, %v10590_v48  ;;  %v2642_v13 = vrot.slane %v2641_v43, 4  ;;  %v2664_v0 = vrot.slane %v2662_v39, 4  ;;  %v2670_v19 = vrot.slane %v2668_v1, 5  ;;  %v2676_v63 = vshll.u32 %v2540_v21, 16 }
 0x1bb   : > { %v2655_v53 = vor.u32 %v2654_v3, %v2651_v16  ;;  %v2675_v49 = vrot.slane %v2673_v4, 4  ;;  %v2682_v55 = vshll.u32 %v2541_v41, 16  ;;  %v2686_v35 = vshrl.u32 %v2541_v41, 16  ;;  %3322 = vrot.lane.b32.xlu1 %v10634_v28, %s12117_s7  ;;  %v2546_v56 = vld [vmem:[#allocation2 + $0x54] sm:$0xf] }
 0x1bc   : > { %4011 = vrot.lane.b32.xlu0 %v13979_v24, %s12117_s7  ;;  %v2647_v47 = vsel %vm12533_vm12, %v2642_v13, %v2646_v60  ;;  %v2665_v62 = vor.u32 %v2664_v0, %v2660_v61  ;;  %v2678_v45 = vrot.slane %v2676_v63, 5  ;;  %v2692_v37 = vshll.u32 %v2542_v6, 16  ;;  %v2547_v21 = vld [vmem:[#allocation2 + $0x58] sm:$0xf]  ;;  %v2548_v43 = vld [vmem:[#allocation2 + $0x5c] sm:$0x1] }
 0x1bd   : > { %v10591_v20 = vcombine.low %v2637_v44, %v2647_v47  ;;  %v2656_v9 = vrot.slane %v2655_v53, 4  ;;  %v2684_v33 = vrot.slane %v2682_v55, 5  ;;  %v2688_v24 = vrot.slane %v2686_v35, 4  ;;  %v2549_v4 = vld [vmem:[#allocation2 + $0x60] sm:$0xf] }
 0x1be   : > { %v2666_v22 = vrot.slane %v2665_v62, 4  ;;  %v2679_v58 = vor.u32 %v2678_v45, %v2675_v49  ;;  %v2694_v57 = vrot.slane %v2692_v37, 5  ;;  %v16605_v12 = vrot.slane %v16604_v14, 4  ;;  %v16607_v63 = vld [vmem:[#allocation8_spill] sm:$0xff]  ;;  %v16611_v45 = vld [vmem:[#allocation13_spill] sm:$0xff] }
 0x1bf   : > { %3026 = vst.msk [vmem:[#allocation3 + $0x60] sm:$0xff] %vm1496_vm15, %v10591_v20  ;;  %v2661_v7 = vsel %vm12533_vm12, %v2656_v9, %v2660_v61  ;;  %v2689_v40 = vor.u32 %v2688_v24, %v2684_v33  ;;  %v2697_v28 = vshrl.u32 %v2543_v54, 16  ;;  %v2700_v34 = vshll.u32 %v2543_v54, 16  ;;  %3324 = vrot.lane.b32.xlu1 %v10635_v36, %s12117_s7  ;;  %v16609_v53 = vld [vmem:[#allocation12_spill] sm:$0xff]  ;;  %v16613_v54 = vld [vmem:[#allocation17_spill] sm:$0xff] }
 0x1c0   : > { %v801_v29 = vsel %vm12405_vm8, %v16605_v12, %v800_v51  ;;  %v2671_v8 = vsel %vm12533_vm12, %v2666_v22, %v2670_v19  ;;  %v2680_v2 = vrot.slane %v2679_v58, 4  ;;  %v2706_v50 = vshll.u32 %v2544_v23, 16  ;;  %v2550_v9 = vld [vmem:[#allocation2 + $0x64] sm:$0xf] }
 0x1c1   : > { %802 = vst [vmem:[#allocation2 + $0xc8] sm:$0x1] %v801_v29  ;;  %v2710_v46 = vshrl.u32 %v2544_v23, 16  ;;  %v10592_v10 = vcombine.low %v2661_v7, %v2671_v8  ;;  %v2690_v15 = vrot.slane %v2689_v40, 4  ;;  %v2699_v60 = vrot.slane %v2697_v28, 4 }
 0x1c2   : > { %v2702_v16 = vrot.slane %v2700_v34, 5  ;;  %v2685_v25 = vsel %vm12533_vm12, %v2680_v2, %v2684_v33  ;;  %v2708_v30 = vrot.slane %v2706_v50, 5  ;;  %v2716_v38 = vshll.u32 %v2545_v52, 16  ;;  %v2551_v33 = vld [vmem:[#allocation2 + $0x68] sm:$0x1] }
 0x1c3   : > { %v2712_v26 = vrot.slane %v2710_v46, 4  ;;  %3027 = vst.msk [vmem:[#allocation3 + $0x88] sm:$0xff] %vm1496_vm15, %v10592_v10  ;;  %v2695_v17 = vsel %vm12533_vm12, %v2690_v15, %v2694_v57  ;;  %v2721_v5 = vshrl.u32 %v2546_v56, 16  ;;  %v2724_v59 = vshll.u32 %v2546_v56, 16  ;;  %v14109_v29 = vld [vmem:[#allocation2 + $0x8c] sm:$0x1] }
 0x1c4   : > { %v2703_v48 = vor.u32 %v2702_v16, %v2699_v60  ;;  %v10593_v36 = vcombine.low %v2685_v25, %v2695_v17  ;;  %v2718_v1 = vrot.slane %v2716_v38, 5  ;;  %v2730_v41 = vshll.u32 %v2547_v21, 16  ;;  %v14112_v34 = vld [vmem:[#allocation2 + $0x90] sm:$0xe]  ;;  %v2487_v56 = vpop.permute.xlu1 %2486  ;;  %v2552_v46 = vld [vmem:[#allocation2 + $0x6c] sm:$0xf] }
 0x1c5   : > { %v2713_v39 = vor.u32 %v2712_v26, %v2708_v30  ;;  %v2723_v3 = vrot.slane %v2721_v5, 4  ;;  %v2726_v61 = vrot.slane %v2724_v59, 5  ;;  %v2734_v6 = vshrl.u32 %v2547_v21, 16  ;;  %v14117_v10 = vld [vmem:[#allocation2 + $0xa0] sm:$0xf]  ;;  %2523 = vst.msk [vmem:[#allocation3 + $0x1c0] sm:$0xff] %vm2044_vm11, %v2487_v56 }
 0x1c6   : > { %v2704_v44 = vrot.slane %v2703_v48, 4  ;;  %3028 = vst.msk [vmem:[#allocation3 + $0xb0] sm:$0xff] %vm1496_vm15, %v10593_v36  ;;  %v2732_v0 = vrot.slane %v2730_v41, 5  ;;  %v2740_v19 = vshll.u32 %v2548_v43, 16  ;;  %v16608_v51 = vrot.slane %v16607_v63, 5 }
 0x1c7   : > { %v2714_v13 = vrot.slane %v2713_v39, 4  ;;  %v16610_v49 = vrot.slane %v16609_v53, 9  ;;  %v2727_v47 = vor.u32 %v2726_v61, %v2723_v3  ;;  %v2736_v62 = vrot.slane %v2734_v6, 4  ;;  %v2553_v26 = vld [vmem:[#allocation2 + $0x70] sm:$0xf] }
 0x1c8   : > { %v2709_v35 = vsel %vm12533_vm12, %v2704_v44, %v2708_v30  ;;  %v16612_v37 = vrot.slane %v16611_v45, 5  ;;  %v2742_v23 = vrot.slane %v2740_v19, 5  ;;  %v2745_v58 = vshrl.u32 %v2549_v4, 16  ;;  %v14123_v38 = vld [vmem:[#allocation2 + $0x98] sm:$0x1] }
 0x1c9   : > { %v4190_v55 = vsel %vm12675_vm0, %v16610_v49, %v16608_v51  ;;  %v2719_v24 = vsel %vm12533_vm12, %v2714_v13, %v2718_v1  ;;  %v2728_v14 = vrot.slane %v2727_v47, 4  ;;  %v2737_v12 = vor.u32 %v2736_v62, %v2732_v0  ;;  %v2554_v43 = vld [vmem:[#allocation2 + $0x74] sm:$0x1]  ;;  %v14130_v1 = vld [vmem:[#allocation2 + $0x9c] sm:$0xe] }
 0x1ca   : > { %v4193_v20 = vsel %vm12675_vm0, %v16613_v54, %v16612_v37  ;;  %v10594_v57 = vcombine.low %v2709_v35, %v2719_v24  ;;  %v2748_v31 = vshll.u32 %v2549_v4, 16  ;;  %v2747_v52 = vrot.slane %v2745_v58, 4  ;;  %v14133_v3 = vld [vmem:[#allocation2 + $0xac] sm:$0xf] }
 0x1cb   : > { %v10691_v22 = vcombine.low %v4190_v55, %v4193_v20  ;;  %v2754_v7 = vshll.u32 %v2550_v9, 16  ;;  %v2758_v40 = vshrl.u32 %v2550_v9, 16  ;;  %v2764_v28 = vshll.u32 %v2551_v33, 16  ;;  %v2489_v45 = vpop.permute.xlu1 %2488  ;;  %v2555_v9 = vld [vmem:[#allocation2 + $0x78] sm:$0xf]  ;;  %v4393_v33 = vld [vmem:[#allocation3 + $0x1b8] sm:$0xff] }
 0x1cc   : > { %3029 = vst.msk [vmem:[#allocation3 + $0xd8] sm:$0xff] %vm1496_vm15, %v10594_v57  ;;  %v2733_v8 = vsel %vm12533_vm12, %v2728_v14, %v2732_v0  ;;  %v2738_v2 = vrot.slane %v2737_v12, 4  ;;  %v2750_v50 = vrot.slane %v2748_v31, 5  ;;  %v4213_v16 = vrot.slane %v14109_v29, 5  ;;  %v4394_v37 = vld [vmem:[#allocation3 + $0x1c0] sm:$0xff]  ;;  %v16614_v57 = vld [vmem:[#allocation10_spill] sm:$0xff] }
 0x1cd   : > { %4327 = vst.msk [vmem:[#allocation3 + $0x110] sm:$0xff] %vm1496_vm15, %v10691_v22  ;;  %v2756_v15 = vrot.slane %v2754_v7, 5  ;;  %v2760_v60 = vrot.slane %v2758_v40, 4  ;;  %v2766_v30 = vrot.slane %v2764_v28, 5  ;;  %v2769_v5 = vshrl.u32 %v2552_v46, 16  ;;  %4878 = vmatprep.mubr.bf16.mxu0 %v4394_v37  ;;  %v16616_v12 = vld [vmem:[#allocation18_spill] sm:$0xff] }
 0x1ce   : > { %v2743_v21 = vsel %vm12533_vm12, %v2738_v2, %v2742_v23  ;;  %v2751_v25 = vor.u32 %v2750_v50, %v2747_v52  ;;  %v2772_v59 = vshll.u32 %v2552_v46, 16  ;;  %v14127_v36 = vrot.slane %v4217_v27, 4  ;;  %2524 = vst.msk [vmem:[#allocation3 + $0x1e8] sm:$0xff] %vm2044_vm11, %v2489_v45  ;;  %v2556_v23 = vld [vmem:[#allocation2 + $0x7c] sm:$0xf]  ;;  %4879 = vmatmul.mubr.bf16.gmra.mrb[44].mxu0 %v4393_v33  ;;  %v16620_v28 = vld [vmem:[#allocation21_spill] sm:$0xff] }
 0x1cf   : > { %v10595_v17 = vcombine.low %v2733_v8, %v2743_v21  ;;  %v2761_v48 = vor.u32 %v2760_v60, %v2756_v15  ;;  %v10679_v39 = vrot.slane %v14112_v34, 9  ;;  %v4224_v41 = vrot.slane %v14117_v10, 5  ;;  %v16618_v7 = vld [vmem:[#allocation19_spill] sm:$0xff]  ;;  %v2557_v2 = vld [vmem:[#allocation2 + $0x80] sm:$0x1]  ;;  %v16621_v60 = vld [vmem:[#allocation14_spill] sm:$0xff] }
 0x1d0   : > { %v2752_v44 = vrot.slane %v2751_v25, 4  ;;  %v2771_v6 = vrot.slane %v2769_v5, 4  ;;  %v2774_v4 = vrot.slane %v2772_v59, 5  ;;  %v2778_v13 = vshll.u32 %v2553_v26, 16  ;;  %v16623_v25 = vld [vmem:[#allocation20_spill] sm:$0xff] }
 0x1d1   : > { %3030 = vst.msk [vmem:[#allocation3 + $0x100] sm:$0xff] %vm1496_vm15, %v10595_v17  ;;  %v2762_v61 = vrot.slane %v2761_v48, 4  ;;  %v4220_v0 = vrot.slane %v14123_v38, 5  ;;  %v2782_v63 = vshrl.u32 %v2553_v26, 16  ;;  %v2788_v51 = vshll.u32 %v2554_v43, 16  ;;  %v16625_v17 = vld [vmem:[#allocation22_spill] sm:$0xff] }
 0x1d2   : > { %v2757_v19 = vsel %vm12533_vm12, %v2752_v44, %v2756_v15  ;;  %v10680_v53 = vrot.slane %v14130_v1, 9  ;;  %v2775_v55 = vor.u32 %v2774_v4, %v2771_v6  ;;  %v2780_v35 = vrot.slane %v2778_v13, 5  ;;  %v16627_v43 = vld [vmem:[#allocation24_spill] sm:$0xff]  ;;  %v2560_v45 = vld [vmem:[#allocation2 + $0x8c] sm:$0x1] }
 0x1d3   : > { %v2767_v49 = vsel %vm12533_vm12, %v2762_v61, %v2766_v30  ;;  %v14144_v47 = vrot.slane %v4224_v41, 4  ;;  %v4231_v62 = vrot.slane %v14133_v3, 5  ;;  %v2784_v20 = vrot.slane %v2782_v63, 4  ;;  %v2021_v50 = vpop.permute.xlu0 %2020  ;;  %v2558_v59 = vld [vmem:[#allocation2 + $0x84] sm:$0xf] }
 0x1d4   : > { %v10596_v54 = vcombine.low %v2757_v19, %v2767_v49  ;;  %v2776_v24 = vrot.slane %v2775_v55, 4  ;;  %v2790_v58 = vrot.slane %v2788_v51, 5  ;;  %v16615_v14 = vrot.slane %v16614_v57, 5  ;;  %2057 = vst.msk [vmem:[#allocation3 + $0x1e0] sm:$0xff] %vm2044_vm11, %v2021_v50  ;;  %v2559_v63 = vld [vmem:[#allocation2 + $0x88] sm:$0xf] }
 0x1d5   : > { %v2785_v22 = vor.u32 %v2784_v20, %v2780_v35  ;;  %v16617_v31 = vrot.slane %v16616_v12, 9  ;;  %v16619_v40 = vrot.slane %v16618_v7, 5  ;;  %v16622_v21 = vrot.slane %v16621_v60, 5  ;;  %v14177_v51 = vld [vmem:[#allocation2 + $0xa4] sm:$0x1] }
 0x1d6   : > { %3031 = vst.msk [vmem:[#allocation3 + $0x128] sm:$0xff] %vm1496_vm15, %v10596_v54  ;;  %v2781_v46 = vsel %vm12533_vm12, %v2776_v24, %v2780_v35  ;;  %v16624_v30 = vrot.slane %v16623_v25, 9  ;;  %v16626_v48 = vrot.slane %v16625_v17, 5  ;;  %v2793_v61 = vshrl.u32 %v2555_v9, 16  ;;  %v14180_v37 = vld [vmem:[#allocation2 + $0xa8] sm:$0xe] }
 0x1d7   : > { %v4197_v52 = vsel %vm12675_vm0, %v16617_v31, %v16615_v14  ;;  %v4200_v56 = vsel %vm12675_vm0, %v16620_v28, %v16619_v40  ;;  %v2786_v15 = vrot.slane %v2785_v22, 4  ;;  %v2796_v6 = vshll.u32 %v2555_v9, 16  ;;  %v4399_v54 = vld [vmem:[#allocation3 + $0x1e8] sm:$0xff]  ;;  %v14182_v24 = vld [vmem:[#allocation2 + $0xb0] sm:$0x1] }
 0x1d8   : > { %v10692_v8 = vcombine.low %v4197_v52, %v4200_v56  ;;  %v4204_v26 = vsel %vm12675_vm0, %v16624_v30, %v16622_v21  ;;  %v4207_v5 = vsel %vm12675_vm0, %v16627_v43, %v16626_v48  ;;  %v2802_v13 = vshll.u32 %v2556_v23, 16  ;;  %4886 = vmatprep.mubr.bf16.mxu0 %v4399_v54  ;;  %v2561_v54 = vld [vmem:[#allocation2 + $0x90] sm:$0xf]  ;;  %v2566_v34 = vld [vmem:[#allocation2 + $0xa4] sm:$0x1] }
 0x1d9   : > { %v10693_v44 = vcombine.low %v4204_v26, %v4207_v5  ;;  %v2791_v4 = vsel %vm12533_vm12, %v2786_v15, %v2790_v58  ;;  %v2806_v19 = vshrl.u32 %v2556_v23, 16  ;;  %v2795_v55 = vrot.slane %v2793_v61, 4  ;;  %v2571_v3 = vld [vmem:[#allocation2 + $0xb8] sm:$0xf] }
 0x1da   : > { %4328 = vst.msk [vmem:[#allocation3 + $0x138] sm:$0xff] %vm1496_vm15, %v10692_v8  ;;  %v10597_v49 = vcombine.low %v2781_v46, %v2791_v4  ;;  %v2798_v35 = vrot.slane %v2796_v6, 5  ;;  %v2804_v20 = vrot.slane %v2802_v13, 5  ;;  %v2812_v9 = vshll.u32 %v2557_v2, 16  ;;  %v14186_v2 = vld [vmem:[#allocation2 + $0xb8] sm:$0xf]  ;;  %v2491_v46 = vpop.permute.xlu1 %2490 }
 0x1db   : > { %4329 = vst.msk [vmem:[#allocation3 + $0x160] sm:$0xff] %vm1496_vm15, %v10693_v44  ;;  %v2808_v33 = vrot.slane %v2806_v19, 4  ;;  %v2817_v22 = vshrl.u32 %v2558_v59, 16  ;;  %v2820_v58 = vshll.u32 %v2558_v59, 16  ;;  %v2826_v57 = vshll.u32 %v2559_v63, 16  ;;  %v4398_v50 = vld [vmem:[#allocation3 + $0x1e0] sm:$0xff] }
 0x1dc   : > { %3032 = vst.msk [vmem:[#allocation3 + $0x150] sm:$0xff] %vm1496_vm15, %v10597_v49  ;;  %v2799_v23 = vor.u32 %v2798_v35, %v2795_v55  ;;  %v2814_v12 = vrot.slane %v2812_v9, 5  ;;  %v2830_v31 = vshrl.u32 %v2559_v63, 16  ;;  %v2836_v52 = vshll.u32 %v2560_v45, 16  ;;  %4887 = vmatmul.mubr.bf16.gmra.mrb[48].mxu0 %v4398_v50  ;;  %v14199_v44 = vld [vmem:[#allocation2 + $0xb4] sm:$0xe] }
 0x1dd   : > { %v2809_v14 = vor.u32 %v2808_v33, %v2804_v20  ;;  %v2819_v40 = vrot.slane %v2817_v22, 4  ;;  %v2822_v28 = vrot.slane %v2820_v58, 5  ;;  %v2828_v56 = vrot.slane %v2826_v57, 5  ;;  %2525 = vst.msk [vmem:[#allocation3 + $0x210] sm:$0xff] %vm2044_vm11, %v2491_v46  ;;  %v14203_v13 = vld [vmem:[#allocation2 + $0xbc] sm:$0x1] }
 0x1de   : > { %v2800_v7 = vrot.slane %v2799_v23, 4  ;;  %v4227_v8 = vrot.slane %v14177_v51, 5  ;;  %v2832_v60 = vrot.slane %v2830_v31, 4  ;;  %v14190_v21 = vrot.slane %v4231_v62, 4  ;;  %v16628_v63 = vld [vmem:[#allocation16_spill] sm:$0xff]  ;;  %v16630_v55 = vld [vmem:[#allocation23_spill] sm:$0xff] }
 0x1df   : > { %v2810_v15 = vrot.slane %v2809_v14, 4  ;;  %v10681_v25 = vrot.slane %v14180_v37, 9  ;;  %v2823_v26 = vor.u32 %v2822_v28, %v2819_v40  ;;  %v4234_v17 = vrot.slane %v14182_v24, 5  ;;  %v2023_v48 = vpop.permute.xlu0 %2022  ;;  %v11983_v33 = vld [vmem:[#allocation2 + $0xc0] sm:$0xff]   ;;  %v16632_v23 = vld [vmem:[#allocation25_spill] sm:$0xff] }
 0x1e0   : > { %v2805_v30 = vsel %vm12533_vm12, %v2800_v7, %v2804_v20  ;;  %v2833_v5 = vor.u32 %v2832_v60, %v2828_v56  ;;  %v2838_v59 = vrot.slane %v2836_v52, 5  ;;  %v4238_v61 = vrot.slane %v14186_v2, 5  ;;  %2058 = vst.msk [vmem:[#allocation3 + $0x208] sm:$0xff] %vm2044_vm11, %v2023_v48  ;;  %v2562_v20 = vld [vmem:[#allocation2 + $0x94] sm:$0xf] }
 0x1e1   : > { %v2815_v43 = vsel %vm12533_vm12, %v2810_v15, %v2814_v12  ;;  %v2824_v4 = vrot.slane %v2823_v26, 4  ;;  %v16629_v49 = vrot.slane %v16628_v63, 5  ;;  %v16631_v35 = vrot.slane %v16630_v55, 9  ;;  %v2563_v58 = vld [vmem:[#allocation2 + $0x98] sm:$0x1]  ;;  %3503 = vst.msk [vmem:[#allocation3 + $0x248] sm:$0xff] %vm1496_vm15, %v11983_v33 }
 0x1e2   : > { %v10598_v6 = vcombine.low %v2805_v30, %v2815_v43  ;;  %v2834_v19 = vrot.slane %v2833_v5, 4  ;;  %v4214_v22 = vsel %vm12675_vm0, %v16632_v23, %v4213_v16  ;;  %v2564_v12 = vld [vmem:[#allocation2 + $0x9c] sm:$0xf]  ;;  %v4218_v29 = vsel %vm12675_vm0, %v10679_v39, %v4217_v27  ;;  %v2565_v7 = vld [vmem:[#allocation2 + $0xa0] sm:$0xf] }
 0x1e3   : > { %v4211_v45 = vsel %vm12675_vm0, %v16631_v35, %v16629_v49  ;;  %v2829_v9 = vsel %vm12533_vm12, %v2824_v4, %v2828_v56  ;;  %v4221_v16 = vsel %vm12675_vm0, %v14127_v36, %v4220_v0  ;;  %v2841_v52 = vshrl.u32 %v2561_v54, 16  ;;  %v2567_v49 = vld [vmem:[#allocation2 + $0xa8] sm:$0xf] }
 0x1e4   : > { %3033 = vst.msk [vmem:[#allocation3 + $0x178] sm:$0xff] %vm1496_vm15, %v10598_v6  ;;  %v2839_v57 = vsel %vm12533_vm12, %v2834_v19, %v2838_v59  ;;  %v10694_v14 = vcombine.low %v4211_v45, %v4214_v22  ;;  %v10682_v40 = vrot.slane %v14199_v44, 9  ;;  %v4404_v28 = vld [vmem:[#allocation3 + $0x210] sm:$0xff]  ;;  %v10695_v56 = vcombine.low %v4218_v29, %v4221_v16 }
 0x1e5   : > { %v10599_v31 = vcombine.low %v2829_v9, %v2839_v57  ;;  %v2844_v18 = vshll.u32 %v2561_v54, 16  ;;  %v2850_v50 = vshll.u32 %v2562_v20, 16  ;;  %v4241_v46 = vrot.slane %v14203_v13, 5  ;;  %4894 = vmatprep.mubr.bf16.mxu0 %v4404_v28 }
 0x1e6   : > { %4330 = vst.msk [vmem:[#allocation3 + $0x188] sm:$0xff] %vm1496_vm15, %v10694_v14  ;;  %v2843_v27 = vrot.slane %v2841_v52, 4  ;;  %v2854_v38 = vshrl.u32 %v2562_v20, 16  ;;  %v2860_v39 = vshll.u32 %v2563_v58, 16  ;;  %4331 = vst.msk [vmem:[#allocation3 + $0x1b0] sm:$0xff] %vm1496_vm15, %v10695_v56  ;;  %v2865_v60 = vshrl.u32 %v2564_v12, 16 }
 0x1e7   : > { %3034 = vst.msk [vmem:[#allocation3 + $0x1a0] sm:$0xff] %vm1496_vm15, %v10599_v31  ;;  %v4403_v36 = vld [vmem:[#allocation3 + $0x208] sm:$0xff]  ;;  %v2846_v0 = vrot.slane %v2844_v18, 5  ;;  %v2852_v15 = vrot.slane %v2850_v50, 5  ;;  %v14240_v30 = vrot.slane %v4238_v61, 4  ;;  %v2868_v5 = vshll.u32 %v2564_v12, 16 }
 0x1e8   : > { %4895 = vmatmul.mubr.bf16.gmra.mrb[52].mxu0 %v4403_v36  ;;  %v2856_v48 = vrot.slane %v2854_v38, 4  ;;  %v2862_v43 = vrot.slane %v2860_v39, 5  ;;  %v2493_v59 = vpop.permute.xlu1 %2492  ;;  %v2867_v4 = vrot.slane %v2865_v60, 4  ;;  %v2874_v19 = vshll.u32 %v2565_v7, 16  ;;  %v2568_v20 = vld [vmem:[#allocation2 + $0xac] sm:$0xf] }
 0x1e9   : > { %v2025_v26 = vpop.permute.xlu0 %2024  ;;  %v2847_v6 = vor.u32 %v2846_v0, %v2843_v27  ;;  %v2878_v63 = vshrl.u32 %v2565_v7, 16  ;;  %2526 = vst.msk [vmem:[#allocation3 + $0x238] sm:$0xff] %vm2044_vm11, %v2493_v59  ;;  %v2870_v35 = vrot.slane %v2868_v5, 5  ;;  %v2884_v45 = vshll.u32 %v2566_v34, 16  ;;  %v2569_v58 = vld [vmem:[#allocation2 + $0xb0] sm:$0x1] }
 0x1ea   : > { %2059 = vst.msk [vmem:[#allocation3 + $0x230] sm:$0xff] %vm2044_vm11, %v2025_v26  ;;  %v2857_v55 = vor.u32 %v2856_v48, %v2852_v15  ;;  %v4225_v54 = vsel %vm12675_vm0, %v10680_v53, %v4224_v41  ;;  %v2876_v9 = vrot.slane %v2874_v19, 5  ;;  %v4228_v22 = vsel %vm12675_vm0, %v14144_v47, %v4227_v8  ;;  %v2570_v31 = vld [vmem:[#allocation2 + $0xb4] sm:$0xf] }
 0x1eb   : > { %v2848_v33 = vrot.slane %v2847_v6, 4  ;;  %v2880_v23 = vrot.slane %v2878_v63, 4  ;;  %v2871_v14 = vor.u32 %v2870_v35, %v2867_v4  ;;  %v2886_v12 = vrot.slane %v2884_v45, 5  ;;  %v3547_v6 = vld [vmem:[#allocation2 + $0xc0] sm:$0xf] }
 0x1ec   : > { %v2858_v57 = vrot.slane %v2857_v55, 4  ;;  %v10696_v10 = vcombine.low %v4225_v54, %v4228_v22  ;;  %v4232_v53 = vsel %vm12675_vm0, %v10681_v25, %v4231_v62  ;;  %v4235_v47 = vsel %vm12675_vm0, %v14190_v21, %v4234_v17  ;;  %v2572_v62 = vld [vmem:[#allocation2 + $0xbc] sm:$0x1] }
 0x1ed   : > { %v2853_v1 = vsel %vm12533_vm12, %v2848_v33, %v2852_v15  ;;  %v2881_v41 = vor.u32 %v2880_v23, %v2876_v9  ;;  %v2872_v8 = vrot.slane %v2871_v14, 4  ;;  %v10697_v29 = vcombine.low %v4232_v53, %v4235_v47 }
 0x1ee   : > { %v2863_v51 = vsel %vm12533_vm12, %v2858_v57, %v2862_v43  ;;  %4332 = vst.msk [vmem:[#allocation3 + $0x1d8] sm:$0xff] %vm1496_vm15, %v10696_v10  ;;  %v2889_v16 = vshrl.u32 %v2567_v49, 16  ;;  %v2892_v7 = vshll.u32 %v2567_v49, 16  ;;  %v2898_v28 = vshll.u32 %v2568_v20, 16  ;;  %v4342_v10 = vld [vmem:[#allocation3 + $0x20] sm:$0xff] }
 0x1ef   : > { %v10600_v52 = vcombine.low %v2853_v1, %v2863_v51  ;;  %v2882_v37 = vrot.slane %v2881_v41, 4  ;;  %v2877_v24 = vsel %vm12533_vm12, %v2872_v8, %v2876_v9  ;;  %4333 = vst.msk [vmem:[#allocation3 + $0x200] sm:$0xff] %vm1496_vm15, %v10697_v29  ;;  %v2902_v25 = vshrl.u32 %v2568_v20, 16  ;;  %v3551_v8 = vld [vmem:[#allocation2 + $0xd0] sm:$0xf] }
 0x1f0   : > { %v2891_v21 = vrot.slane %v2889_v16, 4  ;;  %v2908_v17 = vshll.u32 %v2569_v58, 16  ;;  %v2495_v56 = vpop.permute.xlu1 %2494  ;;  %v4409_v18 = vld [vmem:[#allocation3 + $0x238] sm:$0xff]  ;;  %v2894_v34 = vrot.slane %v2892_v7, 5  ;;  %v2900_v27 = vrot.slane %v2898_v28, 5 }
 0x1f1   : > { %3035 = vst.msk [vmem:[#allocation3 + $0x1c8] sm:$0xff] %vm1496_vm15, %v10600_v52  ;;  %v2887_v50 = vsel %vm12533_vm12, %v2882_v37, %v2886_v12  ;;  %v2913_v38 = vshrl.u32 %v2570_v31, 16  ;;  %4902 = vmatprep.mubr.bf16.mxu0 %v4409_v18  ;;  %v4408_v39 = vld [vmem:[#allocation3 + $0x230] sm:$0xff]  ;;  %v2904_v0 = vrot.slane %v2902_v25, 4  ;;  %v2916_v60 = vshll.u32 %v2570_v31, 16  ;;  %v4347_v18 = vld [vmem:[#allocation3 + $0x48] sm:$0xff] }
 0x1f2   : > { %2527 = vst.msk [vmem:[#allocation3 + $0x260] sm:$0xff] %vm2044_vm11, %v2495_v56  ;;  %v10601_v36 = vcombine.low %v2877_v24, %v2887_v50  ;;  %v2910_v15 = vrot.slane %v2908_v17, 5  ;;  %4903 = vmatmul.mubr.bf16.gmra.mrb[56].mxu0 %v4408_v39  ;;  %v2895_v48 = vor.u32 %v2894_v34, %v2891_v21  ;;  %v2922_v5 = vshll.u32 %v2571_v3, 16  ;;  %v3550_v31 = vld [vmem:[#allocation2 + $0xcc] sm:$0xf] }
 0x1f3   : > { %v2915_v43 = vrot.slane %v2913_v38, 4  ;;  %v2926_v59 = vshrl.u32 %v2571_v3, 16  ;;  %v2905_v4 = vor.u32 %v2904_v0, %v2900_v27  ;;  %v2918_v19 = vrot.slane %v2916_v60, 5  ;;  %v4352_v34 = vld [vmem:[#allocation3 + $0x70] sm:$0xff]  ;;  %v2573_v38 = vld [vmem:[#allocation2 + $0xc0] sm:$0xf] }
 0x1f4   : > { %v2027_v26 = vpop.permute.xlu0 %2026  ;;  %3036 = vst.msk [vmem:[#allocation3 + $0x1f0] sm:$0xff] %vm1496_vm15, %v10601_v36  ;;  %v2932_v63 = vshll.u32 %v2572_v62, 16  ;;  %v4239_v49 = vsel %vm12675_vm0, %v10682_v40, %v4238_v61  ;;  %v2896_v35 = vrot.slane %v2895_v48, 4  ;;  %v2924_v45 = vrot.slane %v2922_v5, 5  ;;  %v1365_v36 = vld [vmem:[#allocation2 + $0xc8] sm:$0x1] }
 0x1f5   : > { %2060 = vst.msk [vmem:[#allocation3 + $0x258] sm:$0xff] %vm2044_vm11, %v2027_v26  ;;  %v3986_v55 = vpop.permute.xlu1 %3985  ;;  %v2928_v54 = vrot.slane %v2926_v59, 4  ;;  %v4242_v20 = vsel %vm12675_vm0, %v14240_v30, %v4241_v46  ;;  %v2906_v33 = vrot.slane %v2905_v4, 4  ;;  %v2919_v9 = vor.u32 %v2918_v19, %v2915_v43  ;;  %v14298_v30 = vld [vmem:[#allocation2 + $0xc4] sm:$0xf] }
 0x1f6   : > { %4033 = vst.msk [vmem:[#allocation3 + $0x18] sm:$0xff] %vm2044_vm11, %v3986_v55  ;;  %v10698_v2 = vcombine.low %v4239_v49, %v4242_v20  ;;  %v2901_v44 = vsel %vm12533_vm12, %v2896_v35, %v2900_v27  ;;  %v3890_v58 = vshrl.u32 %v3547_v6, 16  ;;  %v2934_v12 = vrot.slane %v2932_v63, 5  ;;  %v2574_v0 = vld [vmem:[#allocation2 + $0xc4] sm:$0xf] }
 0x1f7   : > { %v2929_v61 = vor.u32 %v2928_v54, %v2924_v45  ;;  %v2911_v40 = vsel %vm12533_vm12, %v2906_v33, %v2910_v15  ;;  %v2920_v13 = vrot.slane %v2919_v9, 4  ;;  %v3893_v53 = vshll.u32 %v3547_v6, 16  ;;  %v14321_v15 = vld [vmem:[#allocation2 + $0xc4] sm:$0xf] }
 0x1f8   : > { %4334 = vst.msk [vmem:[#allocation3 + $0x228] sm:$0xff] %vm1496_vm15, %v10698_v2  ;;  %v10602_v57 = vcombine.low %v2901_v44, %v2911_v40  ;;  %v14308_v52 = vrot.slane %v3890_v58, 4  ;;  %v3899_v37 = vshll.u32 %v14298_v30, 16  ;;  %v3903_v7 = vshrl.u32 %v14298_v30, 16  ;;  %v3086_v35 = vld [vmem:[#allocation2 + $0xc4] sm:$0xf] }
 0x1f9   : > { %v3297_v23 = vpop.permute.xlu0 %3296  ;;  %v3988_v22 = vpop.permute.xlu1 %3987  ;;  %v4414_v46 = vld [vmem:[#allocation3 + $0x260] sm:$0xff]  ;;  %v2930_v14 = vrot.slane %v2929_v61, 4  ;;  %v2925_v47 = vsel %vm12533_vm12, %v2920_v13, %v2924_v45  ;;  %v14314_v24 = vrot.slane %v3893_v53, 5  ;;  %v3914_v21 = vshrl.u32 %v3550_v31, 16  ;;  %v3552_v45 = vld [vmem:[#allocation2 + $0xd4] sm:$0x1] }
 0x1fa   : > { %3344 = vst.msk [vmem:[#allocation3 + $0x10] sm:$0xff] %vm2044_vm11, %v3297_v23  ;;  %4034 = vst.msk [vmem:[#allocation3 + $0x40] sm:$0xff] %vm2044_vm11, %v3988_v22  ;;  %4910 = vmatprep.mubr.bf16.mxu0 %v4414_v46  ;;  %v3917_v25 = vshll.u32 %v3550_v31, 16  ;;  %v3923_v50 = vshll.u32 %v3551_v8, 16  ;;  %v3927_v48 = vshrl.u32 %v3551_v8, 16  ;;  %v2937_v6 = vshrl.u32 %v2573_v38, 16 }
 0x1fb   : > { %3037 = vst.msk [vmem:[#allocation3 + $0x218] sm:$0xff] %vm1496_vm15, %v10602_v57  ;;  %v2935_v51 = vsel %vm12533_vm12, %v2930_v14, %v2934_v12  ;;  %v3916_v5 = vrot.slane %v3914_v21, 4  ;;  %v2940_v4 = vshll.u32 %v2573_v38, 16  ;;  %v14325_v63 = vrot.slane %v3899_v37, 5  ;;  %v4357_v2 = vld [vmem:[#allocation3 + $0x98] sm:$0xff]  ;;  %v4362_v40 = vld [vmem:[#allocation3 + $0xc0] sm:$0xff] }
 0x1fc   : > { %v4413_v41 = vld [vmem:[#allocation3 + $0x258] sm:$0xff]  ;;  %v10603_v29 = vcombine.low %v2925_v47, %v2935_v51  ;;  %v3919_v59 = vrot.slane %v3917_v25, 5  ;;  %v3905_v49 = vrot.slane %v3903_v7, 4  ;;  %v2946_v54 = vshll.u32 %v2574_v0, 16  ;;  %v3085_v23 = vld [vmem:[#allocation2 + $0xc0] sm:$0xe] }
 0x1fd   : > { %v3299_v1 = vpop.permute.xlu0 %3298  ;;  %4911 = vmatmul.mubr.bf16.gmra.mrb[60].mxu0 %v4413_v41  ;;  %v3990_v16 = vpop.permute.xlu1 %3989  ;;  %v4341_v3 = vld [vmem:[#allocation3 + $0x18] sm:$0xff]  ;;  %v2950_v20 = vshrl.u32 %v2574_v0, 16  ;;  %v4245_v33 = vrot.slane %v14321_v15, 5  ;;  %v14330_v44 = vrot.slane %v3923_v50, 5  ;;  %v3929_v61 = vrot.slane %v3927_v48, 4 }
 0x1fe   : > { %3345 = vst.msk [vmem:[#allocation3 + $0x38] sm:$0xff] %vm2044_vm11, %v3299_v1  ;;  %11810 = vmatprep.mubr.msk.bf16.mxu0 %vm1496_vm15, %v4342_v10  ;;  %4035 = vst.msk [vmem:[#allocation3 + $0x68] sm:$0xff] %vm2044_vm11, %v3990_v16  ;;  %4951 = vmatprep.mubr.bf16.mxu1 %v4341_v3  ;;  %v3896_v32 = vor.u32 %v14314_v24, %v14308_v52  ;;  %v3920_v13 = vor.u32 %v3919_v59, %v3916_v5  ;;  %v2939_v22 = vrot.slane %v2937_v6, 4  ;;  %v11984_v12 = vld [vmem:[#allocation2 + $0xcc] sm:$0xff]   ;;  %v4091_v10 = vld [vmem:[#allocation2 + $0xc0] sm:$0xe] }
 0x1ff   : > { %3038 = vst.msk [vmem:[#allocation3 + $0x240] sm:$0xff] %vm1496_vm15, %v10603_v29  ;;  %v2942_v46 = vrot.slane %v2940_v4, 5  ;;  %v3243_v58 = vrot.slane %v3086_v35, 5  ;;  %v3906_v57 = vor.u32 %v3905_v49, %v14325_v63  ;;  %v3933_v14 = vshll.u32 %v3552_v45, 16  ;;  %3504 = vst.msk [vmem:[#allocation3 + $0x270] sm:$0xff] %vm1496_vm15, %v11984_v12 }
 0x200   : > { %v10620_v31 = vrot.slane %v3085_v23, 9  ;;  %v14339_v1 = vrot.slane %v2946_v54, 5  ;;  %v2952_v41 = vrot.slane %v2950_v20, 4  ;;  %v3930_v51 = vor.u32 %v3929_v61, %v14330_v44  ;;  %v4094_v54 = vld [vmem:[#allocation2 + $0xcc] sm:$0xe] }
 0x201   : > { %v4340_v62 = vld [vmem:[#allocation3 + $0x10] sm:$0xff]  ;;  %v3992_v17 = vpop.permute.xlu1 %3991  ;;  %v4346_v56 = vld [vmem:[#allocation3 + $0x40] sm:$0xff]  ;;  %v4247_v8 = vrot.slane %v4245_v33, 4  ;;  %v3897_v16 = vrot.slane %v3896_v32, 4  ;;  %v14346_v3 = vrot.slane %v3920_v13, 4  ;;  %v2943_v52 = vor.u32 %v2942_v46, %v2939_v22 }
 0x202   : > { %v3301_v28 = vpop.permute.xlu0 %3300  ;;  %4952 = vmatmul.mubr.bf16.vlgmr.msra.gmra.mrb[0].mxu1 %v4340_v62  ;;  %4036 = vst.msk [vmem:[#allocation3 + $0x90] sm:$0xff] %vm2044_vm11, %v3992_v17  ;;  %v10683_v37 = vrot.slane %v4091_v10, 9  ;;  %v3245_v62 = vrot.slane %v3243_v58, 4  ;;  %v3907_v24 = vrot.slane %v3906_v57, 4  ;;  %v3935_v21 = vrot.slane %v3933_v14, 5 }
 0x203   : > { %3346 = vst.msk [vmem:[#allocation3 + $0x60] sm:$0xff] %vm2044_vm11, %v3301_v28  ;;  %4959 = vmatprep.mubr.bf16.mxu1 %v4346_v56  ;;  %v4367_v28 = vld [vmem:[#allocation3 + $0xe8] sm:$0xff]  ;;  %v3244_v56 = vsel %vm12675_vm0, %v10620_v31, %v3243_v58  ;;  %v2953_v50 = vor.u32 %v2952_v41, %v14339_v1  ;;  %v3926_v48 = vsel %vm12533_vm12, %v14346_v3, %v14330_v44  ;;  %v4095_v20 = vld [vmem:[#allocation2 + $0xd0] sm:$0xf]  ;;  %v10684_v44 = vrot.slane %v4094_v54, 9  ;;  %v4382_v3 = vld [vmem:[#allocation3 + $0x160] sm:$0xff] }
 0x204   : > { %v4252_v61 = vrot.slane %v4095_v20, 5  ;;  %v11985_v31 = vld [vmem:[%s16479_s4 + $0x40] sm:$0xff]   ;;  %vm5816_vm7 = vcmask 1043456   ;;  %vm5822_vm8 = vcmask 1040384  }
 0x205   : > { %11811 = vmatmul.mubr.msk.bf16.vlgmr.msra.gmra.mrb[64].mxu0 %vm1496_vm15, %v4347_v18  ;;  %v3994_v39 = vpop.permute.xlu1 %3993  ;;  %v4345_v26 = vld [vmem:[#allocation3 + $0x38] sm:$0xff]  ;;  %v4351_v43 = vld [vmem:[#allocation3 + $0x68] sm:$0xff]  ;;  %v2954_v35 = vrot.slane %v2953_v50, 4  ;;  %11330 = vmatprep.subr.bf16.mxu1 %v11985_v31  ;;  %vm14705_vm9 = vmand %vm5816_vm7, %vm686_vm6 }
 0x206   : > { %v3303_v27 = vpop.permute.xlu0 %3302  ;;  %11814 = vmatprep.mubr.msk.bf16.mxu0 %vm1496_vm15, %v4352_v34  ;;  %4037 = vst.msk [vmem:[#allocation3 + $0xb8] sm:$0xff] %vm2044_vm11, %v3994_v39  ;;  %v4253_v12 = vsel %vm12675_vm0, %v10684_v44, %v4252_v61  ;;  %v4254_v10 = vrot.slane %v4252_v61, 4  ;;  %vm14722_vm6 = vmand %vm5822_vm8, %vm361_vm2 }
 0x207   : > { %3347 = vst.msk [vmem:[#allocation3 + $0x88] sm:$0xff] %vm2044_vm11, %v3303_v27 }
 0x209   : > { %v1202_v19 = vpop.permute.xlu1 %1201  ;;  %v4356_v29 = vld [vmem:[#allocation3 + $0x90] sm:$0xff] }
 0x20a   : > { %v3305_v60 = vpop.permute.xlu0 %3304  ;;  %4960 = vmatmul.mubr.bf16.gmra.mrb[4].mxu1 %v4345_v26  ;;  %v1366_v55 = vsel %vm12702_vm5, %v1202_v19, %v1365_v36  ;;  %v4350_v47 = vld [vmem:[#allocation3 + $0x60] sm:$0xff]  ;;  %v3931_v36 = vrot.slane %v3930_v51, 4  ;;  %v3902_v26 = vsel %vm12533_vm12, %v3897_v16, %v14325_v63  ;;  %v4246_v19 = vsel %vm12675_vm0, %v10683_v37, %v4245_v33  ;;  %v4096_v33 = vld [vmem:[#allocation2 + $0xd4] sm:$0x1] }
 0x20b   : > { %3348 = vst.msk [vmem:[#allocation3 + $0xb0] sm:$0xff] %vm2044_vm11, %v3305_v60  ;;  %4967 = vmatprep.mubr.bf16.mxu1 %v4351_v43  ;;  %1367 = vst [vmem:[#allocation2 + $0xc8] sm:$0x1] %v1366_v55  ;;  %v4372_v60 = vld [vmem:[#allocation3 + $0x110] sm:$0xff]  ;;  %v2944_v43 = vrot.slane %v2943_v52, 4 }
 0x20c   : > { %v3936_v15 = vsel %vm12533_vm12, %v3931_v36, %v3935_v21 }
 0x20d   : > { %11815 = vmatmul.mubr.msk.bf16.gmra.mrb[68].mxu0 %vm1496_vm15, %v4357_v2  ;;  %v3307_v30 = vpop.permute.xlu1 %3306  ;;  %v4361_v32 = vld [vmem:[#allocation3 + $0xb8] sm:$0xff]  ;;  %v2949_v22 = vsel %vm12533_vm12, %v2944_v43, %v14339_v1  ;;  %v10668_v1 = vcombine.low %v3926_v48, %v3936_v15 }
 0x20e   : > { %v3996_v9 = vpop.permute.xlu0 %3995  ;;  %11818 = vmatprep.mubr.msk.bf16.mxu0 %vm1496_vm15, %v4362_v40  ;;  %3349 = vst.msk [vmem:[#allocation3 + $0xd8] sm:$0xff] %vm2044_vm11, %v3307_v30  ;;  %v4355_v2 = vld [vmem:[#allocation3 + $0x88] sm:$0xff]  ;;  %v4255_v30 = vrot.slane %v4096_v33, 5 }
 0x20f   : > { %4038 = vst.msk [vmem:[#allocation3 + $0xe0] sm:$0xff] %vm2044_vm11, %v3996_v9 }
 0x211   : > { %v3309_v7 = vpop.permute.xlu1 %3308 }
 0x212   : > { %v3998_v53 = vpop.permute.xlu0 %3997  ;;  %4968 = vmatmul.mubr.bf16.gmra.mrb[8].mxu1 %v4350_v47  ;;  %v4093_v25 = vld [vmem:[#allocation2 + $0xc8] sm:$0x1]  ;;  %3350 = vst.msk [vmem:[#allocation3 + $0x100] sm:$0xff] %vm2044_vm11, %v3309_v7  ;;  %v11986_v7 = vld [vmem:[%s16479_s4] sm:$0xff]  }
 0x213   : > { %4039 = vst.msk [vmem:[#allocation3 + $0x108] sm:$0xff] %vm2044_vm11, %v3998_v53  ;;  %4975 = vmatprep.mubr.bf16.mxu1 %v4356_v29  ;;  %v3087_v17 = vld [vmem:[#allocation2 + $0xc8] sm:$0x1]  ;;  %v4248_v34 = vrot.slane %v4093_v25, 5  ;;  %v11102_v40 = vpop.f32.mrb[0].mxu0  ;;  %v4256_v29 = vsel %vm12675_vm0, %v4254_v10, %v4255_v30  ;;  %11331 = vmatpush3.bf16.msra.mxu1 %v11986_v7 }
 0x214   : > { %v3549_v18 = vld [vmem:[#allocation2 + $0xc8] sm:$0x1]  ;;  %v3246_v38 = vrot.slane %v3087_v17, 5  ;;  %v11103_v58 = vpop.f32.mrb[1].mxu0  ;;  %v10700_v52 = vcombine.low %v4253_v12, %v4256_v29  ;;  %v4387_v17 = vld [vmem:[#allocation3 + $0x188] sm:$0xff] }
 0x215   : > { %v3909_v39 = vshll.u32 %v3549_v18, 16  ;;  %v2575_v0 = vld [vmem:[#allocation2 + $0xc8] sm:$0x1]  ;;  %11819 = vmatmul.mubr.msk.bf16.gmra.mrb[72].mxu0 %vm1496_vm15, %v4367_v28  ;;  %v3311_v59 = vpop.permute.xlu1 %3310  ;;  %v4249_v63 = vsel %vm12675_vm0, %v4247_v8, %v4248_v34  ;;  %v14388_v41 = vadd.f32 %v11103_v58, %v11102_v40  ;;  %v11105_v53 = vpop.f32.mrb[2].mxu0  ;;  %v4377_v8 = vld [vmem:[#allocation3 + $0x138] sm:$0xff] }
 0x216   : > { %v4000_v27 = vpop.permute.xlu0 %3999  ;;  %v2956_v5 = vshll.u32 %v2575_v0, 16  ;;  %11822 = vmatprep.mubr.msk.bf16.mxu0 %vm1496_vm15, %v4372_v60  ;;  %v3247_v6 = vsel %vm12675_vm0, %v3245_v62, %v3246_v38  ;;  %3351 = vst.msk [vmem:[#allocation3 + $0x128] sm:$0xff] %vm2044_vm11, %v3311_v59  ;;  %v10699_v55 = vcombine.low %v4246_v19, %v4249_v63  ;;  %v11106_v51 = vpop.f32.mrb[3].mxu0  ;;  %v4360_v62 = vld [vmem:[#allocation3 + $0xb0] sm:$0xff]  ;;  %v4365_v0 = vld [vmem:[#allocation3 + $0xd8] sm:$0xff] }
 0x217   : > { %4040 = vst.msk [vmem:[#allocation3 + $0x130] sm:$0xff] %vm2044_vm11, %v4000_v27  ;;  %v3911_v4 = vrot.slane %v3909_v39, 5  ;;  %v10636_v49 = vcombine.low %v3244_v56, %v3247_v6  ;;  %v14396_v16 = vadd.f32 %v11106_v51, %v11105_v53  ;;  %v4392_v18 = vld [vmem:[#allocation3 + $0x1b0] sm:$0xff]  ;;  %v4402_v6 = vld [vmem:[#allocation3 + $0x200] sm:$0xff]  ;;  %v11990_v51 = vld [vmem:[%s16479_s4 + $0x10] sm:$0xff]  }
 0x218   : > { %v2958_v45 = vrot.slane %v2956_v5, 5  ;;  %4335 = vst.msk [vmem:[#allocation3 + $0x250] sm:$0xff] %vm1496_vm15, %v10699_v55  ;;  %4336 = vst.msk [vmem:[#allocation3 + $0x278] sm:$0xff] %vm1496_vm15, %v10700_v52  ;;  %v4397_v5 = vld [vmem:[#allocation3 + $0x1d8] sm:$0xff] }
 0x219   : > { %v3912_v23 = vsel %vm12533_vm12, %v3907_v24, %v3911_v4  ;;  %3326 = vrot.lane.b32.xlu1 %v10636_v49, %s12117_s7  ;;  %v3313_v57 = vpop.permute.xlu1 %3312  ;;  %v4366_v24 = vld [vmem:[#allocation3 + $0xe0] sm:$0xff]  ;;  %v11987_v4 = vld [vmem:[%s16479_s4 + $0x48] sm:$0xff]  }
 0x21a   : > { %v4002_v9 = vpop.permute.xlu0 %4001  ;;  %4976 = vmatmul.mubr.bf16.gmra.mrb[12].mxu1 %v4355_v2  ;;  %v10667_v13 = vcombine.low %v3902_v26, %v3912_v23  ;;  %v2959_v46 = vsel %vm12533_vm12, %v2954_v35, %v2958_v45  ;;  %3352 = vst.msk [vmem:[#allocation3 + $0x150] sm:$0xff] %vm2044_vm11, %v3313_v57  ;;  %v4371_v26 = vld [vmem:[#allocation3 + $0x108] sm:$0xff]  ;;  %11332 = vmatprep.subr.bf16.mxu1 %v11987_v4  ;;  %v4370_v45 = vld [vmem:[#allocation3 + $0x100] sm:$0xff]  ;;  %v11988_v2 = vld [vmem:[%s16479_s4 + $0x8] sm:$0xff]  }
 0x21b   : > { %4041 = vst.msk [vmem:[#allocation3 + $0x158] sm:$0xff] %vm2044_vm11, %v4002_v9  ;;  %4983 = vmatprep.mubr.bf16.mxu1 %v4361_v32  ;;  %v10604_v14 = vcombine.low %v2949_v22, %v2959_v46  ;;  %v4407_v23 = vld [vmem:[#allocation3 + $0x228] sm:$0xff]  ;;  %11333 = vmatpush3.bf16.msra.mxu1 %v11988_v2 }
 0x21c   : > { %4013 = vrot.lane.b32.xlu0 %v10667_v13, %s12117_s7 }
 0x21d   : > { %3039 = vst.msk [vmem:[#allocation3 + $0x268] sm:$0xff] %vm1496_vm15, %v10604_v14  ;;  %11823 = vmatmul.mubr.msk.bf16.gmra.mrb[76].mxu0 %vm1496_vm15, %v4377_v8  ;;  %v3315_v37 = vpop.permute.xlu1 %3314  ;;  %v4375_v13 = vld [vmem:[#allocation3 + $0x128] sm:$0xff] }
 0x21e   : > { %v4004_v47 = vpop.permute.xlu0 %4003  ;;  %11826 = vmatprep.mubr.msk.bf16.mxu0 %vm1496_vm15, %v4382_v3  ;;  %3353 = vst.msk [vmem:[#allocation3 + $0x178] sm:$0xff] %vm2044_vm11, %v3315_v37  ;;  %v4376_v20 = vld [vmem:[#allocation3 + $0x130] sm:$0xff] }
 0x21f   : > { %4042 = vst.msk [vmem:[#allocation3 + $0x180] sm:$0xff] %vm2044_vm11, %v4004_v47  ;;  %v11108_v56 = vpop.f32.mrb[4].mxu0  ;;  %v4412_v33 = vld [vmem:[#allocation3 + $0x250] sm:$0xff]  ;;  %v4417_v30 = vld [vmem:[#allocation3 + $0x278] sm:$0xff] }
 0x220   : > { %4015 = vrot.lane.b32.xlu0 %v10668_v1, %s12117_s7  ;;  %v11109_v50 = vpop.f32.mrb[5].mxu0  ;;  %v11989_v47 = vld [vmem:[%s16479_s4 + $0x50] sm:$0xff]  }
 0x221   : > { %v3317_v21 = vpop.permute.xlu1 %3316  ;;  %v14411_v27 = vadd.f32 %v11109_v50, %v11108_v56  ;;  %v11111_v38 = vpop.f32.mrb[6].mxu0  ;;  %v4380_v31 = vld [vmem:[#allocation3 + $0x150] sm:$0xff]  ;;  %11334 = vmatprep.subr.bf16.mxu1 %v11989_v47  ;;  %v11992_v50 = vld [vmem:[%s16479_s4 + $0x18] sm:$0xff]  }
 0x222   : > { %v4006_v28 = vpop.permute.xlu0 %4005  ;;  %4984 = vmatmul.mubr.bf16.gmra.mrb[16].mxu1 %v4360_v62  ;;  %3354 = vst.msk [vmem:[#allocation3 + $0x1a0] sm:$0xff] %vm2044_vm11, %v3317_v21  ;;  %v11112_v36 = vpop.f32.mrb[7].mxu0  ;;  %v4381_v46 = vld [vmem:[#allocation3 + $0x158] sm:$0xff] }
 0x223   : > { %4043 = vst.msk [vmem:[#allocation3 + $0x1a8] sm:$0xff] %vm2044_vm11, %v4006_v28  ;;  %4991 = vmatprep.mubr.bf16.mxu1 %v4366_v24  ;;  %v14415_v60 = vadd.f32 %v11112_v36, %v11111_v38  ;;  %11335 = vmatpush3.bf16.msra.mxu1 %v11990_v51  ;;  %v11991_v24 = vld [vmem:[%s16479_s4 + $0x58] sm:$0xff]  }
 0x224   : > { %11336 = vmatprep.subr.bf16.mxu1 %v11991_v24  ;;  %v12004_v24 = vld [vmem:[%s16479_s4 + $0xa0] sm:$0xff]  }
 0x225   : > { %11827 = vmatmul.mubr.msk.bf16.gmra.mrb[80].mxu0 %vm1496_vm15, %v4387_v17  ;;  %v3319_v34 = vpop.permute.xlu1 %3318  ;;  %v4385_v7 = vld [vmem:[#allocation3 + $0x178] sm:$0xff] }
 0x226   : > { %v4008_v25 = vpop.permute.xlu0 %4007  ;;  %11830 = vmatprep.mubr.msk.bf16.mxu0 %vm1496_vm15, %v4392_v18  ;;  %3355 = vst.msk [vmem:[#allocation3 + $0x1c8] sm:$0xff] %vm2044_vm11, %v3319_v34  ;;  %v4386_v1 = vld [vmem:[#allocation3 + $0x180] sm:$0xff] }
 0x227   : > { %4044 = vst.msk [vmem:[#allocation3 + $0x1d0] sm:$0xff] %vm2044_vm11, %v4008_v25  ;;  %v11114_v59 = vpop.f32.mrb[8].mxu0  ;;  %11337 = vmatpush3.bf16.msra.mxu1 %v11992_v50  ;;  %v12009_v50 = vld [vmem:[%s16479_s4 + $0xf0] sm:$0xff]  }
 0x228   : > { %v11115_v19 = vpop.f32.mrb[9].mxu0 }
 0x229   : > { %v3321_v48 = vpop.permute.xlu1 %3320  ;;  %v14424_v49 = vadd.f32 %v11115_v19, %v11114_v59  ;;  %v11117_v55 = vpop.f32.mrb[10].mxu0  ;;  %v4390_v18 = vld [vmem:[#allocation3 + $0x1a0] sm:$0xff] }
 0x22a   : > { %v4010_v39 = vpop.permute.xlu0 %4009  ;;  %4992 = vmatmul.mubr.bf16.gmra.mrb[20].mxu1 %v4365_v0  ;;  %3356 = vst.msk [vmem:[#allocation3 + $0x1f0] sm:$0xff] %vm2044_vm11, %v3321_v48  ;;  %v11118_v35 = vpop.f32.mrb[11].mxu0  ;;  %v4391_v62 = vld [vmem:[#allocation3 + $0x1a8] sm:$0xff] }
 0x22b   : > { %4045 = vst.msk [vmem:[#allocation3 + $0x1f8] sm:$0xff] %vm2044_vm11, %v4010_v39  ;;  %4999 = vmatprep.mubr.bf16.mxu1 %v4371_v26  ;;  %v14427_v54 = vadd.f32 %v11118_v35, %v11117_v55 }
 0x22d   : > { %11831 = vmatmul.mubr.msk.bf16.gmra.mrb[84].mxu0 %vm1496_vm15, %v4397_v5  ;;  %v3323_v63 = vpop.permute.xlu1 %3322  ;;  %v11993_v5 = vld [vmem:[%s16479_s4 + $0xc0] sm:$0xff]  }
 0x22e   : > { %v4012_v43 = vpop.permute.xlu0 %4011  ;;  %11834 = vmatprep.mubr.msk.bf16.mxu0 %vm1496_vm15, %v4402_v6  ;;  %3357 = vst.msk [vmem:[#allocation3 + $0x218] sm:$0xff] %vm2044_vm11, %v3323_v63  ;;  %v4396_v38 = vld [vmem:[#allocation3 + $0x1d0] sm:$0xff]  ;;  %11442 = vmatprep.subr.bf16.mxu0 %v11993_v5  ;;  %v12015_v5 = vld [vmem:[%s16479_s4 + $0xb8] sm:$0xff]  }
 0x22f   : > { %4046 = vst.msk [vmem:[#allocation3 + $0x220] sm:$0xff] %vm2044_vm11, %v4012_v43  ;;  %v4395_v43 = vld [vmem:[#allocation3 + $0x1c8] sm:$0xff] }
 0x230   : > { %v11120_v15 = vpop.f32.mrb[12].mxu0 }
 0x231   : > { %v3325_v9 = vpop.permute.xlu1 %3324  ;;  %v11121_v44 = vpop.f32.mrb[13].mxu0  ;;  %v4400_v55 = vld [vmem:[#allocation3 + $0x1f0] sm:$0xff] }
 0x232   : > { %5000 = vmatmul.mubr.bf16.gmra.mrb[24].mxu1 %v4370_v45  ;;  %3358 = vst.msk [vmem:[#allocation3 + $0x240] sm:$0xff] %vm2044_vm11, %v3325_v9  ;;  %v14435_v61 = vadd.f32 %v11121_v44, %v11120_v15  ;;  %v11123_v40 = vpop.f32.mrb[14].mxu0  ;;  %v4401_v6 = vld [vmem:[#allocation3 + $0x1f8] sm:$0xff]  ;;  %v11994_v44 = vld [vmem:[%s16479_s4 + $0x80] sm:$0xff]  }
 0x233   : > { %5007 = vmatprep.mubr.bf16.mxu1 %v4376_v20  ;;  %v11124_v32 = vpop.f32.mrb[15].mxu0  ;;  %11443 = vmatpush3.bf16.msra.mxu0 %v11994_v44 }
 0x234   : > { %v14437_v22 = vadd.f32 %v11124_v32, %v11123_v40 }
 0x235   : > { %11835 = vmatmul.mubr.msk.bf16.gmra.mrb[88].mxu0 %vm1496_vm15, %v4407_v23  ;;  %v4405_v23 = vld [vmem:[#allocation3 + $0x218] sm:$0xff] }
 0x236   : > { %11838 = vmatprep.mubr.msk.bf16.mxu0 %vm1496_vm15, %v4412_v33  ;;  %v4406_v20 = vld [vmem:[#allocation3 + $0x220] sm:$0xff] }
 0x23a   : > { %5008 = vmatmul.mubr.bf16.gmra.mrb[28].mxu1 %v4375_v13  ;;  %v11126_v58 = vpop.f32.mrb[16].mxu0 }
 0x23b   : > { %5015 = vmatprep.mubr.bf16.mxu1 %v4381_v46  ;;  %v11127_v57 = vpop.f32.mrb[17].mxu0  ;;  %v11995_v46 = vld [vmem:[%s16479_s4 + $0xc8] sm:$0xff]  }
 0x23c   : > { %v14440_v14 = vadd.f32 %v11127_v57, %v11126_v58  ;;  %v11129_v12 = vpop.f32.mrb[18].mxu0  ;;  %11444 = vmatprep.subr.bf16.mxu0 %v11995_v46  ;;  %v11996_v58 = vld [vmem:[%s16479_s4 + $0x88] sm:$0xff]   ;;  %v11997_v57 = vld [vmem:[%s16479_s4 + $0x60] sm:$0xff]  }
 0x23d   : > { %11839 = vmatmul.mubr.msk.bf16.gmra.mrb[92].mxu0 %vm1496_vm15, %v4417_v30  ;;  %v11130_v10 = vpop.f32.mrb[19].mxu0  ;;  %11338 = vmatprep.subr.bf16.mxu1 %v11997_v57 }
 0x23e   : > { %v14442_v53 = vadd.f32 %v11130_v10, %v11129_v12  ;;  %11445 = vmatpush3.bf16.msra.mxu0 %v11996_v58  ;;  %v11998_v12 = vld [vmem:[%s16479_s4 + $0x20] sm:$0xff]   ;;  %v11999_v10 = vld [vmem:[%s16479_s4 + $0xd0] sm:$0xff]  }
 0x23f   : > { %11339 = vmatpush3.bf16.msra.mxu1 %v11998_v12  ;;  %11446 = vmatprep.subr.bf16.mxu0 %v11999_v10 }
 0x242   : > { %5016 = vmatmul.mubr.bf16.gmra.mrb[32].mxu1 %v4380_v31  ;;  %v12000_v31 = vld [vmem:[%s16479_s4 + $0x90] sm:$0xff]  }
 0x243   : > { %5023 = vmatprep.mubr.bf16.mxu1 %v4386_v1  ;;  %v12001_v1 = vld [vmem:[%s16479_s4 + $0xd8] sm:$0xff]   ;;  %11447 = vmatpush3.bf16.msra.mxu0 %v12000_v31 }
 0x244   : > { %v11132_v8 = vpop.f32.mrb[20].mxu0  ;;  %11448 = vmatprep.subr.bf16.mxu0 %v12001_v1  ;;  %v4410_v31 = vld [vmem:[#allocation3 + $0x240] sm:$0xff] }
 0x245   : > { %v11133_v29 = vpop.f32.mrb[21].mxu0 }
 0x246   : > { %v14450_v3 = vadd.f32 %v11133_v29, %v11132_v8  ;;  %v11135_v52 = vpop.f32.mrb[22].mxu0 }
 0x247   : > { %v11136_v37 = vpop.f32.mrb[23].mxu0 }
 0x248   : > { %v14452_v28 = vadd.f32 %v11136_v37, %v11135_v52  ;;  %v12002_v37 = vld [vmem:[%s16479_s4 + $0x98] sm:$0xff]  }
 0x249   : > { %11449 = vmatpush3.bf16.msra.mxu0 %v12002_v37 }
 0x24a   : > { %5024 = vmatmul.mubr.bf16.gmra.mrb[36].mxu1 %v4385_v7 }
 0x24b   : > { %5031 = vmatprep.mubr.bf16.mxu1 %v4391_v62  ;;  %v12003_v62 = vld [vmem:[%s16479_s4 + $0xe0] sm:$0xff]  }
 0x24c   : > { %11450 = vmatprep.subr.bf16.mxu0 %v12003_v62 }
 0x24d   : > { %v11138_v21 = vpop.f32.mrb[24].mxu0  ;;  %11451 = vmatpush3.bf16.msra.mxu0 %v12004_v24  ;;  %v12018_v24 = vld [vmem:[#allocation4] sm:$0xff]  }
 0x24e   : > { %v11139_v25 = vpop.f32.mrb[25].mxu0 }
 0x24f   : > { %v14457_v17 = vadd.f32 %v11139_v25, %v11138_v21  ;;  %v11141_v56 = vpop.f32.mrb[26].mxu0  ;;  %v12005_v21 = vld [vmem:[%s16479_s4 + $0xe8] sm:$0xff]  }
 0x250   : > { %v11142_v34 = vpop.f32.mrb[27].mxu0  ;;  %11452 = vmatprep.subr.bf16.mxu0 %v12005_v21  ;;  %v12006_v25 = vld [vmem:[%s16479_s4 + $0x68] sm:$0xff]  }
 0x251   : > { %v14462_v39 = vadd.f32 %v11142_v34, %v11141_v56  ;;  %v12007_v56 = vld [vmem:[%s16479_s4 + $0xa8] sm:$0xff]   ;;  %11340 = vmatprep.subr.bf16.mxu1 %v12006_v25  ;;  %v12010_v34 = vld [vmem:[%s16479_s4 + $0x70] sm:$0xff]  }
 0x252   : > { %5032 = vmatmul.mubr.bf16.gmra.mrb[40].mxu1 %v4390_v18  ;;  %v12008_v18 = vld [vmem:[%s16479_s4 + $0x28] sm:$0xff]   ;;  %11453 = vmatpush3.bf16.msra.mxu0 %v12007_v56 }
 0x253   : > { %5039 = vmatprep.mubr.bf16.mxu1 %v4396_v38  ;;  %11341 = vmatpush3.bf16.msra.mxu1 %v12008_v18  ;;  %v12011_v38 = vld [vmem:[%s16479_s4 + $0xb0] sm:$0xff]  }
 0x254   : > { %11454 = vmatprep.subr.bf16.mxu0 %v12009_v50  ;;  %11342 = vmatprep.subr.bf16.mxu1 %v12010_v34 }
 0x255   : > { %v11144_v36 = vpop.f32.mrb[28].mxu0 }
 0x256   : > { %v11145_v0 = vpop.f32.mrb[29].mxu0  ;;  %11455 = vmatpush3.bf16.msra.mxu0 %v12011_v38 }
 0x257   : > { %v14464_v26 = vadd.f32 %v11145_v0, %v11144_v36  ;;  %v11147_v48 = vpop.f32.mrb[30].mxu0  ;;  %v12012_v36 = vld [vmem:[%s16479_s4 + $0x30] sm:$0xff]   ;;  %v12013_v0 = vld [vmem:[%s16479_s4 + $0xf8] sm:$0xff]  }
 0x258   : > { %v11148_v59 = vpop.f32.mrb[31].mxu0  ;;  %11343 = vmatpush3.bf16.msra.mxu1 %v12012_v36  ;;  %11456 = vmatprep.subr.bf16.mxu0 %v12013_v0 }
 0x259   : > { %v14469_v4 = vadd.f32 %v11148_v59, %v11147_v48  ;;  %v12016_v59 = vld [vmem:[%s16479_s4 + $0x38] sm:$0xff]  }
 0x25a   : > { %5040 = vmatmul.mubr.bf16.gmra.mrb[44].mxu1 %v4395_v43  ;;  %v12014_v43 = vld [vmem:[%s16479_s4 + $0x78] sm:$0xff]   ;;  %11457 = vmatpush3.bf16.msra.mxu0 %v12015_v5 }
 0x25b   : > { %5047 = vmatprep.mubr.bf16.mxu1 %v4401_v6  ;;  %11344 = vmatprep.subr.bf16.mxu1 %v12014_v43 }
 0x25c   : > { %11345 = vmatpush3.bf16.msra.mxu1 %v12016_v59 }
 0x25d   : > { %v11150_v19 = vpop.f32.mrb[32].mxu0 }
 0x25e   : > { %v11151_v63 = vpop.f32.mrb[33].mxu0 }
 0x25f   : > { %v14471_v35 = vadd.f32 %v11151_v63, %v11150_v19  ;;  %v11153_v45 = vpop.f32.mrb[34].mxu0  ;;  %v6076_v19 = vld [vmem:[#allocation4] sm:$0xf]  ;;  %v6077_v63 = vld [vmem:[#allocation4 + $0x4] sm:$0xf] }
 0x260   : > { %v11154_v9 = vpop.f32.mrb[35].mxu0 }
 0x261   : > { %v14473_v2 = vadd.f32 %v11154_v9, %v11153_v45  ;;  %v6125_v45 = vshrl.u32 %v6076_v19, 16  ;;  %v6134_v9 = vshll.u32 %v6077_v63, 16 }
 0x262   : > { %5048 = vmatmul.mubr.bf16.gmra.mrb[48].mxu1 %v4400_v55  ;;  %v6078_v55 = vld [vmem:[#allocation4 + $0x8] sm:$0x1] }
 0x263   : > { %5055 = vmatprep.mubr.bf16.mxu1 %v4406_v20  ;;  %v6128_v20 = vshll.u32 %v6076_v19, 16  ;;  %v6127_v44 = vrot.slane %v6125_v45, 4 }
 0x26a   : > { %5056 = vmatmul.mubr.bf16.gmra.mrb[52].mxu1 %v4405_v23  ;;  %v11156_v15 = vpop.f32.mrb[36].mxu0  ;;  %v6138_v23 = vshrl.u32 %v6077_v63, 16 }
 0x26b   : > { %v11157_v33 = vpop.f32.mrb[37].mxu0 }
 0x26c   : > { %v14478_v40 = vadd.f32 %v11157_v33, %v11156_v15  ;;  %v11159_v32 = vpop.f32.mrb[38].mxu0  ;;  %v6144_v33 = vshll.u32 %v6078_v55, 16  ;;  %v6140_v46 = vrot.slane %v6138_v23, 4  ;;  %v12028_v23 = vld [vmem:[%s16479_s4 + $0x140] sm:$0xff]  }
 0x26d   : > { %v11160_v13 = vpop.f32.mrb[39].mxu0  ;;  %11554 = vmatprep.subr.bf16.mxu1 %v12028_v23 }
 0x26e   : > { %v14483_v30 = vadd.f32 %v11160_v13, %v11159_v32  ;;  %v6130_v32 = vrot.slane %v6128_v20, 5  ;;  %v6136_v13 = vrot.slane %v6134_v9, 5  ;;  %v6146_v10 = vrot.slane %v6144_v33, 5 }
 0x26f   : > { %v4490_v20 = vlaneseq }
 0x270   : > { %v6131_v58 = vor.u32 %v6130_v32, %v6127_v44  ;;  %v6141_v57 = vor.u32 %v6140_v46, %v6136_v13 }
 0x272   : > { %v6132_v1 = vrot.slane %v6131_v58, 4 }
 0x27a   : > { %v11162_v47 = vpop.f32.mrb[40].mxu0 }
 0x27b   : > { %v11163_v51 = vpop.f32.mrb[41].mxu0 }
 0x27c   : > { %v14503_v8 = vadd.f32 %v11163_v51, %v11162_v47  ;;  %v11165_v29 = vpop.f32.mrb[42].mxu0  ;;  %v6142_v47 = vrot.slane %v6141_v57, 4 }
 0x27d   : > { %v11166_v52 = vpop.f32.mrb[43].mxu0 }
 0x27e   : > { %v14508_v7 = vadd.f32 %v11166_v52, %v11165_v29  ;;  %v6137_v29 = vsel %vm12533_vm12, %v6132_v1, %v6136_v13  ;;  %v6147_v52 = vsel %vm12533_vm12, %v6142_v47, %v6146_v10  ;;  %v14579_v13 = vshrl.u32 %v4490_v20, 7 }
 0x27f   : > { %v10801_v37 = vcombine.low %v6137_v29, %v6147_v52 }
 0x280   : > { %16634 = vst [vmem:[#allocation15_spill] sm:$0xff] %v14579_v13  ;;  %v16517_v57 = vsub.s32 0, %v14579_v13 }
 0x28b   : > { %v3327_v48 = vpop.permute.xlu1 %3326 }
 0x28c   : > { %3359 = vst.msk [vmem:[#allocation3 + $0x268] sm:$0xff] %vm2044_vm11, %v3327_v48 }
 0x28e   : > { %v4014_v6 = vpop.permute.xlu0 %4013 }
 0x28f   : > { %4047 = vst.msk [vmem:[#allocation3 + $0x248] sm:$0xff] %vm2044_vm11, %v4014_v6 }
 0x292   : > { %v4016_v15 = vpop.permute.xlu0 %4015 }
 0x293   : > { %4048 = vst.msk [vmem:[#allocation3 + $0x270] sm:$0xff] %vm2044_vm11, %v4016_v15  ;;  %v4415_v62 = vld [vmem:[#allocation3 + $0x268] sm:$0xff] }
 0x294   : > { %v12029_v15 = vld [vmem:[%s16479_s4 + $0x100] sm:$0xff]  }
 0x296   : > { %v4411_v12 = vld [vmem:[#allocation3 + $0x248] sm:$0xff] }
 0x297   : > { %5063 = vmatprep.mubr.bf16.mxu1 %v4411_v12  ;;  %v4337_v12 = vld [vmem:[%s16478_s3] sm:$0x7] }
 0x298   : > { %5064 = vmatmul.mubr.bf16.gmra.mrb[56].mxu1 %v4410_v31  ;;  %v14589_v1 = vrot.slane %v4337_v12, %v16517_v57 }
 0x29a   : > { %v4416_v51 = vld [vmem:[#allocation3 + $0x270] sm:$0xff]  ;;  %16636 = vst [vmem:[#allocation26_spill] sm:$0xff] %v14589_v1  ;;  %v4804_v23 = vadd.f32 %v14415_v60, %v14589_v1  ;;  %v14625_v60 = vadd.f32 %v14435_v61, %v14589_v1 }
 0x29b   : > { %5071 = vmatprep.mubr.bf16.mxu1 %v4416_v51 }
 0x2a0   : > { %5072 = vmatmul.mubr.bf16.gmra.mrb[60].mxu1 %v4415_v62 }
 0x2a1   : > { %9522 = vmatprep.mubr.bf16.mxu1 %v10801_v37  ;;  %v11168_v21 = vpop.f32.mrb[44].mxu0 }
 0x2a2   : > { %v11169_v25 = vpop.f32.mrb[45].mxu0 }
 0x2a3   : > { %v14559_v56 = vadd.f32 %v11169_v25, %v11168_v21  ;;  %v11171_v18 = vpop.f32.mrb[46].mxu0 }
 0x2a4   : > { %v11172_v50 = vpop.f32.mrb[47].mxu0 }
 0x2a5   : > { %v14561_v34 = vadd.f32 %v11172_v50, %v11171_v18  ;;  %v16516_v18 = vsub.s32 1, %v14579_v13 }
 0x2a8   : > { %9523 = vmatmul.mubr.bf16.vlgmr.msra.gmra.mrb[64].mxu1 %v12018_v24  ;;  %v4793_v24 = vadd.f32 %v14388_v41, %v14589_v1 }
 0x2a9   : > { %11555 = vmatpush3.bf16.msra.mxu1 %v12029_v15 }
 0x2af   : > { %v11174_v38 = vpop.f32.mrb[48].mxu0 }
 0x2b0   : > { %v11175_v36 = vpop.f32.mrb[49].mxu0 }
 0x2b1   : > { %v14563_v0 = vadd.f32 %v11175_v36, %v11174_v38  ;;  %v11177_v48 = vpop.f32.mrb[50].mxu0  ;;  %v4796_v38 = vadd.f32 %v14396_v16, %v14589_v1  ;;  %v14611_v16 = vadd.f32 %v14424_v49, %v14589_v1  ;;  %v14629_v49 = vadd.f32 %v14437_v22, %v14589_v1 }
 0x2b2   : > { %v11178_v43 = vpop.f32.mrb[51].mxu0  ;;  %v14646_v22 = vadd.f32 %v14452_v28, %v14589_v1  ;;  %v6588_v28 = vld [vmem:[#allocation4] sm:$0xe] }
 0x2b3   : > { %v14565_v5 = vadd.f32 %v11178_v43, %v11177_v48 }
 0x2bb   : > { %v11180_v59 = vpop.f32.mrb[52].mxu0 }
 0x2bc   : > { %v11181_v6 = vpop.f32.mrb[53].mxu0 }
 0x2bd   : > { %v14567_v19 = vadd.f32 %v11181_v6, %v11180_v59  ;;  %v11183_v63 = vpop.f32.mrb[54].mxu0  ;;  %v16515_v59 = vsub.s32 2, %v14579_v13 }
 0x2be   : > { %v11184_v55 = vpop.f32.mrb[55].mxu0 }
 0x2bf   : > { %v14569_v45 = vadd.f32 %v11184_v55, %v11183_v63  ;;  %v14603_v55 = vrot.slane %v4337_v12, %v16516_v18 }
 0x2c5   : > { %v11186_v9 = vpop.f32.mrb[56].mxu0 }
 0x2c6   : > { %v11187_v33 = vpop.f32.mrb[57].mxu0 }
 0x2c7   : > { %v14577_v44 = vadd.f32 %v11187_v33, %v11186_v9  ;;  %v11189_v32 = vpop.f32.mrb[58].mxu0  ;;  %v4801_v9 = vadd.f32 %v14411_v27, %v14589_v1  ;;  %v14615_v33 = vadd.f32 %v14427_v54, %v14589_v1  ;;  %v14633_v54 = vadd.f32 %v14440_v14, %v14589_v1 }
 0x2c8   : > { %v11190_v46 = vpop.f32.mrb[59].mxu0  ;;  %v14650_v14 = vadd.f32 %v14457_v17, %v14589_v1  ;;  %v14663_v17 = vadd.f32 %v14464_v26, %v14589_v1  ;;  %v12035_v26 = vld [vmem:[%s16479_s4 + $0x108] sm:$0xff]  }
 0x2c9   : > { %16633 = vst [vmem:[#allocation9_spill] sm:$0xff] %v14577_v44  ;;  %v14581_v58 = vadd.f32 %v11190_v46, %v11189_v32  ;;  %v14619_v46 = vrot.slane %v4337_v12, %v16515_v59  ;;  %v14637_v12 = vadd.f32 %v14442_v53, %v14589_v1  ;;  %v14654_v53 = vadd.f32 %v14462_v39, %v14589_v1 }
 0x2ca   : > { %v14667_v39 = vadd.f32 %v14469_v4, %v14589_v1 }
 0x2cb   : > { %16635 = vst [vmem:[#allocation32_spill] sm:$0xff] %v14581_v58 }
 0x2d0   : > { %v11192_v10 = vpop.f32.mrb[60].mxu0 }
 0x2d1   : > { %v11193_v31 = vpop.f32.mrb[61].mxu0 }
 0x2d2   : > { %v14591_v47 = vadd.f32 %v11193_v31, %v11192_v10  ;;  %v11195_v51 = vpop.f32.mrb[62].mxu0  ;;  %v14621_v31 = vld [vmem:[#allocation4 + $0x4] sm:$0xf] }
 0x2d3   : > { %v11196_v29 = vpop.f32.mrb[63].mxu0 }
 0x2d4   : > { %16637 = vst [vmem:[#allocation27_spill] sm:$0xff] %v14591_v47  ;;  %v14593_v52 = vadd.f32 %v11196_v29, %v11195_v51  ;;  %v14641_v29 = vadd.f32 %v14450_v3, %v14589_v1  ;;  %v6686_v3 = vrot.slane %v14621_v31, 5 }
 0x2d5   : > { %v11214_v37 = vpop.f32.mrb[0].mxu1 }
 0x2d6   : > { %16638 = vst [vmem:[#allocation35_spill] sm:$0xff] %v14593_v52  ;;  %v11215_v62 = vpop.f32.mrb[1].mxu1 }
 0x2d7   : > { %v11216_v21 = vadd.f32 %v11215_v62, %v11214_v37  ;;  %v11217_v25 = vpop.f32.mrb[2].mxu1 }
 0x2d8   : > { %v11218_v50 = vpop.f32.mrb[3].mxu1  ;;  %v11812_v48 = vpop.f32.mrb[64].mxu0 }
 0x2d9   : > { %v11219_v36 = vadd.f32 %v11218_v50, %v11217_v25  ;;  %v4954_v43 = vadd.f32 %v11216_v21, %v4793_v24  ;;  %v5114_v6 = vpop.f32.mrb[65].mxu0 }
 0x2da   : > { %v11813_v41 = vpop.f32.mrb[66].mxu0 }
 0x2db   : > { %v5115_v63 = vadd.f32 %v5114_v6, %v4954_v43  ;;  %v4957_v20 = vadd.f32 %v11219_v36, %v4796_v38  ;;  %v5117_v15 = vpop.f32.mrb[67].mxu0  ;;  %v6590_v6 = vld [vmem:[#allocation4 + $0x8] sm:$0x1] }
 0x2dd   : > { %v5241_v32 = vmax.f32 %v5115_v63, 0.0  ;;  %v5118_v10 = vadd.f32 %v5117_v15, %v4957_v20  ;;  %v11220_v27 = vpop.f32.mrb[4].mxu1  ;;  %v14671_v63 = vadd.f32 %v14471_v35, %v14589_v1  ;;  %v14675_v20 = vadd.f32 %v14473_v2, %v14589_v1  ;;  %v12034_v15 = vld [vmem:[%s16479_s4 + $0x148] sm:$0xff]  }
 0x2de   : > { %v11221_v51 = vpop.f32.mrb[5].mxu1  ;;  %v10817_v2 = vrot.slane %v6588_v28, 9  ;;  %11556 = vmatprep.subr.bf16.mxu1 %v12034_v15 }
 0x2df   : > { %v5277_v61 = vmul.f32 %v14603_v55, %v5241_v32  ;;  %v5242_v37 = vmax.f32 %v5118_v10, 0.0  ;;  %v11222_v62 = vadd.f32 %v11221_v51, %v11220_v27  ;;  %v11223_v24 = vpop.f32.mrb[6].mxu1  ;;  %v6688_v51 = vrot.slane %v6686_v3, 4  ;;  %11557 = vmatpush3.bf16.msra.mxu1 %v12035_v26 }
 0x2e0   : > { %v11224_v21 = vpop.f32.mrb[7].mxu1  ;;  %v14659_v43 = vpop.f32.mrb[68].mxu0 }
 0x2e1   : > { %v5313_v25 = vadd.f32 %v14619_v46, %v5277_v61  ;;  %v5278_v50 = vmul.f32 %v14603_v55, %v5242_v37  ;;  %v4962_v38 = vadd.f32 %v11222_v62, %v4801_v9  ;;  %v11225_v36 = vadd.f32 %v11224_v21, %v11223_v24  ;;  %v5130_v9 = vpop.f32.mrb[69].mxu0 }
 0x2e2   : > { %v14684_v35 = vpop.f32.mrb[70].mxu0  ;;  %v6689_v61 = vrot.slane %v6590_v6, 5  ;;  %v14688_v37 = vadd.f32 %v14478_v40, %v14589_v1 }
 0x2e3   : > { %v11054_v32 = vpack.c.bf16 %v5313_v25, %v5313_v25  ;;  %v5314_v4 = vadd.f32 %v14619_v46, %v5278_v50  ;;  %v5123_v10 = vadd.f32 %v11812_v48, %v4962_v38  ;;  %v4965_v27 = vadd.f32 %v11225_v36, %v4804_v23  ;;  %v5133_v31 = vpop.f32.mrb[71].mxu0 }
 0x2e4   : > { %v14692_v48 = vadd.f32 %v14483_v30, %v14589_v1  ;;  %v14696_v23 = vadd.f32 %v14503_v8, %v14589_v1  ;;  %v14700_v50 = vadd.f32 %v14508_v7, %v14589_v1  ;;  %v5818_v8 = vld [vmem:[#allocation4 + $0xc] sm:$0xf]  ;;  %v14711_v7 = vsel %vm12675_vm0, %v10817_v2, %v6686_v3  ;;  %v5824_v3 = vld [vmem:[#allocation4 + $0x14] sm:$0x1] }
 0x2e5   : > { %v5496_v62 = vshrl.u32 %v11054_v32, 16  ;;  %v11055_v24 = vpack.c.bf16 %v5314_v4, %v5314_v4  ;;  %v5243_v21 = vmax.f32 %v5123_v10, 0.0  ;;  %v11226_v25 = vpop.f32.mrb[8].mxu1  ;;  %v5126_v38 = vadd.f32 %v11813_v41, %v4965_v27 }
 0x2e6   : > { %v11227_v40 = vpop.f32.mrb[9].mxu1  ;;  %v5499_v28 = vshll.u32 %v11054_v32, 16  ;;  %v14715_v41 = vsel %vm12675_vm0, %v6688_v51, %v6689_v61 }
 0x2e7   : > { %v5498_v36 = vrot.slane %v5496_v62, 7  ;;  %v5504_v6 = vshrl.u32 %v11055_v24, 16  ;;  %v5279_v15 = vmul.f32 %v14603_v55, %v5243_v21  ;;  %v11229_v26 = vpop.f32.mrb[10].mxu1  ;;  %v5244_v4 = vmax.f32 %v5126_v38, 0.0 }
 0x2e8   : > { %v11228_v10 = vadd.f32 %v11227_v40, %v11226_v25  ;;  %v11230_v59 = vpop.f32.mrb[11].mxu1  ;;  %v5507_v62 = vshll.u32 %v11055_v24, 16  ;;  %v14718_v18 = vpop.f32.mrb[72].mxu0 }
 0x2e9   : > { %v5501_v32 = vor.u32 %v5499_v28, %v5498_v36  ;;  %v5506_v27 = vrot.slane %v5504_v6, 7  ;;  %v5315_v21 = vadd.f32 %v14619_v46, %v5279_v15  ;;  %v5502_v57 = vrot.slane %v5498_v36, 4  ;;  %v14728_v38 = vpop.f32.mrb[73].mxu0 }
 0x2ea   : > { %v5280_v2 = vmul.f32 %v14603_v55, %v5244_v4  ;;  %v4970_v51 = vadd.f32 %v11228_v10, %v14611_v16  ;;  %v11231_v61 = vadd.f32 %v11230_v59, %v11229_v26  ;;  %v14732_v6 = vpop.f32.mrb[74].mxu0  ;;  %v14742_v16 = vadd.f32 %v14559_v56, %v14589_v1 }
 0x2eb   : > { %v5819_v24 = vsel %vm14705_vm9, %v5501_v32, %v5818_v8  ;;  %v5509_v40 = vor.u32 %v5507_v62, %v5506_v27  ;;  %v5511_v28 = vrot.slane %v5506_v27, 4  ;;  %v11056_v36 = vpack.c.bf16 %v5315_v21, %v5315_v21  ;;  %v14736_v4 = vpop.f32.mrb[75].mxu0 }
 0x2ec   : > { %5820 = vst [vmem:[#allocation4 + $0xc] sm:$0xf] %v5819_v24  ;;  %v5316_v15 = vadd.f32 %v14619_v46, %v5280_v2  ;;  %v5131_v13 = vadd.f32 %v5130_v9, %v4970_v51  ;;  %v4973_v52 = vadd.f32 %v11231_v61, %v14615_v33  ;;  %v14750_v33 = vadd.f32 %v14561_v34, %v14589_v1  ;;  %v5827_v34 = vld [vmem:[#allocation4 + $0x18] sm:$0xf] }
 0x2ed   : > { %v5510_v8 = vsel %vm12341_vm4, %v5502_v57, %v5509_v40  ;;  %v5825_v10 = vsel %vm14722_vm6, %v5511_v28, %v5824_v3  ;;  %v5513_v32 = vshrl.u32 %v11056_v36, 16  ;;  %v11232_v27 = vpop.f32.mrb[12].mxu1  ;;  %v14754_v56 = vadd.f32 %v14563_v0, %v14589_v1 }
 0x2ee   : > { %5821 = vst [vmem:[#allocation4 + $0x10] sm:$0xf] %v5510_v8  ;;  %5826 = vst [vmem:[#allocation4 + $0x14] sm:$0x1] %v5825_v10  ;;  %v11057_v9 = vpack.c.bf16 %v5316_v15, %v5316_v15  ;;  %v5245_v62 = vmax.f32 %v5131_v13, 0.0  ;;  %v5134_v21 = vadd.f32 %v5133_v31, %v4973_v52  ;;  %v11233_v2 = vpop.f32.mrb[13].mxu1  ;;  %v14758_v24 = vadd.f32 %v14565_v5, %v14589_v1 }
 0x2ef   : > { %v5515_v57 = vrot.slane %v5513_v32, 7  ;;  %v5516_v51 = vshll.u32 %v11056_v36, 16  ;;  %v11234_v61 = vadd.f32 %v11233_v2, %v11232_v27  ;;  %v11235_v3 = vpop.f32.mrb[14].mxu1  ;;  %v14763_v52 = vadd.f32 %v14567_v19, %v14589_v1  ;;  %v5831_v5 = vld [vmem:[#allocation4 + $0x20] sm:$0x1] }
 0x2f0   : > { %16644 = vst [vmem:[#allocation29_spill] sm:$0xff] %v14758_v24  ;;  %v5521_v40 = vshrl.u32 %v11057_v9, 16  ;;  %v5281_v28 = vmul.f32 %v14603_v55, %v5245_v62  ;;  %v5246_v15 = vmax.f32 %v5134_v21, 0.0  ;;  %v11236_v13 = vpop.f32.mrb[15].mxu1  ;;  %v14766_v8 = vpop.f32.mrb[76].mxu0  ;;  %v5524_v32 = vshll.u32 %v11057_v9, 16 }
 0x2f1   : > { %16645 = vst [vmem:[#allocation28_spill] sm:$0xff] %v14763_v52  ;;  %v5518_v0 = vor.u32 %v5516_v51, %v5515_v57  ;;  %v4978_v31 = vadd.f32 %v11234_v61, %v14625_v60  ;;  %v11237_v36 = vadd.f32 %v11236_v13, %v11235_v3  ;;  %v14770_v62 = vpop.f32.mrb[77].mxu0  ;;  %v5519_v21 = vrot.slane %v5515_v57, 4 }
 0x2f2   : > { %v5523_v10 = vrot.slane %v5521_v40, 7  ;;  %v5317_v27 = vadd.f32 %v14619_v46, %v5281_v28  ;;  %v5282_v2 = vmul.f32 %v14603_v55, %v5246_v15  ;;  %v14776_v61 = vpop.f32.mrb[78].mxu0  ;;  %v14783_v57 = vadd.f32 %v14569_v45, %v14589_v1 }
 0x2f3   : > { %v5828_v19 = vsel %vm14705_vm9, %v5518_v0, %v5827_v34  ;;  %v5139_v51 = vadd.f32 %v14659_v43, %v4978_v31  ;;  %v4981_v60 = vadd.f32 %v11237_v36, %v14629_v49  ;;  %v6079_v3 = vld [vmem:[#allocation4 + $0xc] sm:$0xf]  ;;  %v14779_v15 = vpop.f32.mrb[79].mxu0 }
 0x2f4   : > { %5829 = vst [vmem:[#allocation4 + $0x18] sm:$0xf] %v5828_v19  ;;  %v5526_v9 = vor.u32 %v5524_v32, %v5523_v10  ;;  %v5528_v40 = vrot.slane %v5523_v10, 4  ;;  %v11058_v13 = vpack.c.bf16 %v5317_v27, %v5317_v27  ;;  %v5318_v28 = vadd.f32 %v14619_v46, %v5282_v2  ;;  %16646 = vst [vmem:[#allocation36_spill] sm:$0xff] %v14783_v57 }
 0x2f5   : > { %v5247_v34 = vmax.f32 %v5139_v51, 0.0  ;;  %v5142_v43 = vadd.f32 %v14684_v35, %v4981_v60  ;;  %v11238_v0 = vpop.f32.mrb[16].mxu1  ;;  %v12017_v49 = vld [vmem:[#allocation4 + $0xc] sm:$0xff]   ;;  %v6149_v31 = vshrl.u32 %v6079_v3, 16 }
 0x2f6   : > { %v5527_v36 = vsel %vm12341_vm4, %v5519_v21, %v5526_v9  ;;  %v5832_v10 = vsel %vm14722_vm6, %v5528_v40, %v5831_v5  ;;  %v5530_v32 = vshrl.u32 %v11058_v13, 16  ;;  %v5533_v27 = vshll.u32 %v11058_v13, 16  ;;  %v11239_v2 = vpop.f32.mrb[17].mxu1  ;;  %v14790_v19 = vld [vmem:[#allocation4 + $0x10] sm:$0xf]  ;;  %9683 = vmatprep.mubr.bf16.mxu0 %v12017_v49 }
 0x2f7   : > { %5830 = vst [vmem:[#allocation4 + $0x1c] sm:$0xf] %v5527_v36  ;;  %5833 = vst [vmem:[#allocation4 + $0x20] sm:$0x1] %v5832_v10  ;;  %v11059_v45 = vpack.c.bf16 %v5318_v28, %v5318_v28  ;;  %v5283_v51 = vmul.f32 %v14603_v55, %v5247_v34  ;;  %v5248_v35 = vmax.f32 %v5142_v43, 0.0  ;;  %v11240_v60 = vadd.f32 %v11239_v2, %v11238_v0  ;;  %v11241_v59 = vpop.f32.mrb[18].mxu1 }
 0x2f8   : > { %v5532_v47 = vrot.slane %v5530_v32, 7  ;;  %v11242_v58 = vpop.f32.mrb[19].mxu1  ;;  %v16647_v21 = vcombine.low %v14711_v7, %v14715_v41  ;;  %v6151_v5 = vrot.slane %v6149_v31, 4  ;;  %v6152_v9 = vshll.u32 %v6079_v3, 16  ;;  %v5834_v13 = vld [vmem:[#allocation4 + $0x24] sm:$0xf] }
 0x2f9   : > { %v6158_v40 = vshll.u32 %v14790_v19, 16  ;;  %v5538_v36 = vshrl.u32 %v11059_v45, 16  ;;  %v5541_v10 = vshll.u32 %v11059_v45, 16  ;;  %v5319_v28 = vadd.f32 %v14619_v46, %v5283_v51  ;;  %v14799_v43 = vpop.f32.mrb[80].mxu0 }
 0x2fa   : > { %9684 = vmatmul.mubr.bf16.vlgmr.msra.gmra.mrb[96].mxu0 %v16647_v21  ;;  %v5284_v34 = vmul.f32 %v14603_v55, %v5248_v35  ;;  %v5535_v0 = vor.u32 %v5533_v27, %v5532_v47  ;;  %v5536_v49 = vrot.slane %v5532_v47, 4  ;;  %v4986_v32 = vadd.f32 %v11240_v60, %v14633_v54  ;;  %v14802_v7 = vpop.f32.mrb[81].mxu0  ;;  %v5838_v35 = vld [vmem:[#allocation4 + $0x2c] sm:$0x1] }
 0x2fb   : > { %v11243_v2 = vadd.f32 %v11242_v58, %v11241_v59  ;;  %v5540_v41 = vrot.slane %v5538_v36, 7  ;;  %v11060_v3 = vpack.c.bf16 %v5319_v28, %v5319_v28  ;;  %v14805_v21 = vpop.f32.mrb[82].mxu0  ;;  %v6154_v45 = vrot.slane %v6152_v9, 5  ;;  %v6082_v24 = vld [vmem:[#allocation4 + $0x18] sm:$0xf] }
 0x2fc   : > { %v5320_v31 = vadd.f32 %v14619_v46, %v5284_v34  ;;  %v5835_v51 = vsel %vm14705_vm9, %v5535_v0, %v5834_v13  ;;  %v5147_v44 = vadd.f32 %v14728_v38, %v4986_v32  ;;  %v14811_v27 = vpop.f32.mrb[83].mxu0  ;;  %v14813_v58 = vrot.slane %v6158_v40, 5 }
 0x2fd   : > { %v4989_v47 = vadd.f32 %v11243_v2, %v14637_v12  ;;  %5836 = vst [vmem:[#allocation4 + $0x24] sm:$0xf] %v5835_v51  ;;  %v5543_v54 = vor.u32 %v5541_v10, %v5540_v41  ;;  %v5545_v59 = vrot.slane %v5540_v41, 4  ;;  %v5547_v60 = vshrl.u32 %v11060_v3, 16  ;;  %v11244_v28 = vpop.f32.mrb[20].mxu1 }
 0x2fe   : > { %v5550_v36 = vshll.u32 %v11060_v3, 16  ;;  %v11061_v34 = vpack.c.bf16 %v5320_v31, %v5320_v31  ;;  %v5249_v9 = vmax.f32 %v5147_v44, 0.0  ;;  %v11245_v13 = vpop.f32.mrb[21].mxu1  ;;  %v12019_v0 = vld [vmem:[#allocation4 + $0x18] sm:$0xff]   ;;  %v6155_v57 = vor.u32 %v6154_v45, %v6151_v5  ;;  %v5841_v2 = vld [vmem:[#allocation4 + $0x30] sm:$0xf] }
 0x2ff   : > { %v5150_v1 = vadd.f32 %v14736_v4, %v4989_v47  ;;  %v5544_v12 = vsel %vm12341_vm4, %v5536_v49, %v5543_v54  ;;  %v5839_v38 = vsel %vm14722_vm6, %v5545_v59, %v5838_v35  ;;  %v5549_v40 = vrot.slane %v5547_v60, 7  ;;  %v11247_v10 = vpop.f32.mrb[22].mxu1  ;;  %9691 = vmatprep.mubr.bf16.mxu0 %v12019_v0  ;;  %v5845_v54 = vld [vmem:[#allocation4 + $0x38] sm:$0x1]  ;;  %v6591_v0 = vld [vmem:[#allocation4 + $0xc] sm:$0xe] }
 0x300   : > { %v11246_v32 = vadd.f32 %v11245_v13, %v11244_v28  ;;  %5837 = vst [vmem:[#allocation4 + $0x28] sm:$0xf] %v5544_v12  ;;  %5840 = vst [vmem:[#allocation4 + $0x2c] sm:$0x1] %v5839_v38  ;;  %v5555_v41 = vshrl.u32 %v11061_v34, 16  ;;  %v5558_v3 = vshll.u32 %v11061_v34, 16  ;;  %v5285_v44 = vmul.f32 %v14603_v55, %v5249_v9 }
 0x301   : > { %v5250_v4 = vmax.f32 %v5150_v1, 0.0  ;;  %v11248_v31 = vpop.f32.mrb[23].mxu1  ;;  %v5552_v5 = vor.u32 %v5550_v36, %v5549_v40  ;;  %v5553_v45 = vrot.slane %v5549_v40, 4  ;;  %v14822_v47 = vpop.f32.mrb[84].mxu0  ;;  %v14826_v28 = vrot.slane %v6155_v57, 4  ;;  %v12040_v1 = vld [vmem:[%s16479_s4 + $0x150] sm:$0xff]  }
 0x302   : > { %v4994_v49 = vadd.f32 %v11246_v32, %v14641_v29  ;;  %v11249_v51 = vadd.f32 %v11248_v31, %v11247_v10  ;;  %v5557_v35 = vrot.slane %v5555_v41, 7  ;;  %v5321_v59 = vadd.f32 %v14619_v46, %v5285_v44  ;;  %v14828_v34 = vpop.f32.mrb[85].mxu0  ;;  %v12041_v57 = vld [vmem:[%s16479_s4 + $0x110] sm:$0xff]   ;;  %11558 = vmatprep.subr.bf16.mxu1 %v12040_v1 }
 0x303   : > { %v5286_v60 = vmul.f32 %v14603_v55, %v5250_v4  ;;  %v5842_v29 = vsel %vm14705_vm9, %v5552_v5, %v5841_v2  ;;  %v6162_v13 = vshrl.u32 %v14790_v19, 16  ;;  %v14838_v12 = vpop.f32.mrb[86].mxu0  ;;  %v6081_v2 = vld [vmem:[#allocation4 + $0x14] sm:$0x1]  ;;  %v6161_v19 = vsel %vm12533_vm12, %v14826_v28, %v14813_v58  ;;  %v6592_v4 = vld [vmem:[#allocation4 + $0x10] sm:$0xf]  ;;  %11559 = vmatpush3.bf16.msra.mxu1 %v12041_v57 }
 0x304   : > { %v5155_v36 = vadd.f32 %v14718_v18, %v4994_v49  ;;  %v4997_v9 = vadd.f32 %v11249_v51, %v14646_v22  ;;  %5843 = vst [vmem:[#allocation4 + $0x30] sm:$0xf] %v5842_v29  ;;  %v5560_v38 = vor.u32 %v5558_v3, %v5557_v35  ;;  %v5562_v40 = vrot.slane %v5557_v35, 4  ;;  %v14844_v41 = vpop.f32.mrb[87].mxu0  ;;  %v12046_v3 = vld [vmem:[%s16479_s4 + $0x158] sm:$0xff]  }
 0x305   : > { %v11062_v32 = vpack.c.bf16 %v5321_v59, %v5321_v59  ;;  %v5322_v10 = vadd.f32 %v14619_v46, %v5286_v60  ;;  %v6164_v44 = vrot.slane %v6162_v13, 4  ;;  %v11250_v31 = vpop.f32.mrb[24].mxu1  ;;  %v5848_v59 = vld [vmem:[#allocation4 + $0x3c] sm:$0xf]  ;;  %11560 = vmatprep.subr.bf16.mxu1 %v12046_v3  ;;  %v6168_v13 = vshll.u32 %v6081_v2, 16 }
 0x306   : > { %v5251_v18 = vmax.f32 %v5155_v36, 0.0  ;;  %v5158_v22 = vadd.f32 %v14732_v6, %v4997_v9  ;;  %v5561_v5 = vsel %vm12341_vm4, %v5553_v45, %v5560_v38  ;;  %v5846_v49 = vsel %vm14722_vm6, %v5562_v40, %v5845_v54  ;;  %v11251_v35 = vpop.f32.mrb[25].mxu1 }
 0x307   : > { %v5564_v6 = vshrl.u32 %v11062_v32, 16  ;;  %v5567_v51 = vshll.u32 %v11062_v32, 16  ;;  %5844 = vst [vmem:[#allocation4 + $0x34] sm:$0xf] %v5561_v5  ;;  %5847 = vst [vmem:[#allocation4 + $0x38] sm:$0x1] %v5846_v49  ;;  %v11063_v60 = vpack.c.bf16 %v5322_v10, %v5322_v10  ;;  %v6165_v29 = vor.u32 %v6164_v44, %v14813_v58 }
 0x308   : > { %v5287_v28 = vmul.f32 %v14603_v55, %v5251_v18  ;;  %v5252_v1 = vmax.f32 %v5158_v22, 0.0  ;;  %v11253_v36 = vpop.f32.mrb[26].mxu1  ;;  %v10818_v45 = vrot.slane %v6591_v0, 9  ;;  %v6693_v57 = vrot.slane %v6592_v4, 5  ;;  %v6593_v49 = vld [vmem:[#allocation4 + $0x14] sm:$0x1] }
 0x309   : > { %v5566_v9 = vrot.slane %v5564_v6, 7  ;;  %v11254_v38 = vpop.f32.mrb[27].mxu1  ;;  %v5572_v54 = vshrl.u32 %v11063_v60, 16  ;;  %v5575_v40 = vshll.u32 %v11063_v60, 16  ;;  %v14862_v10 = vpop.f32.mrb[88].mxu0  ;;  %v12047_v58 = vld [vmem:[%s16479_s4 + $0x118] sm:$0xff]  }
 0x30a   : > { %v5323_v32 = vadd.f32 %v14619_v46, %v5287_v28  ;;  %v5288_v5 = vmul.f32 %v14603_v55, %v5252_v1  ;;  %16648 = vst [vmem:[#allocation30_spill] sm:$0xff] %v14862_v10  ;;  %v6166_v44 = vrot.slane %v6165_v29, 4  ;;  %v6170_v2 = vrot.slane %v6168_v13, 5  ;;  %v14867_v0 = vpop.f32.mrb[89].mxu0  ;;  %11561 = vmatpush3.bf16.msra.mxu1 %v12047_v58  ;;  %v5852_v10 = vld [vmem:[#allocation4 + $0x44] sm:$0x1] }
 0x30b   : > { %v5569_v18 = vor.u32 %v5567_v51, %v5566_v9  ;;  %v5570_v22 = vrot.slane %v5566_v9, 4  ;;  %16649 = vst [vmem:[#allocation31_spill] sm:$0xff] %v14867_v0  ;;  %v5574_v4 = vrot.slane %v5572_v54, 7  ;;  %v6694_v60 = vsel %vm12675_vm0, %v10818_v45, %v6693_v57  ;;  %v14872_v28 = vpop.f32.mrb[90].mxu0  ;;  %v12021_v0 = vld [vmem:[#allocation4 + $0x24] sm:$0xff]  }
 0x30c   : > { %v11064_v3 = vpack.c.bf16 %v5323_v32, %v5323_v32  ;;  %v5324_v6 = vadd.f32 %v14619_v46, %v5288_v5  ;;  %16650 = vst [vmem:[#allocation33_spill] sm:$0xff] %v14872_v28  ;;  %v6171_v51 = vsel %vm12533_vm12, %v6166_v44, %v6170_v2  ;;  %v6695_v29 = vrot.slane %v6693_v57, 4  ;;  %v14878_v13 = vpop.f32.mrb[91].mxu0 }
 0x30d   : > { %v5849_v1 = vsel %vm14705_vm9, %v5569_v18, %v5848_v59  ;;  %v6696_v9 = vrot.slane %v6593_v49, 5  ;;  %v5577_v54 = vor.u32 %v5575_v40, %v5574_v4  ;;  %v5579_v32 = vrot.slane %v5574_v4, 4  ;;  %v14880_v45 = vpop.f32.mrb[28].mxu1  ;;  %v12020_v4 = vld [vmem:[#allocation4 + $0xc] sm:$0xff]  }
 0x30e   : > { %5850 = vst [vmem:[#allocation4 + $0x3c] sm:$0xf] %v5849_v1  ;;  %v5581_v5 = vshrl.u32 %v11064_v3, 16  ;;  %v5584_v52 = vshll.u32 %v11064_v3, 16  ;;  %v11065_v28 = vpack.c.bf16 %v5324_v6, %v5324_v6  ;;  %v10802_v58 = vcombine.low %v6161_v19, %v6171_v51  ;;  %v14884_v44 = vpop.f32.mrb[29].mxu1 }
 0x30f   : > { %v6697_v59 = vsel %vm12675_vm0, %v6695_v29, %v6696_v9  ;;  %v11252_v18 = vadd.f32 %v11251_v35, %v11250_v31  ;;  %v5578_v57 = vsel %vm12341_vm4, %v5570_v22, %v5577_v54  ;;  %v5853_v40 = vsel %vm14722_vm6, %v5579_v32, %v5852_v10  ;;  %v6083_v3 = vld [vmem:[#allocation4 + $0x1c] sm:$0xf]  ;;  %v14890_v6 = vpop.f32.mrb[30].mxu1  ;;  %v5855_v19 = vld [vmem:[#allocation4 + $0x48] sm:$0xf] }
 0x310   : > { %v5583_v49 = vrot.slane %v5581_v5, 7  ;;  %v10834_v2 = vcombine.low %v6694_v60, %v6697_v59  ;;  %5851 = vst [vmem:[#allocation4 + $0x40] sm:$0xf] %v5578_v57  ;;  %5854 = vst [vmem:[#allocation4 + $0x44] sm:$0x1] %v5853_v40  ;;  %v5589_v31 = vshrl.u32 %v11065_v28, 16  ;;  %9530 = vmatprep.mubr.bf16.mxu1 %v10802_v58  ;;  %v11255_v51 = vadd.f32 %v11254_v38, %v11253_v36 }
 0x311   : > { %v5592_v35 = vshll.u32 %v11065_v28, 16  ;;  %v5002_v1 = vadd.f32 %v11252_v18, %v14650_v14  ;;  %v11260_v29 = vpop.f32.mrb[31].mxu1  ;;  %v5859_v54 = vld [vmem:[#allocation4 + $0x50] sm:$0x1]  ;;  %9531 = vmatmul.mubr.bf16.gmra.mrb[68].mxu1 %v12020_v4  ;;  %v6173_v10 = vshrl.u32 %v6082_v24, 16  ;;  %v6176_v60 = vshll.u32 %v6082_v24, 16 }
 0x312   : > { %v5586_v22 = vor.u32 %v5584_v52, %v5583_v49  ;;  %v5587_v9 = vrot.slane %v5583_v49, 4  ;;  %9692 = vmatmul.mubr.bf16.gmra.mrb[100].mxu0 %v10834_v2  ;;  %v5591_v32 = vrot.slane %v5589_v31, 7  ;;  %v5005_v59 = vadd.f32 %v11255_v51, %v14654_v53  ;;  %v6084_v57 = vld [vmem:[#allocation4 + $0x20] sm:$0x1]  ;;  %v6594_v58 = vld [vmem:[#allocation4 + $0x18] sm:$0xe] }
 0x313   : > { %v5163_v5 = vadd.f32 %v14770_v62, %v5002_v1  ;;  %9699 = vmatprep.mubr.bf16.mxu0 %v12021_v0  ;;  %v6182_v28 = vshll.u32 %v6083_v3, 16  ;;  %v6175_v36 = vrot.slane %v6173_v10, 4  ;;  %v6178_v52 = vrot.slane %v6176_v60, 5  ;;  %v6595_v2 = vld [vmem:[#allocation4 + $0x1c] sm:$0xf]  ;;  %v12052_v10 = vld [vmem:[%s16479_s4 + $0x180] sm:$0xff]  }
 0x314   : > { %v5856_v14 = vsel %vm14705_vm9, %v5586_v22, %v5855_v19  ;;  %v6186_v38 = vshrl.u32 %v6083_v3, 16  ;;  %v5594_v18 = vor.u32 %v5592_v35, %v5591_v32  ;;  %v5596_v40 = vrot.slane %v5591_v32, 4  ;;  %v6596_v31 = vld [vmem:[#allocation4 + $0x20] sm:$0x1] }
 0x315   : > { %5857 = vst [vmem:[#allocation4 + $0x48] sm:$0xf] %v5856_v14  ;;  %v5253_v49 = vmax.f32 %v5163_v5, 0.0  ;;  %v5166_v24 = vadd.f32 %v14779_v15, %v5005_v59  ;;  %v6179_v62 = vor.u32 %v6178_v52, %v6175_v36  ;;  %v6184_v4 = vrot.slane %v6182_v28, 5  ;;  %v14898_v1 = vpop.f32.mrb[32].mxu1  ;;  %v12051_v15 = vld [vmem:[%s16479_s4 + $0x1c0] sm:$0xff]  }
 0x316   : > { %v6188_v53 = vrot.slane %v6186_v38, 4  ;;  %v6192_v0 = vshll.u32 %v6084_v57, 16  ;;  %v5595_v19 = vsel %vm12341_vm4, %v5587_v9, %v5594_v18  ;;  %v5860_v3 = vsel %vm14722_vm6, %v5596_v40, %v5859_v54  ;;  %v14905_v22 = vpop.f32.mrb[33].mxu1  ;;  %v6085_v36 = vld [vmem:[#allocation4 + $0x24] sm:$0xf]  ;;  %11666 = vmatprep.subr.bf16.mxu0 %v12051_v15  ;;  %v12023_v15 = vld [vmem:[#allocation4 + $0x30] sm:$0xff]  }
 0x317   : > { %v5289_v35 = vmul.f32 %v14603_v55, %v5253_v49  ;;  %v5254_v51 = vmax.f32 %v5166_v24, 0.0  ;;  %5858 = vst [vmem:[#allocation4 + $0x4c] sm:$0xf] %v5595_v19  ;;  %5861 = vst [vmem:[#allocation4 + $0x50] sm:$0x1] %v5860_v3  ;;  %v6180_v60 = vrot.slane %v6179_v62, 4  ;;  %v11258_v40 = vadd.f32 %v14884_v44, %v14880_v45  ;;  %11667 = vmatpush3.bf16.msra.mxu0 %v12052_v10 }
 0x318   : > { %v6189_v9 = vor.u32 %v6188_v53, %v6184_v4  ;;  %v6194_v32 = vrot.slane %v6192_v0, 5  ;;  %v10819_v5 = vrot.slane %v6594_v58, 9  ;;  %v14913_v54 = vpop.f32.mrb[34].mxu1  ;;  %v6700_v28 = vrot.slane %v6595_v2, 5  ;;  %v12054_v53 = vld [vmem:[%s16479_s4 + $0x160] sm:$0xff]  }
 0x319   : > { %v5325_v59 = vadd.f32 %v14619_v46, %v5289_v35  ;;  %v5290_v57 = vmul.f32 %v14603_v55, %v5254_v51  ;;  %v6703_v14 = vrot.slane %v6596_v31, 5  ;;  %v14917_v52 = vpop.f32.mrb[35].mxu1  ;;  %v6185_v38 = vsel %vm12533_vm12, %v6180_v60, %v6184_v4  ;;  %v6086_v44 = vld [vmem:[#allocation4 + $0x28] sm:$0xf]  ;;  %v12022_v51 = vld [vmem:[#allocation4 + $0x18] sm:$0xff]   ;;  %11562 = vmatprep.subr.bf16.mxu1 %v12054_v53 }
 0x31a   : > { %v6190_v18 = vrot.slane %v6189_v9, 4  ;;  %v11261_v58 = vadd.f32 %v11260_v29, %v14890_v6  ;;  %v6701_v2 = vsel %vm12675_vm0, %v10819_v5, %v6700_v28  ;;  %v6702_v62 = vrot.slane %v6700_v28, 4  ;;  %v12055_v29 = vld [vmem:[%s16479_s4 + $0x120] sm:$0xff]   ;;  %v5862_v10 = vld [vmem:[#allocation4 + $0x54] sm:$0xf] }
 0x31b   : > { %v11066_v49 = vpack.c.bf16 %v5325_v59, %v5325_v59  ;;  %v5326_v24 = vadd.f32 %v14619_v46, %v5290_v57  ;;  %v5010_v0 = vadd.f32 %v11258_v40, %v14663_v17  ;;  %v6197_v6 = vshrl.u32 %v6085_v36, 16  ;;  %11563 = vmatpush3.bf16.msra.mxu1 %v12055_v29  ;;  %v6087_v53 = vld [vmem:[#allocation4 + $0x2c] sm:$0x1] }
 0x31c   : > { %v6195_v4 = vsel %vm12533_vm12, %v6190_v18, %v6194_v32  ;;  %v5013_v45 = vadd.f32 %v11261_v58, %v14667_v39  ;;  %v6704_v60 = vsel %vm12675_vm0, %v6702_v62, %v6703_v14  ;;  %v5866_v18 = vld [vmem:[#allocation4 + $0x5c] sm:$0x1]  ;;  %v6200_v14 = vshll.u32 %v6085_v36, 16  ;;  %v6598_v36 = vld [vmem:[#allocation4 + $0x28] sm:$0xf] }
 0x31d   : > { %v5598_v31 = vshrl.u32 %v11066_v49, 16  ;;  %v5601_v19 = vshll.u32 %v11066_v49, 16  ;;  %v11067_v3 = vpack.c.bf16 %v5326_v24, %v5326_v24  ;;  %v10803_v35 = vcombine.low %v6185_v38, %v6195_v4  ;;  %v14941_v32 = vpop.f32.mrb[36].mxu1 }
 0x31e   : > { %v5171_v17 = vadd.f32 %v14766_v8, %v5010_v0  ;;  %v5174_v39 = vadd.f32 %v14776_v61, %v5013_v45  ;;  %v6199_v9 = vrot.slane %v6197_v6, 4  ;;  %v10835_v28 = vcombine.low %v6701_v2, %v6704_v60  ;;  %v14943_v38 = vpop.f32.mrb[37].mxu1  ;;  %v6599_v60 = vld [vmem:[#allocation4 + $0x2c] sm:$0x1] }
 0x31f   : > { %v5600_v5 = vrot.slane %v5598_v31, 7  ;;  %v5606_v59 = vshrl.u32 %v11067_v3, 16  ;;  %v5609_v57 = vshll.u32 %v11067_v3, 16  ;;  %9538 = vmatprep.mubr.bf16.mxu1 %v10803_v35  ;;  %v6206_v49 = vshll.u32 %v6086_v44, 16  ;;  %v14945_v8 = vpop.f32.mrb[38].mxu1 }
 0x320   : > { %9539 = vmatmul.mubr.bf16.gmra.mrb[72].mxu1 %v12022_v51  ;;  %v5255_v40 = vmax.f32 %v5171_v17, 0.0  ;;  %v5256_v58 = vmax.f32 %v5174_v39, 0.0  ;;  %9700 = vmatmul.mubr.bf16.gmra.mrb[104].mxu0 %v10835_v28  ;;  %v6210_v4 = vshrl.u32 %v6086_v44, 16  ;;  %v14947_v0 = vpop.f32.mrb[39].mxu1  ;;  %v6202_v6 = vrot.slane %v6200_v14, 5 }
 0x321   : > { %v5603_v61 = vor.u32 %v5601_v19, %v5600_v5  ;;  %v5604_v24 = vrot.slane %v5600_v5, 4  ;;  %v5608_v62 = vrot.slane %v5606_v59, 7  ;;  %9707 = vmatprep.mubr.bf16.mxu0 %v12023_v15  ;;  %v6208_v29 = vrot.slane %v6206_v49, 5  ;;  %v6597_v31 = vld [vmem:[#allocation4 + $0x24] sm:$0xe] }
 0x322   : > { %v5291_v2 = vmul.f32 %v14603_v55, %v5255_v40  ;;  %v5292_v45 = vmul.f32 %v14603_v55, %v5256_v58  ;;  %v6212_v51 = vrot.slane %v6210_v4, 4  ;;  %v6203_v39 = vor.u32 %v6202_v6, %v6199_v9  ;;  %v6088_v49 = vld [vmem:[#allocation4 + $0x30] sm:$0xf] }
 0x323   : > { %v5863_v3 = vsel %vm14705_vm9, %v5603_v61, %v5862_v10  ;;  %v5611_v19 = vor.u32 %v5609_v57, %v5608_v62  ;;  %v5613_v35 = vrot.slane %v5608_v62, 4  ;;  %v6216_v5 = vshll.u32 %v6087_v53, 16  ;;  %v12058_v9 = vld [vmem:[%s16479_s4 + $0x1c8] sm:$0xff]   ;;  %v14964_v62 = vpop.f32.mrb[92].mxu0 }
 0x324   : > { %5864 = vst [vmem:[#allocation4 + $0x54] sm:$0xf] %v5863_v3  ;;  %v5327_v44 = vadd.f32 %v14619_v46, %v5291_v2  ;;  %v5328_v17 = vadd.f32 %v14619_v46, %v5292_v45  ;;  %v6213_v28 = vor.u32 %v6212_v51, %v6208_v29  ;;  %v10820_v40 = vrot.slane %v6597_v31, 9  ;;  %16651 = vst [vmem:[#allocation34_spill] sm:$0xff] %v14964_v62  ;;  %v14973_v6 = vpop.f32.mrb[93].mxu0  ;;  %v12025_v62 = vld [vmem:[#allocation4 + $0x3c] sm:$0xff]  }
 0x325   : > { %v5612_v15 = vsel %vm12341_vm4, %v5604_v24, %v5611_v19  ;;  %v5867_v59 = vsel %vm14722_vm6, %v5613_v35, %v5866_v18  ;;  %v6204_v58 = vrot.slane %v6203_v39, 4  ;;  %v6218_v14 = vrot.slane %v6216_v5, 5  ;;  %v14959_v61 = vpop.f32.mrb[40].mxu1  ;;  %v12059_v18 = vld [vmem:[%s16479_s4 + $0x188] sm:$0xff]   ;;  %16652 = vst [vmem:[#allocation11_spill] sm:$0xff] %v14973_v6  ;;  %11668 = vmatprep.subr.bf16.mxu0 %v12058_v9  ;;  %v12024_v5 = vld [vmem:[#allocation4 + $0x24] sm:$0xff]  }
 0x326   : > { %5865 = vst [vmem:[#allocation4 + $0x58] sm:$0xf] %v5612_v15  ;;  %5868 = vst [vmem:[#allocation4 + $0x5c] sm:$0x1] %v5867_v59  ;;  %v11068_v10 = vpack.c.bf16 %v5327_v44, %v5327_v44  ;;  %v11069_v57 = vpack.c.bf16 %v5328_v17, %v5328_v17  ;;  %v6214_v24 = vrot.slane %v6213_v28, 4  ;;  %v6707_v53 = vrot.slane %v6598_v36, 5  ;;  %11669 = vmatpush3.bf16.msra.mxu0 %v12059_v18 }
 0x327   : > { %v6710_v4 = vrot.slane %v6599_v60, 5  ;;  %v11264_v2 = vadd.f32 %v14905_v22, %v14898_v1  ;;  %v14971_v45 = vpop.f32.mrb[41].mxu1  ;;  %v14977_v44 = vpop.f32.mrb[94].mxu0  ;;  %v5869_v17 = vld [vmem:[#allocation4 + $0x60] sm:$0xf]  ;;  %v6209_v36 = vsel %vm12533_vm12, %v6204_v58, %v6208_v29  ;;  %v12060_v28 = vld [vmem:[%s16479_s4 + $0x168] sm:$0xff]  }
 0x328   : > { %v5615_v31 = vshrl.u32 %v11068_v10, 16  ;;  %v5618_v3 = vshll.u32 %v11068_v10, 16  ;;  %v5623_v19 = vshrl.u32 %v11069_v57, 16  ;;  %v5626_v35 = vshll.u32 %v11069_v57, 16  ;;  %v14975_v51 = vpop.f32.mrb[42].mxu1  ;;  %16653 = vst [vmem:[#allocation7_spill] sm:$0xff] %v14977_v44  ;;  %11564 = vmatprep.subr.bf16.mxu1 %v12060_v28 }
 0x329   : > { %v5873_v39 = vld [vmem:[#allocation4 + $0x68] sm:$0x1]  ;;  %v6219_v1 = vsel %vm12533_vm12, %v6214_v24, %v6218_v14  ;;  %v6708_v22 = vsel %vm12675_vm0, %v10820_v40, %v6707_v53  ;;  %v6709_v60 = vrot.slane %v6707_v53, 4  ;;  %v14985_v15 = vpop.f32.mrb[43].mxu1  ;;  %v14987_v59 = vpop.f32.mrb[95].mxu0  ;;  %v5018_v58 = vadd.f32 %v11264_v2, %v14671_v63  ;;  %v12061_v40 = vld [vmem:[%s16479_s4 + $0x128] sm:$0xff]  }
 0x32a   : > { %16654 = vst [vmem:[#allocation8_spill] sm:$0xff] %v14987_v59  ;;  %v5617_v10 = vrot.slane %v5615_v31, 7  ;;  %v5625_v57 = vrot.slane %v5623_v19, 7  ;;  %v10804_v29 = vcombine.low %v6209_v36, %v6219_v1  ;;  %v6089_v14 = vld [vmem:[#allocation4 + $0x34] sm:$0xf]  ;;  %v12062_v9 = vld [vmem:[%s16479_s4 + $0x1d0] sm:$0xff]   ;;  %v11267_v24 = vadd.f32 %v14917_v52, %v14913_v54  ;;  %11565 = vmatpush3.bf16.msra.mxu1 %v12061_v40 }
 0x32b   : > { %v6711_v18 = vsel %vm12675_vm0, %v6709_v60, %v6710_v4  ;;  %v6090_v53 = vld [vmem:[#allocation4 + $0x38] sm:$0x1]  ;;  %v6221_v31 = vshrl.u32 %v6088_v49, 16  ;;  %v6224_v19 = vshll.u32 %v6088_v49, 16  ;;  %v6600_v36 = vld [vmem:[#allocation4 + $0x30] sm:$0xe]  ;;  %v5179_v6 = vadd.f32 %v14802_v7, %v5018_v58  ;;  %11670 = vmatprep.subr.bf16.mxu0 %v12062_v9 }
 0x32c   : > { %v5620_v63 = vor.u32 %v5618_v3, %v5617_v10  ;;  %v5621_v2 = vrot.slane %v5617_v10, 4  ;;  %v5628_v1 = vor.u32 %v5626_v35, %v5625_v57  ;;  %v5630_v44 = vrot.slane %v5625_v57, 4  ;;  %9546 = vmatprep.mubr.bf16.mxu1 %v10804_v29  ;;  %v6601_v54 = vld [vmem:[#allocation4 + $0x34] sm:$0xf]  ;;  %v6602_v28 = vld [vmem:[#allocation4 + $0x38] sm:$0x1] }
 0x32d   : > { %v10836_v59 = vcombine.low %v6708_v22, %v6711_v18  ;;  %9547 = vmatmul.mubr.bf16.gmra.mrb[76].mxu1 %v12024_v5  ;;  %v5021_v4 = vadd.f32 %v11267_v24, %v14675_v20  ;;  %v6223_v60 = vrot.slane %v6221_v31, 4  ;;  %v6226_v35 = vrot.slane %v6224_v19, 5  ;;  %v15011_v22 = vpop.f32.mrb[44].mxu1  ;;  %v12064_v19 = vld [vmem:[%s16479_s4 + $0x170] sm:$0xff]  }
 0x32e   : > { %v5870_v52 = vsel %vm14705_vm9, %v5620_v63, %v5869_v17  ;;  %v5629_v49 = vsel %vm12341_vm4, %v5621_v2, %v5628_v1  ;;  %v5874_v3 = vsel %vm14722_vm6, %v5630_v44, %v5873_v39  ;;  %v5257_v20 = vmax.f32 %v5179_v6, 0.0  ;;  %v15014_v17 = vld [vmem:[#allocation4 + $0x3c] sm:$0xf]  ;;  %v15016_v57 = vpop.f32.mrb[45].mxu1  ;;  %11566 = vmatprep.subr.bf16.mxu1 %v12064_v19  ;;  %v6093_v19 = vld [vmem:[#allocation4 + $0x44] sm:$0x1] }
 0x32f   : > { %5871 = vst [vmem:[#allocation4 + $0x60] sm:$0xf] %v5870_v52  ;;  %5872 = vst [vmem:[#allocation4 + $0x64] sm:$0xf] %v5629_v49  ;;  %9708 = vmatmul.mubr.bf16.gmra.mrb[108].mxu0 %v10836_v59  ;;  %v5182_v7 = vadd.f32 %v14811_v27, %v5021_v4  ;;  %v6230_v5 = vshll.u32 %v6089_v14, 16  ;;  %v6234_v10 = vshrl.u32 %v6089_v14, 16  ;;  %v6227_v29 = vor.u32 %v6226_v35, %v6223_v60 }
 0x330   : > { %5875 = vst [vmem:[#allocation4 + $0x68] sm:$0x1] %v5874_v3  ;;  %9715 = vmatprep.mubr.bf16.mxu0 %v12025_v62  ;;  %v6240_v44 = vshll.u32 %v6090_v53, 16  ;;  %v10821_v39 = vrot.slane %v6600_v36, 9  ;;  %v6714_v58 = vrot.slane %v6601_v54, 5  ;;  %v15018_v40 = vpop.f32.mrb[46].mxu1  ;;  %v5293_v9 = vmul.f32 %v14603_v55, %v5257_v20 }
 0x331   : > { %v5258_v18 = vmax.f32 %v5182_v7, 0.0  ;;  %v6232_v59 = vrot.slane %v6230_v5, 5  ;;  %v6236_v6 = vrot.slane %v6234_v10, 4  ;;  %v15021_v24 = vpop.f32.mrb[47].mxu1  ;;  %v12063_v27 = vld [vmem:[%s16479_s4 + $0x190] sm:$0xff]   ;;  %v6228_v14 = vrot.slane %v6227_v29, 4 }
 0x332   : > { %v6242_v31 = vrot.slane %v6240_v44, 5  ;;  %v6715_v62 = vsel %vm12675_vm0, %v10821_v39, %v6714_v58  ;;  %v6716_v53 = vrot.slane %v6714_v58, 4  ;;  %v5329_v36 = vadd.f32 %v14619_v46, %v5293_v9  ;;  %11671 = vmatpush3.bf16.msra.mxu0 %v12063_v27  ;;  %v12065_v4 = vld [vmem:[%s16479_s4 + $0x130] sm:$0xff]   ;;  %v12066_v60 = vld [vmem:[%s16479_s4 + $0x1d8] sm:$0xff]   ;;  %v12070_v20 = vld [vmem:[%s16479_s4 + $0x1e0] sm:$0xff]  }
 0x333   : > { %v5294_v63 = vmul.f32 %v14603_v55, %v5258_v18  ;;  %v6237_v2 = vor.u32 %v6236_v6, %v6232_v59  ;;  %v6717_v1 = vrot.slane %v6602_v28, 5  ;;  %v6233_v54 = vsel %vm12533_vm12, %v6228_v14, %v6232_v59  ;;  %v12067_v35 = vld [vmem:[%s16479_s4 + $0x198] sm:$0xff]   ;;  %11567 = vmatpush3.bf16.msra.mxu1 %v12065_v4  ;;  %11672 = vmatprep.subr.bf16.mxu0 %v12066_v60  ;;  %v12072_v14 = vld [vmem:[%s16479_s4 + $0x1a0] sm:$0xff]   ;;  %v12026_v60 = vld [vmem:[#allocation4 + $0x30] sm:$0xff]  }
 0x334   : > { %v11270_v52 = vadd.f32 %v14943_v38, %v14941_v32  ;;  %v11273_v49 = vadd.f32 %v14947_v0, %v14945_v8  ;;  %v6245_v3 = vshrl.u32 %v15014_v17, 16  ;;  %v12069_v28 = vld [vmem:[%s16479_s4 + $0x178] sm:$0xff]   ;;  %v11070_v7 = vpack.c.bf16 %v5329_v36, %v5329_v36  ;;  %v12027_v0 = vld [vmem:[#allocation4 + $0x48] sm:$0xff]  }
 0x335   : > { %v5330_v32 = vadd.f32 %v14619_v46, %v5294_v63  ;;  %v6238_v38 = vrot.slane %v6237_v2, 4  ;;  %v6718_v8 = vsel %vm12675_vm0, %v6716_v53, %v6717_v1  ;;  %v6092_v5 = vld [vmem:[#allocation4 + $0x40] sm:$0xf]  ;;  %11568 = vmatprep.subr.bf16.mxu1 %v12069_v28  ;;  %v15065_v27 = vpop.f32.mrb[48].mxu1  ;;  %v6248_v36 = vshll.u32 %v15014_v17, 16 }
 0x336   : > { %v12071_v10 = vld [vmem:[%s16479_s4 + $0x138] sm:$0xff]   ;;  %v10837_v29 = vcombine.low %v6715_v62, %v6718_v8  ;;  %v5026_v44 = vadd.f32 %v11270_v52, %v14688_v37  ;;  %v5029_v39 = vadd.f32 %v11273_v49, %v14692_v48  ;;  %v6247_v58 = vrot.slane %v6245_v3, 4  ;;  %11673 = vmatpush3.bf16.msra.mxu0 %v12067_v35  ;;  %v5876_v62 = vld [vmem:[#allocation4 + $0x6c] sm:$0xf]  ;;  %v15073_v63 = vpop.f32.mrb[49].mxu1 }
 0x337   : > { %v5632_v9 = vshrl.u32 %v11070_v7, 16  ;;  %v5635_v18 = vshll.u32 %v11070_v7, 16  ;;  %v11071_v59 = vpack.c.bf16 %v5330_v32, %v5330_v32  ;;  %v6243_v6 = vsel %vm12533_vm12, %v6238_v38, %v6242_v31  ;;  %11674 = vmatprep.subr.bf16.mxu0 %v12070_v20  ;;  %v12073_v31 = vld [vmem:[%s16479_s4 + $0x1e8] sm:$0xff]   ;;  %v15078_v52 = vpop.f32.mrb[50].mxu1  ;;  %11569 = vmatpush3.bf16.msra.mxu1 %v12071_v10 }
 0x338   : > { %v10805_v53 = vcombine.low %v6233_v54, %v6243_v6  ;;  %9716 = vmatmul.mubr.bf16.gmra.mrb[112].mxu0 %v10837_v29  ;;  %v5187_v37 = vadd.f32 %v14799_v43, %v5026_v44  ;;  %v5190_v48 = vadd.f32 %v14805_v21, %v5029_v39  ;;  %v6254_v54 = vshll.u32 %v6092_v5, 16  ;;  %v15080_v3 = vpop.f32.mrb[51].mxu1  ;;  %v5880_v7 = vld [vmem:[#allocation4 + $0x74] sm:$0x1]  ;;  %v6604_v44 = vld [vmem:[#allocation4 + $0x40] sm:$0xf] }
 0x339   : > { %v5634_v2 = vrot.slane %v5632_v9, 7  ;;  %v5640_v1 = vshrl.u32 %v11071_v59, 16  ;;  %v5643_v4 = vshll.u32 %v11071_v59, 16  ;;  %9723 = vmatprep.mubr.bf16.mxu0 %v12027_v0  ;;  %v6250_v17 = vrot.slane %v6248_v36, 5  ;;  %v12074_v38 = vld [vmem:[%s16479_s4 + $0x1a8] sm:$0xff]  }
 0x33a   : > { %9554 = vmatprep.mubr.bf16.mxu1 %v10805_v53  ;;  %v5259_v43 = vmax.f32 %v5187_v37, 0.0  ;;  %v5260_v21 = vmax.f32 %v5190_v48, 0.0  ;;  %v6258_v49 = vshrl.u32 %v6092_v5, 16  ;;  %v6256_v32 = vrot.slane %v6254_v54, 5  ;;  %11675 = vmatpush3.bf16.msra.mxu0 %v12072_v14  ;;  %v6603_v5 = vld [vmem:[#allocation4 + $0x3c] sm:$0xe] }
 0x33b   : > { %v5637_v35 = vor.u32 %v5635_v18, %v5634_v2  ;;  %v5638_v28 = vrot.slane %v5634_v2, 4  ;;  %v5642_v20 = vrot.slane %v5640_v1, 7  ;;  %9555 = vmatmul.mubr.bf16.gmra.mrb[80].mxu1 %v12026_v60  ;;  %v6251_v10 = vor.u32 %v6250_v17, %v6247_v58  ;;  %11676 = vmatprep.subr.bf16.mxu0 %v12073_v31  ;;  %v6605_v48 = vld [vmem:[#allocation4 + $0x44] sm:$0x1]  ;;  %v12076_v58 = vld [vmem:[%s16479_s4 + $0x1f0] sm:$0xff]  }
 0x33c   : > { %v5295_v8 = vmul.f32 %v14603_v55, %v5259_v43  ;;  %v5296_v0 = vmul.f32 %v14603_v55, %v5260_v21  ;;  %v6260_v29 = vrot.slane %v6258_v49, 4  ;;  %v6264_v59 = vshll.u32 %v6093_v19, 16  ;;  %v12079_v49 = vld [vmem:[%s16479_s4 + $0x1f8] sm:$0xff]  }
 0x33d   : > { %v5877_v39 = vsel %vm14705_vm9, %v5637_v35, %v5876_v62  ;;  %v5645_v9 = vor.u32 %v5643_v4, %v5642_v20  ;;  %v5647_v18 = vrot.slane %v5642_v20, 4  ;;  %v6252_v53 = vrot.slane %v6251_v10, 4  ;;  %v15091_v36 = vpop.f32.mrb[52].mxu1  ;;  %v12078_v4 = vld [vmem:[%s16479_s4 + $0x1b0] sm:$0xff]  }
 0x33e   : > { %5878 = vst [vmem:[#allocation4 + $0x6c] sm:$0xf] %v5877_v39  ;;  %v5331_v6 = vadd.f32 %v14619_v46, %v5295_v8  ;;  %v5332_v14 = vadd.f32 %v14619_v46, %v5296_v0  ;;  %v6261_v37 = vor.u32 %v6260_v29, %v6256_v32  ;;  %v6266_v31 = vrot.slane %v6264_v59, 5  ;;  %v15100_v1 = vpop.f32.mrb[53].mxu1  ;;  %11677 = vmatpush3.bf16.msra.mxu0 %v12074_v38  ;;  %v6094_v29 = vld [vmem:[#allocation4 + $0x48] sm:$0xf] }
 0x33f   : > { %v5646_v62 = vsel %vm12341_vm4, %v5638_v28, %v5645_v9  ;;  %v5881_v19 = vsel %vm14722_vm6, %v5647_v18, %v5880_v7  ;;  %v10822_v2 = vrot.slane %v6603_v5, 9  ;;  %v6257_v43 = vsel %vm12533_vm12, %v6252_v53, %v6256_v32  ;;  %v15107_v17 = vpop.f32.mrb[54].mxu1  ;;  %11678 = vmatprep.subr.bf16.mxu0 %v12076_v58  ;;  %v5883_v5 = vld [vmem:[#allocation4 + $0x78] sm:$0xf]  ;;  %v5887_v39 = vld [vmem:[#allocation4 + $0x80] sm:$0x1] }
 0x340   : > { %5879 = vst [vmem:[#allocation4 + $0x70] sm:$0xf] %v5646_v62  ;;  %5882 = vst [vmem:[#allocation4 + $0x74] sm:$0x1] %v5881_v19  ;;  %v11072_v60 = vpack.c.bf16 %v5331_v6, %v5331_v6  ;;  %v11073_v54 = vpack.c.bf16 %v5332_v14, %v5332_v14  ;;  %v6262_v21 = vrot.slane %v6261_v37, 4  ;;  %v6721_v35 = vrot.slane %v6604_v44, 5 }
 0x341   : > { %v6724_v28 = vrot.slane %v6605_v48, 5  ;;  %v11276_v20 = vadd.f32 %v14971_v45, %v14959_v61  ;;  %v11279_v7 = vadd.f32 %v14985_v15, %v14975_v51  ;;  %v15116_v38 = vpop.f32.mrb[55].mxu1  ;;  %v12080_v45 = vld [vmem:[%s16479_s4 + $0x1b8] sm:$0xff]   ;;  %v12082_v51 = vld [vmem:[%s16479_s4 + $0x200] sm:$0xff]   ;;  %v6096_v58 = vld [vmem:[#allocation4 + $0x50] sm:$0x1] }
 0x342   : > { %v5649_v8 = vshrl.u32 %v11072_v60, 16  ;;  %v5652_v32 = vshll.u32 %v11072_v60, 16  ;;  %v5657_v0 = vshrl.u32 %v11073_v54, 16  ;;  %v5660_v10 = vshll.u32 %v11073_v54, 16  ;;  %11679 = vmatpush3.bf16.msra.mxu0 %v12078_v4  ;;  %v12030_v14 = vld [vmem:[#allocation4 + $0x3c] sm:$0xff]   ;;  %11842 = vmatprep.subr.bf16.mxu1 %v12082_v51 }
 0x343   : > { %v6267_v9 = vsel %vm12533_vm12, %v6262_v21, %v6266_v31  ;;  %v6722_v44 = vsel %vm12675_vm0, %v10822_v2, %v6721_v35  ;;  %v6723_v18 = vrot.slane %v6721_v35, 4  ;;  %v5034_v61 = vadd.f32 %v11276_v20, %v14696_v23  ;;  %v6095_v37 = vld [vmem:[#allocation4 + $0x4c] sm:$0xf]  ;;  %11680 = vmatprep.subr.bf16.mxu0 %v12079_v49  ;;  %v6606_v31 = vld [vmem:[#allocation4 + $0x48] sm:$0xe] }
 0x344   : > { %v5651_v15 = vrot.slane %v5649_v8, 7  ;;  %v5659_v59 = vrot.slane %v5657_v0, 7  ;;  %v10806_v6 = vcombine.low %v6257_v43, %v6267_v9  ;;  %v5037_v53 = vadd.f32 %v11279_v7, %v14700_v50  ;;  %v12031_v43 = vld [vmem:[#allocation4 + $0x54] sm:$0xff]  }
 0x345   : > { %v6725_v23 = vsel %vm12675_vm0, %v6723_v18, %v6724_v28  ;;  %v5195_v48 = vadd.f32 %v14828_v34, %v5034_v61  ;;  %v6269_v62 = vshrl.u32 %v6094_v29, 16  ;;  %v6272_v19 = vshll.u32 %v6094_v29, 16  ;;  %v6607_v28 = vld [vmem:[#allocation4 + $0x4c] sm:$0xf] }
 0x346   : > { %v5654_v2 = vor.u32 %v5652_v32, %v5651_v15  ;;  %v5655_v4 = vrot.slane %v5651_v15, 4  ;;  %v5662_v60 = vor.u32 %v5660_v10, %v5659_v59  ;;  %v5664_v54 = vrot.slane %v5659_v59, 4  ;;  %9562 = vmatprep.mubr.bf16.mxu1 %v10806_v6  ;;  %11681 = vmatpush3.bf16.msra.mxu0 %v12080_v45  ;;  %v6097_v15 = vld [vmem:[#allocation4 + $0x54] sm:$0xf] }
 0x347   : > { %v10838_v21 = vcombine.low %v6722_v44, %v6725_v23  ;;  %9563 = vmatmul.mubr.bf16.gmra.mrb[84].mxu1 %v12030_v14  ;;  %v5261_v50 = vmax.f32 %v5195_v48, 0.0  ;;  %v5198_v49 = vadd.f32 %v14844_v41, %v5037_v53  ;;  %v6271_v35 = vrot.slane %v6269_v62, 4 }
 0x348   : > { %v5884_v34 = vsel %vm14705_vm9, %v5654_v2, %v5883_v5  ;;  %v5663_v20 = vsel %vm12341_vm4, %v5655_v4, %v5662_v60  ;;  %v5888_v7 = vsel %vm14722_vm6, %v5664_v54, %v5887_v39  ;;  %v6274_v8 = vrot.slane %v6272_v19, 5  ;;  %v6608_v5 = vld [vmem:[#allocation4 + $0x50] sm:$0x1] }
 0x349   : > { %5885 = vst [vmem:[#allocation4 + $0x78] sm:$0xf] %v5884_v34  ;;  %5886 = vst [vmem:[#allocation4 + $0x7c] sm:$0xf] %v5663_v20  ;;  %9724 = vmatmul.mubr.bf16.gmra.mrb[116].mxu0 %v10838_v21  ;;  %v5297_v32 = vmul.f32 %v14603_v55, %v5261_v50  ;;  %v5262_v41 = vmax.f32 %v5198_v49, 0.0  ;;  %v6278_v0 = vshll.u32 %v6095_v37, 16  ;;  %v11282_v19 = vadd.f32 %v15016_v57, %v15011_v22 }
 0x34a   : > { %5889 = vst [vmem:[#allocation4 + $0x80] sm:$0x1] %v5888_v7  ;;  %v6282_v10 = vshrl.u32 %v6095_v37, 16  ;;  %9731 = vmatprep.mubr.bf16.mxu0 %v12031_v43  ;;  %v6275_v29 = vor.u32 %v6274_v8, %v6271_v35  ;;  %v6288_v9 = vshll.u32 %v6096_v58, 16  ;;  %v10823_v44 = vrot.slane %v6606_v31, 9  ;;  %v12033_v57 = vld [vmem:[#allocation4 + $0x60] sm:$0xff]  }
 0x34b   : > { %v6728_v18 = vrot.slane %v6607_v28, 5  ;;  %v5333_v61 = vadd.f32 %v14619_v46, %v5297_v32  ;;  %v5298_v39 = vmul.f32 %v14603_v55, %v5262_v41  ;;  %v6280_v45 = vrot.slane %v6278_v0, 5  ;;  %v5894_v7 = vld [vmem:[#allocation4 + $0x8c] sm:$0x1] }
 0x34c   : > { %v6284_v51 = vrot.slane %v6282_v10, 4  ;;  %v6276_v59 = vrot.slane %v6275_v29, 4  ;;  %v6290_v6 = vrot.slane %v6288_v9, 5  ;;  %v6731_v58 = vrot.slane %v6608_v5, 5  ;;  %v12032_v29 = vld [vmem:[#allocation4 + $0x48] sm:$0xff]  }
 0x34d   : > { %v6729_v14 = vsel %vm12675_vm0, %v10823_v44, %v6728_v18  ;;  %v6730_v53 = vrot.slane %v6728_v18, 4  ;;  %v11074_v37 = vpack.c.bf16 %v5333_v61, %v5333_v61  ;;  %v5334_v23 = vadd.f32 %v14619_v46, %v5298_v39  ;;  %v6609_v5 = vld [vmem:[#allocation4 + $0x54] sm:$0xe]  ;;  %v6099_v61 = vld [vmem:[#allocation4 + $0x5c] sm:$0x1] }
 0x34e   : > { %v6285_v48 = vor.u32 %v6284_v51, %v6280_v45  ;;  %v6281_v62 = vsel %vm12533_vm12, %v6276_v59, %v6280_v45  ;;  %v11285_v31 = vadd.f32 %v15021_v24, %v15018_v40  ;;  %v6293_v2 = vshrl.u32 %v6097_v15, 16  ;;  %v6098_v40 = vld [vmem:[#allocation4 + $0x58] sm:$0xf]  ;;  %v5890_v24 = vld [vmem:[#allocation4 + $0x84] sm:$0xf] }
 0x34f   : > { %v5666_v4 = vshrl.u32 %v11074_v37, 16  ;;  %v5669_v60 = vshll.u32 %v11074_v37, 16  ;;  %v11075_v54 = vpack.c.bf16 %v5334_v23, %v5334_v23  ;;  %v6732_v21 = vsel %vm12675_vm0, %v6730_v53, %v6731_v58  ;;  %v6610_v37 = vld [vmem:[#allocation4 + $0x58] sm:$0xf]  ;;  %v6611_v23 = vld [vmem:[#allocation4 + $0x5c] sm:$0x1] }
 0x350   : > { %v6286_v43 = vrot.slane %v6285_v48, 4  ;;  %v5042_v50 = vadd.f32 %v11282_v19, %v14742_v16  ;;  %v5045_v49 = vadd.f32 %v11285_v31, %v14750_v33  ;;  %v6295_v35 = vrot.slane %v6293_v2, 4 }
 0x351   : > { %v5668_v28 = vrot.slane %v5666_v4, 7  ;;  %v5674_v34 = vshrl.u32 %v11075_v54, 16  ;;  %v5677_v20 = vshll.u32 %v11075_v54, 16  ;;  %v10839_v32 = vcombine.low %v6729_v14, %v6732_v21 }
 0x352   : > { %v6291_v22 = vsel %vm12533_vm12, %v6286_v43, %v6290_v6  ;;  %v5203_v41 = vadd.f32 %v14822_v47, %v5042_v50  ;;  %v5206_v0 = vadd.f32 %v14838_v12, %v5045_v49  ;;  %v6296_v9 = vshll.u32 %v6097_v15, 16 }
 0x353   : > { %v10807_v8 = vcombine.low %v6281_v62, %v6291_v22  ;;  %v5671_v16 = vor.u32 %v5669_v60, %v5668_v28  ;;  %v5672_v10 = vrot.slane %v5668_v28, 4  ;;  %v5676_v33 = vrot.slane %v5674_v34, 7  ;;  %9732 = vmatmul.mubr.bf16.gmra.mrb[120].mxu0 %v10839_v32 }
 0x354   : > { %v5263_v44 = vmax.f32 %v5203_v41, 0.0  ;;  %v5264_v18 = vmax.f32 %v5206_v0, 0.0  ;;  %v6302_v39 = vshll.u32 %v6098_v40, 16  ;;  %v6306_v45 = vshrl.u32 %v6098_v40, 16  ;;  %9739 = vmatprep.mubr.bf16.mxu0 %v12033_v57  ;;  %v6100_v41 = vld [vmem:[#allocation4 + $0x60] sm:$0xf] }
 0x355   : > { %9570 = vmatprep.mubr.bf16.mxu1 %v10807_v8  ;;  %v5891_v51 = vsel %vm14705_vm9, %v5671_v16, %v5890_v24  ;;  %v5679_v59 = vor.u32 %v5677_v20, %v5676_v33  ;;  %v5681_v47 = vrot.slane %v5676_v33, 4  ;;  %v6298_v12 = vrot.slane %v6296_v9, 5  ;;  %v5897_v0 = vld [vmem:[#allocation4 + $0x90] sm:$0xf]  ;;  %v5901_v16 = vld [vmem:[#allocation4 + $0x98] sm:$0x1] }
 0x356   : > { %9571 = vmatmul.mubr.bf16.gmra.mrb[88].mxu1 %v12032_v29  ;;  %5892 = vst [vmem:[#allocation4 + $0x84] sm:$0xf] %v5891_v51  ;;  %v5299_v6 = vmul.f32 %v14603_v55, %v5263_v44  ;;  %v5300_v15 = vmul.f32 %v14603_v55, %v5264_v18  ;;  %v6304_v14 = vrot.slane %v6302_v39, 5  ;;  %v6308_v53 = vrot.slane %v6306_v45, 4  ;;  %v16655_v33 = vld [vmem:[#allocation29_spill] sm:$0xff] }
 0x357   : > { %v5680_v48 = vsel %vm12341_vm4, %v5672_v10, %v5679_v59  ;;  %v5895_v58 = vsel %vm14722_vm6, %v5681_v47, %v5894_v7  ;;  %v6299_v62 = vor.u32 %v6298_v12, %v6295_v35  ;;  %v6312_v19 = vshll.u32 %v6099_v61, 16  ;;  %v12037_v9 = vld [vmem:[#allocation4 + $0x6c] sm:$0xff]   ;;  %v12036_v18 = vld [vmem:[#allocation4 + $0x54] sm:$0xff]   ;;  %v16656_v61 = vld [vmem:[#allocation31_spill] sm:$0xff] }
 0x358   : > { %5893 = vst [vmem:[#allocation4 + $0x88] sm:$0xf] %v5680_v48  ;;  %5896 = vst [vmem:[#allocation4 + $0x8c] sm:$0x1] %v5895_v58  ;;  %v5335_v31 = vadd.f32 %v14619_v46, %v5299_v6  ;;  %v5336_v2 = vadd.f32 %v14619_v46, %v5300_v15  ;;  %v6309_v4 = vor.u32 %v6308_v53, %v6304_v14  ;;  %v10824_v60 = vrot.slane %v6609_v5, 9 }
 0x359   : > { %v6300_v54 = vrot.slane %v6299_v62, 4  ;;  %v6314_v43 = vrot.slane %v6312_v19, 5  ;;  %v6735_v21 = vrot.slane %v6610_v37, 5  ;;  %v6738_v50 = vrot.slane %v6611_v23, 5  ;;  %v6101_v51 = vld [vmem:[#allocation4 + $0x64] sm:$0xf] }
 0x35a   : > { %v11076_v49 = vpack.c.bf16 %v5335_v31, %v5335_v31  ;;  %v11077_v28 = vpack.c.bf16 %v5336_v2, %v5336_v2  ;;  %v6310_v34 = vrot.slane %v6309_v4, 4  ;;  %v11288_v20 = vadd.f32 %v15073_v63, %v15065_v27  ;;  %v6612_v53 = vld [vmem:[#allocation4 + $0x60] sm:$0xe]  ;;  %v6613_v62 = vld [vmem:[#allocation4 + $0x64] sm:$0xf] }
 0x35b   : > { %v6305_v35 = vsel %vm12533_vm12, %v6300_v54, %v6304_v14  ;;  %v6736_v22 = vsel %vm12675_vm0, %v10824_v60, %v6735_v21  ;;  %v6737_v57 = vrot.slane %v6735_v21, 4  ;;  %v11291_v40 = vadd.f32 %v15080_v3, %v15078_v52  ;;  %v6614_v21 = vld [vmem:[#allocation4 + $0x68] sm:$0x1] }
 0x35c   : > { %v5683_v24 = vshrl.u32 %v11076_v49, 16  ;;  %v5686_v7 = vshll.u32 %v11076_v49, 16  ;;  %v5691_v8 = vshrl.u32 %v11077_v28, 16  ;;  %v5694_v32 = vshll.u32 %v11077_v28, 16 }
 0x35d   : > { %v6315_v27 = vsel %vm12533_vm12, %v6310_v34, %v6314_v43  ;;  %v6739_v63 = vsel %vm12675_vm0, %v6737_v57, %v6738_v50  ;;  %v5050_v10 = vadd.f32 %v11288_v20, %v14754_v56  ;;  %v5053_v29 = vadd.f32 %v11291_v40, %v16655_v33  ;;  %v6102_v56 = vld [vmem:[#allocation4 + $0x68] sm:$0x1]  ;;  %v6103_v40 = vld [vmem:[#allocation4 + $0x6c] sm:$0xf] }
 0x35e   : > { %v5685_v5 = vrot.slane %v5683_v24, 7  ;;  %v5693_v52 = vrot.slane %v5691_v8, 7  ;;  %v10808_v3 = vcombine.low %v6305_v35, %v6315_v27  ;;  %v10840_v44 = vcombine.low %v6736_v22, %v6739_v63 }
 0x35f   : > { %v5211_v39 = vadd.f32 %v16656_v61, %v5050_v10  ;;  %v5214_v45 = vadd.f32 %v14878_v13, %v5053_v29  ;;  %v6317_v59 = vshrl.u32 %v6100_v41, 16  ;;  %v6320_v47 = vshll.u32 %v6100_v41, 16  ;;  %v6104_v29 = vld [vmem:[#allocation4 + $0x70] sm:$0xf] }
 0x360   : > { %v5688_v12 = vor.u32 %v5686_v7, %v5685_v5  ;;  %v5689_v6 = vrot.slane %v5685_v5, 4  ;;  %v5696_v15 = vor.u32 %v5694_v32, %v5693_v52  ;;  %v5698_v14 = vrot.slane %v5693_v52, 4  ;;  %9578 = vmatprep.mubr.bf16.mxu1 %v10808_v3  ;;  %9740 = vmatmul.mubr.bf16.gmra.mrb[124].mxu0 %v10840_v44 }
 0x361   : > { %9579 = vmatmul.mubr.bf16.gmra.mrb[92].mxu1 %v12036_v18  ;;  %v5265_v37 = vmax.f32 %v5211_v39, 0.0  ;;  %v5266_v23 = vmax.f32 %v5214_v45, 0.0  ;;  %9747 = vmatprep.mubr.bf16.mxu0 %v12037_v9  ;;  %v6319_v48 = vrot.slane %v6317_v59, 4  ;;  %v6322_v58 = vrot.slane %v6320_v47, 5  ;;  %v12039_v18 = vld [vmem:[#allocation4 + $0x78] sm:$0xff]   ;;  %v16657_v45 = vld [vmem:[#allocation28_spill] sm:$0xff] }
 0x362   : > { %v5898_v13 = vsel %vm14705_vm9, %v5688_v12, %v5897_v0  ;;  %v5697_v19 = vsel %vm12341_vm4, %v5689_v6, %v5696_v15  ;;  %v5902_v31 = vsel %vm14722_vm6, %v5698_v14, %v5901_v16  ;;  %v6326_v2 = vshll.u32 %v6101_v51, 16  ;;  %v16658_v59 = vld [vmem:[#allocation36_spill] sm:$0xff]  ;;  %v5908_v14 = vld [vmem:[#allocation4 + $0xa4] sm:$0x1] }
 0x363   : > { %5899 = vst [vmem:[#allocation4 + $0x90] sm:$0xf] %v5898_v13  ;;  %5900 = vst [vmem:[#allocation4 + $0x94] sm:$0xf] %v5697_v19  ;;  %v5301_v4 = vmul.f32 %v14603_v55, %v5265_v37  ;;  %v5302_v60 = vmul.f32 %v14603_v55, %v5266_v23  ;;  %v6323_v54 = vor.u32 %v6322_v58, %v6319_v48  ;;  %v6330_v43 = vshrl.u32 %v6101_v51, 16  ;;  %v12038_v19 = vld [vmem:[#allocation4 + $0x60] sm:$0xff]  }
 0x364   : > { %5903 = vst [vmem:[#allocation4 + $0x98] sm:$0x1] %v5902_v31  ;;  %v6328_v50 = vrot.slane %v6326_v2, 5  ;;  %v6336_v49 = vshll.u32 %v6102_v56, 16  ;;  %v10825_v28 = vrot.slane %v6612_v53, 9  ;;  %v6742_v34 = vrot.slane %v6613_v62, 5 }
 0x365   : > { %v5337_v20 = vadd.f32 %v14619_v46, %v5301_v4  ;;  %v5338_v35 = vadd.f32 %v14619_v46, %v5302_v60  ;;  %v6324_v22 = vrot.slane %v6323_v54, 4  ;;  %v6332_v57 = vrot.slane %v6330_v43, 4  ;;  %v16660_v53 = vld [vmem:[#allocation33_spill] sm:$0xff]  ;;  %v6615_v2 = vld [vmem:[#allocation4 + $0x6c] sm:$0xe] }
 0x366   : > { %v6338_v24 = vrot.slane %v6336_v49, 5  ;;  %v6743_v7 = vsel %vm12675_vm0, %v10825_v28, %v6742_v34  ;;  %v6744_v8 = vrot.slane %v6742_v34, 4  ;;  %v6745_v32 = vrot.slane %v6614_v21, 5  ;;  %v6105_v31 = vld [vmem:[#allocation4 + $0x74] sm:$0x1] }
 0x367   : > { %v11078_v41 = vpack.c.bf16 %v5337_v20, %v5337_v20  ;;  %v11079_v0 = vpack.c.bf16 %v5338_v35, %v5338_v35  ;;  %v6329_v16 = vsel %vm12533_vm12, %v6324_v22, %v6328_v50  ;;  %v6333_v27 = vor.u32 %v6332_v57, %v6328_v50  ;;  %v6616_v21 = vld [vmem:[#allocation4 + $0x70] sm:$0xf] }
 0x368   : > { %v6746_v63 = vsel %vm12675_vm0, %v6744_v8, %v6745_v32  ;;  %v11294_v10 = vadd.f32 %v15100_v1, %v15091_v36  ;;  %v11297_v33 = vadd.f32 %v15116_v38, %v15107_v17  ;;  %v6341_v9 = vshrl.u32 %v6103_v40, 16  ;;  %v5904_v1 = vld [vmem:[#allocation4 + $0x9c] sm:$0xf]  ;;  %v6106_v8 = vld [vmem:[#allocation4 + $0x78] sm:$0xf] }
 0x369   : > { %v5700_v5 = vshrl.u32 %v11078_v41, 16  ;;  %v5703_v52 = vshll.u32 %v11078_v41, 16  ;;  %v5708_v3 = vshrl.u32 %v11079_v0, 16  ;;  %v5711_v44 = vshll.u32 %v11079_v0, 16  ;;  %v16659_v38 = vld [vmem:[#allocation30_spill] sm:$0xff]  ;;  %v16662_v0 = vld [vmem:[#allocation9_spill] sm:$0xff] }
 0x36a   : > { %v6334_v61 = vrot.slane %v6333_v27, 4  ;;  %v10841_v39 = vcombine.low %v6743_v7, %v6746_v63  ;;  %v5058_v51 = vadd.f32 %v11294_v10, %v16657_v45  ;;  %v5061_v47 = vadd.f32 %v11297_v33, %v16658_v59  ;;  %v6617_v7 = vld [vmem:[#allocation4 + $0x74] sm:$0x1]  ;;  %v16661_v41 = vld [vmem:[#allocation26_spill] sm:$0xff] }
 0x36b   : > { %v5702_v12 = vrot.slane %v5700_v5, 7  ;;  %v5710_v6 = vrot.slane %v5708_v3, 7  ;;  %v6343_v15 = vrot.slane %v6341_v9, 4  ;;  %v6344_v36 = vshll.u32 %v6103_v40, 16  ;;  %v15212_v50 = vpop.f32.mrb[56].mxu1 }
 0x36c   : > { %v6339_v17 = vsel %vm12533_vm12, %v6334_v61, %v6338_v24  ;;  %9748 = vmatmul.mubr.bf16.gmra.mrb[128].mxu0 %v10841_v39  ;;  %v5219_v56 = vadd.f32 %v16659_v38, %v5058_v51  ;;  %v5222_v37 = vadd.f32 %v16660_v53, %v5061_v47  ;;  %v6350_v23 = vshll.u32 %v6104_v29, 16  ;;  %v15222_v35 = vpop.f32.mrb[57].mxu1  ;;  %v6107_v33 = vld [vmem:[#allocation4 + $0x7c] sm:$0xf] }
 0x36d   : > { %v5705_v48 = vor.u32 %v5703_v52, %v5702_v12  ;;  %v5706_v58 = vrot.slane %v5702_v12, 4  ;;  %v5713_v62 = vor.u32 %v5711_v44, %v5710_v6  ;;  %v5715_v13 = vrot.slane %v5710_v6, 4  ;;  %9755 = vmatprep.mubr.bf16.mxu0 %v12039_v18  ;;  %v15226_v32 = vpop.f32.mrb[58].mxu1  ;;  %v6108_v12 = vld [vmem:[#allocation4 + $0x80] sm:$0x1] }
 0x36e   : > { %v10809_v4 = vcombine.low %v6329_v16, %v6339_v17  ;;  %v5267_v60 = vmax.f32 %v5219_v56, 0.0  ;;  %v5268_v54 = vmax.f32 %v5222_v37, 0.0  ;;  %v6346_v43 = vrot.slane %v6344_v36, 5  ;;  %v15232_v9 = vpop.f32.mrb[59].mxu1  ;;  %v6619_v17 = vld [vmem:[#allocation4 + $0x7c] sm:$0xf] }
 0x36f   : > { %v5905_v49 = vsel %vm14705_vm9, %v5705_v48, %v5904_v1  ;;  %v5714_v28 = vsel %vm12341_vm4, %v5706_v58, %v5713_v62  ;;  %v5909_v34 = vsel %vm14722_vm6, %v5715_v13, %v5908_v14  ;;  %v15220_v20 = vrot.slane %v6350_v23, 5  ;;  %v12043_v48 = vld [vmem:[#allocation4 + $0x84] sm:$0xff]   ;;  %v6618_v58 = vld [vmem:[#allocation4 + $0x78] sm:$0xe] }
 0x370   : > { %5906 = vst [vmem:[#allocation4 + $0x9c] sm:$0xf] %v5905_v49  ;;  %5907 = vst [vmem:[#allocation4 + $0xa0] sm:$0xf] %v5714_v28  ;;  %9586 = vmatprep.mubr.bf16.mxu1 %v10809_v4  ;;  %v5303_v22 = vmul.f32 %v14603_v55, %v5267_v60  ;;  %v5304_v57 = vmul.f32 %v14603_v55, %v5268_v54  ;;  %v6347_v40 = vor.u32 %v6346_v43, %v6343_v15  ;;  %v5911_v13 = vld [vmem:[#allocation4 + $0xa8] sm:$0xf] }
 0x371   : > { %5910 = vst [vmem:[#allocation4 + $0xa4] sm:$0x1] %v5909_v34  ;;  %v6354_v24 = vshrl.u32 %v6104_v29, 16  ;;  %v15230_v16 = vadd.f32 %v16662_v0, %v16661_v41  ;;  %9587 = vmatmul.mubr.bf16.gmra.mrb[96].mxu1 %v12038_v19  ;;  %v6360_v27 = vshll.u32 %v6105_v31, 16  ;;  %v10826_v63 = vrot.slane %v6615_v2, 9 }
 0x372   : > { %v6749_v10 = vrot.slane %v6616_v21, 5  ;;  %v5339_v5 = vadd.f32 %v14619_v46, %v5303_v22  ;;  %v5340_v52 = vadd.f32 %v14619_v46, %v5304_v57  ;;  %v6348_v29 = vrot.slane %v6347_v40, 4  ;;  %v5915_v49 = vld [vmem:[#allocation4 + $0xb0] sm:$0x1]  ;;  %v6620_v22 = vld [vmem:[#allocation4 + $0x80] sm:$0x1] }
 0x373   : > { %v6356_v3 = vrot.slane %v6354_v24, 4  ;;  %v6362_v44 = vrot.slane %v6360_v27, 5  ;;  %v6752_v61 = vrot.slane %v6617_v7, 5  ;;  %v6365_v39 = vshrl.u32 %v6106_v8, 16  ;;  %v15239_v6 = vpop.f32.mrb[60].mxu1 }
 0x374   : > { %v6751_v18 = vrot.slane %v6749_v10, 4  ;;  %v11080_v45 = vpack.c.bf16 %v5339_v5, %v5339_v5  ;;  %v11081_v51 = vpack.c.bf16 %v5340_v52, %v5340_v52  ;;  %v6750_v47 = vsel %vm12675_vm0, %v10826_v63, %v6749_v10  ;;  %v15243_v38 = vpop.f32.mrb[61].mxu1  ;;  %v6109_v0 = vld [vmem:[#allocation4 + $0x84] sm:$0xf]  ;;  %v6110_v27 = vld [vmem:[#allocation4 + $0x88] sm:$0xf] }
 0x375   : > { %v6357_v59 = vor.u32 %v6356_v3, %v15220_v20  ;;  %v6367_v36 = vrot.slane %v6365_v39, 4  ;;  %v6368_v1 = vshll.u32 %v6106_v8, 16  ;;  %v6374_v14 = vshll.u32 %v6107_v33, 16  ;;  %v15248_v62 = vpop.f32.mrb[62].mxu1  ;;  %v6111_v52 = vld [vmem:[#allocation4 + $0x8c] sm:$0x1] }
 0x376   : > { %v6753_v15 = vsel %vm12675_vm0, %v6751_v18, %v6752_v61  ;;  %v5717_v56 = vshrl.u32 %v11080_v45, 16  ;;  %v5720_v53 = vshll.u32 %v11080_v45, 16  ;;  %v5725_v37 = vshrl.u32 %v11081_v51, 16  ;;  %v12042_v18 = vld [vmem:[#allocation4 + $0x6c] sm:$0xff]   ;;  %v6621_v39 = vld [vmem:[#allocation4 + $0x84] sm:$0xe] }
 0x377   : > { %v6353_v23 = vsel %vm12533_vm12, %v6348_v29, %v15220_v20  ;;  %v5728_v19 = vshll.u32 %v11081_v51, 16  ;;  %v6358_v31 = vrot.slane %v6357_v59, 4  ;;  %v10842_v2 = vcombine.low %v6750_v47, %v6753_v15  ;;  %v15260_v15 = vpop.f32.mrb[63].mxu1 }
 0x378   : > { %v6370_v4 = vrot.slane %v6368_v1, 5  ;;  %v5719_v60 = vrot.slane %v5717_v56, 7  ;;  %v5727_v54 = vrot.slane %v5725_v37, 7  ;;  %v6378_v43 = vshrl.u32 %v6107_v33, 16  ;;  %v6623_v56 = vld [vmem:[#allocation4 + $0x8c] sm:$0x1] }
 0x379   : > { %v6384_v21 = vshll.u32 %v6108_v12, 16  ;;  %v6363_v28 = vsel %vm12533_vm12, %v6358_v31, %v6362_v44  ;;  %9756 = vmatmul.mubr.bf16.gmra.mrb[132].mxu0 %v10842_v2  ;;  %v6376_v20 = vrot.slane %v6374_v14, 5  ;;  %v6756_v57 = vrot.slane %v6619_v17, 5  ;;  %v6622_v12 = vld [vmem:[#allocation4 + $0x88] sm:$0xf] }
 0x37a   : > { %v6371_v34 = vor.u32 %v6370_v4, %v6367_v36  ;;  %v5722_v40 = vor.u32 %v5720_v53, %v5719_v60  ;;  %v5723_v24 = vrot.slane %v5719_v60, 4  ;;  %v5730_v7 = vor.u32 %v5728_v19, %v5727_v54  ;;  %9763 = vmatprep.mubr.bf16.mxu0 %v12043_v48  ;;  %v12045_v48 = vld [vmem:[#allocation4 + $0x90] sm:$0xff]  }
 0x37b   : > { %v5732_v8 = vrot.slane %v5727_v54, 4  ;;  %v10810_v63 = vcombine.low %v6353_v23, %v6363_v28  ;;  %v6380_v33 = vrot.slane %v6378_v43, 4  ;;  %v10827_v5 = vrot.slane %v6618_v58, 9  ;;  %v15266_v19 = vpop.f32.mrb[64].mxu1  ;;  %v6113_v54 = vld [vmem:[#allocation4 + $0x94] sm:$0xf] }
 0x37c   : > { %v6372_v10 = vrot.slane %v6371_v34, 4  ;;  %v5912_v29 = vsel %vm14705_vm9, %v5722_v40, %v5911_v13  ;;  %v5731_v3 = vsel %vm12341_vm4, %v5723_v24, %v5730_v7  ;;  %v6386_v61 = vrot.slane %v6384_v21, 5  ;;  %v6112_v13 = vld [vmem:[#allocation4 + $0x90] sm:$0xf]  ;;  %v15268_v43 = vpop.f32.mrb[65].mxu1 }
 0x37d   : > { %v5916_v44 = vsel %vm14722_vm6, %v5732_v8, %v5915_v49  ;;  %5913 = vst [vmem:[#allocation4 + $0xa8] sm:$0xf] %v5912_v29  ;;  %5914 = vst [vmem:[#allocation4 + $0xac] sm:$0xf] %v5731_v3  ;;  %9594 = vmatprep.mubr.bf16.mxu1 %v10810_v63  ;;  %v6381_v45 = vor.u32 %v6380_v33, %v6376_v20  ;;  %v6757_v51 = vsel %vm12675_vm0, %v10827_v5, %v6756_v57  ;;  %v12044_v8 = vld [vmem:[#allocation4 + $0x78] sm:$0xff]  }
 0x37e   : > { %5917 = vst [vmem:[#allocation4 + $0xb0] sm:$0x1] %v5916_v44  ;;  %v6758_v59 = vrot.slane %v6756_v57, 4  ;;  %v6759_v47 = vrot.slane %v6620_v22, 5  ;;  %9595 = vmatmul.mubr.bf16.gmra.mrb[100].mxu1 %v12042_v18  ;;  %v6389_v36 = vshrl.u32 %v6109_v0, 16  ;;  %v6392_v1 = vshll.u32 %v6109_v0, 16 }
 0x37f   : > { %v6398_v14 = vshll.u32 %v6110_v27, 16  ;;  %v6402_v17 = vshrl.u32 %v6110_v27, 16  ;;  %v6377_v53 = vsel %vm12533_vm12, %v6372_v10, %v6376_v20  ;;  %v6382_v37 = vrot.slane %v6381_v45, 4  ;;  %v6114_v20 = vld [vmem:[#allocation4 + $0x98] sm:$0x1]  ;;  %v15272_v22 = vpop.f32.mrb[66].mxu1 }
 0x380   : > { %v6760_v23 = vsel %vm12675_vm0, %v6758_v59, %v6759_v47  ;;  %v6408_v58 = vshll.u32 %v6111_v52, 16  ;;  %v6391_v2 = vrot.slane %v6389_v36, 4  ;;  %v6394_v4 = vrot.slane %v6392_v1, 5  ;;  %v6625_v33 = vld [vmem:[#allocation4 + $0x94] sm:$0xf] }
 0x381   : > { %v10843_v31 = vcombine.low %v6757_v51, %v6760_v23  ;;  %v6400_v60 = vrot.slane %v6398_v14, 5  ;;  %v6387_v21 = vsel %vm12533_vm12, %v6382_v37, %v6386_v61  ;;  %v6404_v49 = vrot.slane %v6402_v17, 4  ;;  %v6624_v45 = vld [vmem:[#allocation4 + $0x90] sm:$0xe]  ;;  %v16663_v51 = vld [vmem:[#allocation32_spill] sm:$0xff]  ;;  %v12049_v37 = vld [vmem:[#allocation4 + $0x9c] sm:$0xff]  }
 0x382   : > { %v10828_v28 = vrot.slane %v6621_v39, 9  ;;  %v6763_v34 = vrot.slane %v6622_v12, 5  ;;  %v10811_v57 = vcombine.low %v6377_v53, %v6387_v21  ;;  %v6395_v40 = vor.u32 %v6394_v4, %v6391_v2  ;;  %v6115_v1 = vld [vmem:[#allocation4 + $0x9c] sm:$0xf]  ;;  %v6116_v14 = vld [vmem:[#allocation4 + $0xa0] sm:$0xf] }
 0x383   : > { %9764 = vmatmul.mubr.bf16.gmra.mrb[136].mxu0 %v10843_v31  ;;  %v6410_v24 = vrot.slane %v6408_v58, 5  ;;  %v6413_v7 = vshrl.u32 %v6112_v13, 16  ;;  %v6405_v0 = vor.u32 %v6404_v49, %v6400_v60  ;;  %v6766_v63 = vrot.slane %v6623_v56, 5  ;;  %v15286_v4 = vpop.f32.mrb[67].mxu1  ;;  %v6117_v21 = vld [vmem:[#allocation4 + $0xa4] sm:$0x1] }
 0x384   : > { %9771 = vmatprep.mubr.bf16.mxu0 %v12045_v48  ;;  %v6765_v27 = vrot.slane %v6763_v34, 4  ;;  %v6416_v10 = vshll.u32 %v6112_v13, 16  ;;  %9602 = vmatprep.mubr.bf16.mxu1 %v10811_v57  ;;  %v6396_v5 = vrot.slane %v6395_v40, 4  ;;  %v6422_v29 = vshll.u32 %v6113_v54, 16  ;;  %v6626_v48 = vld [vmem:[#allocation4 + $0x98] sm:$0x1] }
 0x385   : > { %v6415_v52 = vrot.slane %v6413_v7, 4  ;;  %v6426_v3 = vshrl.u32 %v6113_v54, 16  ;;  %v6406_v44 = vrot.slane %v6405_v0, 4  ;;  %v6432_v39 = vshll.u32 %v6114_v20, 16 }
 0x386   : > { %v6767_v18 = vsel %vm12675_vm0, %v6765_v27, %v6766_v63  ;;  %v6418_v61 = vrot.slane %v6416_v10, 5  ;;  %v15278_v59 = vadd.f32 %v16663_v51, %v16661_v41  ;;  %9603 = vmatmul.mubr.bf16.gmra.mrb[104].mxu1 %v12044_v8  ;;  %v6764_v47 = vsel %vm12675_vm0, %v10828_v28, %v6763_v34  ;;  %v6628_v63 = vld [vmem:[#allocation4 + $0xa0] sm:$0xf] }
 0x387   : > { %v6424_v12 = vrot.slane %v6422_v29, 5  ;;  %v6428_v36 = vrot.slane %v6426_v3, 4  ;;  %v6401_v17 = vsel %vm12533_vm12, %v6396_v5, %v6400_v60  ;;  %v6411_v56 = vsel %vm12533_vm12, %v6406_v44, %v6410_v24  ;;  %v12048_v60 = vld [vmem:[#allocation4 + $0x84] sm:$0xff]   ;;  %v6119_v3 = vld [vmem:[#allocation4 + $0xac] sm:$0xf] }
 0x388   : > { %v10844_v53 = vcombine.low %v6764_v47, %v6767_v18  ;;  %v6419_v23 = vor.u32 %v6418_v61, %v6415_v52  ;;  %v10812_v58 = vcombine.low %v6401_v17, %v6411_v56  ;;  %v6434_v31 = vrot.slane %v6432_v39, 5  ;;  %v6118_v29 = vld [vmem:[#allocation4 + $0xa8] sm:$0xf]  ;;  %v16664_v44 = vld [vmem:[#allocation27_spill] sm:$0xff]  ;;  %v6627_v56 = vld [vmem:[#allocation4 + $0x9c] sm:$0xe] }
 0x389   : > { %v6429_v13 = vor.u32 %v6428_v36, %v6424_v12  ;;  %v6770_v2 = vrot.slane %v6625_v33, 5  ;;  %v6437_v49 = vshrl.u32 %v6115_v1, 16  ;;  %v6440_v28 = vshll.u32 %v6115_v1, 16  ;;  %v16665_v51 = vld [vmem:[#allocation35_spill] sm:$0xff]  ;;  %v12053_v36 = vld [vmem:[#allocation4 + $0xa8] sm:$0xff]  }
 0x38a   : > { %v6420_v54 = vrot.slane %v6419_v23, 4  ;;  %v6446_v34 = vshll.u32 %v6116_v14, 16  ;;  %9610 = vmatprep.mubr.bf16.mxu1 %v10812_v58  ;;  %v10829_v57 = vrot.slane %v6624_v45, 9  ;;  %v6450_v24 = vshrl.u32 %v6116_v14, 16 }
 0x38b   : > { %9772 = vmatmul.mubr.bf16.gmra.mrb[140].mxu0 %v10844_v53  ;;  %v6430_v20 = vrot.slane %v6429_v13, 4  ;;  %v6772_v40 = vrot.slane %v6770_v2, 4  ;;  %v6773_v7 = vrot.slane %v6626_v48, 5  ;;  %v6439_v8 = vrot.slane %v6437_v49, 4  ;;  %v6120_v53 = vld [vmem:[#allocation4 + $0xb0] sm:$0x1] }
 0x38c   : > { %9779 = vmatprep.mubr.bf16.mxu0 %v12049_v37  ;;  %v6442_v0 = vrot.slane %v6440_v28, 5  ;;  %v6448_v27 = vrot.slane %v6446_v34, 5  ;;  %v6425_v10 = vsel %vm12533_vm12, %v6420_v54, %v6424_v12  ;;  %v6452_v5 = vrot.slane %v6450_v24, 4  ;;  %v6629_v54 = vld [vmem:[#allocation4 + $0xa4] sm:$0x1] }
 0x38d   : > { %v6435_v33 = vsel %vm12533_vm12, %v6430_v20, %v6434_v31  ;;  %v6456_v52 = vshll.u32 %v6117_v21, 16  ;;  %v4913_v18 = vadd.f32 %v16664_v44, %v16661_v41  ;;  %v6774_v39 = vsel %vm12675_vm0, %v6772_v40, %v6773_v7 }
 0x38e   : > { %v10813_v61 = vcombine.low %v6425_v10, %v6435_v33  ;;  %v6443_v45 = vor.u32 %v6442_v0, %v6439_v8  ;;  %v4916_v47 = vadd.f32 %v16665_v51, %v16661_v41  ;;  %9611 = vmatmul.mubr.bf16.gmra.mrb[108].mxu1 %v12048_v60  ;;  %v6771_v12 = vsel %vm12675_vm0, %v10829_v57, %v6770_v2  ;;  %v12050_v0 = vld [vmem:[#allocation4 + $0x90] sm:$0xff]   ;;  %v16667_v51 = vld [vmem:[#allocation8_spill] sm:$0xff] }
 0x38f   : > { %v6453_v1 = vor.u32 %v6452_v5, %v6448_v27  ;;  %v6777_v14 = vrot.slane %v6628_v63, 5  ;;  %v6461_v37 = vshrl.u32 %v6118_v29, 16  ;;  %v6464_v23 = vshll.u32 %v6118_v29, 16 }
 0x390   : > { %9618 = vmatprep.mubr.bf16.mxu1 %v10813_v61  ;;  %v6444_v17 = vrot.slane %v6443_v45, 4  ;;  %v6470_v48 = vshll.u32 %v6119_v3, 16  ;;  %v10845_v58 = vcombine.low %v6771_v12, %v6774_v39  ;;  %v6458_v31 = vrot.slane %v6456_v52, 5  ;;  %v6631_v39 = vld [vmem:[#allocation4 + $0xac] sm:$0xf] }
 0x391   : > { %v6454_v13 = vrot.slane %v6453_v1, 4  ;;  %v6474_v21 = vshrl.u32 %v6119_v3, 16  ;;  %v6779_v41 = vrot.slane %v6777_v14, 4  ;;  %v6463_v49 = vrot.slane %v6461_v37, 4  ;;  %v16669_v1 = vld [vmem:[#allocation7_spill] sm:$0xff] }
 0x392   : > { %v6466_v28 = vrot.slane %v6464_v23, 5  ;;  %v6472_v34 = vrot.slane %v6470_v48, 5  ;;  %v6449_v2 = vsel %vm12533_vm12, %v6444_v17, %v6448_v27  ;;  %v6480_v57 = vshll.u32 %v6120_v53, 16  ;;  %v6630_v37 = vld [vmem:[#allocation4 + $0xa8] sm:$0xe] }
 0x393   : > { %9780 = vmatmul.mubr.bf16.gmra.mrb[144].mxu0 %v10845_v58  ;;  %v6459_v60 = vsel %vm12533_vm12, %v6454_v13, %v6458_v31  ;;  %v6476_v20 = vrot.slane %v6474_v21, 4  ;;  %v6780_v24 = vrot.slane %v6629_v54, 5  ;;  %v11300_v8 = vadd.f32 %v15222_v35, %v15212_v50  ;;  %v12056_v54 = vld [vmem:[#allocation4 + $0x9c] sm:$0xff]  }
 0x394   : > { %9787 = vmatprep.mubr.bf16.mxu0 %v12053_v36  ;;  %v10814_v40 = vcombine.low %v6449_v2, %v6459_v60  ;;  %v6467_v7 = vor.u32 %v6466_v28, %v6463_v49  ;;  %v10830_v63 = vrot.slane %v6627_v56, 9  ;;  %v11303_v33 = vadd.f32 %v15232_v9, %v15226_v32  ;;  %v16666_v9 = vld [vmem:[#allocation11_spill] sm:$0xff]  ;;  %v7965_v36 = vld [vmem:[#allocation4 + $0x18] sm:$0xf] }
 0x395   : > { %v6477_v10 = vor.u32 %v6476_v20, %v6472_v34  ;;  %v11306_v27 = vadd.f32 %v15243_v38, %v15239_v6  ;;  %v6781_v5 = vsel %vm12675_vm0, %v6779_v41, %v6780_v24  ;;  %v5066_v29 = vadd.f32 %v11300_v8, %v15230_v16 }
 0x396   : > { %v6468_v52 = vrot.slane %v6467_v7, 4  ;;  %v11309_v3 = vadd.f32 %v15260_v15, %v15248_v62  ;;  %9619 = vmatmul.mubr.bf16.gmra.mrb[112].mxu1 %v12050_v0  ;;  %v6482_v35 = vrot.slane %v6480_v57, 5  ;;  %v5069_v44 = vadd.f32 %v11303_v33, %v15278_v59  ;;  %v16668_v15 = vld [vmem:[#allocation34_spill] sm:$0xff]  ;;  %v7967_v0 = vld [vmem:[#allocation4 + $0x20] sm:$0x1] }
 0x397   : > { %v6478_v50 = vrot.slane %v6477_v10, 4  ;;  %v5074_v61 = vadd.f32 %v11306_v27, %v4913_v18  ;;  %9626 = vmatprep.mubr.bf16.mxu1 %v10814_v40  ;;  %v6778_v32 = vsel %vm12675_vm0, %v10830_v63, %v6777_v14  ;;  %v5227_v6 = vadd.f32 %v16666_v9, %v5066_v29  ;;  %v7966_v14 = vld [vmem:[#allocation4 + $0x1c] sm:$0xf]  ;;  %v12057_v9 = vld [vmem:[#allocation4 + $0xa8] sm:$0xff]  }
 0x398   : > { %v5077_v38 = vadd.f32 %v11309_v3, %v4916_v47  ;;  %v10846_v45 = vcombine.low %v6778_v32, %v6781_v5  ;;  %v5230_v62 = vadd.f32 %v16667_v51, %v5069_v44  ;;  %v6473_v59 = vsel %vm12533_vm12, %v6468_v52, %v6472_v34  ;;  %v6632_v34 = vld [vmem:[#allocation4 + $0xb0] sm:$0x1] }
 0x399   : > { %v6483_v16 = vsel %vm12533_vm12, %v6478_v50, %v6482_v35  ;;  %v5235_v12 = vadd.f32 %v16668_v15, %v5074_v61  ;;  %v5269_v18 = vmax.f32 %v5227_v6, 0.0  ;;  %v6784_v23 = vrot.slane %v6631_v39, 5  ;;  %v5918_v35 = vld [vmem:[#allocation4 + $0xb4] sm:$0xf]  ;;  %v5922_v39 = vld [vmem:[#allocation4 + $0xbc] sm:$0x1] }
 0x39a   : > { %v5238_v17 = vadd.f32 %v16669_v1, %v5077_v38  ;;  %v10815_v56 = vcombine.low %v6473_v59, %v6483_v16  ;;  %v5270_v47 = vmax.f32 %v5230_v62, 0.0  ;;  %v8014_v13 = vshrl.u32 %v7965_v36, 16 }
 0x39b   : > { %9788 = vmatmul.mubr.bf16.gmra.mrb[148].mxu0 %v10846_v45  ;;  %v5271_v53 = vmax.f32 %v5235_v12, 0.0  ;;  %v5305_v48 = vmul.f32 %v14603_v55, %v5269_v18  ;;  %v8017_v31 = vshll.u32 %v7965_v36, 16  ;;  %v10831_v2 = vrot.slane %v6630_v37, 9  ;;  %v5925_v45 = vld [vmem:[#allocation4 + $0xc0] sm:$0xf] }
 0x39c   : > { %v5272_v58 = vmax.f32 %v5238_v17, 0.0  ;;  %v5306_v21 = vmul.f32 %v14603_v55, %v5270_v47  ;;  %v8023_v60 = vshll.u32 %v7966_v14, 16  ;;  %v6786_v40 = vrot.slane %v6784_v23, 4  ;;  %v5929_v17 = vld [vmem:[#allocation4 + $0xc8] sm:$0x1] }
 0x39d   : > { %v5307_v41 = vmul.f32 %v14603_v55, %v5271_v53  ;;  %v5341_v49 = vadd.f32 %v14619_v46, %v5305_v48  ;;  %v8027_v24 = vshrl.u32 %v7966_v14, 16  ;;  %v8016_v63 = vrot.slane %v8014_v13, 4  ;;  %v7532_v48 = vld [vmem:[#allocation4 + $0xc] sm:$0xe] }
 0x39e   : > { %v5308_v28 = vmul.f32 %v14603_v55, %v5272_v58  ;;  %9627 = vmatmul.mubr.bf16.gmra.mrb[116].mxu1 %v12056_v54  ;;  %v5342_v20 = vadd.f32 %v14619_v46, %v5306_v21  ;;  %v8019_v10 = vrot.slane %v8017_v31, 5  ;;  %v15336_v55 = vsel %vm12675_vm0, %v10831_v2, %v6784_v23  ;;  %v7534_v58 = vld [vmem:[#allocation4 + $0x14] sm:$0x1] }
 0x39f   : > { %v5343_v57 = vadd.f32 %v14619_v46, %v5307_v41  ;;  %9634 = vmatprep.mubr.bf16.mxu1 %v10815_v56  ;;  %v11082_v7 = vpack.c.bf16 %v5341_v49, %v5341_v49  ;;  %v6787_v5 = vrot.slane %v6632_v34, 5  ;;  %v15338_v3 = vrot.slane %v8023_v60, 5  ;;  %v15345_v56 = vld [vmem:[#allocation4 + $0x10] sm:$0xf]  ;;  %v7020_v41 = vld [vmem:[#allocation4 + $0xc] sm:$0xf] }
 0x3a0   : > { %v5344_v8 = vadd.f32 %v14619_v46, %v5308_v28  ;;  %v11083_v33 = vpack.c.bf16 %v5342_v20, %v5342_v20  ;;  %v8029_v50 = vrot.slane %v8027_v24, 4  ;;  %v8033_v32 = vshll.u32 %v7967_v0, 16  ;;  %v7021_v49 = vld [vmem:[#allocation4 + $0x10] sm:$0xf]  ;;  %v7022_v20 = vld [vmem:[#allocation4 + $0x14] sm:$0x1] }
 0x3a1   : > { %v11084_v27 = vpack.c.bf16 %v5343_v57, %v5343_v57  ;;  %v5734_v52 = vshrl.u32 %v11082_v7, 16  ;;  %v15342_v46 = vsel %vm12675_vm0, %v6786_v40, %v6787_v5  ;;  %v5737_v38 = vshll.u32 %v11082_v7, 16  ;;  %v15356_v57 = vld [vmem:[#allocation4 + $0x24] sm:$0xf]  ;;  %v15362_v0 = vld [vmem:[#allocation4 + $0x28] sm:$0xf] }
 0x3a2   : > { %v11085_v29 = vpack.c.bf16 %v5344_v8, %v5344_v8  ;;  %v5742_v44 = vshrl.u32 %v11083_v33, 16  ;;  %v8020_v51 = vor.u32 %v8019_v10, %v8016_v63  ;;  %v5745_v15 = vshll.u32 %v11083_v33, 16 }
 0x3a3   : > { %v5751_v61 = vshrl.u32 %v11084_v27, 16  ;;  %v5736_v6 = vrot.slane %v5734_v52, 7  ;;  %v5754_v36 = vshll.u32 %v11084_v27, 16  ;;  %v8030_v14 = vor.u32 %v8029_v50, %v15338_v3 }
 0x3a4   : > { %v5759_v16 = vshrl.u32 %v11085_v29, 16  ;;  %v5744_v62 = vrot.slane %v5742_v44, 7  ;;  %v5762_v1 = vshll.u32 %v11085_v29, 16  ;;  %v7630_v60 = vrot.slane %v15345_v56, 5  ;;  %v15364_v29 = vld [vmem:[#allocation4 + $0x2c] sm:$0x1] }
 0x3a5   : > { %v5753_v12 = vrot.slane %v5751_v61, 7  ;;  %v5739_v59 = vor.u32 %v5737_v38, %v5736_v6  ;;  %v5740_v47 = vrot.slane %v5736_v6, 4  ;;  %v8035_v7 = vrot.slane %v8033_v32, 5 }
 0x3a6   : > { %v5761_v18 = vrot.slane %v5759_v16, 7  ;;  %9635 = vmatmul.mubr.bf16.gmra.mrb[120].mxu1 %v12057_v9  ;;  %v5747_v53 = vor.u32 %v5745_v15, %v5744_v62  ;;  %v5749_v37 = vrot.slane %v5744_v62, 4  ;;  %v10881_v8 = vrot.slane %v7532_v48, 9 }
 0x3a7   : > { %v5756_v23 = vor.u32 %v5754_v36, %v5753_v12  ;;  %v5919_v13 = vsel %vm14705_vm9, %v5739_v59, %v5918_v35  ;;  %v5757_v31 = vrot.slane %v5753_v12, 4  ;;  %v8021_v30 = vrot.slane %v8020_v51, 4 }
 0x3a8   : > { %v5764_v54 = vor.u32 %v5762_v1, %v5761_v18  ;;  %v5766_v21 = vrot.slane %v5761_v18, 4  ;;  %5920 = vst [vmem:[#allocation4 + $0xb4] sm:$0xf] %v5919_v13  ;;  %v5748_v28 = vsel %vm12341_vm4, %v5740_v47, %v5747_v53  ;;  %v5923_v34 = vsel %vm14722_vm6, %v5749_v37, %v5922_v39 }
 0x3a9   : > { %v5926_v2 = vsel %vm14705_vm9, %v5756_v23, %v5925_v45  ;;  %5921 = vst [vmem:[#allocation4 + $0xb8] sm:$0xf] %v5748_v28  ;;  %5924 = vst [vmem:[#allocation4 + $0xbc] sm:$0x1] %v5923_v34  ;;  %v7069_v63 = vshrl.u32 %v7020_v41, 16  ;;  %v7072_v10 = vshll.u32 %v7020_v41, 16  ;;  %v10847_v51 = vcombine.low %v15336_v55, %v15342_v46 }
 0x3aa   : > { %5927 = vst [vmem:[#allocation4 + $0xc0] sm:$0xf] %v5926_v2  ;;  %v5765_v40 = vsel %vm12341_vm4, %v5757_v31, %v5764_v54  ;;  %v5930_v24 = vsel %vm14722_vm6, %v5766_v21, %v5929_v17  ;;  %v7078_v33 = vshll.u32 %v7021_v49, 16  ;;  %v7633_v27 = vrot.slane %v7534_v58, 5 }
 0x3ab   : > { %5928 = vst [vmem:[#allocation4 + $0xc4] sm:$0xf] %v5765_v40  ;;  %5931 = vst [vmem:[#allocation4 + $0xc8] sm:$0x1] %v5930_v24  ;;  %v7082_v5 = vshrl.u32 %v7021_v49, 16  ;;  %v7088_v52 = vshll.u32 %v7022_v20, 16  ;;  %v15377_v12 = vadd.f32 %v15268_v43, %v15266_v19  ;;  %v15381_v36 = vadd.f32 %v15286_v4, %v15272_v22 }
 0x3ac   : > { %v8038_v26 = vshrl.u32 %v15356_v57, 16  ;;  %v8031_v50 = vrot.slane %v8030_v14, 4  ;;  %v7632_v25 = vrot.slane %v7630_v60, 4  ;;  %v7071_v35 = vrot.slane %v7069_v63, 4 }
 0x3ad   : > { %v7074_v44 = vrot.slane %v7072_v10, 5  ;;  %v7080_v61 = vrot.slane %v7078_v33, 5  ;;  %v7084_v32 = vrot.slane %v7082_v5, 4  ;;  %v7090_v9 = vrot.slane %v7088_v52, 5  ;;  %v7536_v33 = vld [vmem:[#allocation4 + $0x1c] sm:$0xf] }
 0x3ae   : > { %v15367_v6 = vrot.slane %v8038_v26, 4  ;;  %v8041_v38 = vshll.u32 %v15356_v57, 16  ;;  %v8047_v39 = vshll.u32 %v15362_v0, 16  ;;  %v8051_v45 = vshrl.u32 %v15362_v0, 16 }
 0x3af   : > { %v8057_v16 = vshll.u32 %v15364_v29, 16  ;;  %v6121_v62 = vld [vmem:[#allocation4 + $0xb4] sm:$0xf]  ;;  %v8026_v1 = vsel %vm12533_vm12, %v8021_v30, %v15338_v3  ;;  %v8036_v17 = vsel %vm12533_vm12, %v8031_v50, %v8035_v7  ;;  %v15390_v55 = vsel %vm12675_vm0, %v7632_v25, %v7633_v27  ;;  %v7537_v27 = vld [vmem:[#allocation4 + $0x20] sm:$0x1] }
 0x3b0   : > { %v6633_v15 = vld [vmem:[#allocation4 + $0xb4] sm:$0xe]  ;;  %v6485_v18 = vshrl.u32 %v6121_v62, 16  ;;  %v6122_v19 = vld [vmem:[#allocation4 + $0xb8] sm:$0xf]  ;;  %v6488_v43 = vshll.u32 %v6121_v62, 16  ;;  %v15394_v22 = vsel %vm12675_vm0, %v10881_v8, %v7630_v60  ;;  %v7075_v4 = vor.u32 %v7074_v44, %v7071_v35 }
 0x3b1   : > { %v12068_v59 = vld [vmem:[#allocation4 + $0xb4] sm:$0xff]   ;;  %v7085_v14 = vor.u32 %v7084_v32, %v7080_v61  ;;  %v6123_v56 = vld [vmem:[#allocation4 + $0xbc] sm:$0x1]  ;;  %v6494_v3 = vshll.u32 %v6122_v19, 16  ;;  %v6498_v53 = vshrl.u32 %v6122_v19, 16  ;;  %v10832_v37 = vrot.slane %v6633_v15, 9 }
 0x3b2   : > { %v12075_v46 = vld [vmem:[#allocation4 + $0xc0] sm:$0xff]   ;;  %9795 = vmatprep.mubr.bf16.mxu0 %v12068_v59  ;;  %v6487_v47 = vrot.slane %v6485_v18, 4  ;;  %v6490_v23 = vrot.slane %v6488_v43, 5  ;;  %v6504_v48 = vshll.u32 %v6123_v56, 16  ;;  %v6634_v58 = vld [vmem:[#allocation4 + $0xb8] sm:$0xf]  ;;  %v10929_v31 = vcombine.low %v8026_v1, %v8036_v17 }
 0x3b3   : > { %9796 = vmatmul.mubr.bf16.gmra.mrb[152].mxu0 %v10847_v51  ;;  %v6635_v13 = vld [vmem:[#allocation4 + $0xbc] sm:$0x1]  ;;  %v10897_v54 = vcombine.low %v15394_v22, %v15390_v55  ;;  %v6496_v21 = vrot.slane %v6494_v3, 5  ;;  %v6500_v41 = vrot.slane %v6498_v53, 4  ;;  %v6791_v49 = vrot.slane %v6634_v58, 5  ;;  %v12077_v17 = vld [vmem:[#allocation4 + $0xb4] sm:$0xff]  }
 0x3b4   : > { %9803 = vmatprep.mubr.bf16.mxu0 %v12075_v46  ;;  %v6794_v28 = vrot.slane %v6635_v13, 5  ;;  %v6491_v34 = vor.u32 %v6490_v23, %v6487_v47  ;;  %v6506_v2 = vrot.slane %v6504_v48, 5  ;;  %v7076_v60 = vrot.slane %v7075_v4, 4  ;;  %v7535_v8 = vld [vmem:[#allocation4 + $0x18] sm:$0xe] }
 0x3b5   : > { %v7086_v20 = vrot.slane %v7085_v14, 4  ;;  %v6501_v57 = vor.u32 %v6500_v41, %v6496_v21  ;;  %v6792_v40 = vsel %vm12675_vm0, %v10832_v37, %v6791_v49  ;;  %v6793_v24 = vrot.slane %v6791_v49, 4  ;;  %v7023_v50 = vld [vmem:[#allocation4 + $0x18] sm:$0xf]  ;;  %v7024_v51 = vld [vmem:[#allocation4 + $0x1c] sm:$0xf] }
 0x3b6   : > { %v8043_v7 = vrot.slane %v8041_v38, 5  ;;  %v6492_v0 = vrot.slane %v6491_v34, 4  ;;  %v7081_v30 = vsel %vm12533_vm12, %v7076_v60, %v7080_v61  ;;  %v8049_v10 = vrot.slane %v8047_v39, 5  ;;  %v7025_v18 = vld [vmem:[#allocation4 + $0x20] sm:$0x1] }
 0x3b7   : > { %v7091_v63 = vsel %vm12533_vm12, %v7086_v20, %v7090_v9  ;;  %v6502_v5 = vrot.slane %v6501_v57, 4  ;;  %v6795_v52 = vsel %vm12675_vm0, %v6793_v24, %v6794_v28  ;;  %v8053_v44 = vrot.slane %v8051_v45, 4  ;;  %v7971_v1 = vld [vmem:[#allocation4 + $0x30] sm:$0xf]  ;;  %v7972_v19 = vld [vmem:[#allocation4 + $0x34] sm:$0xf] }
 0x3b8   : > { %v15406_v29 = vcombine.low %v7081_v30, %v7091_v63  ;;  %v8044_v26 = vor.u32 %v8043_v7, %v15367_v6  ;;  %v6497_v25 = vsel %vm12533_vm12, %v6492_v0, %v6496_v21  ;;  %v10848_v35 = vcombine.low %v6792_v40, %v6795_v52  ;;  %v7973_v56 = vld [vmem:[#allocation4 + $0x38] sm:$0x1]  ;;  %v7538_v23 = vld [vmem:[#allocation4 + $0x24] sm:$0xe]  ;;  %v7539_v21 = vld [vmem:[#allocation4 + $0x28] sm:$0xf] }
 0x3b9   : > { %v8059_v61 = vrot.slane %v8057_v16, 5  ;;  %v6507_v32 = vsel %vm12533_vm12, %v6502_v5, %v6506_v2  ;;  %v10882_v38 = vrot.slane %v7535_v8, 9  ;;  %v7637_v39 = vrot.slane %v7536_v33, 5  ;;  %v12081_v2 = vld [vmem:[#allocation4 + $0x18] sm:$0xff]   ;;  %v7540_v24 = vld [vmem:[#allocation4 + $0x2c] sm:$0x1] }
 0x3ba   : > { %v8045_v9 = vrot.slane %v8044_v26, 4  ;;  %v10816_v62 = vcombine.low %v6497_v25, %v6507_v32  ;;  %v8054_v15 = vor.u32 %v8053_v44, %v8049_v10  ;;  %v7640_v59 = vrot.slane %v7537_v27, 5  ;;  %v7026_v30 = vld [vmem:[#allocation4 + $0x24] sm:$0xf]  ;;  %v7027_v5 = vld [vmem:[#allocation4 + $0x28] sm:$0xf] }
 0x3bb   : > { %9804 = vmatmul.mubr.bf16.gmra.mrb[156].mxu0 %v10848_v35  ;;  %v7093_v6 = vshrl.u32 %v7023_v50, 16  ;;  %v15417_v16 = vsel %vm12675_vm0, %v10882_v38, %v7637_v39  ;;  %v7639_v55 = vrot.slane %v7637_v39, 4  ;;  %v7096_v46 = vshll.u32 %v7023_v50, 16  ;;  %v12085_v35 = vld [vmem:[%s16479_s4 + $0x208] sm:$0xff]   ;;  %v7028_v38 = vld [vmem:[#allocation4 + $0x2c] sm:$0x1] }
 0x3bc   : > { %10005 = vmatprep.mubr.bf16.mxu0 %v10929_v31  ;;  %v8050_v45 = vsel %vm12533_vm12, %v8045_v9, %v8049_v10  ;;  %9642 = vmatprep.mubr.bf16.mxu1 %v10816_v62  ;;  %v8055_v43 = vrot.slane %v8054_v15, 4  ;;  %v7102_v4 = vshll.u32 %v7024_v51, 16  ;;  %v7106_v14 = vshrl.u32 %v7024_v51, 16  ;;  %v7974_v39 = vld [vmem:[#allocation4 + $0x3c] sm:$0xf] }
 0x3bd   : > { %v7095_v22 = vrot.slane %v7093_v6, 4  ;;  %9643 = vmatmul.mubr.bf16.gmra.mrb[124].mxu1 %v12077_v17  ;;  %v7641_v47 = vsel %vm12675_vm0, %v7639_v55, %v7640_v59  ;;  %v7098_v3 = vrot.slane %v7096_v46, 5  ;;  %v7112_v53 = vshll.u32 %v7025_v18, 16  ;;  %v7975_v18 = vld [vmem:[#allocation4 + $0x40] sm:$0xf]  ;;  %v12105_v6 = vld [vmem:[%s16479_s4 + $0x200] sm:$0xff]  }
 0x3be   : > { %v8062_v37 = vshrl.u32 %v7971_v1, 16  ;;  %9844 = vmatprep.mubr.bf16.mxu1 %v10897_v54  ;;  %v8060_v48 = vsel %vm12533_vm12, %v8055_v43, %v8059_v61  ;;  %v10898_v58 = vcombine.low %v15417_v16, %v7641_v47  ;;  %v7104_v13 = vrot.slane %v7102_v4, 5  ;;  %v7976_v46 = vld [vmem:[#allocation4 + $0x44] sm:$0x1]  ;;  %v12088_v4 = vld [vmem:[%s16479_s4 + $0x210] sm:$0xff]  }
 0x3bf   : > { %v7108_v31 = vrot.slane %v7106_v14, 4  ;;  %v10930_v41 = vcombine.low %v8050_v45, %v8060_v48  ;;  %v7099_v49 = vor.u32 %v7098_v3, %v7095_v22  ;;  %v7114_v28 = vrot.slane %v7112_v53, 5  ;;  %v7541_v53 = vld [vmem:[#allocation4 + $0x30] sm:$0xe] }
 0x3c0   : > { %v8064_v34 = vrot.slane %v8062_v37, 4  ;;  %v8065_v20 = vshll.u32 %v7971_v1, 16  ;;  %v8071_v57 = vshll.u32 %v7972_v19, 16  ;;  %v8075_v40 = vshrl.u32 %v7972_v19, 16  ;;  %v12083_v1 = vld [vmem:[#allocation4 + $0x24] sm:$0xff]  }
 0x3c1   : > { %v7109_v60 = vor.u32 %v7108_v31, %v7104_v13  ;;  %v7100_v7 = vrot.slane %v7099_v49, 4  ;;  %v8081_v54 = vshll.u32 %v7973_v56, 16  ;;  %v10883_v8 = vrot.slane %v7538_v23, 9  ;;  %v7542_v37 = vld [vmem:[#allocation4 + $0x34] sm:$0xf] }
 0x3c2   : > { %v7644_v0 = vrot.slane %v7539_v21, 5  ;;  %v8067_v10 = vrot.slane %v8065_v20, 5  ;;  %v8073_v33 = vrot.slane %v8071_v57, 5  ;;  %v8077_v27 = vrot.slane %v8075_v40, 4  ;;  %v7543_v31 = vld [vmem:[#allocation4 + $0x38] sm:$0x1] }
 0x3c3   : > { %10006 = vmatmul.mubr.bf16.vlgmr.msra.gmra.mrb[160].mxu0 %v12081_v2  ;;  %v7110_v63 = vrot.slane %v7109_v60, 4  ;;  %v7105_v52 = vsel %vm12533_vm12, %v7100_v7, %v7104_v13  ;;  %v8083_v26 = vrot.slane %v8081_v54, 5  ;;  %v7647_v9 = vrot.slane %v7540_v24, 5  ;;  %v7029_v21 = vld [vmem:[#allocation4 + $0x30] sm:$0xf]  ;;  %v12091_v24 = vld [vmem:[%s16479_s4 + $0x218] sm:$0xff]  }
 0x3c4   : > { %10013 = vmatprep.mubr.bf16.mxu0 %v10930_v41  ;;  %v15428_v50 = vsel %vm12675_vm0, %v10883_v8, %v7644_v0  ;;  %v7646_v25 = vrot.slane %v7644_v0, 4  ;;  %v8068_v61 = vor.u32 %v8067_v10, %v8064_v34  ;;  %v8078_v32 = vor.u32 %v8077_v27, %v8073_v33 }
 0x3c5   : > { %v7115_v44 = vsel %vm12533_vm12, %v7110_v63, %v7114_v28  ;;  %9845 = vmatmul.mubr.bf16.vlgmr.msra.gmra.mrb[128].mxu1 %v15406_v29  ;;  %v7117_v62 = vshrl.u32 %v7026_v30, 16  ;;  %v7120_v15 = vshll.u32 %v7026_v30, 16  ;;  %v7126_v59 = vshll.u32 %v7027_v5, 16 }
 0x3c6   : > { %v10866_v51 = vcombine.low %v7105_v52, %v7115_v44  ;;  %11843 = vmatpush3.bf16.msra.mxu1 %v12105_v6  ;;  %9852 = vmatprep.mubr.bf16.mxu1 %v10898_v58  ;;  %v8069_v17 = vrot.slane %v8068_v61, 4  ;;  %v8079_v45 = vrot.slane %v8078_v32, 4  ;;  %v7648_v16 = vsel %vm12675_vm0, %v7646_v25, %v7647_v9  ;;  %v12084_v32 = vld [vmem:[#allocation4 + $0x30] sm:$0xff]  }
 0x3c7   : > { %v7130_v55 = vshrl.u32 %v7027_v5, 16  ;;  %v10899_v29 = vcombine.low %v15428_v50, %v7648_v16  ;;  %11844 = vmatprep.subr.bf16.mxu1 %v12085_v35  ;;  %v7119_v19 = vrot.slane %v7117_v62, 4  ;;  %v7122_v43 = vrot.slane %v7120_v15, 5  ;;  %v7030_v5 = vld [vmem:[#allocation4 + $0x34] sm:$0xf]  ;;  %v12094_v62 = vld [vmem:[%s16479_s4 + $0x220] sm:$0xff]  }
 0x3c8   : > { %v7128_v22 = vrot.slane %v7126_v59, 5  ;;  %v8074_v14 = vsel %vm12533_vm12, %v8069_v17, %v8073_v33  ;;  %v8084_v56 = vsel %vm12533_vm12, %v8079_v45, %v8083_v26  ;;  %v7136_v3 = vshll.u32 %v7028_v38, 16 }
 0x3c9   : > { %v7132_v47 = vrot.slane %v7130_v55, 4  ;;  %v10931_v23 = vcombine.low %v8074_v14, %v8084_v56  ;;  %v7123_v48 = vor.u32 %v7122_v43, %v7119_v19  ;;  %v8086_v58 = vshrl.u32 %v7974_v39, 16  ;;  %v7544_v14 = vld [vmem:[#allocation4 + $0x3c] sm:$0xe] }
 0x3ca   : > { %v8089_v13 = vshll.u32 %v7974_v39, 16  ;;  %v7138_v49 = vrot.slane %v7136_v3, 5  ;;  %v8095_v28 = vshll.u32 %v7975_v18, 16  ;;  %v8099_v34 = vshrl.u32 %v7975_v18, 16  ;;  %11845 = vmatpush3.bf16.msra.mxu1 %v12085_v35  ;;  %v7031_v35 = vld [vmem:[#allocation4 + $0x38] sm:$0x1] }
 0x3cb   : > { %10014 = vmatmul.mubr.bf16.gmra.mrb[164].mxu0 %v12083_v1  ;;  %v7133_v41 = vor.u32 %v7132_v47, %v7128_v22  ;;  %v7124_v2 = vrot.slane %v7123_v48, 4  ;;  %v8088_v60 = vrot.slane %v8086_v58, 4  ;;  %v8105_v57 = vshll.u32 %v7976_v46, 16  ;;  %11846 = vmatprep.subr.bf16.mxu1 %v12088_v4  ;;  %v7977_v1 = vld [vmem:[#allocation4 + $0x48] sm:$0xf] }
 0x3cc   : > { %10021 = vmatprep.mubr.bf16.mxu0 %v10931_v23  ;;  %v8091_v20 = vrot.slane %v8089_v13, 5  ;;  %v8097_v54 = vrot.slane %v8095_v28, 5  ;;  %v8101_v8 = vrot.slane %v8099_v34, 4  ;;  %v10884_v0 = vrot.slane %v7541_v53, 9  ;;  %v7978_v46 = vld [vmem:[#allocation4 + $0x4c] sm:$0xf] }
 0x3cd   : > { %v15449_v40 = vpop.f32.mrb[96].mxu0  ;;  %v7134_v7 = vrot.slane %v7133_v41, 4  ;;  %9853 = vmatmul.mubr.bf16.gmra.mrb[132].mxu1 %v10866_v51  ;;  %v7129_v63 = vsel %vm12533_vm12, %v7124_v2, %v7128_v22  ;;  %v8107_v33 = vrot.slane %v8105_v57, 5  ;;  %v7651_v27 = vrot.slane %v7542_v37, 5  ;;  %v7545_v37 = vld [vmem:[#allocation4 + $0x40] sm:$0xf] }
 0x3ce   : > { %v15454_v30 = vpop.f32.mrb[97].mxu0  ;;  %v8092_v10 = vor.u32 %v8091_v20, %v8088_v60  ;;  %9860 = vmatprep.mubr.bf16.mxu1 %v10899_v29  ;;  %v8102_v50 = vor.u32 %v8101_v8, %v8097_v54  ;;  %v7654_v25 = vrot.slane %v7543_v31, 5  ;;  %v7141_v44 = vshrl.u32 %v7029_v21, 16  ;;  %11847 = vmatpush3.bf16.msra.mxu1 %v12088_v4  ;;  %v7979_v4 = vld [vmem:[#allocation4 + $0x50] sm:$0x1] }
 0x3cf   : > { %v15458_v52 = vpop.f32.mrb[98].mxu0  ;;  %v7139_v26 = vsel %vm12533_vm12, %v7134_v7, %v7138_v49  ;;  %v7652_v39 = vsel %vm12675_vm0, %v10884_v0, %v7651_v27  ;;  %v7653_v51 = vrot.slane %v7651_v27, 4  ;;  %11848 = vmatprep.subr.bf16.mxu1 %v12091_v24  ;;  %v7144_v18 = vshll.u32 %v7029_v21, 16  ;;  %v12097_v23 = vld [vmem:[%s16479_s4 + $0x228] sm:$0xff]   ;;  %v7546_v21 = vld [vmem:[#allocation4 + $0x44] sm:$0x1] }
 0x3d0   : > { %v15462_v61 = vpop.f32.mrb[99].mxu0  ;;  %v10867_v9 = vcombine.low %v7129_v63, %v7139_v26  ;;  %v8093_v38 = vrot.slane %v8092_v10, 4  ;;  %v8103_v15 = vrot.slane %v8102_v50, 4  ;;  %v7143_v59 = vrot.slane %v7141_v44, 4  ;;  %v7032_v2 = vld [vmem:[#allocation4 + $0x3c] sm:$0xf] }
 0x3d1   : > { %v7150_v6 = vshll.u32 %v7030_v5, 16  ;;  %v7655_v45 = vsel %vm12675_vm0, %v7653_v51, %v7654_v25  ;;  %v7154_v16 = vshrl.u32 %v7030_v5, 16  ;;  %v7160_v55 = vshll.u32 %v7031_v35, 16  ;;  %v12100_v63 = vld [vmem:[%s16479_s4 + $0x230] sm:$0xff]   ;;  %v7033_v26 = vld [vmem:[#allocation4 + $0x40] sm:$0xf] }
 0x3d2   : > { %v8098_v17 = vsel %vm12533_vm12, %v8093_v38, %v8097_v54  ;;  %v8108_v29 = vsel %vm12533_vm12, %v8103_v15, %v8107_v33  ;;  %v10900_v19 = vcombine.low %v7652_v39, %v7655_v45  ;;  %v7146_v43 = vrot.slane %v7144_v18, 5  ;;  %11849 = vmatpush3.bf16.msra.mxu1 %v12091_v24  ;;  %v12086_v10 = vld [vmem:[#allocation4 + $0x3c] sm:$0xff]   ;;  %v7980_v15 = vld [vmem:[#allocation4 + $0x54] sm:$0xf] }
 0x3d3   : > { %10022 = vmatmul.mubr.bf16.gmra.mrb[168].mxu0 %v12084_v32  ;;  %v7152_v22 = vrot.slane %v7150_v6, 5  ;;  %v10932_v56 = vcombine.low %v8098_v17, %v8108_v29  ;;  %v7156_v47 = vrot.slane %v7154_v16, 4  ;;  %v7162_v3 = vrot.slane %v7160_v55, 5  ;;  %11850 = vmatprep.subr.bf16.mxu1 %v12094_v62  ;;  %v7034_v32 = vld [vmem:[#allocation4 + $0x44] sm:$0x1] }
 0x3d4   : > { %v8110_v53 = vshrl.u32 %v7977_v1, 16  ;;  %v7147_v48 = vor.u32 %v7146_v43, %v7143_v59  ;;  %v8113_v58 = vshll.u32 %v7977_v1, 16  ;;  %v8119_v13 = vshll.u32 %v7978_v46, 16  ;;  %v7981_v17 = vld [vmem:[#allocation4 + $0x58] sm:$0xf]  ;;  %v12103_v45 = vld [vmem:[%s16479_s4 + $0x238] sm:$0xff]  }
 0x3d5   : > { %v8123_v31 = vshrl.u32 %v7978_v46, 16  ;;  %9861 = vmatmul.mubr.bf16.gmra.mrb[136].mxu1 %v10867_v9  ;;  %10029 = vmatprep.mubr.bf16.mxu0 %v10932_v56  ;;  %v7157_v41 = vor.u32 %v7156_v47, %v7152_v22  ;;  %v8129_v28 = vshll.u32 %v7979_v4, 16  ;;  %v10885_v34 = vrot.slane %v7544_v14, 9  ;;  %v7547_v56 = vld [vmem:[#allocation4 + $0x48] sm:$0xe] }
 0x3d6   : > { %v8112_v49 = vrot.slane %v8110_v53, 4  ;;  %9868 = vmatprep.mubr.bf16.mxu1 %v10900_v19  ;;  %v7148_v60 = vrot.slane %v7147_v48, 4  ;;  %v8115_v20 = vrot.slane %v8113_v58, 5  ;;  %v8121_v57 = vrot.slane %v8119_v13, 5  ;;  %11851 = vmatpush3.bf16.msra.mxu1 %v12094_v62  ;;  %v7982_v19 = vld [vmem:[#allocation4 + $0x5c] sm:$0x1] }
 0x3d7   : > { %v8125_v24 = vrot.slane %v8123_v31, 4  ;;  %v7158_v7 = vrot.slane %v7157_v41, 4  ;;  %v8131_v54 = vrot.slane %v8129_v28, 5  ;;  %v7658_v8 = vrot.slane %v7545_v37, 5  ;;  %11852 = vmatprep.subr.bf16.mxu1 %v12097_v23  ;;  %v7548_v47 = vld [vmem:[#allocation4 + $0x4c] sm:$0xf] }
 0x3d8   : > { %v7661_v0 = vrot.slane %v7546_v21, 5  ;;  %v7153_v33 = vsel %vm12533_vm12, %v7148_v60, %v7152_v22  ;;  %v8116_v27 = vor.u32 %v8115_v20, %v8112_v49  ;;  %v7165_v50 = vshrl.u32 %v7032_v2, 16  ;;  %v7549_v48 = vld [vmem:[#allocation4 + $0x50] sm:$0x1]  ;;  %v12087_v58 = vld [vmem:[#allocation4 + $0x48] sm:$0xff]  }
 0x3d9   : > { %v8126_v5 = vor.u32 %v8125_v24, %v8121_v57  ;;  %v7163_v25 = vsel %vm12533_vm12, %v7158_v7, %v7162_v3  ;;  %v7659_v35 = vsel %vm12675_vm0, %v10885_v34, %v7658_v8  ;;  %v7660_v44 = vrot.slane %v7658_v8, 4  ;;  %v7035_v49 = vld [vmem:[#allocation4 + $0x48] sm:$0xf]  ;;  %v7036_v20 = vld [vmem:[#allocation4 + $0x4c] sm:$0xf] }
 0x3da   : > { %v7168_v9 = vshll.u32 %v7032_v2, 16  ;;  %v10868_v38 = vcombine.low %v7153_v33, %v7163_v25  ;;  %v8117_v39 = vrot.slane %v8116_v27, 4  ;;  %v7167_v62 = vrot.slane %v7165_v50, 4  ;;  %11853 = vmatpush3.bf16.msra.mxu1 %v12097_v23  ;;  %v7983_v25 = vld [vmem:[#allocation4 + $0x60] sm:$0xf] }
 0x3db   : > { %10030 = vmatmul.mubr.bf16.gmra.mrb[172].mxu0 %v12086_v10  ;;  %v8127_v51 = vrot.slane %v8126_v5, 4  ;;  %v7662_v59 = vsel %vm12675_vm0, %v7660_v44, %v7661_v0  ;;  %v7174_v6 = vshll.u32 %v7033_v26, 16  ;;  %v7178_v1 = vshrl.u32 %v7033_v26, 16  ;;  %11854 = vmatprep.subr.bf16.mxu1 %v12100_v63  ;;  %v7037_v5 = vld [vmem:[#allocation4 + $0x50] sm:$0x1] }
 0x3dc   : > { %v7170_v18 = vrot.slane %v7168_v9, 5  ;;  %v8122_v16 = vsel %vm12533_vm12, %v8117_v39, %v8121_v57  ;;  %v10901_v46 = vcombine.low %v7659_v35, %v7662_v59  ;;  %v7184_v29 = vshll.u32 %v7034_v32, 16 }
 0x3dd   : > { %v8132_v55 = vsel %vm12533_vm12, %v8127_v51, %v8131_v54  ;;  %9869 = vmatmul.mubr.bf16.gmra.mrb[140].mxu1 %v10868_v38  ;;  %v7176_v4 = vrot.slane %v7174_v6, 5  ;;  %v7180_v14 = vrot.slane %v7178_v1, 4  ;;  %v8134_v53 = vshrl.u32 %v7980_v15, 16  ;;  %v7984_v38 = vld [vmem:[#allocation4 + $0x64] sm:$0xf] }
 0x3de   : > { %v10933_v43 = vcombine.low %v8122_v16, %v8132_v55  ;;  %v7171_v22 = vor.u32 %v7170_v18, %v7167_v62  ;;  %9876 = vmatprep.mubr.bf16.mxu1 %v10901_v46  ;;  %v7186_v3 = vrot.slane %v7184_v29, 5  ;;  %v8137_v37 = vshll.u32 %v7980_v15, 16  ;;  %11855 = vmatpush3.bf16.msra.mxu1 %v12100_v63  ;;  %v7985_v46 = vld [vmem:[#allocation4 + $0x68] sm:$0x1] }
 0x3df   : > { %v8143_v23 = vshll.u32 %v7981_v17, 16  ;;  %v7181_v31 = vor.u32 %v7180_v14, %v7176_v4  ;;  %v8147_v21 = vshrl.u32 %v7981_v17, 16  ;;  %v8153_v41 = vshll.u32 %v7982_v19, 16  ;;  %11856 = vmatprep.subr.bf16.mxu1 %v12103_v45 }
 0x3e0   : > { %10037 = vmatprep.mubr.bf16.mxu0 %v10933_v43  ;;  %v7172_v13 = vrot.slane %v7171_v22, 4  ;;  %v8136_v28 = vrot.slane %v8134_v53, 4  ;;  %v8139_v34 = vrot.slane %v8137_v37, 5  ;;  %v10886_v60 = vrot.slane %v7547_v56, 9  ;;  %v7550_v56 = vld [vmem:[#allocation4 + $0x54] sm:$0xe] }
 0x3e1   : > { %v8145_v2 = vrot.slane %v8143_v23, 5  ;;  %v7182_v24 = vrot.slane %v7181_v31, 4  ;;  %v8149_v7 = vrot.slane %v8147_v21, 4  ;;  %v8155_v54 = vrot.slane %v8153_v41, 5  ;;  %v12089_v37 = vld [vmem:[#allocation4 + $0x54] sm:$0xff]  }
 0x3e2   : > { %v7177_v57 = vsel %vm12533_vm12, %v7172_v13, %v7176_v4  ;;  %v8140_v8 = vor.u32 %v8139_v34, %v8136_v28  ;;  %v7665_v0 = vrot.slane %v7548_v47, 5  ;;  %v7668_v63 = vrot.slane %v7549_v48, 5  ;;  %11857 = vmatpush3.bf16.msra.mxu1 %v12103_v45  ;;  %v7551_v13 = vld [vmem:[#allocation4 + $0x58] sm:$0xf]  ;;  %v7552_v28 = vld [vmem:[#allocation4 + $0x5c] sm:$0x1] }
 0x3e3   : > { %10038 = vmatmul.mubr.bf16.gmra.mrb[176].mxu0 %v12087_v58  ;;  %v7189_v10 = vshrl.u32 %v7035_v49, 16  ;;  %v7187_v33 = vsel %vm12533_vm12, %v7182_v24, %v7186_v3  ;;  %v8150_v27 = vor.u32 %v8149_v7, %v8145_v2  ;;  %v7192_v26 = vshll.u32 %v7035_v49, 16 }
 0x3e4   : > { %v7198_v50 = vshll.u32 %v7036_v20, 16  ;;  %v10869_v35 = vcombine.low %v7177_v57, %v7187_v33  ;;  %v8141_v44 = vrot.slane %v8140_v8, 4  ;;  %v7666_v32 = vsel %vm12675_vm0, %v10886_v60, %v7665_v0  ;;  %v15504_v51 = vpop.f32.mrb[68].mxu1  ;;  %v7038_v8 = vld [vmem:[#allocation4 + $0x54] sm:$0xf] }
 0x3e5   : > { %v7667_v9 = vrot.slane %v7665_v0, 4  ;;  %v15502_v39 = vpop.f32.mrb[100].mxu0  ;;  %v8151_v62 = vrot.slane %v8150_v27, 4  ;;  %v7191_v15 = vrot.slane %v7189_v10, 4  ;;  %v7194_v59 = vrot.slane %v7192_v26, 5  ;;  %v15508_v1 = vpop.f32.mrb[69].mxu1 }
 0x3e6   : > { %v7200_v18 = vrot.slane %v7198_v50, 5  ;;  %v15506_v6 = vpop.f32.mrb[101].mxu0  ;;  %9877 = vmatmul.mubr.bf16.gmra.mrb[144].mxu1 %v10869_v35  ;;  %v8146_v17 = vsel %vm12533_vm12, %v8141_v44, %v8145_v2  ;;  %v7202_v16 = vshrl.u32 %v7036_v20, 16  ;;  %v7208_v55 = vshll.u32 %v7037_v5, 16  ;;  %v15516_v19 = vpop.f32.mrb[70].mxu1 }
 0x3e7   : > { %v7669_v45 = vsel %vm12675_vm0, %v7667_v9, %v7668_v63  ;;  %v15514_v29 = vpop.f32.mrb[102].mxu0  ;;  %v8156_v43 = vsel %vm12533_vm12, %v8151_v62, %v8155_v54  ;;  %v7195_v4 = vor.u32 %v7194_v59, %v7191_v15  ;;  %v8158_v14 = vshrl.u32 %v7983_v25, 16  ;;  %v15522_v3 = vpop.f32.mrb[71].mxu1  ;;  %v7039_v27 = vld [vmem:[#allocation4 + $0x58] sm:$0xf] }
 0x3e8   : > { %v10902_v22 = vcombine.low %v7666_v32, %v7669_v45  ;;  %v15520_v47 = vpop.f32.mrb[103].mxu0  ;;  %v10934_v53 = vcombine.low %v8146_v17, %v8156_v43  ;;  %v7204_v23 = vrot.slane %v7202_v16, 4  ;;  %v7210_v48 = vrot.slane %v7208_v55, 5  ;;  %v7040_v32 = vld [vmem:[#allocation4 + $0x5c] sm:$0x1] }
 0x3e9   : > { %v8161_v58 = vshll.u32 %v7983_v25, 16  ;;  %v7196_v31 = vrot.slane %v7195_v4, 4  ;;  %v8160_v21 = vrot.slane %v8158_v14, 4  ;;  %v8167_v41 = vshll.u32 %v7984_v38, 16  ;;  %v7986_v17 = vld [vmem:[#allocation4 + $0x6c] sm:$0xf] }
 0x3ea   : > { %9884 = vmatprep.mubr.bf16.mxu1 %v10902_v22  ;;  %v8171_v49 = vshrl.u32 %v7984_v38, 16  ;;  %10045 = vmatprep.mubr.bf16.mxu0 %v10934_v53  ;;  %v7205_v34 = vor.u32 %v7204_v23, %v7200_v18  ;;  %v8177_v60 = vshll.u32 %v7985_v46, 16  ;;  %v10887_v20 = vrot.slane %v7550_v56, 9  ;;  %v7987_v55 = vld [vmem:[#allocation4 + $0x70] sm:$0xf] }
 0x3eb   : > { %v8163_v2 = vrot.slane %v8161_v58, 5  ;;  %10046 = vmatmul.mubr.bf16.gmra.mrb[180].mxu0 %v12089_v37  ;;  %v7201_v57 = vsel %vm12533_vm12, %v7196_v31, %v7200_v18  ;;  %v8169_v24 = vrot.slane %v8167_v41, 5  ;;  %v7672_v54 = vrot.slane %v7551_v13, 5  ;;  %v7988_v46 = vld [vmem:[#allocation4 + $0x74] sm:$0x1]  ;;  %v12090_v31 = vld [vmem:[#allocation4 + $0x60] sm:$0xff]  }
 0x3ec   : > { %v8173_v7 = vrot.slane %v8171_v49, 4  ;;  %v7206_v0 = vrot.slane %v7205_v34, 4  ;;  %v8179_v10 = vrot.slane %v8177_v60, 5  ;;  %v7675_v33 = vrot.slane %v7552_v28, 5  ;;  %v7553_v56 = vld [vmem:[#allocation4 + $0x60] sm:$0xe] }
 0x3ed   : > { %v8164_v63 = vor.u32 %v8163_v2, %v8160_v21  ;;  %v7673_v26 = vsel %vm12675_vm0, %v10887_v20, %v7672_v54  ;;  %v7674_v50 = vrot.slane %v7672_v54, 4  ;;  %v15530_v25 = vadd.f32 %v15454_v30, %v15449_v40  ;;  %v7554_v58 = vld [vmem:[#allocation4 + $0x64] sm:$0xf]  ;;  %v7555_v28 = vld [vmem:[#allocation4 + $0x68] sm:$0x1] }
 0x3ee   : > { %v8174_v5 = vor.u32 %v8173_v7, %v8169_v24  ;;  %v7211_v35 = vsel %vm12533_vm12, %v7206_v0, %v7210_v48  ;;  %v7213_v9 = vshrl.u32 %v7038_v8, 16  ;;  %v7216_v38 = vshll.u32 %v7038_v8, 16 }
 0x3ef   : > { %v8165_v44 = vrot.slane %v8164_v63, 4  ;;  %v10870_v62 = vcombine.low %v7201_v57, %v7211_v35  ;;  %v7676_v59 = vsel %vm12675_vm0, %v7674_v50, %v7675_v33  ;;  %v7222_v18 = vshll.u32 %v7039_v27, 16 }
 0x3f0   : > { %v8175_v15 = vrot.slane %v8174_v5, 4  ;;  %v10903_v16 = vcombine.low %v7673_v26, %v7676_v59  ;;  %v7215_v40 = vrot.slane %v7213_v9, 4  ;;  %v7218_v30 = vrot.slane %v7216_v38, 5 }
 0x3f1   : > { %v8170_v45 = vsel %vm12533_vm12, %v8165_v44, %v8169_v24  ;;  %9885 = vmatmul.mubr.bf16.gmra.mrb[148].mxu1 %v10870_v62  ;;  %v7224_v22 = vrot.slane %v7222_v18, 5  ;;  %v7226_v4 = vshrl.u32 %v7039_v27, 16  ;;  %v7232_v14 = vshll.u32 %v7040_v32, 16 }
 0x3f2   : > { %v8180_v43 = vsel %vm12533_vm12, %v8175_v15, %v8179_v10  ;;  %9892 = vmatprep.mubr.bf16.mxu1 %v10903_v16  ;;  %v7219_v37 = vor.u32 %v7218_v30, %v7215_v40  ;;  %v8182_v23 = vshrl.u32 %v7986_v17, 16  ;;  %v8185_v48 = vshll.u32 %v7986_v17, 16 }
 0x3f3   : > { %v10935_v53 = vcombine.low %v8170_v45, %v8180_v43  ;;  %v15540_v13 = vpop.f32.mrb[72].mxu1  ;;  %v7228_v21 = vrot.slane %v7226_v4, 4  ;;  %v8191_v41 = vshll.u32 %v7987_v55, 16  ;;  %v8195_v49 = vshrl.u32 %v7987_v55, 16  ;;  %v15542_v34 = vpop.f32.mrb[104].mxu0 }
 0x3f4   : > { %v15544_v2 = vpop.f32.mrb[73].mxu1  ;;  %v7220_v60 = vrot.slane %v7219_v37, 4  ;;  %v8184_v20 = vrot.slane %v8182_v23, 4  ;;  %v8187_v57 = vrot.slane %v8185_v48, 5  ;;  %v8201_v24 = vshll.u32 %v7988_v46, 16  ;;  %v15546_v7 = vpop.f32.mrb[105].mxu0 }
 0x3f5   : > { %10053 = vmatprep.mubr.bf16.mxu0 %v10935_v53  ;;  %v15548_v54 = vpop.f32.mrb[74].mxu1  ;;  %v7229_v8 = vor.u32 %v7228_v21, %v7224_v22  ;;  %v7234_v0 = vrot.slane %v7232_v14, 5  ;;  %v8193_v63 = vrot.slane %v8191_v41, 5  ;;  %v8197_v10 = vrot.slane %v8195_v49, 4  ;;  %v15550_v33 = vpop.f32.mrb[106].mxu0 }
 0x3f6   : > { %10054 = vmatmul.mubr.bf16.gmra.mrb[184].mxu0 %v12090_v31  ;;  %v15552_v27 = vpop.f32.mrb[75].mxu1  ;;  %v7225_v5 = vsel %vm12533_vm12, %v7220_v60, %v7224_v22  ;;  %v8188_v26 = vor.u32 %v8187_v57, %v8184_v20  ;;  %v10888_v50 = vrot.slane %v7553_v56, 9  ;;  %v7679_v35 = vrot.slane %v7554_v58, 5  ;;  %v15556_v44 = vpop.f32.mrb[107].mxu0  ;;  %v7041_v45 = vld [vmem:[#allocation4 + $0x60] sm:$0xf] }
 0x3f7   : > { %v7230_v32 = vrot.slane %v7229_v8, 4  ;;  %v8198_v9 = vor.u32 %v8197_v10, %v8193_v63  ;;  %v8203_v38 = vrot.slane %v8201_v24, 5  ;;  %v15560_v62 = vadd.f32 %v15462_v61, %v15458_v52  ;;  %v7042_v61 = vld [vmem:[#allocation4 + $0x64] sm:$0xf]  ;;  %v7043_v43 = vld [vmem:[#allocation4 + $0x68] sm:$0x1] }
 0x3f8   : > { %v8189_v15 = vrot.slane %v8188_v26, 4  ;;  %v7681_v59 = vrot.slane %v7679_v35, 4  ;;  %v7682_v18 = vrot.slane %v7555_v28, 5  ;;  %v15564_v17 = vadd.f32 %v15506_v6, %v15502_v39  ;;  %v7989_v22 = vld [vmem:[#allocation4 + $0x78] sm:$0xf] }
 0x3f9   : > { %v7235_v16 = vsel %vm12533_vm12, %v7230_v32, %v7234_v0  ;;  %v8199_v40 = vrot.slane %v8198_v9, 4  ;;  %v15570_v30 = vadd.f32 %v15508_v1, %v15504_v51  ;;  %v15574_v52 = vadd.f32 %v15520_v47, %v15514_v29  ;;  %v12092_v47 = vld [vmem:[#allocation4 + $0x6c] sm:$0xff]   ;;  %v7990_v14 = vld [vmem:[#allocation4 + $0x7c] sm:$0xf]  ;;  %v7991_v23 = vld [vmem:[#allocation4 + $0x80] sm:$0x1] }
 0x3fa   : > { %v10871_v55 = vcombine.low %v7225_v5, %v7235_v16  ;;  %v7680_v46 = vsel %vm12675_vm0, %v10888_v50, %v7679_v35  ;;  %v7683_v39 = vsel %vm12675_vm0, %v7681_v59, %v7682_v18  ;;  %v15582_v6 = vadd.f32 %v15522_v3, %v15516_v19  ;;  %v7556_v48 = vld [vmem:[#allocation4 + $0x6c] sm:$0xe]  ;;  %v7557_v21 = vld [vmem:[#allocation4 + $0x70] sm:$0xf]  ;;  %v7558_v20 = vld [vmem:[#allocation4 + $0x74] sm:$0x1] }
 0x3fb   : > { %v8194_v51 = vsel %vm12533_vm12, %v8189_v15, %v8193_v63  ;;  %v8204_v1 = vsel %vm12533_vm12, %v8199_v40, %v8203_v38  ;;  %v10904_v29 = vcombine.low %v7680_v46, %v7683_v39  ;;  %v7237_v4 = vshrl.u32 %v7041_v45, 16 }
 0x3fc   : > { %9893 = vmatmul.mubr.bf16.gmra.mrb[152].mxu1 %v10871_v55  ;;  %v10936_v56 = vcombine.low %v8194_v51, %v8204_v1  ;;  %v7240_v53 = vshll.u32 %v7041_v45, 16  ;;  %v7246_v37 = vshll.u32 %v7042_v61, 16  ;;  %v7250_v3 = vshrl.u32 %v7042_v61, 16 }
 0x3fd   : > { %9900 = vmatprep.mubr.bf16.mxu1 %v10904_v29  ;;  %v7239_v19 = vrot.slane %v7237_v4, 4  ;;  %v7256_v58 = vshll.u32 %v7043_v43, 16  ;;  %v8206_v31 = vshrl.u32 %v7989_v22, 16  ;;  %v8209_v28 = vshll.u32 %v7989_v22, 16 }
 0x3fe   : > { %10061 = vmatprep.mubr.bf16.mxu0 %v10936_v56  ;;  %v7242_v41 = vrot.slane %v7240_v53, 5  ;;  %v7248_v49 = vrot.slane %v7246_v37, 5  ;;  %v8215_v60 = vshll.u32 %v7990_v14, 16  ;;  %v7252_v57 = vrot.slane %v7250_v3, 4  ;;  %v7044_v56 = vld [vmem:[#allocation4 + $0x6c] sm:$0xf] }
 0x3ff   : > { %10062 = vmatmul.mubr.bf16.gmra.mrb[188].mxu0 %v12092_v47  ;;  %v7258_v24 = vrot.slane %v7256_v58, 5  ;;  %v8208_v8 = vrot.slane %v8206_v31, 4  ;;  %v8219_v0 = vshrl.u32 %v7990_v14, 16  ;;  %v8211_v5 = vrot.slane %v8209_v28, 5  ;;  %v7992_v58 = vld [vmem:[#allocation4 + $0x84] sm:$0xf] }
 0x400   : > { %v15588_v63 = vpop.f32.mrb[76].mxu1  ;;  %v7243_v10 = vor.u32 %v7242_v41, %v7239_v19  ;;  %v8217_v26 = vrot.slane %v8215_v60, 5  ;;  %v8225_v50 = vshll.u32 %v7991_v23, 16  ;;  %v7253_v32 = vor.u32 %v7252_v57, %v7248_v49  ;;  %v7993_v28 = vld [vmem:[#allocation4 + $0x88] sm:$0xf] }
 0x401   : > { %v15590_v35 = vpop.f32.mrb[77].mxu1  ;;  %v8221_v9 = vrot.slane %v8219_v0, 4  ;;  %v10889_v38 = vrot.slane %v7556_v48, 9  ;;  %v7686_v15 = vrot.slane %v7557_v21, 5  ;;  %v8212_v16 = vor.u32 %v8211_v5, %v8208_v8  ;;  %v12093_v8 = vld [vmem:[#allocation4 + $0x78] sm:$0xff]  }
 0x402   : > { %v15592_v59 = vpop.f32.mrb[108].mxu0  ;;  %v15594_v18 = vpop.f32.mrb[78].mxu1  ;;  %v7244_v45 = vrot.slane %v7243_v10, 4  ;;  %v8227_v40 = vrot.slane %v8225_v50, 5  ;;  %v7689_v61 = vrot.slane %v7558_v20, 5  ;;  %v7254_v39 = vrot.slane %v7253_v32, 4 }
 0x403   : > { %v15596_v55 = vpop.f32.mrb[109].mxu0  ;;  %v15598_v46 = vpop.f32.mrb[79].mxu1  ;;  %v8222_v43 = vor.u32 %v8221_v9, %v8217_v26  ;;  %v7687_v22 = vsel %vm12675_vm0, %v10889_v38, %v7686_v15  ;;  %v7688_v51 = vrot.slane %v7686_v15, 4  ;;  %v8213_v47 = vrot.slane %v8212_v16, 4 }
 0x404   : > { %v15602_v1 = vpop.f32.mrb[110].mxu0  ;;  %v7249_v29 = vsel %vm12533_vm12, %v7244_v45, %v7248_v49  ;;  %v15608_v4 = vadd.f32 %v15546_v7, %v15542_v34  ;;  %v15612_v14 = vadd.f32 %v15544_v2, %v15540_v13  ;;  %v7259_v37 = vsel %vm12533_vm12, %v7254_v39, %v7258_v24  ;;  %v7045_v34 = vld [vmem:[#allocation4 + $0x70] sm:$0xf]  ;;  %v7046_v7 = vld [vmem:[#allocation4 + $0x74] sm:$0x1] }
 0x405   : > { %v15614_v53 = vpop.f32.mrb[111].mxu0  ;;  %v8223_v23 = vrot.slane %v8222_v43, 4  ;;  %v7690_v48 = vsel %vm12675_vm0, %v7688_v51, %v7689_v61  ;;  %v15622_v19 = vadd.f32 %v15556_v44, %v15550_v33  ;;  %v10872_v3 = vcombine.low %v7249_v29, %v7259_v37  ;;  %v7994_v33 = vld [vmem:[#allocation4 + $0x8c] sm:$0x1]  ;;  %v7559_v24 = vld [vmem:[#allocation4 + $0x78] sm:$0xe] }
 0x406   : > { %v8218_v13 = vsel %vm12533_vm12, %v8213_v47, %v8217_v26  ;;  %v10905_v2 = vcombine.low %v7687_v22, %v7690_v48  ;;  %v15630_v21 = vadd.f32 %v15552_v27, %v15548_v54  ;;  %v7261_v41 = vshrl.u32 %v7044_v56, 16  ;;  %v7560_v26 = vld [vmem:[#allocation4 + $0x7c] sm:$0xf] }
 0x407   : > { %16670 = vst [vmem:[#allocation12_spill] sm:$0xff] %v15622_v19  ;;  %v8228_v31 = vsel %vm12533_vm12, %v8223_v23, %v8227_v40  ;;  %v7264_v49 = vshll.u32 %v7044_v56, 16  ;;  %9901 = vmatmul.mubr.bf16.gmra.mrb[156].mxu1 %v10872_v3  ;;  %v7270_v60 = vshll.u32 %v7045_v34, 16  ;;  %v7274_v20 = vshrl.u32 %v7045_v34, 16  ;;  %v7561_v40 = vld [vmem:[#allocation4 + $0x80] sm:$0x1] }
 0x408   : > { %v10937_v44 = vcombine.low %v8218_v13, %v8228_v31  ;;  %v7280_v57 = vshll.u32 %v7046_v7, 16  ;;  %9908 = vmatprep.mubr.bf16.mxu1 %v10905_v2  ;;  %v7263_v0 = vrot.slane %v7261_v41, 4  ;;  %v8230_v5 = vshrl.u32 %v7992_v58, 16 }
 0x409   : > { %v7266_v10 = vrot.slane %v7264_v49, 5  ;;  %v7272_v50 = vrot.slane %v7270_v60, 5  ;;  %v7276_v54 = vrot.slane %v7274_v20, 4  ;;  %v8233_v32 = vshll.u32 %v7992_v58, 16 }
 0x40a   : > { %10069 = vmatprep.mubr.bf16.mxu0 %v10937_v44  ;;  %v7282_v27 = vrot.slane %v7280_v57, 5  ;;  %v8232_v15 = vrot.slane %v8230_v5, 4  ;;  %v8239_v45 = vshll.u32 %v7993_v28, 16  ;;  %v8243_v16 = vshrl.u32 %v7993_v28, 16 }
 0x40b   : > { %v15632_v9 = vpop.f32.mrb[112].mxu0  ;;  %10070 = vmatmul.mubr.bf16.gmra.mrb[192].mxu0 %v12093_v8  ;;  %v7267_v38 = vor.u32 %v7266_v10, %v7263_v0  ;;  %v7277_v39 = vor.u32 %v7276_v54, %v7272_v50  ;;  %v8235_v43 = vrot.slane %v8233_v32, 5  ;;  %v8249_v22 = vshll.u32 %v7994_v33, 16  ;;  %v7048_v8 = vld [vmem:[#allocation4 + $0x7c] sm:$0xf] }
 0x40c   : > { %v15634_v61 = vpop.f32.mrb[113].mxu0  ;;  %v10890_v51 = vrot.slane %v7559_v24, 9  ;;  %v8241_v56 = vrot.slane %v8239_v45, 5  ;;  %v8245_v37 = vrot.slane %v8243_v16, 4  ;;  %v7693_v23 = vrot.slane %v7560_v26, 5 }
 0x40d   : > { %v15636_v29 = vpop.f32.mrb[114].mxu0  ;;  %v7268_v47 = vrot.slane %v7267_v38, 4  ;;  %v7278_v7 = vrot.slane %v7277_v39, 4  ;;  %v8236_v3 = vor.u32 %v8235_v43, %v8232_v15  ;;  %v8251_v13 = vrot.slane %v8249_v22, 5  ;;  %v7047_v24 = vld [vmem:[#allocation4 + $0x78] sm:$0xf] }
 0x40e   : > { %v15638_v48 = vpop.f32.mrb[80].mxu1  ;;  %v15640_v34 = vpop.f32.mrb[115].mxu0  ;;  %v7696_v2 = vrot.slane %v7561_v40, 5  ;;  %v8246_v41 = vor.u32 %v8245_v37, %v8241_v56  ;;  %v7694_v49 = vsel %vm12675_vm0, %v10890_v51, %v7693_v23  ;;  %v7695_v28 = vrot.slane %v7693_v23, 4  ;;  %v7049_v54 = vld [vmem:[#allocation4 + $0x80] sm:$0x1] }
 0x40f   : > { %v15642_v58 = vpop.f32.mrb[81].mxu1  ;;  %v7273_v31 = vsel %vm12533_vm12, %v7268_v47, %v7272_v50  ;;  %v7283_v44 = vsel %vm12533_vm12, %v7278_v7, %v7282_v27  ;;  %v8237_v60 = vrot.slane %v8236_v3, 4  ;;  %v15654_v20 = vadd.f32 %v15596_v55, %v15592_v59  ;;  %v7996_v45 = vld [vmem:[#allocation4 + $0x94] sm:$0xf]  ;;  %v7997_v39 = vld [vmem:[#allocation4 + $0x98] sm:$0x1] }
 0x410   : > { %v15648_v33 = vpop.f32.mrb[82].mxu1  ;;  %v15658_v57 = vadd.f32 %v15590_v35, %v15588_v63  ;;  %v10873_v10 = vcombine.low %v7273_v31, %v7283_v44  ;;  %v8247_v5 = vrot.slane %v8246_v41, 4  ;;  %v7697_v26 = vsel %vm12675_vm0, %v7695_v28, %v7696_v2  ;;  %v7995_v35 = vld [vmem:[#allocation4 + $0x90] sm:$0xf]  ;;  %v7563_v7 = vld [vmem:[#allocation4 + $0x88] sm:$0xf] }
 0x411   : > { %16671 = vst [vmem:[#allocation13_spill] sm:$0xff] %v15654_v20  ;;  %v15660_v0 = vpop.f32.mrb[83].mxu1  ;;  %v15666_v50 = vadd.f32 %v15614_v53, %v15602_v1  ;;  %v8242_v59 = vsel %vm12533_vm12, %v8237_v60, %v8241_v56  ;;  %v10906_v55 = vcombine.low %v7694_v49, %v7697_v26  ;;  %v15672_v63 = vadd.f32 %v15598_v46, %v15594_v18  ;;  %v12095_v53 = vld [vmem:[#allocation4 + $0x84] sm:$0xff]   ;;  %v7564_v41 = vld [vmem:[#allocation4 + $0x8c] sm:$0x1] }
 0x412   : > { %9909 = vmatmul.mubr.bf16.gmra.mrb[160].mxu1 %v10873_v10  ;;  %v8252_v27 = vsel %vm12533_vm12, %v8247_v5, %v8251_v13  ;;  %v7285_v32 = vshrl.u32 %v7047_v24, 16  ;;  %v7288_v38 = vshll.u32 %v7047_v24, 16  ;;  %v7294_v15 = vshll.u32 %v7048_v8, 16  ;;  %v7562_v46 = vld [vmem:[#allocation4 + $0x84] sm:$0xe] }
 0x413   : > { %16672 = vst [vmem:[#allocation17_spill] sm:$0xff] %v15666_v50  ;;  %v10938_v1 = vcombine.low %v8242_v59, %v8252_v27  ;;  %9916 = vmatprep.mubr.bf16.mxu1 %v10906_v55  ;;  %v7298_v16 = vshrl.u32 %v7048_v8, 16  ;;  %v7304_v40 = vshll.u32 %v7049_v54, 16  ;;  %v8254_v18 = vshrl.u32 %v7995_v35, 16 }
 0x414   : > { %v7287_v43 = vrot.slane %v7285_v32, 4  ;;  %v7290_v22 = vrot.slane %v7288_v38, 5  ;;  %v7296_v51 = vrot.slane %v7294_v15, 5  ;;  %v8257_v37 = vshll.u32 %v7995_v35, 16 }
 0x415   : > { %10077 = vmatprep.mubr.bf16.mxu0 %v10938_v1  ;;  %v7300_v47 = vrot.slane %v7298_v16, 4  ;;  %v7306_v56 = vrot.slane %v7304_v40, 5  ;;  %v8263_v23 = vshll.u32 %v7996_v45, 16  ;;  %v8256_v13 = vrot.slane %v8254_v18, 4  ;;  %v7050_v1 = vld [vmem:[#allocation4 + $0x84] sm:$0xf] }
 0x416   : > { %10078 = vmatmul.mubr.bf16.gmra.mrb[196].mxu0 %v12095_v53  ;;  %v7291_v3 = vor.u32 %v7290_v22, %v7287_v43  ;;  %v8267_v2 = vshrl.u32 %v7996_v45, 16  ;;  %v8273_v31 = vshll.u32 %v7997_v39, 16  ;;  %v8259_v28 = vrot.slane %v8257_v37, 5  ;;  %v7051_v43 = vld [vmem:[#allocation4 + $0x88] sm:$0xf] }
 0x417   : > { %v7301_v49 = vor.u32 %v7300_v47, %v7296_v51  ;;  %v8265_v44 = vrot.slane %v8263_v23, 5  ;;  %v10891_v60 = vrot.slane %v7562_v46, 9  ;;  %v7700_v5 = vrot.slane %v7563_v7, 5  ;;  %v7052_v37 = vld [vmem:[#allocation4 + $0x8c] sm:$0x1] }
 0x418   : > { %v7292_v24 = vrot.slane %v7291_v3, 4  ;;  %v8269_v8 = vrot.slane %v8267_v2, 4  ;;  %v8275_v10 = vrot.slane %v8273_v31, 5  ;;  %v8260_v59 = vor.u32 %v8259_v28, %v8256_v13  ;;  %v7998_v7 = vld [vmem:[#allocation4 + $0x9c] sm:$0xf] }
 0x419   : > { %v7302_v54 = vrot.slane %v7301_v49, 4  ;;  %v7703_v55 = vrot.slane %v7564_v41, 5  ;;  %v15680_v35 = vadd.f32 %v15634_v61, %v15632_v9  ;;  %v7701_v15 = vsel %vm12675_vm0, %v10891_v60, %v7700_v5  ;;  %v7999_v31 = vld [vmem:[#allocation4 + $0xa0] sm:$0xf]  ;;  %v8000_v60 = vld [vmem:[#allocation4 + $0xa4] sm:$0x1] }
 0x41a   : > { %v15676_v26 = vpop.f32.mrb[84].mxu1  ;;  %v7297_v32 = vsel %vm12533_vm12, %v7292_v24, %v7296_v51  ;;  %v8270_v38 = vor.u32 %v8269_v8, %v8265_v44  ;;  %v7702_v45 = vrot.slane %v7700_v5, 4  ;;  %v8261_v39 = vrot.slane %v8260_v59, 4  ;;  %v7565_v59 = vld [vmem:[#allocation4 + $0x90] sm:$0xe] }
 0x41b   : > { %16673 = vst [vmem:[#allocation10_spill] sm:$0xff] %v15680_v35  ;;  %v15682_v27 = vpop.f32.mrb[85].mxu1  ;;  %v7307_v40 = vsel %vm12533_vm12, %v7302_v54, %v7306_v56  ;;  %v15694_v9 = vadd.f32 %v15642_v58, %v15638_v48  ;;  %v15698_v61 = vadd.f32 %v15640_v34, %v15636_v29  ;;  %v15706_v56 = vadd.f32 %v15660_v0, %v15648_v33  ;;  %v12096_v33 = vld [vmem:[#allocation4 + $0x90] sm:$0xff]  }
 0x41c   : > { %v11488_v53 = vpop.f32.mrb[116].mxu0  ;;  %v15688_v16 = vpop.f32.mrb[86].mxu1  ;;  %v10874_v18 = vcombine.low %v7297_v32, %v7307_v40  ;;  %v8271_v46 = vrot.slane %v8270_v38, 4  ;;  %v7704_v47 = vsel %vm12675_vm0, %v7702_v45, %v7703_v55  ;;  %v7309_v23 = vshrl.u32 %v7050_v1, 16 }
 0x41d   : > { %16674 = vst [vmem:[#allocation18_spill] sm:$0xff] %v15698_v61  ;;  %v11489_v22 = vpop.f32.mrb[117].mxu0  ;;  %v15700_v51 = vpop.f32.mrb[87].mxu1  ;;  %v10907_v58 = vcombine.low %v7701_v15, %v7704_v47  ;;  %v8266_v34 = vsel %vm12533_vm12, %v8261_v39, %v8265_v44  ;;  %v7312_v13 = vshll.u32 %v7050_v1, 16  ;;  %v7318_v2 = vshll.u32 %v7051_v43, 16 }
 0x41e   : > { %v11491_v48 = vpop.f32.mrb[118].mxu0  ;;  %9917 = vmatmul.mubr.bf16.gmra.mrb[164].mxu1 %v10874_v18  ;;  %v8276_v3 = vsel %vm12533_vm12, %v8271_v46, %v8275_v10  ;;  %v7311_v0 = vrot.slane %v7309_v23, 4  ;;  %v7322_v49 = vshrl.u32 %v7051_v43, 16  ;;  %v7328_v28 = vshll.u32 %v7052_v37, 16  ;;  %v7566_v10 = vld [vmem:[#allocation4 + $0x94] sm:$0xf] }
 0x41f   : > { %v11492_v29 = vpop.f32.mrb[119].mxu0  ;;  %v10939_v41 = vcombine.low %v8266_v34, %v8276_v3  ;;  %9924 = vmatprep.mubr.bf16.mxu1 %v10907_v58  ;;  %v7314_v24 = vrot.slane %v7312_v13, 5  ;;  %v7320_v8 = vrot.slane %v7318_v2, 5  ;;  %v8278_v5 = vshrl.u32 %v7998_v7, 16  ;;  %v7567_v46 = vld [vmem:[#allocation4 + $0x98] sm:$0x1] }
 0x420   : > { %v8281_v54 = vshll.u32 %v7998_v7, 16  ;;  %v7324_v44 = vrot.slane %v7322_v49, 4  ;;  %v8287_v55 = vshll.u32 %v7999_v31, 16  ;;  %v8291_v32 = vshrl.u32 %v7999_v31, 16  ;;  %v7053_v2 = vld [vmem:[#allocation4 + $0x90] sm:$0xf] }
 0x421   : > { %10085 = vmatprep.mubr.bf16.mxu0 %v10939_v41  ;;  %v7315_v38 = vor.u32 %v7314_v24, %v7311_v0  ;;  %v8280_v15 = vrot.slane %v8278_v5, 4  ;;  %v8297_v1 = vshll.u32 %v8000_v60, 16  ;;  %v7330_v39 = vrot.slane %v7328_v28, 5 }
 0x422   : > { %10086 = vmatmul.mubr.bf16.gmra.mrb[200].mxu0 %v12096_v33  ;;  %v8283_v45 = vrot.slane %v8281_v54, 5  ;;  %v7325_v40 = vor.u32 %v7324_v44, %v7320_v8  ;;  %v8289_v43 = vrot.slane %v8287_v55, 5  ;;  %v8293_v18 = vrot.slane %v8291_v32, 4  ;;  %v7054_v54 = vld [vmem:[#allocation4 + $0x94] sm:$0xf] }
 0x423   : > { %v7316_v47 = vrot.slane %v7315_v38, 4  ;;  %v10892_v58 = vrot.slane %v7565_v59, 9  ;;  %v7707_v23 = vrot.slane %v7566_v10, 5  ;;  %v8299_v3 = vrot.slane %v8297_v1, 5  ;;  %v7055_v38 = vld [vmem:[#allocation4 + $0x98] sm:$0x1] }
 0x424   : > { %v8284_v37 = vor.u32 %v8283_v45, %v8280_v15  ;;  %v7326_v7 = vrot.slane %v7325_v40, 4  ;;  %v8294_v34 = vor.u32 %v8293_v18, %v8289_v43  ;;  %v15712_v13 = vadd.f32 %v11489_v22, %v11488_v53  ;;  %v8002_v40 = vld [vmem:[#allocation4 + $0xac] sm:$0xf] }
 0x425   : > { %v7321_v41 = vsel %vm12533_vm12, %v7316_v47, %v7320_v8  ;;  %v7709_v0 = vrot.slane %v7707_v23, 4  ;;  %v7710_v49 = vrot.slane %v7567_v46, 5  ;;  %v15726_v53 = vadd.f32 %v15682_v27, %v15676_v26  ;;  %v8001_v26 = vld [vmem:[#allocation4 + $0xa8] sm:$0xf]  ;;  %v8003_v47 = vld [vmem:[#allocation4 + $0xb0] sm:$0x1] }
 0x426   : > { %16675 = vst [vmem:[#allocation19_spill] sm:$0xff] %v15712_v13  ;;  %v15714_v31 = vpop.f32.mrb[120].mxu0  ;;  %v8285_v33 = vrot.slane %v8284_v37, 4  ;;  %v7331_v24 = vsel %vm12533_vm12, %v7326_v7, %v7330_v39  ;;  %v8295_v5 = vrot.slane %v8294_v34, 4  ;;  %v15728_v22 = vadd.f32 %v11492_v29, %v11491_v48 }
 0x427   : > { %v15720_v60 = vpop.f32.mrb[121].mxu0  ;;  %v10875_v44 = vcombine.low %v7321_v41, %v7331_v24  ;;  %v7708_v55 = vsel %vm12675_vm0, %v10892_v58, %v7707_v23  ;;  %v7711_v32 = vsel %vm12675_vm0, %v7709_v0, %v7710_v49  ;;  %v15738_v10 = vadd.f32 %v15700_v51, %v15688_v16  ;;  %v12098_v16 = vld [vmem:[#allocation4 + $0x9c] sm:$0xff]  }
 0x428   : > { %16676 = vst [vmem:[#allocation21_spill] sm:$0xff] %v15728_v22  ;;  %v15730_v8 = vpop.f32.mrb[122].mxu0  ;;  %v8290_v29 = vsel %vm12533_vm12, %v8285_v33, %v8289_v43  ;;  %v8300_v15 = vsel %vm12533_vm12, %v8295_v5, %v8299_v3  ;;  %v10908_v45 = vcombine.low %v7708_v55, %v7711_v32  ;;  %v7333_v1 = vshrl.u32 %v7053_v2, 16  ;;  %v7568_v43 = vld [vmem:[#allocation4 + $0x9c] sm:$0xe] }
 0x429   : > { %v15718_v28 = vpop.f32.mrb[88].mxu1  ;;  %v11498_v48 = vpop.f32.mrb[123].mxu0  ;;  %9925 = vmatmul.mubr.bf16.gmra.mrb[168].mxu1 %v10875_v44  ;;  %v10940_v18 = vcombine.low %v8290_v29, %v8300_v15  ;;  %v7336_v51 = vshll.u32 %v7053_v2, 16  ;;  %v7342_v46 = vshll.u32 %v7054_v54, 16  ;;  %v7346_v58 = vshrl.u32 %v7054_v54, 16 }
 0x42a   : > { %v11383_v59 = vpop.f32.mrb[89].mxu1  ;;  %9932 = vmatprep.mubr.bf16.mxu1 %v10908_v45  ;;  %v7335_v37 = vrot.slane %v7333_v1, 4  ;;  %v7352_v23 = vshll.u32 %v7055_v38, 16  ;;  %v8302_v7 = vshrl.u32 %v8001_v26, 16  ;;  %v8305_v41 = vshll.u32 %v8001_v26, 16 }
 0x42b   : > { %v15740_v27 = vpop.f32.mrb[90].mxu1  ;;  %10093 = vmatprep.mubr.bf16.mxu0 %v10940_v18  ;;  %v7338_v34 = vrot.slane %v7336_v51, 5  ;;  %v7344_v3 = vrot.slane %v7342_v46, 5  ;;  %v8311_v33 = vshll.u32 %v8002_v40, 16  ;;  %v7569_v0 = vld [vmem:[#allocation4 + $0xa0] sm:$0xf] }
 0x42c   : > { %v15746_v39 = vpop.f32.mrb[91].mxu1  ;;  %10094 = vmatmul.mubr.bf16.gmra.mrb[204].mxu0 %v12098_v16  ;;  %v7348_v49 = vrot.slane %v7346_v58, 4  ;;  %v7354_v24 = vrot.slane %v7352_v23, 5  ;;  %v8304_v5 = vrot.slane %v8302_v7, 4  ;;  %v8315_v44 = vshrl.u32 %v8002_v40, 16 }
 0x42d   : > { %v7570_v2 = vld [vmem:[#allocation4 + $0xa4] sm:$0x1]  ;;  %v7339_v55 = vor.u32 %v7338_v34, %v7335_v37  ;;  %v8307_v32 = vrot.slane %v8305_v41, 5  ;;  %v8313_v29 = vrot.slane %v8311_v33, 5  ;;  %v8321_v15 = vshll.u32 %v8003_v47, 16 }
 0x42e   : > { %v7349_v54 = vor.u32 %v7348_v49, %v7344_v3  ;;  %v8317_v38 = vrot.slane %v8315_v44, 4  ;;  %v10893_v45 = vrot.slane %v7568_v43, 9  ;;  %v7714_v1 = vrot.slane %v7569_v0, 5  ;;  %v7056_v40 = vld [vmem:[#allocation4 + $0x9c] sm:$0xf] }
 0x42f   : > { %v7340_v18 = vrot.slane %v7339_v55, 4  ;;  %v8308_v51 = vor.u32 %v8307_v32, %v8304_v5  ;;  %v8323_v46 = vrot.slane %v8321_v15, 5  ;;  %v7717_v26 = vrot.slane %v7570_v2, 5  ;;  %v7057_v34 = vld [vmem:[#allocation4 + $0xa0] sm:$0xf] }
 0x430   : > { %v7350_v22 = vrot.slane %v7349_v54, 4  ;;  %v8318_v13 = vor.u32 %v8317_v38, %v8313_v29  ;;  %v7715_v16 = vsel %vm12675_vm0, %v10893_v45, %v7714_v1  ;;  %v7716_v58 = vrot.slane %v7714_v1, 4  ;;  %v8004_v55 = vld [vmem:[#allocation4 + $0xb4] sm:$0xf]  ;;  %v8005_v15 = vld [vmem:[#allocation4 + $0xb8] sm:$0xf] }
 0x431   : > { %v7345_v47 = vsel %vm12533_vm12, %v7340_v18, %v7344_v3  ;;  %v8309_v37 = vrot.slane %v8308_v51, 4  ;;  %v15756_v7 = vadd.f32 %v15720_v60, %v15714_v31  ;;  %v15759_v43 = vadd.f32 %v11383_v59, %v15718_v28  ;;  %v7058_v31 = vld [vmem:[#allocation4 + $0xa4] sm:$0x1]  ;;  %v8006_v18 = vld [vmem:[#allocation4 + $0xbc] sm:$0x1]  ;;  %v12099_v51 = vld [vmem:[#allocation4 + $0xa8] sm:$0xff]  }
 0x432   : > { %v7355_v0 = vsel %vm12533_vm12, %v7350_v22, %v7354_v24  ;;  %v8319_v49 = vrot.slane %v8318_v13, 4  ;;  %v7718_v3 = vsel %vm12675_vm0, %v7716_v58, %v7717_v26  ;;  %v15770_v5 = vadd.f32 %v11498_v48, %v15730_v8 }
 0x433   : > { %v15750_v23 = vpop.f32.mrb[124].mxu0  ;;  %16677 = vst [vmem:[#allocation14_spill] sm:$0xff] %v15756_v7  ;;  %v10876_v28 = vcombine.low %v7345_v47, %v7355_v0  ;;  %v8314_v59 = vsel %vm12533_vm12, %v8309_v37, %v8313_v29  ;;  %v10909_v2 = vcombine.low %v7715_v16, %v7718_v3  ;;  %v15782_v8 = vadd.f32 %v15746_v39, %v15740_v27 }
 0x434   : > { %v15761_v41 = vpop.f32.mrb[92].mxu1  ;;  %v15763_v33 = vpop.f32.mrb[125].mxu0  ;;  %16678 = vst [vmem:[#allocation20_spill] sm:$0xff] %v15770_v5  ;;  %v8324_v13 = vsel %vm12533_vm12, %v8319_v49, %v8323_v46  ;;  %v7357_v48 = vshrl.u32 %v7056_v40, 16  ;;  %v7360_v24 = vshll.u32 %v7056_v40, 16  ;;  %v7366_v45 = vshll.u32 %v7057_v34, 16 }
 0x435   : > { %v11389_v60 = vpop.f32.mrb[93].mxu1  ;;  %v15772_v44 = vpop.f32.mrb[126].mxu0  ;;  %9933 = vmatmul.mubr.bf16.gmra.mrb[172].mxu1 %v10876_v28  ;;  %v10941_v38 = vcombine.low %v8314_v59, %v8324_v13  ;;  %v7370_v29 = vshrl.u32 %v7057_v34, 16  ;;  %v7376_v1 = vshll.u32 %v7058_v31, 16  ;;  %v8326_v58 = vshrl.u32 %v8004_v55, 16 }
 0x436   : > { %v15776_v32 = vpop.f32.mrb[94].mxu1  ;;  %v11504_v22 = vpop.f32.mrb[127].mxu0  ;;  %9940 = vmatprep.mubr.bf16.mxu1 %v10909_v2  ;;  %v7359_v26 = vrot.slane %v7357_v48, 4  ;;  %v7362_v16 = vrot.slane %v7360_v24, 5  ;;  %v7571_v46 = vld [vmem:[#allocation4 + $0xa8] sm:$0xe] }
 0x437   : > { %v11392_v54 = vpop.f32.mrb[95].mxu1  ;;  %10101 = vmatprep.mubr.bf16.mxu0 %v10941_v38  ;;  %v7368_v47 = vrot.slane %v7366_v45, 5  ;;  %v7372_v27 = vrot.slane %v7370_v29, 4  ;;  %v7378_v39 = vrot.slane %v7376_v1, 5  ;;  %v8329_v37 = vshll.u32 %v8004_v55, 16 }
 0x438   : > { %v7572_v40 = vld [vmem:[#allocation4 + $0xac] sm:$0xf]  ;;  %10102 = vmatmul.mubr.bf16.gmra.mrb[208].mxu0 %v12099_v51  ;;  %v7363_v0 = vor.u32 %v7362_v16, %v7359_v26  ;;  %v8328_v49 = vrot.slane %v8326_v58, 4  ;;  %v8335_v3 = vshll.u32 %v8005_v15, 16  ;;  %v8339_v28 = vshrl.u32 %v8005_v15, 16 }
 0x439   : > { %v7573_v34 = vld [vmem:[#allocation4 + $0xb0] sm:$0x1]  ;;  %v7373_v31 = vor.u32 %v7372_v27, %v7368_v47  ;;  %v8331_v59 = vrot.slane %v8329_v37, 5  ;;  %v8345_v2 = vshll.u32 %v8006_v18, 16  ;;  %v10894_v13 = vrot.slane %v7571_v46, 9 }
 0x43a   : > { %v7364_v48 = vrot.slane %v7363_v0, 4  ;;  %v8337_v24 = vrot.slane %v8335_v3, 5  ;;  %v8341_v5 = vrot.slane %v8339_v28, 4  ;;  %v7721_v7 = vrot.slane %v7572_v40, 5  ;;  %v7059_v37 = vld [vmem:[#allocation4 + $0xa8] sm:$0xf] }
 0x43b   : > { %v7374_v38 = vrot.slane %v7373_v31, 4  ;;  %v8332_v45 = vor.u32 %v8331_v59, %v8328_v49  ;;  %v8347_v29 = vrot.slane %v8345_v2, 5  ;;  %v7724_v1 = vrot.slane %v7573_v34, 5  ;;  %v8007_v3 = vld [vmem:[#allocation4 + $0xc0] sm:$0xf] }
 0x43c   : > { %v7369_v55 = vsel %vm12533_vm12, %v7364_v48, %v7368_v47  ;;  %v8342_v51 = vor.u32 %v8341_v5, %v8337_v24  ;;  %v7722_v15 = vsel %vm12675_vm0, %v10894_v13, %v7721_v7  ;;  %v7723_v26 = vrot.slane %v7721_v7, 4  ;;  %v7060_v47 = vld [vmem:[#allocation4 + $0xac] sm:$0xf]  ;;  %v8009_v34 = vld [vmem:[#allocation4 + $0xc8] sm:$0x1] }
 0x43d   : > { %v7379_v18 = vsel %vm12533_vm12, %v7374_v38, %v7378_v39  ;;  %v8333_v58 = vrot.slane %v8332_v45, 4  ;;  %v15794_v46 = vadd.f32 %v15763_v33, %v15750_v23  ;;  %v15797_v27 = vadd.f32 %v11389_v60, %v15761_v41  ;;  %v7061_v39 = vld [vmem:[#allocation4 + $0xb0] sm:$0x1]  ;;  %v8008_v60 = vld [vmem:[#allocation4 + $0xc4] sm:$0xf] }
 0x43e   : > { %v10877_v40 = vcombine.low %v7369_v55, %v7379_v18  ;;  %v8343_v0 = vrot.slane %v8342_v51, 4  ;;  %v7725_v7 = vsel %vm12675_vm0, %v7723_v26, %v7724_v1  ;;  %v15802_v49 = vadd.f32 %v11504_v22, %v15772_v44  ;;  %v7574_v13 = vld [vmem:[#allocation4 + $0xb4] sm:$0xe] }
 0x43f   : > { %v15788_v16 = vpop.f32.mrb[128].mxu0  ;;  %16679 = vst [vmem:[#allocation22_spill] sm:$0xff] %v15794_v46  ;;  %v8338_v23 = vsel %vm12533_vm12, %v8333_v58, %v8337_v24  ;;  %v10910_v33 = vcombine.low %v7722_v15, %v7725_v7  ;;  %v15807_v41 = vadd.f32 %v11392_v54, %v15776_v32  ;;  %v7381_v2 = vshrl.u32 %v7059_v37, 16  ;;  %v7575_v24 = vld [vmem:[#allocation4 + $0xb8] sm:$0xf] }
 0x440   : > { %v11507_v5 = vpop.f32.mrb[129].mxu0  ;;  %16680 = vst [vmem:[#allocation24_spill] sm:$0xff] %v15802_v49  ;;  %9941 = vmatmul.mubr.bf16.gmra.mrb[176].mxu1 %v10877_v40  ;;  %v8348_v59 = vsel %vm12533_vm12, %v8343_v0, %v8347_v29  ;;  %v7384_v44 = vshll.u32 %v7059_v37, 16  ;;  %v7390_v22 = vshll.u32 %v7060_v47, 16  ;;  %v7394_v38 = vshrl.u32 %v7060_v47, 16  ;;  %v12101_v55 = vld [vmem:[#allocation4 + $0xb4] sm:$0xff]  }
 0x441   : > { %v11509_v28 = vpop.f32.mrb[130].mxu0  ;;  %v10942_v48 = vcombine.low %v8338_v23, %v8348_v59  ;;  %9948 = vmatprep.mubr.bf16.mxu1 %v10910_v33  ;;  %v7400_v45 = vshll.u32 %v7061_v39, 16  ;;  %v7383_v32 = vrot.slane %v7381_v2, 4  ;;  %v8350_v15 = vshrl.u32 %v8007_v3, 16  ;;  %v7576_v39 = vld [vmem:[#allocation4 + $0xbc] sm:$0x1] }
 0x442   : > { %v11510_v31 = vpop.f32.mrb[131].mxu0  ;;  %v7386_v54 = vrot.slane %v7384_v44, 5  ;;  %v7392_v51 = vrot.slane %v7390_v22, 5  ;;  %v7396_v18 = vrot.slane %v7394_v38, 4  ;;  %v8353_v29 = vshll.u32 %v8007_v3, 16 }
 0x443   : > { %10109 = vmatprep.mubr.bf16.mxu0 %v10942_v48  ;;  %v7402_v58 = vrot.slane %v7400_v45, 5  ;;  %v8359_v40 = vshll.u32 %v8008_v60, 16  ;;  %v8352_v7 = vrot.slane %v8350_v15, 4  ;;  %v8363_v23 = vshrl.u32 %v8008_v60, 16 }
 0x444   : > { %v11394_v1 = vpop.f32.mrb[96].mxu1  ;;  %10110 = vmatmul.mubr.bf16.gmra.mrb[212].mxu0 %v12101_v55  ;;  %v7387_v0 = vor.u32 %v7386_v54, %v7383_v32  ;;  %v8369_v47 = vshll.u32 %v8009_v34, 16  ;;  %v7397_v59 = vor.u32 %v7396_v18, %v7392_v51  ;;  %v8355_v49 = vrot.slane %v8353_v29, 5  ;;  %v7062_v54 = vld [vmem:[#allocation4 + $0xb4] sm:$0xf] }
 0x445   : > { %v11395_v26 = vpop.f32.mrb[97].mxu1  ;;  %v8361_v2 = vrot.slane %v8359_v40, 5  ;;  %v10895_v44 = vrot.slane %v7574_v13, 9  ;;  %v8365_v46 = vrot.slane %v8363_v23, 4  ;;  %v7728_v48 = vrot.slane %v7575_v24, 5 }
 0x446   : > { %v11397_v37 = vpop.f32.mrb[98].mxu1  ;;  %v7388_v22 = vrot.slane %v7387_v0, 4  ;;  %v8371_v61 = vrot.slane %v8369_v47, 5  ;;  %v7398_v38 = vrot.slane %v7397_v59, 4  ;;  %v8356_v45 = vor.u32 %v8355_v49, %v8352_v7  ;;  %v7063_v18 = vld [vmem:[#allocation4 + $0xb8] sm:$0xf] }
 0x447   : > { %v11398_v33 = vpop.f32.mrb[99].mxu1  ;;  %v7731_v3 = vrot.slane %v7576_v39, 5  ;;  %v15812_v35 = vadd.f32 %v11507_v5, %v15788_v16  ;;  %v8366_v34 = vor.u32 %v8365_v46, %v8361_v2  ;;  %v7729_v55 = vsel %vm12675_vm0, %v10895_v44, %v7728_v48  ;;  %v7064_v7 = vld [vmem:[#allocation4 + $0xbc] sm:$0x1]  ;;  %v7578_v47 = vld [vmem:[#allocation4 + $0xc4] sm:$0xf] }
 0x448   : > { %v7393_v60 = vsel %vm12533_vm12, %v7388_v22, %v7392_v51  ;;  %v7730_v32 = vrot.slane %v7728_v48, 4  ;;  %v7403_v13 = vsel %vm12533_vm12, %v7398_v38, %v7402_v58  ;;  %v8357_v15 = vrot.slane %v8356_v45, 4  ;;  %v7577_v44 = vld [vmem:[#allocation4 + $0xc0] sm:$0xe] }
 0x449   : > { %16681 = vst [vmem:[#allocation16_spill] sm:$0xff] %v15812_v35  ;;  %v15820_v24 = vadd.f32 %v11395_v26, %v11394_v1  ;;  %v15822_v49 = vadd.f32 %v11510_v31, %v11509_v28  ;;  %v10878_v5 = vcombine.low %v7393_v60, %v7403_v13  ;;  %v8367_v29 = vrot.slane %v8366_v34, 4  ;;  %v7065_v22 = vld [vmem:[#allocation4 + $0xc0] sm:$0xf] }
 0x44a   : > { %v7732_v46 = vsel %vm12675_vm0, %v7730_v32, %v7731_v3  ;;  %v15826_v51 = vadd.f32 %v11398_v33, %v11397_v37  ;;  %v7405_v23 = vshrl.u32 %v7062_v54, 16  ;;  %v8362_v28 = vsel %vm12533_vm12, %v8357_v15, %v8361_v2  ;;  %v12102_v48 = vld [vmem:[#allocation4 + $0xc0] sm:$0xff]  }
 0x44b   : > { %16682 = vst [vmem:[#allocation23_spill] sm:$0xff] %v15822_v49  ;;  %v10911_v0 = vcombine.low %v7729_v55, %v7732_v46  ;;  %9949 = vmatmul.mubr.bf16.gmra.mrb[180].mxu1 %v10878_v5  ;;  %v8372_v31 = vsel %vm12533_vm12, %v8367_v29, %v8371_v61  ;;  %v7408_v1 = vshll.u32 %v7062_v54, 16  ;;  %v7414_v26 = vshll.u32 %v7063_v18, 16  ;;  %v7579_v55 = vld [vmem:[#allocation4 + $0xc8] sm:$0x1] }
 0x44c   : > { %v11512_v16 = vpop.f32.mrb[132].mxu0  ;;  %v10943_v59 = vcombine.low %v8362_v28, %v8372_v31  ;;  %v7407_v37 = vrot.slane %v7405_v23, 4  ;;  %v7418_v33 = vshrl.u32 %v7063_v18, 16  ;;  %v7424_v3 = vshll.u32 %v7064_v7, 16  ;;  %v7066_v29 = vld [vmem:[#allocation4 + $0xc4] sm:$0xf] }
 0x44d   : > { %v11513_v40 = vpop.f32.mrb[133].mxu0  ;;  %9956 = vmatprep.mubr.bf16.mxu1 %v10911_v0  ;;  %v7410_v38 = vrot.slane %v7408_v1, 5  ;;  %v7416_v45 = vrot.slane %v7414_v26, 5  ;;  %v7735_v60 = vrot.slane %v7578_v47, 5  ;;  %v10896_v13 = vrot.slane %v7577_v44, 9 }
 0x44e   : > { %v11515_v58 = vpop.f32.mrb[134].mxu0  ;;  %10117 = vmatprep.mubr.bf16.mxu0 %v10943_v59  ;;  %v7420_v2 = vrot.slane %v7418_v33, 4  ;;  %v15832_v32 = vadd.f32 %v11513_v40, %v11512_v16  ;;  %v7067_v23 = vld [vmem:[#allocation4 + $0xc8] sm:$0x1]  ;;  %v7429_v47 = vshrl.u32 %v7065_v22, 16  ;;  %v7432_v28 = vshll.u32 %v7065_v22, 16 }
 0x44f   : > { %v11516_v39 = vpop.f32.mrb[135].mxu0  ;;  %10118 = vmatmul.mubr.bf16.gmra.mrb[216].mxu0 %v12102_v48  ;;  %v7411_v54 = vor.u32 %v7410_v38, %v7407_v37  ;;  %v7737_v15 = vrot.slane %v7735_v60, 4  ;;  %v7426_v1 = vrot.slane %v7424_v3, 5  ;;  %v7738_v16 = vrot.slane %v7579_v55, 5  ;;  %v8010_v26 = vld [vmem:[#allocation4 + $0xcc] sm:$0xf] }
 0x450   : > { %16683 = vst [vmem:[#allocation25_spill] sm:$0xff] %v15832_v32  ;;  %v7421_v46 = vor.u32 %v7420_v2, %v7416_v45  ;;  %v15836_v0 = vadd.f32 %v11516_v39, %v11515_v58  ;;  %v7736_v33 = vsel %vm12675_vm0, %v10896_v13, %v7735_v60  ;;  %v7431_v44 = vrot.slane %v7429_v47, 4 }
 0x451   : > { %v11400_v34 = vpop.f32.mrb[100].mxu1  ;;  %v7412_v31 = vrot.slane %v7411_v54, 4  ;;  %v7434_v48 = vrot.slane %v7432_v28, 5  ;;  %v7739_v39 = vsel %vm12675_vm0, %v7737_v15, %v7738_v16  ;;  %v7438_v22 = vshll.u32 %v7066_v29, 16 }
 0x452   : > { %v11401_v61 = vpop.f32.mrb[101].mxu1  ;;  %16684 = vst [vmem:[#allocation6_spill] sm:$0xff] %v15836_v0  ;;  %v7422_v37 = vrot.slane %v7421_v46, 4  ;;  %v7442_v3 = vshrl.u32 %v7066_v29, 16  ;;  %v7448_v54 = vshll.u32 %v7067_v23, 16  ;;  %v8374_v60 = vshrl.u32 %v8010_v26, 16 }
 0x453   : > { %v15834_v5 = vadd.f32 %v11401_v61, %v11400_v34  ;;  %v11403_v18 = vpop.f32.mrb[102].mxu1  ;;  %v7417_v58 = vsel %vm12533_vm12, %v7412_v31, %v7416_v45  ;;  %v8011_v34 = vld [vmem:[#allocation4 + $0xd0] sm:$0xf]  ;;  %v7435_v61 = vor.u32 %v7434_v48, %v7431_v44  ;;  %v8377_v28 = vshll.u32 %v8010_v26, 16  ;;  %v8478_v45 = vld [vmem:[#allocation4 + $0x1c] sm:$0xf] }
 0x454   : > { %v11404_v7 = vpop.f32.mrb[103].mxu1  ;;  %v7427_v55 = vsel %vm12533_vm12, %v7422_v37, %v7426_v1  ;;  %v7444_v47 = vrot.slane %v7442_v3, 4  ;;  %v10912_v0 = vcombine.low %v7736_v33, %v7739_v39  ;;  %v8376_v15 = vrot.slane %v8374_v60, 4  ;;  %v8477_v29 = vld [vmem:[#allocation4 + $0x18] sm:$0xe] }
 0x455   : > { %v15838_v40 = vadd.f32 %v11404_v7, %v11403_v18  ;;  %v8012_v18 = vld [vmem:[#allocation4 + $0xd4] sm:$0x1]  ;;  %v10879_v46 = vcombine.low %v7417_v58, %v7427_v55  ;;  %v7440_v7 = vrot.slane %v7438_v22, 5  ;;  %v8383_v16 = vshll.u32 %v8011_v34, 16  ;;  %v8479_v23 = vld [vmem:[#allocation4 + $0x20] sm:$0x1] }
 0x456   : > { %v11518_v59 = vpop.f32.mrb[136].mxu0  ;;  %v8379_v35 = vrot.slane %v8377_v28, 5  ;;  %v8387_v1 = vshrl.u32 %v8011_v34, 16  ;;  %v8393_v37 = vshll.u32 %v8012_v18, 16  ;;  %v7436_v48 = vrot.slane %v7435_v61, 4 }
 0x457   : > { %v11519_v38 = vpop.f32.mrb[137].mxu0  ;;  %9957 = vmatmul.mubr.bf16.gmra.mrb[184].mxu1 %v10879_v46  ;;  %v7445_v49 = vor.u32 %v7444_v47, %v7440_v7  ;;  %v7450_v58 = vrot.slane %v7448_v54, 5  ;;  %v8385_v22 = vrot.slane %v8383_v16, 5  ;;  %v8575_v3 = vrot.slane %v8478_v45, 5  ;;  %v8481_v28 = vld [vmem:[#allocation4 + $0x28] sm:$0xf] }
 0x458   : > { %v11521_v2 = vpop.f32.mrb[138].mxu0  ;;  %9964 = vmatprep.mubr.bf16.mxu1 %v10912_v0  ;;  %v8380_v50 = vor.u32 %v8379_v35, %v8376_v15  ;;  %v8389_v33 = vrot.slane %v8387_v1, 4  ;;  %v10945_v39 = vrot.slane %v8477_v29, 9  ;;  %v8395_v20 = vrot.slane %v8393_v37, 5  ;;  %v8482_v1 = vld [vmem:[#allocation4 + $0x2c] sm:$0x1] }
 0x459   : > { %v11522_v13 = vpop.f32.mrb[139].mxu0  ;;  %v11406_v31 = vpop.f32.mrb[104].mxu1  ;;  %v7446_v55 = vrot.slane %v7445_v49, 4  ;;  %v8577_v19 = vrot.slane %v8575_v3, 4  ;;  %v8578_v46 = vrot.slane %v8479_v23, 5  ;;  %v15848_v47 = vadd.f32 %v11519_v38, %v11518_v59 }
 0x45a   : > { %v11407_v32 = vpop.f32.mrb[105].mxu1  ;;  %v8381_v0 = vrot.slane %v8380_v50, 4  ;;  %v8390_v61 = vor.u32 %v8389_v33, %v8385_v22  ;;  %v7441_v35 = vsel %vm12533_vm12, %v7436_v48, %v7440_v7  ;;  %v15858_v15 = vadd.f32 %v11522_v13, %v11521_v2  ;;  %v8484_v38 = vld [vmem:[#allocation4 + $0x34] sm:$0xf]  ;;  %v8480_v23 = vld [vmem:[#allocation4 + $0x24] sm:$0xe] }
 0x45b   : > { %v11409_v44 = vpop.f32.mrb[106].mxu1  ;;  %v7451_v18 = vsel %vm12533_vm12, %v7446_v55, %v7450_v58  ;;  %v15852_v54 = vadd.f32 %v11407_v32, %v11406_v31  ;;  %v8579_v49 = vsel %vm12675_vm0, %v8577_v19, %v8578_v46  ;;  %v8576_v31 = vsel %vm12675_vm0, %v10945_v39, %v8575_v3  ;;  %v8485_v19 = vld [vmem:[#allocation4 + $0x38] sm:$0x1]  ;;  %v15868_v55 = vld [vmem:[#allocation4 + $0x40] sm:$0xf] }
 0x45c   : > { %v11410_v26 = vpop.f32.mrb[107].mxu1  ;;  %v10880_v29 = vcombine.low %v7441_v35, %v7451_v18  ;;  %v8386_v50 = vsel %vm12533_vm12, %v8381_v0, %v8385_v22  ;;  %v8391_v32 = vrot.slane %v8390_v61, 4  ;;  %v10961_v7 = vcombine.low %v8576_v31, %v8579_v49  ;;  %v8483_v39 = vld [vmem:[#allocation4 + $0x30] sm:$0xe] }
 0x45d   : > { %v15860_v59 = vadd.f32 %v11410_v26, %v11409_v44  ;;  %v8582_v48 = vrot.slane %v8481_v28, 5  ;;  %v12104_v44 = vld [vmem:[#allocation4 + $0xcc] sm:$0xff]   ;;  %v8589_v58 = vrot.slane %v8484_v38, 5  ;;  %v8585_v3 = vrot.slane %v8482_v1, 5 }
 0x45e   : > { %v11524_v60 = vpop.f32.mrb[140].mxu0  ;;  %v8396_v13 = vsel %vm12533_vm12, %v8391_v32, %v8395_v20  ;;  %v8592_v61 = vrot.slane %v8485_v19, 5  ;;  %v10946_v20 = vrot.slane %v8480_v23, 9 }
 0x45f   : > { %v11525_v34 = vpop.f32.mrb[141].mxu0  ;;  %9965 = vmatmul.mubr.bf16.gmra.mrb[188].mxu1 %v10880_v29  ;;  %v10944_v22 = vcombine.low %v8386_v50, %v8396_v13  ;;  %v8584_v33 = vrot.slane %v8582_v48, 4  ;;  %v8591_v0 = vrot.slane %v8589_v58, 4  ;;  %v8596_v29 = vrot.slane %v15868_v55, 5  ;;  %v8490_v50 = vld [vmem:[#allocation4 + $0x4c] sm:$0xf] }
 0x460   : > { %v11527_v45 = vpop.f32.mrb[142].mxu0  ;;  %11858 = vmatprep.mubr.bf16.mxu1 %v10961_v7  ;;  %v15870_v46 = vadd.f32 %v11525_v34, %v11524_v60  ;;  %v10947_v34 = vrot.slane %v8483_v39, 9  ;;  %v8488_v7 = vld [vmem:[#allocation4 + $0x44] sm:$0x1]  ;;  %v8603_v23 = vrot.slane %v8490_v50, 5 }
 0x461   : > { %v11528_v16 = vpop.f32.mrb[143].mxu0  ;;  %v11412_v37 = vpop.f32.mrb[108].mxu1  ;;  %10125 = vmatprep.mubr.bf16.mxu0 %v10944_v22  ;;  %v8586_v49 = vsel %vm12675_vm0, %v8584_v33, %v8585_v3  ;;  %v8593_v32 = vsel %vm12675_vm0, %v8591_v0, %v8592_v61  ;;  %v15892_v13 = vld [vmem:[%s16480_s5] sm:$0x7]  ;;  %v8491_v55 = vld [vmem:[#allocation4 + $0x50] sm:$0x1] }
 0x462   : > { %v11413_v2 = vpop.f32.mrb[109].mxu1  ;;  %v15874_v35 = vadd.f32 %v11528_v16, %v11527_v45  ;;  %10126 = vmatmul.mubr.bf16.gmra.mrb[220].mxu0 %v12104_v44  ;;  %v8583_v45 = vsel %vm12675_vm0, %v10946_v20, %v8582_v48  ;;  %16686 = vst [vmem:[#allocation31_spill] sm:$0xff] %v15892_v13  ;;  %v8486_v33 = vld [vmem:[#allocation4 + $0x3c] sm:$0xe]  ;;  %v8605_v3 = vrot.slane %v8603_v23, 4  ;;  %v8599_v0 = vrot.slane %v8488_v7, 5 }
 0x463   : > { %v11415_v26 = vpop.f32.mrb[110].mxu1  ;;  %v15872_v28 = vadd.f32 %v11413_v2, %v11412_v37  ;;  %v10962_v1 = vcombine.low %v8583_v45, %v8586_v49  ;;  %v8590_v37 = vsel %vm12675_vm0, %v10947_v34, %v8589_v58  ;;  %v8489_v61 = vld [vmem:[#allocation4 + $0x48] sm:$0xe]  ;;  %v15900_v20 = vld [vmem:[#allocation4 + $0x64] sm:$0xf]  ;;  %v8606_v49 = vrot.slane %v8491_v55, 5 }
 0x464   : > { %v11416_v18 = vpop.f32.mrb[111].mxu1  ;;  %v10963_v44 = vcombine.low %v8590_v37, %v8593_v32  ;;  %v10948_v34 = vrot.slane %v8486_v33, 9  ;;  %v10949_v7 = vrot.slane %v8489_v61, 9 }
 0x465   : > { %v15878_v38 = vadd.f32 %v11416_v18, %v11415_v26  ;;  %v8598_v26 = vrot.slane %v8596_v29, 4  ;;  %v15898_v18 = vld [vmem:[#allocation4 + $0x58] sm:$0xf] }
 0x466   : > { %v11530_v42 = vpop.f32.mrb[144].mxu0 }
 0x467   : > { %v11531_v60 = vpop.f32.mrb[145].mxu0  ;;  %11859 = vmatmul.mubr.bf16.vlgmr.msra.gmra.mrb[192].mxu1 %v10962_v1  ;;  %v8600_v32 = vsel %vm12675_vm0, %v8598_v26, %v8599_v0  ;;  %v8494_v0 = vld [vmem:[#allocation4 + $0x5c] sm:$0x1] }
 0x468   : > { %v11533_v31 = vpop.f32.mrb[146].mxu0  ;;  %v15887_v2 = vadd.f32 %v11531_v60, %v11530_v42  ;;  %11862 = vmatprep.mubr.bf16.mxu1 %v10963_v44  ;;  %v8617_v44 = vrot.slane %v15900_v20, 5  ;;  %v8492_v20 = vld [vmem:[#allocation4 + $0x54] sm:$0xe] }
 0x469   : > { %v11534_v16 = vpop.f32.mrb[147].mxu0  ;;  %v11418_v19 = vpop.f32.mrb[112].mxu1 }
 0x46a   : > { %16685 = vst [vmem:[#allocation29_spill] sm:$0xff] %v15887_v2  ;;  %v11419_v22 = vpop.f32.mrb[113].mxu1  ;;  %v15894_v48 = vadd.f32 %v11534_v16, %v11533_v31  ;;  %v8610_v31 = vrot.slane %v15898_v18, 5  ;;  %v16688_v16 = vld [vmem:[#allocation15_spill] sm:$0xff]  ;;  %v8604_v18 = vsel %vm12675_vm0, %v10949_v7, %v8603_v23 }
 0x46b   : > { %v15896_v58 = vadd.f32 %v11419_v22, %v11418_v19  ;;  %v11421_v39 = vpop.f32.mrb[114].mxu1  ;;  %v16689_v1 = vsub.s32 0, %v16688_v16  ;;  %v8607_v19 = vsel %vm12675_vm0, %v8605_v3, %v8606_v49  ;;  %v8597_v22 = vsel %vm12675_vm0, %v10948_v34, %v8596_v29 }
 0x46c   : > { %16687 = vst [vmem:[#allocation28_spill] sm:$0xff] %v15894_v48  ;;  %v11422_v42 = vpop.f32.mrb[115].mxu1  ;;  %v10965_v29 = vcombine.low %v8604_v18, %v8607_v19  ;;  %v8612_v49 = vrot.slane %v8610_v31, 4  ;;  %v15943_v19 = vld [vmem:[#allocation4 + $0x7c] sm:$0xf] }
 0x46d   : > { %v15902_v50 = vadd.f32 %v11422_v42, %v11421_v39  ;;  %v15910_v37 = vrot.slane %v15892_v13, %v16689_v1  ;;  %v10964_v39 = vcombine.low %v8597_v22, %v8600_v32  ;;  %v8613_v22 = vrot.slane %v8494_v0, 5 }
 0x46e   : > { %v11536_v60 = vpop.f32.mrb[148].mxu0  ;;  %v8631_v0 = vrot.slane %v15943_v19, 5  ;;  %v8500_v19 = vld [vmem:[#allocation4 + $0x74] sm:$0x1] }
 0x46f   : > { %v11537_v45 = vpop.f32.mrb[149].mxu0  ;;  %v15925_v3 = vadd.f32 %v15377_v12, %v15910_v37  ;;  %v15929_v61 = vadd.f32 %v15381_v36, %v15910_v37  ;;  %v15933_v23 = vadd.f32 %v15570_v30, %v15910_v37  ;;  %v15937_v32 = vadd.f32 %v15582_v6, %v15910_v37  ;;  %11863 = vmatmul.mubr.bf16.gmra.mrb[196].mxu1 %v10964_v39  ;;  %v15941_v36 = vld [vmem:[#allocation4 + $0x70] sm:$0xf] }
 0x470   : > { %v11539_v55 = vpop.f32.mrb[150].mxu0  ;;  %v15917_v33 = vadd.f32 %v11537_v45, %v11536_v60  ;;  %v8497_v60 = vld [vmem:[#allocation4 + $0x68] sm:$0x1]  ;;  %v8619_v12 = vrot.slane %v8617_v44, 4  ;;  %v15951_v30 = vadd.f32 %v15630_v21, %v15910_v37  ;;  %v15955_v6 = vadd.f32 %v15658_v57, %v15910_v37  ;;  %11866 = vmatprep.mubr.bf16.mxu1 %v10965_v29 }
 0x471   : > { %v11540_v26 = vpop.f32.mrb[151].mxu0  ;;  %v11424_v42 = vpop.f32.mrb[116].mxu1  ;;  %v15959_v18 = vadd.f32 %v15672_v63, %v15910_v37  ;;  %v10950_v21 = vrot.slane %v8492_v20, 9  ;;  %v8614_v57 = vsel %vm12675_vm0, %v8612_v49, %v8613_v22  ;;  %v8624_v29 = vrot.slane %v15941_v36, 5  ;;  %v15981_v20 = vld [vmem:[#allocation4 + $0x88] sm:$0xf] }
 0x472   : > { %16690 = vst [vmem:[#allocation36_spill] sm:$0xff] %v15917_v33  ;;  %v15921_v1 = vadd.f32 %v11540_v26, %v11539_v55  ;;  %v11425_v34 = vpop.f32.mrb[117].mxu1  ;;  %v15947_v55 = vadd.f32 %v15612_v14, %v15910_v37  ;;  %v8495_v26 = vld [vmem:[#allocation4 + $0x60] sm:$0xe]  ;;  %v15963_v14 = vadd.f32 %v15694_v9, %v15910_v37  ;;  %v15973_v13 = vadd.f32 %v15706_v56, %v15910_v37  ;;  %v8498_v36 = vld [vmem:[#allocation4 + $0x6c] sm:$0xe] }
 0x473   : > { %v15939_v45 = vadd.f32 %v11425_v34, %v11424_v42  ;;  %v11427_v7 = vpop.f32.mrb[118].mxu1  ;;  %v8620_v42 = vrot.slane %v8497_v60, 5  ;;  %v15977_v63 = vadd.f32 %v15726_v53, %v15910_v37  ;;  %v10951_v9 = vrot.slane %v8495_v26, 9  ;;  %v8503_v26 = vld [vmem:[#allocation4 + $0x80] sm:$0x1] }
 0x474   : > { %16691 = vst [vmem:[#allocation30_spill] sm:$0xff] %v15921_v1  ;;  %v11428_v39 = vpop.f32.mrb[119].mxu1  ;;  %v15985_v49 = vadd.f32 %v15738_v10, %v15910_v37  ;;  %v15993_v56 = vadd.f32 %v15782_v8, %v15910_v37  ;;  %v8611_v53 = vsel %vm12675_vm0, %v10950_v21, %v8610_v31  ;;  %v16003_v10 = vadd.f32 %v15807_v41, %v15910_v37  ;;  %v8501_v21 = vld [vmem:[#allocation4 + $0x78] sm:$0xe] }
 0x475   : > { %16692 = vst [vmem:[#allocation33_spill] sm:$0xff] %v15939_v45  ;;  %v15965_v34 = vadd.f32 %v11428_v39, %v11427_v7  ;;  %v8621_v60 = vsel %vm12675_vm0, %v8619_v12, %v8620_v42  ;;  %v15989_v7 = vadd.f32 %v15759_v43, %v15910_v37  ;;  %v15999_v12 = vadd.f32 %v15797_v27, %v15910_v37  ;;  %v16007_v39 = vld [vmem:[#allocation4 + $0x94] sm:$0xf]  ;;  %v8504_v27 = vld [vmem:[#allocation4 + $0x84] sm:$0xe] }
 0x476   : > { %v10966_v22 = vcombine.low %v8611_v53, %v8614_v57  ;;  %v8618_v43 = vsel %vm12675_vm0, %v10951_v9, %v8617_v44  ;;  %v8626_v31 = vrot.slane %v8624_v29, 4  ;;  %v8633_v16 = vrot.slane %v8631_v0, 4 }
 0x477   : > { %16693 = vst [vmem:[#allocation26_spill] sm:$0xff] %v15965_v34  ;;  %v10967_v42 = vcombine.low %v8618_v43, %v8621_v60  ;;  %v9589_v33 = vadd.f32 %v15820_v24, %v15910_v37  ;;  %v9592_v41 = vadd.f32 %v15826_v51, %v15910_v37  ;;  %v9597_v44 = vadd.f32 %v15834_v5, %v15910_v37  ;;  %v8506_v5 = vld [vmem:[#allocation4 + $0x8c] sm:$0x1] }
 0x478   : > { %11867 = vmatmul.mubr.bf16.gmra.mrb[200].mxu1 %v10966_v22  ;;  %v9600_v60 = vadd.f32 %v15838_v40, %v15910_v37  ;;  %v8627_v53 = vrot.slane %v8500_v19, 5  ;;  %v8634_v43 = vrot.slane %v8503_v26, 5  ;;  %v8645_v45 = vrot.slane %v16007_v39, 5  ;;  %v8507_v22 = vld [vmem:[#allocation4 + $0x90] sm:$0xe] }
 0x479   : > { %v11430_v8 = vpop.f32.mrb[120].mxu1  ;;  %11870 = vmatprep.mubr.bf16.mxu1 %v10967_v42  ;;  %v9605_v24 = vadd.f32 %v15852_v54, %v15910_v37  ;;  %v10952_v51 = vrot.slane %v8498_v36, 9  ;;  %v10953_v48 = vrot.slane %v8501_v21, 9  ;;  %v16694_v26 = vrot.slane %v15981_v20, 5  ;;  %v16035_v42 = vld [vmem:[#allocation4 + $0xa0] sm:$0xf] }
 0x47a   : > { %v11431_v1 = vpop.f32.mrb[121].mxu1  ;;  %v8628_v40 = vsel %vm12675_vm0, %v8626_v31, %v8627_v53  ;;  %v8635_v19 = vsel %vm12675_vm0, %v8633_v16, %v8634_v43  ;;  %v9613_v54 = vadd.f32 %v15872_v28, %v15910_v37  ;;  %v10954_v39 = vrot.slane %v8504_v27, 9 }
 0x47b   : > { %v11432_v57 = vadd.f32 %v11431_v1, %v11430_v8  ;;  %v11433_v9 = vpop.f32.mrb[122].mxu1  ;;  %v9608_v1 = vadd.f32 %v15860_v59, %v15910_v37  ;;  %v8640_v8 = vrot.slane %v16694_v26, 4  ;;  %v8632_v36 = vsel %vm12675_vm0, %v10953_v48, %v8631_v0  ;;  %v8509_v59 = vld [vmem:[#allocation4 + $0x98] sm:$0x1] }
 0x47c   : > { %v11434_v34 = vpop.f32.mrb[123].mxu1  ;;  %v8641_v31 = vrot.slane %v8506_v5, 5  ;;  %v10955_v21 = vrot.slane %v8507_v22, 9  ;;  %v16039_v16 = vadd.f32 %v15530_v25, %v15925_v3  ;;  %v10969_v43 = vcombine.low %v8632_v36, %v8635_v19  ;;  %v16697_v5 = vld [vmem:[#allocation17_spill] sm:$0xff] }
 0x47d   : > { %v11435_v2 = vadd.f32 %v11434_v34, %v11433_v9  ;;  %v8625_v34 = vsel %vm12675_vm0, %v10952_v51, %v8624_v29  ;;  %v8647_v9 = vrot.slane %v8645_v45, 4  ;;  %v16043_v28 = vadd.f32 %v15560_v62, %v15929_v61  ;;  %v16052_v51 = vld [vmem:[#allocation4 + $0xac] sm:$0xf]  ;;  %v16696_v61 = vld [vmem:[#allocation13_spill] sm:$0xff] }
 0x47e   : > { %v10968_v53 = vcombine.low %v8625_v34, %v8628_v40  ;;  %v16047_v48 = vadd.f32 %v15564_v17, %v15933_v23  ;;  %v8642_v29 = vsel %vm12675_vm0, %v8640_v8, %v8641_v31  ;;  %v8648_v0 = vrot.slane %v8509_v59, 5  ;;  %v16695_v17 = vld [vmem:[#allocation12_spill] sm:$0xff]  ;;  %v16700_v40 = vld [vmem:[#allocation19_spill] sm:$0xff]  ;;  %v16702_v8 = vld [vmem:[#allocation14_spill] sm:$0xff] }
 0x47f   : > { %v8652_v27 = vrot.slane %v16035_v42, 5  ;;  %v16056_v25 = vadd.f32 %v15574_v52, %v15937_v32  ;;  %v16060_v62 = vadd.f32 %v15608_v4, %v15947_v55  ;;  %v16064_v3 = vadd.f32 %v16695_v17, %v15951_v30  ;;  %v16698_v32 = vld [vmem:[#allocation10_spill] sm:$0xff] }
 0x480   : > { %11871 = vmatmul.mubr.bf16.gmra.mrb[204].mxu1 %v10968_v53  ;;  %v16068_v23 = vadd.f32 %v16696_v61, %v15955_v6  ;;  %v16072_v22 = vadd.f32 %v16697_v5, %v15959_v18  ;;  %v8649_v52 = vsel %vm12675_vm0, %v8647_v9, %v8648_v0  ;;  %v16078_v4 = vadd.f32 %v16698_v32, %v15963_v14  ;;  %v16699_v55 = vld [vmem:[#allocation18_spill] sm:$0xff]  ;;  %v16701_v18 = vld [vmem:[#allocation21_spill] sm:$0xff]  ;;  %v16703_v14 = vld [vmem:[#allocation20_spill] sm:$0xff] }
 0x481   : > { %11874 = vmatprep.mubr.bf16.mxu1 %v10969_v43  ;;  %v16082_v30 = vadd.f32 %v16699_v55, %v15973_v13  ;;  %v16086_v6 = vadd.f32 %v16700_v40, %v15977_v63  ;;  %v8659_v19 = vrot.slane %v16052_v51, 5  ;;  %v16091_v26 = vadd.f32 %v16701_v18, %v15985_v49  ;;  %v16704_v59 = vld [vmem:[#allocation22_spill] sm:$0xff]  ;;  %v16705_v63 = vld [vmem:[#allocation24_spill] sm:$0xff]  ;;  %v16707_v43 = vld [vmem:[#allocation23_spill] sm:$0xff] }
 0x482   : > { %v16095_v34 = vadd.f32 %v16702_v8, %v15989_v7  ;;  %v16099_v36 = vadd.f32 %v16703_v14, %v15993_v56  ;;  %v16103_v31 = vadd.f32 %v16704_v59, %v15999_v12  ;;  %v16107_v9 = vadd.f32 %v16705_v63, %v16003_v10  ;;  %v16706_v53 = vld [vmem:[#allocation16_spill] sm:$0xff]  ;;  %v16708_v51 = vld [vmem:[#allocation25_spill] sm:$0xff]  ;;  %v16709_v56 = vld [vmem:[#allocation6_spill] sm:$0xff] }
 0x483   : > { %v16110_v49 = vadd.f32 %v16706_v53, %v9589_v33  ;;  %v16113_v0 = vadd.f32 %v16707_v43, %v9592_v41  ;;  %v16116_v17 = vadd.f32 %v16708_v51, %v9597_v44  ;;  %v16119_v61 = vadd.f32 %v16709_v56, %v9600_v60  ;;  %v8512_v18 = vld [vmem:[#allocation4 + $0xa4] sm:$0x1]  ;;  %v8517_v8 = vld [vmem:[#allocation4 + $0xb8] sm:$0xf] }
 0x484   : > { %v16122_v12 = vadd.f32 %v15848_v47, %v9605_v24  ;;  %v16125_v5 = vadd.f32 %v15858_v15, %v9608_v1  ;;  %v9637_v10 = vadd.f32 %v11432_v57, %v15910_v37  ;;  %v16710_v33 = vrot.slane %v15981_v20, 5  ;;  %v8515_v57 = vld [vmem:[#allocation4 + $0xb0] sm:$0x1]  ;;  %v8520_v14 = vld [vmem:[#allocation4 + $0xc4] sm:$0xf]  ;;  %v16714_v11 = vld [vmem:[#allocation26_spill] sm:$0xff] }
 0x485   : > { %v8646_v44 = vsel %vm12675_vm0, %v10955_v21, %v8645_v45  ;;  %v9640_v24 = vadd.f32 %v11435_v2, %v15910_v37  ;;  %v8654_v15 = vrot.slane %v8652_v27, 4  ;;  %v8510_v45 = vld [vmem:[#allocation4 + $0x9c] sm:$0xe]  ;;  %v8661_v21 = vrot.slane %v8659_v19, 4  ;;  %v8513_v2 = vld [vmem:[#allocation4 + $0xa8] sm:$0xe] }
 0x486   : > { %v11542_v13 = vpop.f32.mrb[152].mxu0  ;;  %v8639_v41 = vsel %vm12675_vm0, %v10954_v39, %v16710_v33  ;;  %v10971_v40 = vcombine.low %v8646_v44, %v8649_v52  ;;  %v9616_v39 = vadd.f32 %v15878_v38, %v15910_v37  ;;  %v8655_v52 = vrot.slane %v8512_v18, 5 }
 0x487   : > { %v11543_v7 = vpop.f32.mrb[153].mxu0  ;;  %v10970_v60 = vcombine.low %v8639_v41, %v8642_v29  ;;  %v16142_v29 = vadd.f32 %v15870_v46, %v9613_v54  ;;  %v8662_v59 = vrot.slane %v8515_v57, 5  ;;  %v10956_v63 = vrot.slane %v8510_v45, 9 }
 0x488   : > { %v11544_v32 = vadd.f32 %v11543_v7, %v11542_v13  ;;  %v11545_v55 = vpop.f32.mrb[154].mxu0  ;;  %v8656_v53 = vsel %vm12675_vm0, %v8654_v15, %v8655_v52  ;;  %v8666_v43 = vrot.slane %v8517_v8, 5  ;;  %v10957_v7 = vrot.slane %v8513_v2, 9  ;;  %v8521_v15 = vld [vmem:[#allocation4 + $0xc8] sm:$0x1] }
 0x489   : > { %v11546_v47 = vpop.f32.mrb[155].mxu0  ;;  %11875 = vmatmul.mubr.bf16.gmra.mrb[208].mxu1 %v10970_v60  ;;  %v8663_v51 = vsel %vm12675_vm0, %v8661_v21, %v8662_v59  ;;  %v8673_v56 = vrot.slane %v8520_v14, 5  ;;  %v16151_v54 = vadd.f32 %v15874_v35, %v9616_v39  ;;  %v8523_v60 = vld [vmem:[#allocation4 + $0xd0] sm:$0xf]  ;;  %v9621_v35 = vadd.f32 %v15896_v58, %v15910_v37  ;;  %v8519_v21 = vld [vmem:[#allocation4 + $0xc0] sm:$0xe] }
 0x48a   : > { %v16137_v1 = vadd.f32 %v11544_v32, %v9637_v10  ;;  %v11547_v20 = vadd.f32 %v11546_v47, %v11545_v55  ;;  %11878 = vmatprep.mubr.bf16.mxu1 %v10971_v40  ;;  %v8653_v10 = vsel %vm12675_vm0, %v10956_v63, %v8652_v27  ;;  %v8660_v32 = vsel %vm12675_vm0, %v10957_v7, %v8659_v19  ;;  %v8518_v55 = vld [vmem:[#allocation4 + $0xbc] sm:$0x1]  ;;  %v8522_v58 = vld [vmem:[#allocation4 + $0xcc] sm:$0xe]  ;;  %v8524_v59 = vld [vmem:[#allocation4 + $0xd4] sm:$0x1] }
 0x48b   : > { %v10972_v44 = vcombine.low %v8653_v10, %v8656_v53  ;;  %v10973_v47 = vcombine.low %v8660_v32, %v8663_v51  ;;  %v8668_v42 = vrot.slane %v8666_v43, 4  ;;  %v8669_v19 = vrot.slane %v8518_v55, 5  ;;  %v16711_v51 = vld [vmem:[#allocation29_spill] sm:$0xff] }
 0x48c   : > { %v16144_v13 = vadd.f32 %v11547_v20, %v9640_v24  ;;  %v8516_v24 = vld [vmem:[#allocation4 + $0xb4] sm:$0xe]  ;;  %v8675_v20 = vrot.slane %v8673_v56, 4  ;;  %v8680_v8 = vrot.slane %v8523_v60, 5  ;;  %v8676_v14 = vrot.slane %v8521_v15, 5 }
 0x48d   : > { %v10958_v2 = vrot.slane %v8516_v24, 9  ;;  %v9624_v53 = vadd.f32 %v15902_v50, %v15910_v37  ;;  %v10960_v55 = vrot.slane %v8522_v58, 9 }
 0x48e   : > { %v11548_v38 = vpop.f32.mrb[156].mxu0  ;;  %v8682_v60 = vrot.slane %v8680_v8, 4 }
 0x48f   : > { %v11549_v46 = vpop.f32.mrb[157].mxu0  ;;  %v8667_v10 = vsel %vm12675_vm0, %v10958_v2, %v8666_v43 }
 0x490   : > { %v16157_v33 = vadd.f32 %v11549_v46, %v11548_v38  ;;  %v11551_v41 = vpop.f32.mrb[158].mxu0  ;;  %v11436_v40 = vpop.f32.mrb[124].mxu1  ;;  %v8670_v38 = vsel %vm12675_vm0, %v8668_v42, %v8669_v19  ;;  %v16174_v46 = vadd.f32 %v16711_v51, %v9621_v35 }
 0x491   : > { %v11552_v18 = vpop.f32.mrb[159].mxu0  ;;  %v11437_v57 = vpop.f32.mrb[125].mxu1  ;;  %11879 = vmatmul.mubr.bf16.gmra.mrb[212].mxu1 %v10972_v44  ;;  %v8677_v44 = vsel %vm12675_vm0, %v8675_v20, %v8676_v14 }
 0x492   : > { %v16163_v27 = vadd.f32 %v11552_v18, %v11551_v41  ;;  %v16165_v39 = vadd.f32 %v11437_v57, %v11436_v40  ;;  %v11439_v45 = vpop.f32.mrb[126].mxu1  ;;  %11882 = vmatprep.mubr.bf16.mxu1 %v10973_v47  ;;  %v10959_v41 = vrot.slane %v8519_v21, 9  ;;  %v8683_v40 = vrot.slane %v8524_v59, 5  ;;  %v16713_v59 = vld [vmem:[#allocation33_spill] sm:$0xff] }
 0x493   : > { %v11440_v52 = vpop.f32.mrb[127].mxu1  ;;  %v10974_v47 = vcombine.low %v8667_v10, %v8670_v38  ;;  %v9629_v38 = vadd.f32 %v16713_v59, %v15910_v37 }
 0x494   : > { %v16167_v63 = vadd.f32 %v11440_v52, %v11439_v45  ;;  %v8674_v24 = vsel %vm12675_vm0, %v10959_v41, %v8673_v56  ;;  %v16712_v45 = vld [vmem:[#allocation28_spill] sm:$0xff]  ;;  %v8681_v52 = vsel %vm12675_vm0, %v10960_v55, %v8680_v8  ;;  %v8684_v2 = vsel %vm12675_vm0, %v8682_v60, %v8683_v40 }
 0x495   : > { %v10975_v15 = vcombine.low %v8674_v24, %v8677_v44  ;;  %v16187_v19 = vadd.f32 %v16712_v45, %v9624_v53  ;;  %v9632_v55 = vadd.f32 %v16714_v11, %v15910_v37  ;;  %v16715_v40 = vld [vmem:[#allocation36_spill] sm:$0xff] }
 0x496   : > { %v11682_v7 = vpop.f32.mrb[160].mxu0 }
 0x497   : > { %v11683_v32 = vpop.f32.mrb[161].mxu0 }
 0x498   : > { %v16180_v18 = vadd.f32 %v11683_v32, %v11682_v7  ;;  %v11685_v50 = vpop.f32.mrb[162].mxu0  ;;  %v11570_v35 = vpop.f32.mrb[128].mxu1  ;;  %v10976_v7 = vcombine.low %v8681_v52, %v8684_v2 }
 0x499   : > { %v11686_v42 = vpop.f32.mrb[163].mxu0  ;;  %v11571_v57 = vpop.f32.mrb[129].mxu1  ;;  %11883 = vmatmul.mubr.bf16.gmra.mrb[216].mxu1 %v10974_v47 }
 0x49a   : > { %v16184_v43 = vadd.f32 %v11686_v42, %v11685_v50  ;;  %v11572_v20 = vadd.f32 %v11571_v57, %v11570_v35  ;;  %v11573_v21 = vpop.f32.mrb[130].mxu1  ;;  %11886 = vmatprep.mubr.bf16.mxu1 %v10975_v15  ;;  %v16206_v50 = vadd.f32 %v16715_v40, %v9629_v38  ;;  %v16716_v57 = vld [vmem:[#allocation30_spill] sm:$0xff] }
 0x49b   : > { %v11574_v56 = vpop.f32.mrb[131].mxu1  ;;  %v16210_v45 = vadd.f32 %v16716_v57, %v9632_v55 }
 0x49c   : > { %v16194_v14 = vadd.f32 %v11572_v20, %v16039_v16  ;;  %v11575_v58 = vadd.f32 %v11574_v56, %v11573_v21 }
 0x49e   : > { %v11688_v53 = vpop.f32.mrb[164].mxu0  ;;  %v16199_v51 = vadd.f32 %v11575_v58, %v16043_v28 }
 0x49f   : > { %v11689_v10 = vpop.f32.mrb[165].mxu0 }
 0x4a0   : > { %v11690_v41 = vadd.f32 %v11689_v10, %v11688_v53  ;;  %v11691_v44 = vpop.f32.mrb[166].mxu0  ;;  %v11576_v8 = vpop.f32.mrb[132].mxu1 }
 0x4a1   : > { %v11692_v32 = vpop.f32.mrb[167].mxu0  ;;  %v11577_v60 = vpop.f32.mrb[133].mxu1  ;;  %11887 = vmatmul.mubr.bf16.gmra.mrb[220].mxu1 %v10976_v7 }
 0x4a2   : > { %v16203_v16 = vadd.f32 %v11692_v32, %v11691_v44  ;;  %v11578_v47 = vadd.f32 %v11577_v60, %v11576_v8  ;;  %v11579_v24 = vpop.f32.mrb[134].mxu1 }
 0x4a3   : > { %v11580_v35 = vpop.f32.mrb[135].mxu1 }
 0x4a4   : > { %v9855_v28 = vadd.f32 %v11578_v47, %v16047_v48  ;;  %v11581_v42 = vadd.f32 %v11580_v35, %v11579_v24  ;;  %v9645_v47 = vadd.f32 %v16165_v39, %v15910_v37 }
 0x4a6   : > { %v11694_v15 = vpop.f32.mrb[168].mxu0  ;;  %v9858_v20 = vadd.f32 %v11581_v42, %v16056_v25 }
 0x4a7   : > { %v11695_v21 = vpop.f32.mrb[169].mxu0 }
 0x4a8   : > { %v16213_v52 = vadd.f32 %v11695_v21, %v11694_v15  ;;  %v11697_v2 = vpop.f32.mrb[170].mxu0  ;;  %v11582_v56 = vpop.f32.mrb[136].mxu1 }
 0x4a9   : > { %v11698_v58 = vpop.f32.mrb[171].mxu0  ;;  %v11583_v59 = vpop.f32.mrb[137].mxu1 }
 0x4aa   : > { %v16215_v38 = vadd.f32 %v11698_v58, %v11697_v2  ;;  %v11584_v53 = vadd.f32 %v11583_v59, %v11582_v56  ;;  %v11585_v7 = vpop.f32.mrb[138].mxu1  ;;  %v9648_v2 = vadd.f32 %v16167_v63, %v15910_v37  ;;  %v16225_v56 = vadd.f32 %v16157_v33, %v9645_v47 }
 0x4ab   : > { %v11586_v10 = vpop.f32.mrb[139].mxu1  ;;  %v16232_v33 = vadd.f32 %v11690_v41, %v9855_v28  ;;  %v16240_v41 = vadd.f32 %v16203_v16, %v9858_v20 }
 0x4ac   : > { %v9863_v48 = vadd.f32 %v11584_v53, %v16060_v62  ;;  %v11587_v44 = vadd.f32 %v11586_v10, %v11585_v7 }
 0x4ae   : > { %v11700_v8 = vpop.f32.mrb[172].mxu0  ;;  %v9866_v32 = vadd.f32 %v11587_v44, %v16064_v3  ;;  %v16251_v16 = vadd.f32 %v16213_v52, %v9863_v48 }
 0x4af   : > { %v11701_v11 = vpop.f32.mrb[173].mxu0 }
 0x4b0   : > { %v11702_v25 = vadd.f32 %v11701_v11, %v11700_v8  ;;  %v11703_v55 = vpop.f32.mrb[174].mxu0  ;;  %v11588_v60 = vpop.f32.mrb[140].mxu1  ;;  %v16229_v8 = vadd.f32 %v16163_v27, %v9648_v2 }
 0x4b1   : > { %v11704_v40 = vpop.f32.mrb[175].mxu0  ;;  %v11589_v24 = vpop.f32.mrb[141].mxu1 }
 0x4b2   : > { %v11705_v35 = vadd.f32 %v11704_v40, %v11703_v55  ;;  %v11590_v42 = vadd.f32 %v11589_v24, %v11588_v60  ;;  %v11591_v15 = vpop.f32.mrb[142].mxu1 }
 0x4b3   : > { %v11592_v57 = vpop.f32.mrb[143].mxu1 }
 0x4b4   : > { %v9871_v21 = vadd.f32 %v11590_v42, %v16068_v23  ;;  %v11593_v62 = vadd.f32 %v11592_v57, %v11591_v15 }
 0x4b6   : > { %v11706_v3 = vpop.f32.mrb[176].mxu0  ;;  %v9874_v58 = vadd.f32 %v11593_v62, %v16072_v22 }
 0x4b7   : > { %v11707_v59 = vpop.f32.mrb[177].mxu0 }
 0x4b8   : > { %v11708_v53 = vadd.f32 %v11707_v59, %v11706_v3  ;;  %v11709_v39 = vpop.f32.mrb[178].mxu0  ;;  %v16237_v59 = vadd.f32 %v16180_v18, %v16194_v14 }
 0x4b9   : > { %v11710_v7 = vpop.f32.mrb[179].mxu0  ;;  %v11594_v10 = vpop.f32.mrb[144].mxu1 }
 0x4ba   : > { %v11711_v44 = vadd.f32 %v11710_v7, %v11709_v39  ;;  %v11595_v23 = vpop.f32.mrb[145].mxu1  ;;  %v16245_v7 = vadd.f32 %v16184_v43, %v16199_v51 }
 0x4bb   : > { %v11596_v11 = vadd.f32 %v11595_v23, %v11594_v10  ;;  %v11597_v55 = vpop.f32.mrb[146].mxu1  ;;  %v16247_v23 = vadd.f32 %v11702_v25, %v9871_v21 }
 0x4bc   : > { %v11598_v60 = vpop.f32.mrb[147].mxu1 }
 0x4bd   : > { %v9879_v37 = vadd.f32 %v11596_v11, %v16078_v4  ;;  %v11599_v63 = vadd.f32 %v11598_v60, %v11597_v55 }
 0x4be   : > { %v11712_v40 = vpop.f32.mrb[180].mxu0 }
 0x4bf   : > { %v9882_v22 = vadd.f32 %v11599_v63, %v16082_v30  ;;  %v11713_v47 = vpop.f32.mrb[181].mxu0 }
 0x4c0   : > { %v11714_v24 = vadd.f32 %v11713_v47, %v11712_v40  ;;  %v11715_v42 = vpop.f32.mrb[182].mxu0  ;;  %v16256_v40 = vadd.f32 %v16215_v38, %v9866_v32 }
 0x4c1   : > { %v11716_v15 = vpop.f32.mrb[183].mxu0  ;;  %v16266_v32 = vadd.f32 %v11711_v44, %v9882_v22 }
 0x4c2   : > { %v11717_v57 = vadd.f32 %v11716_v15, %v11715_v42 }
 0x4c4   : > { %v11600_v62 = vpop.f32.mrb[148].mxu1 }
 0x4c5   : > { %v11601_v27 = vpop.f32.mrb[149].mxu1 }
 0x4c6   : > { %v11602_v2 = vadd.f32 %v11601_v27, %v11600_v62  ;;  %v11603_v3 = vpop.f32.mrb[150].mxu1  ;;  %v16262_v27 = vadd.f32 %v11708_v53, %v9879_v37 }
 0x4c7   : > { %v11604_v4 = vpop.f32.mrb[151].mxu1 }
 0x4c8   : > { %v9887_v28 = vadd.f32 %v11602_v2, %v16086_v6  ;;  %v11605_v30 = vadd.f32 %v11604_v4, %v11603_v3  ;;  %v16253_v6 = vadd.f32 %v11705_v35, %v9874_v58 }
 0x4c9   : > { %v11718_v39 = vpop.f32.mrb[184].mxu0 }
 0x4ca   : > { %v11719_v10 = vpop.f32.mrb[185].mxu0  ;;  %v9890_v11 = vadd.f32 %v11605_v30, %v16091_v26  ;;  %v16258_v25 = vadd.f32 %v11714_v24, %v9887_v28 }
 0x4cb   : > { %v11720_v55 = vadd.f32 %v11719_v10, %v11718_v39  ;;  %v11721_v18 = vpop.f32.mrb[186].mxu0 }
 0x4cc   : > { %v11722_v14 = vpop.f32.mrb[187].mxu0  ;;  %v16264_v38 = vadd.f32 %v11717_v57, %v9890_v11 }
 0x4cd   : > { %v11723_v60 = vadd.f32 %v11722_v14, %v11721_v18 }
 0x4cf   : > { %v11606_v20 = vpop.f32.mrb[152].mxu1 }
 0x4d0   : > { %v11607_v63 = vpop.f32.mrb[153].mxu1 }
 0x4d1   : > { %v11608_v43 = vadd.f32 %v11607_v63, %v11606_v20  ;;  %v11609_v51 = vpop.f32.mrb[154].mxu1 }
 0x4d2   : > { %v11610_v21 = vpop.f32.mrb[155].mxu1  ;;  %v11724_v26 = vpop.f32.mrb[188].mxu0 }
 0x4d3   : > { %v9895_v47 = vadd.f32 %v11608_v43, %v16095_v34  ;;  %v11611_v42 = vadd.f32 %v11610_v21, %v11609_v51  ;;  %v11725_v15 = vpop.f32.mrb[189].mxu0 }
 0x4d4   : > { %v11726_v62 = vadd.f32 %v11725_v15, %v11724_v26  ;;  %v11727_v52 = vpop.f32.mrb[190].mxu0 }
 0x4d5   : > { %v9898_v48 = vadd.f32 %v11611_v42, %v16099_v36  ;;  %v11728_v35 = vpop.f32.mrb[191].mxu0  ;;  %v16268_v30 = vadd.f32 %v11720_v55, %v9895_v47 }
 0x4d6   : > { %v11729_v58 = vadd.f32 %v11728_v35, %v11727_v52 }
 0x4d7   : > { %v16271_v53 = vadd.f32 %v11723_v60, %v9898_v48 }
 0x4da   : > { %v11612_v24 = vpop.f32.mrb[156].mxu1 }
 0x4db   : > { %v11613_v2 = vpop.f32.mrb[157].mxu1 }
 0x4dc   : > { %v11614_v3 = vadd.f32 %v11613_v2, %v11612_v24  ;;  %v11615_v4 = vpop.f32.mrb[158].mxu1 }
 0x4dd   : > { %v11616_v28 = vpop.f32.mrb[159].mxu1 }
 0x4de   : > { %v11730_v34 = vpop.f32.mrb[192].mxu0  ;;  %v9903_v39 = vadd.f32 %v11614_v3, %v16103_v31  ;;  %v11617_v10 = vadd.f32 %v11616_v28, %v11615_v4 }
 0x4df   : > { %v11731_v36 = vpop.f32.mrb[193].mxu0 }
 0x4e0   : > { %v11732_v18 = vadd.f32 %v11731_v36, %v11730_v34  ;;  %v11733_v14 = vpop.f32.mrb[194].mxu0  ;;  %v9906_v37 = vadd.f32 %v11617_v10, %v16107_v9  ;;  %v16274_v22 = vadd.f32 %v11726_v62, %v9903_v39 }
 0x4e1   : > { %v11734_v44 = vpop.f32.mrb[195].mxu0 }
 0x4e2   : > { %v11735_v57 = vadd.f32 %v11734_v44, %v11733_v14  ;;  %v16276_v11 = vadd.f32 %v11729_v58, %v9906_v37 }
 0x4e5   : > { %v11618_v20 = vpop.f32.mrb[160].mxu1 }
 0x4e6   : > { %v11619_v63 = vpop.f32.mrb[161].mxu1 }
 0x4e7   : > { %v11620_v55 = vadd.f32 %v11619_v63, %v11618_v20  ;;  %v11621_v43 = vpop.f32.mrb[162].mxu1 }
 0x4e8   : > { %v11622_v51 = vpop.f32.mrb[163].mxu1 }
 0x4e9   : > { %v9911_v31 = vadd.f32 %v11620_v55, %v16110_v49  ;;  %v11623_v21 = vadd.f32 %v11622_v51, %v11621_v43  ;;  %v11736_v26 = vpop.f32.mrb[196].mxu0 }
 0x4ea   : > { %v11737_v47 = vpop.f32.mrb[197].mxu0 }
 0x4eb   : > { %v9914_v60 = vadd.f32 %v11623_v21, %v16113_v0  ;;  %v11738_v42 = vadd.f32 %v11737_v47, %v11736_v26  ;;  %v11739_v9 = vpop.f32.mrb[198].mxu0  ;;  %v16280_v15 = vadd.f32 %v11732_v18, %v9911_v31 }
 0x4ec   : > { %v11740_v62 = vpop.f32.mrb[199].mxu0 }
 0x4ed   : > { %v11741_v52 = vadd.f32 %v11740_v62, %v11739_v9  ;;  %v16282_v48 = vadd.f32 %v11735_v57, %v9914_v60 }
 0x4f1   : > { %v11624_v35 = vpop.f32.mrb[164].mxu1 }
 0x4f2   : > { %v11625_v58 = vpop.f32.mrb[165].mxu1 }
 0x4f3   : > { %v11626_v24 = vadd.f32 %v11625_v58, %v11624_v35  ;;  %v11627_v2 = vpop.f32.mrb[166].mxu1 }
 0x4f4   : > { %v11628_v3 = vpop.f32.mrb[167].mxu1 }
 0x4f5   : > { %v9919_v49 = vadd.f32 %v11626_v24, %v16116_v17  ;;  %v11629_v4 = vadd.f32 %v11628_v3, %v11627_v2  ;;  %v11742_v28 = vpop.f32.mrb[200].mxu0 }
 0x4f6   : > { %v11743_v34 = vpop.f32.mrb[201].mxu0 }
 0x4f7   : > { %v9922_v0 = vadd.f32 %v11629_v4, %v16119_v61  ;;  %v11744_v39 = vadd.f32 %v11743_v34, %v11742_v28  ;;  %v11745_v10 = vpop.f32.mrb[202].mxu0  ;;  %v16286_v36 = vadd.f32 %v11738_v42, %v9919_v49 }
 0x4f8   : > { %v11746_v18 = vpop.f32.mrb[203].mxu0 }
 0x4f9   : > { %v11747_v14 = vadd.f32 %v11746_v18, %v11745_v10  ;;  %v16288_v37 = vadd.f32 %v11741_v52, %v9922_v0 }
 0x4fc   : > { %v11630_v44 = vpop.f32.mrb[168].mxu1 }
 0x4fd   : > { %v11631_v57 = vpop.f32.mrb[169].mxu1 }
 0x4fe   : > { %v11632_v20 = vadd.f32 %v11631_v57, %v11630_v44  ;;  %v11633_v63 = vpop.f32.mrb[170].mxu1 }
 0x4ff   : > { %v11634_v55 = vpop.f32.mrb[171].mxu1  ;;  %v11748_v43 = vpop.f32.mrb[204].mxu0 }
 0x500   : > { %v9927_v17 = vadd.f32 %v11632_v20, %v16122_v12  ;;  %v11635_v51 = vadd.f32 %v11634_v55, %v11633_v63  ;;  %v11749_v31 = vpop.f32.mrb[205].mxu0 }
 0x501   : > { %v11750_v21 = vadd.f32 %v11749_v31, %v11748_v43  ;;  %v11751_v61 = vpop.f32.mrb[206].mxu0 }
 0x502   : > { %v9930_v26 = vadd.f32 %v11635_v51, %v16125_v5  ;;  %v11752_v47 = vpop.f32.mrb[207].mxu0  ;;  %v16292_v60 = vadd.f32 %v11744_v39, %v9927_v17 }
 0x503   : > { %v11753_v42 = vadd.f32 %v11752_v47, %v11751_v61 }
 0x504   : > { %v16294_v9 = vadd.f32 %v11747_v14, %v9930_v26 }
 0x508   : > { %v11636_v62 = vpop.f32.mrb[172].mxu1 }
 0x509   : > { %v11637_v52 = vpop.f32.mrb[173].mxu1 }
 0x50a   : > { %v11638_v35 = vadd.f32 %v11637_v52, %v11636_v62  ;;  %v11639_v58 = vpop.f32.mrb[174].mxu1 }
 0x50b   : > { %v11640_v24 = vpop.f32.mrb[175].mxu1  ;;  %v11754_v2 = vpop.f32.mrb[208].mxu0 }
 0x50c   : > { %v9935_v12 = vadd.f32 %v11638_v35, %v16142_v29  ;;  %v11641_v3 = vadd.f32 %v11640_v24, %v11639_v58  ;;  %v11755_v49 = vpop.f32.mrb[209].mxu0 }
 0x50d   : > { %v11756_v4 = vadd.f32 %v11755_v49, %v11754_v2  ;;  %v11757_v28 = vpop.f32.mrb[210].mxu0 }
 0x50e   : > { %v9938_v5 = vadd.f32 %v11641_v3, %v16151_v54  ;;  %v11758_v34 = vpop.f32.mrb[211].mxu0  ;;  %v16298_v0 = vadd.f32 %v11750_v21, %v9935_v12 }
 0x50f   : > { %v11759_v39 = vadd.f32 %v11758_v34, %v11757_v28 }
 0x510   : > { %v16300_v10 = vadd.f32 %v11753_v42, %v9938_v5 }
 0x513   : > { %v11642_v18 = vpop.f32.mrb[176].mxu1 }
 0x514   : > { %v11643_v14 = vpop.f32.mrb[177].mxu1 }
 0x515   : > { %v11644_v44 = vadd.f32 %v11643_v14, %v11642_v18  ;;  %v11645_v57 = vpop.f32.mrb[178].mxu1 }
 0x516   : > { %v11646_v20 = vpop.f32.mrb[179].mxu1 }
 0x517   : > { %v9943_v63 = vadd.f32 %v11644_v44, %v16174_v46  ;;  %v11647_v29 = vadd.f32 %v11646_v20, %v11645_v57  ;;  %v11760_v55 = vpop.f32.mrb[212].mxu0 }
 0x518   : > { %v11761_v43 = vpop.f32.mrb[213].mxu0 }
 0x519   : > { %v9946_v17 = vadd.f32 %v11647_v29, %v16187_v19  ;;  %v11762_v51 = vadd.f32 %v11761_v43, %v11760_v55  ;;  %v11763_v54 = vpop.f32.mrb[214].mxu0  ;;  %v16304_v31 = vadd.f32 %v11756_v4, %v9943_v63 }
 0x51a   : > { %v11764_v21 = vpop.f32.mrb[215].mxu0 }
 0x51b   : > { %v11765_v61 = vadd.f32 %v11764_v21, %v11763_v54  ;;  %v16306_v26 = vadd.f32 %v11759_v39, %v9946_v17 }
 0x51e   : > { %v11648_v47 = vpop.f32.mrb[180].mxu1 }
 0x51f   : > { %v11649_v42 = vpop.f32.mrb[181].mxu1 }
 0x520   : > { %v11650_v62 = vadd.f32 %v11649_v42, %v11648_v47  ;;  %v11651_v52 = vpop.f32.mrb[182].mxu1 }
 0x521   : > { %v11652_v35 = vpop.f32.mrb[183].mxu1 }
 0x522   : > { %v9951_v46 = vadd.f32 %v11650_v62, %v16206_v50  ;;  %v11653_v58 = vadd.f32 %v11652_v35, %v11651_v52  ;;  %v11766_v24 = vpop.f32.mrb[216].mxu0 }
 0x523   : > { %v11767_v2 = vpop.f32.mrb[217].mxu0 }
 0x524   : > { %v9954_v19 = vadd.f32 %v11653_v58, %v16210_v45  ;;  %v11768_v12 = vadd.f32 %v11767_v2, %v11766_v24  ;;  %v11769_v3 = vpop.f32.mrb[218].mxu0  ;;  %v16310_v49 = vadd.f32 %v11762_v51, %v9951_v46  ;;  %v16717_v24 = vld [vmem:[#allocation15_spill] sm:$0xff] }
 0x525   : > { %v11770_v4 = vpop.f32.mrb[219].mxu0  ;;  %v16718_v2 = vsub.s32 1, %v16717_v24 }
 0x526   : > { %v11771_v28 = vadd.f32 %v11770_v4, %v11769_v3  ;;  %v16312_v5 = vadd.f32 %v11765_v61, %v9954_v19  ;;  %v16719_v19 = vld [vmem:[#allocation31_spill] sm:$0xff] }
 0x52a   : > { %v11654_v34 = vpop.f32.mrb[184].mxu1 }
 0x52b   : > { %v11655_v39 = vpop.f32.mrb[185].mxu1 }
 0x52c   : > { %v11656_v18 = vadd.f32 %v11655_v39, %v11654_v34  ;;  %v11657_v14 = vpop.f32.mrb[186].mxu1  ;;  %v12106_v34 = vld [vmem:[%s16480_s5] sm:$0x7]  ;;  %v16720_v39 = vsub.s32 2, %v16717_v24 }
 0x52d   : > { %v11658_v44 = vpop.f32.mrb[187].mxu1 }
 0x52e   : > { %v9959_v50 = vadd.f32 %v11656_v18, %v16137_v1  ;;  %v11659_v57 = vadd.f32 %v11658_v44, %v11657_v14 }
 0x530   : > { %v9962_v20 = vadd.f32 %v11659_v57, %v16144_v13  ;;  %v16316_v63 = vadd.f32 %v11768_v12, %v9959_v50  ;;  %v16328_v12 = vrot.slane %v16719_v19, %v16718_v2 }
 0x532   : > { %v11660_v45 = vpop.f32.mrb[188].mxu1  ;;  %v16318_v29 = vadd.f32 %v11771_v28, %v9962_v20 }
 0x533   : > { %v11661_v55 = vpop.f32.mrb[189].mxu1 }
 0x534   : > { %v11662_v43 = vadd.f32 %v11661_v55, %v11660_v45  ;;  %v11663_v17 = vpop.f32.mrb[190].mxu1 }
 0x535   : > { %v11664_v51 = vpop.f32.mrb[191].mxu1  ;;  %v11772_v21 = vpop.f32.mrb[220].mxu0 }
 0x536   : > { %v9967_v54 = vadd.f32 %v11662_v43, %v16225_v56  ;;  %v11665_v61 = vadd.f32 %v11664_v51, %v11663_v17  ;;  %v11773_v47 = vpop.f32.mrb[221].mxu0 }
 0x537   : > { %v11774_v42 = vadd.f32 %v11773_v47, %v11772_v21  ;;  %v11775_v62 = vpop.f32.mrb[222].mxu0 }
 0x538   : > { %v9970_v1 = vadd.f32 %v11665_v61, %v16229_v8  ;;  %v11776_v13 = vpop.f32.mrb[223].mxu0 }
 0x539   : > { %v11777_v52 = vadd.f32 %v11776_v13, %v11775_v62  ;;  %v16322_v46 = vadd.f32 %v11774_v42, %v9967_v54 }
 0x53a   : > { %v11860_v35 = vpop.f32.mrb[192].mxu1 }
 0x53b   : > { %v10177_v58 = vadd.f32 %v11860_v35, %v16232_v33  ;;  %v10168_v56 = vpop.f32.mrb[193].mxu1  ;;  %v16331_v28 = vadd.f32 %v11777_v52, %v9970_v1  ;;  %v16339_v33 = vrot.slane %v12106_v34, %v16720_v39 }
 0x53c   : > { %v10169_v3 = vadd.f32 %v10168_v56, %v16237_v59  ;;  %v11861_v4 = vpop.f32.mrb[194].mxu1 }
 0x53d   : > { %v10297_v8 = vmax.f32 %v10177_v58, 0.0  ;;  %v10180_v18 = vadd.f32 %v11861_v4, %v16240_v41  ;;  %v10171_v14 = vpop.f32.mrb[195].mxu1 }
 0x53e   : > { %v10295_v44 = vmax.f32 %v10169_v3, 0.0  ;;  %v10172_v50 = vadd.f32 %v10171_v14, %v16245_v7 }
 0x53f   : > { %v10333_v59 = vmul.f32 %v16328_v12, %v10297_v8  ;;  %v10298_v57 = vmax.f32 %v10180_v18, 0.0 }
 0x540   : > { %v10331_v20 = vmul.f32 %v16328_v12, %v10295_v44  ;;  %v10296_v45 = vmax.f32 %v10172_v50, 0.0 }
 0x541   : > { %v10369_v41 = vadd.f32 %v16339_v33, %v10333_v59  ;;  %v10334_v55 = vmul.f32 %v16328_v12, %v10298_v57 }
 0x542   : > { %v10367_v7 = vadd.f32 %v16339_v33, %v10331_v20  ;;  %v10332_v43 = vmul.f32 %v16328_v12, %v10296_v45  ;;  %v11864_v17 = vpop.f32.mrb[196].mxu1 }
 0x543   : > { %10401 = vst [vmem:[%s16347_s23 + $0x10] sm:$0xff] %v10369_v41  ;;  %v10370_v51 = vadd.f32 %v16339_v33, %v10334_v55  ;;  %v10193_v54 = vadd.f32 %v11864_v17, %v16247_v23  ;;  %v10184_v21 = vpop.f32.mrb[197].mxu1 }
 0x544   : > { %10399 = vst [vmem:[%s16347_s23] sm:$0xff] %v10367_v7  ;;  %v10368_v61 = vadd.f32 %v16339_v33, %v10332_v43  ;;  %v10185_v47 = vadd.f32 %v10184_v21, %v16251_v16  ;;  %v11865_v1 = vpop.f32.mrb[198].mxu1 }
 0x545   : > { %10402 = vst [vmem:[%s16347_s23 + $0x18] sm:$0xff] %v10370_v51  ;;  %v10301_v42 = vmax.f32 %v10193_v54, 0.0  ;;  %v10196_v62 = vadd.f32 %v11865_v1, %v16253_v6  ;;  %v10187_v13 = vpop.f32.mrb[199].mxu1 }
 0x546   : > { %10400 = vst [vmem:[%s16347_s23 + $0x8] sm:$0xff] %v10368_v61  ;;  %v10299_v52 = vmax.f32 %v10185_v47, 0.0  ;;  %v10188_v35 = vadd.f32 %v10187_v13, %v16256_v40 }
 0x547   : > { %v10337_v23 = vmul.f32 %v16328_v12, %v10301_v42  ;;  %v10302_v58 = vmax.f32 %v10196_v62, 0.0 }
 0x548   : > { %v10335_v24 = vmul.f32 %v16328_v12, %v10299_v52  ;;  %v10300_v2 = vmax.f32 %v10188_v35, 0.0 }
 0x549   : > { %v10373_v16 = vadd.f32 %v16339_v33, %v10337_v23  ;;  %v10338_v19 = vmul.f32 %v16328_v12, %v10302_v58 }
 0x54a   : > { %v10371_v6 = vadd.f32 %v16339_v33, %v10335_v24  ;;  %v10336_v56 = vmul.f32 %v16328_v12, %v10300_v2 }
 0x54b   : > { %v11868_v3 = vpop.f32.mrb[200].mxu1  ;;  %10405 = vst [vmem:[%s16347_s23 + $0x30] sm:$0xff] %v10373_v16  ;;  %v10374_v40 = vadd.f32 %v16339_v33, %v10338_v19 }
 0x54c   : > { %v10209_v4 = vadd.f32 %v11868_v3, %v16258_v25  ;;  %v10200_v8 = vpop.f32.mrb[201].mxu1  ;;  %10403 = vst [vmem:[%s16347_s23 + $0x20] sm:$0xff] %v10371_v6  ;;  %v10372_v34 = vadd.f32 %v16339_v33, %v10336_v56 }
 0x54d   : > { %v10201_v39 = vadd.f32 %v10200_v8, %v16262_v27  ;;  %v11869_v18 = vpop.f32.mrb[202].mxu1  ;;  %10406 = vst [vmem:[%s16347_s23 + $0x38] sm:$0xff] %v10374_v40 }
 0x54e   : > { %v10305_v14 = vmax.f32 %v10209_v4, 0.0  ;;  %v10212_v44 = vadd.f32 %v11869_v18, %v16264_v38  ;;  %v10203_v50 = vpop.f32.mrb[203].mxu1  ;;  %10404 = vst [vmem:[%s16347_s23 + $0x28] sm:$0xff] %v10372_v34 }
 0x54f   : > { %v10303_v59 = vmax.f32 %v10201_v39, 0.0  ;;  %v10204_v57 = vadd.f32 %v10203_v50, %v16266_v32 }
 0x550   : > { %v10341_v25 = vmul.f32 %v16328_v12, %v10305_v14  ;;  %v10306_v20 = vmax.f32 %v10212_v44, 0.0 }
 0x551   : > { %v10339_v45 = vmul.f32 %v16328_v12, %v10303_v59  ;;  %v10304_v41 = vmax.f32 %v10204_v57, 0.0 }
 0x552   : > { %v10377_v27 = vadd.f32 %v16339_v33, %v10341_v25  ;;  %v10342_v55 = vmul.f32 %v16328_v12, %v10306_v20 }
 0x553   : > { %v10375_v38 = vadd.f32 %v16339_v33, %v10339_v45  ;;  %v10340_v7 = vmul.f32 %v16328_v12, %v10304_v41  ;;  %v11872_v43 = vpop.f32.mrb[204].mxu1 }
 0x554   : > { %10409 = vst [vmem:[%s16347_s23 + $0x50] sm:$0xff] %v10377_v27  ;;  %v10378_v32 = vadd.f32 %v16339_v33, %v10342_v55  ;;  %v10225_v17 = vadd.f32 %v11872_v43, %v16274_v22  ;;  %v10216_v51 = vpop.f32.mrb[205].mxu1 }
 0x555   : > { %10407 = vst [vmem:[%s16347_s23 + $0x40] sm:$0xff] %v10375_v38  ;;  %v10376_v54 = vadd.f32 %v16339_v33, %v10340_v7  ;;  %v10217_v21 = vadd.f32 %v10216_v51, %v16268_v30  ;;  %v11873_v61 = vpop.f32.mrb[206].mxu1 }
 0x556   : > { %10410 = vst [vmem:[%s16347_s23 + $0x58] sm:$0xff] %v10378_v32  ;;  %v10309_v47 = vmax.f32 %v10225_v17, 0.0  ;;  %v10228_v1 = vadd.f32 %v11873_v61, %v16276_v11  ;;  %v10219_v42 = vpop.f32.mrb[207].mxu1 }
 0x557   : > { %10408 = vst [vmem:[%s16347_s23 + $0x48] sm:$0xff] %v10376_v54  ;;  %v10307_v62 = vmax.f32 %v10217_v21, 0.0  ;;  %v10220_v13 = vadd.f32 %v10219_v42, %v16271_v53 }
 0x558   : > { %v10345_v22 = vmul.f32 %v16328_v12, %v10309_v47  ;;  %v10310_v52 = vmax.f32 %v10228_v1, 0.0 }
 0x559   : > { %v10343_v35 = vmul.f32 %v16328_v12, %v10307_v62  ;;  %v10308_v23 = vmax.f32 %v10220_v13, 0.0 }
 0x55a   : > { %v10381_v30 = vadd.f32 %v16339_v33, %v10345_v22  ;;  %v10346_v58 = vmul.f32 %v16328_v12, %v10310_v52 }
 0x55b   : > { %v10379_v11 = vadd.f32 %v16339_v33, %v10343_v35  ;;  %v10344_v24 = vmul.f32 %v16328_v12, %v10308_v23 }
 0x55c   : > { %v11876_v2 = vpop.f32.mrb[208].mxu1  ;;  %10413 = vst [vmem:[%s16347_s23 + $0x70] sm:$0xff] %v10381_v30  ;;  %v10382_v53 = vadd.f32 %v16339_v33, %v10346_v58 }
 0x55d   : > { %v10241_v16 = vadd.f32 %v11876_v2, %v16286_v36  ;;  %v10232_v19 = vpop.f32.mrb[209].mxu1  ;;  %10411 = vst [vmem:[%s16347_s23 + $0x60] sm:$0xff] %v10379_v11  ;;  %v10380_v6 = vadd.f32 %v16339_v33, %v10344_v24 }
 0x55e   : > { %v10233_v56 = vadd.f32 %v10232_v19, %v16280_v15  ;;  %v11877_v3 = vpop.f32.mrb[210].mxu1  ;;  %10414 = vst [vmem:[%s16347_s23 + $0x78] sm:$0xff] %v10382_v53 }
 0x55f   : > { %v10313_v40 = vmax.f32 %v10241_v16, 0.0  ;;  %v10244_v4 = vadd.f32 %v11877_v3, %v16288_v37  ;;  %v10235_v8 = vpop.f32.mrb[211].mxu1  ;;  %10412 = vst [vmem:[%s16347_s23 + $0x68] sm:$0xff] %v10380_v6 }
 0x560   : > { %v10311_v34 = vmax.f32 %v10233_v56, 0.0  ;;  %v10236_v39 = vadd.f32 %v10235_v8, %v16282_v48 }
 0x561   : > { %v10349_v36 = vmul.f32 %v16328_v12, %v10313_v40  ;;  %v10314_v18 = vmax.f32 %v10244_v4, 0.0 }
 0x562   : > { %v10347_v14 = vmul.f32 %v16328_v12, %v10311_v34  ;;  %v10312_v44 = vmax.f32 %v10236_v39, 0.0 }
 0x563   : > { %v10385_v15 = vadd.f32 %v16339_v33, %v10349_v36  ;;  %v10350_v50 = vmul.f32 %v16328_v12, %v10314_v18 }
 0x564   : > { %v10383_v37 = vadd.f32 %v16339_v33, %v10347_v14  ;;  %v10348_v59 = vmul.f32 %v16328_v12, %v10312_v44  ;;  %v11880_v57 = vpop.f32.mrb[212].mxu1 }
 0x565   : > { %10417 = vst [vmem:[%s16347_s23 + $0x90] sm:$0xff] %v10385_v15  ;;  %v10386_v48 = vadd.f32 %v16339_v33, %v10350_v50  ;;  %v10257_v25 = vadd.f32 %v11880_v57, %v16298_v0  ;;  %v10248_v20 = vpop.f32.mrb[213].mxu1 }
 0x566   : > { %10415 = vst [vmem:[%s16347_s23 + $0x80] sm:$0xff] %v10383_v37  ;;  %v10384_v45 = vadd.f32 %v16339_v33, %v10348_v59  ;;  %v10249_v41 = vadd.f32 %v10248_v20, %v16292_v60  ;;  %v11881_v27 = vpop.f32.mrb[214].mxu1 }
 0x567   : > { %10418 = vst [vmem:[%s16347_s23 + $0x98] sm:$0xff] %v10386_v48  ;;  %v10317_v55 = vmax.f32 %v10257_v25, 0.0  ;;  %v10260_v38 = vadd.f32 %v11881_v27, %v16300_v10  ;;  %v10251_v7 = vpop.f32.mrb[215].mxu1 }
 0x568   : > { %10416 = vst [vmem:[%s16347_s23 + $0x88] sm:$0xff] %v10384_v45  ;;  %v10315_v43 = vmax.f32 %v10249_v41, 0.0  ;;  %v10252_v32 = vadd.f32 %v10251_v7, %v16294_v9 }
 0x569   : > { %v10353_v0 = vmul.f32 %v16328_v12, %v10317_v55  ;;  %v10318_v17 = vmax.f32 %v10260_v38, 0.0 }
 0x56a   : > { %v10351_v51 = vmul.f32 %v16328_v12, %v10315_v43  ;;  %v10316_v54 = vmax.f32 %v10252_v32, 0.0 }
 0x56b   : > { %v10389_v60 = vadd.f32 %v16339_v33, %v10353_v0  ;;  %v10354_v21 = vmul.f32 %v16328_v12, %v10318_v17 }
 0x56c   : > { %v10387_v10 = vadd.f32 %v16339_v33, %v10351_v51  ;;  %v10352_v61 = vmul.f32 %v16328_v12, %v10316_v54  ;;  %v11884_v47 = vpop.f32.mrb[216].mxu1 }
 0x56d   : > { %10421 = vst [vmem:[%s16347_s23 + $0xb0] sm:$0xff] %v10389_v60  ;;  %v10390_v9 = vadd.f32 %v16339_v33, %v10354_v21  ;;  %v10273_v1 = vadd.f32 %v11884_v47, %v16310_v49  ;;  %v10264_v42 = vpop.f32.mrb[217].mxu1 }
 0x56e   : > { %10419 = vst [vmem:[%s16347_s23 + $0xa0] sm:$0xff] %v10387_v10  ;;  %v10388_v62 = vadd.f32 %v16339_v33, %v10352_v61  ;;  %v10265_v13 = vadd.f32 %v10264_v42, %v16304_v31  ;;  %v11885_v22 = vpop.f32.mrb[218].mxu1 }
 0x56f   : > { %10422 = vst [vmem:[%s16347_s23 + $0xb8] sm:$0xff] %v10390_v9  ;;  %v10321_v52 = vmax.f32 %v10273_v1, 0.0  ;;  %v10276_v35 = vadd.f32 %v11885_v22, %v16312_v5  ;;  %v10267_v23 = vpop.f32.mrb[219].mxu1 }
 0x570   : > { %10420 = vst [vmem:[%s16347_s23 + $0xa8] sm:$0xff] %v10388_v62  ;;  %v10319_v30 = vmax.f32 %v10265_v13, 0.0  ;;  %v10268_v58 = vadd.f32 %v10267_v23, %v16306_v26 }
 0x571   : > { %v10357_v49 = vmul.f32 %v16328_v12, %v10321_v52  ;;  %v10322_v11 = vmax.f32 %v10276_v35, 0.0 }
 0x572   : > { %v10355_v24 = vmul.f32 %v16328_v12, %v10319_v30  ;;  %v10320_v2 = vmax.f32 %v10268_v58, 0.0 }
 0x573   : > { %v10393_v31 = vadd.f32 %v16339_v33, %v10357_v49  ;;  %v10358_v53 = vmul.f32 %v16328_v12, %v10322_v11 }
 0x574   : > { %v10391_v5 = vadd.f32 %v16339_v33, %v10355_v24  ;;  %v10356_v16 = vmul.f32 %v16328_v12, %v10320_v2  ;;  %v11888_v19 = vpop.f32.mrb[220].mxu1 }
 0x575   : > { %10425 = vst [vmem:[%s16347_s23 + $0xd0] sm:$0xff] %v10393_v31  ;;  %v10394_v26 = vadd.f32 %v16339_v33, %v10358_v53  ;;  %v10289_v6 = vadd.f32 %v11888_v19, %v16322_v46  ;;  %v10280_v56 = vpop.f32.mrb[221].mxu1 }
 0x576   : > { %10423 = vst [vmem:[%s16347_s23 + $0xc0] sm:$0xff] %v10391_v5  ;;  %v10392_v3 = vadd.f32 %v16339_v33, %v10356_v16  ;;  %v10281_v40 = vadd.f32 %v10280_v56, %v16316_v63  ;;  %v11889_v4 = vpop.f32.mrb[222].mxu1 }
 0x577   : > { %10426 = vst [vmem:[%s16347_s23 + $0xd8] sm:$0xff] %v10394_v26  ;;  %v10325_v8 = vmax.f32 %v10289_v6, 0.0  ;;  %v10292_v34 = vadd.f32 %v11889_v4, %v16331_v28  ;;  %v10283_v39 = vpop.f32.mrb[223].mxu1 }
 0x578   : > { %10424 = vst [vmem:[%s16347_s23 + $0xc8] sm:$0xff] %v10392_v3  ;;  %v10323_v36 = vmax.f32 %v10281_v40, 0.0  ;;  %v10284_v46 = vadd.f32 %v10283_v39, %v16318_v29 }
 0x579   : > { %v10361_v18 = vmul.f32 %v16328_v12, %v10325_v8  ;;  %v10326_v14 = vmax.f32 %v10292_v34, 0.0 }
 0x57a   : > { %v10359_v44 = vmul.f32 %v16328_v12, %v10323_v36  ;;  %v10324_v63 = vmax.f32 %v10284_v46, 0.0 }
 0x57b   : > { %v10397_v15 = vadd.f32 %v16339_v33, %v10361_v18  ;;  %v10362_v50 = vmul.f32 %v16328_v12, %v10326_v14 }
 0x57c   : > { %v10395_v37 = vadd.f32 %v16339_v33, %v10359_v44  ;;  %v10360_v28 = vmul.f32 %v16328_v12, %v10324_v63 }
 0x57d   : > { %10429 = vst [vmem:[%s16347_s23 + $0xf0] sm:$0xff] %v10397_v15  ;;  %v10398_v59 = vadd.f32 %v16339_v33, %v10362_v50 }
 0x57e   : > { %10427 = vst [vmem:[%s16347_s23 + $0xe0] sm:$0xff] %v10395_v37  ;;  %v10396_v29 = vadd.f32 %v16339_v33, %v10360_v28 }
 0x57f   : > { %10430 = vst [vmem:[%s16347_s23 + $0xf8] sm:$0xff] %v10398_v59 }
 0x580   : > { %10428 = vst [vmem:[%s16347_s23 + $0xe8] sm:$0xff] %v10396_v29 }
 0x581 PF: > { %s16_s21 = sadd.s32 1, %s12113_s21  }
 0x582   : > { %p13_p4 = scmp.ge.s32.totalorder %s16_s21, 4  }
 0x584   :  { %15 = sbr.rel (!%p13_p4) target bundleno = 1 (0x1), region = 81 }

</bundles_post_ra>
